<compile_context>
chip_gen: v5e
topology: v5e:2x2
jax: 0.10.0
libtpu: 0.0.40
codegen_flags: <defaults>
</compile_context>

<pallas_src>
import jax
import jax.numpy as jnp
from jax import lax
from jax.experimental import pallas as pl
from jax.experimental.pallas import tpu as pltpu

# ----------------------------- model dimensions -----------------------------
B = 2            # batch
T_ENC = 5        # encoder length
T_DEC = 3        # decoder length
T = T_ENC + T_DEC
V = 4            # number of time-varying continuous variables
HC = 8           # hidden_continuous_size
H = 32           # hidden_size (scaled down from 160 for the example)
NH = 4           # attention heads
DK = H // NH     # per-head dim (shared value dim)
OUT = 7          # output_size (quantiles)
QKV = 2 * NH * DK + DK   # fused q||k||v projection width
VH = V * H
EPS = 1e-5


# ----------------------------- in-kernel helpers -----------------------------
def _elu(x):
    return jnp.where(x > 0, x, jnp.exp(x) - 1.0)


def _ln(x, g, b):
    mu = jnp.mean(x, axis=-1, keepdims=True)
    var = jnp.mean((x - mu) ** 2, axis=-1, keepdims=True)
    return (x - mu) * lax.rsqrt(var + EPS) * g + b


def _block_ln(x, avg, g, b):
    """Per-variable LayerNorm on a lane-packed [M, V*H] tensor.

    `avg` is a block-diagonal [V*H, V*H] averaging matrix (1/H in each block),
    so per-variable mean/var stay in lanes (MXU) — no cross-lane reshapes.
    """
    mu = jnp.dot(x, avg, preferred_element_type=jnp.float32)
    ex2 = jnp.dot(x * x, avg, preferred_element_type=jnp.float32)
    var = jnp.maximum(ex2 - mu * mu, 0.0)
    return (x - mu) * lax.rsqrt(var + EPS) * g + b


def _gan(x, skip, wgv, bgv, lng, lnb):
    """GateAddNorm with fused GLU gate||value weight: LN(skip + GLU(x))."""
    d = skip.shape[-1]
    gv = jnp.dot(x, wgv, preferred_element_type=jnp.float32) + bgv
    return _ln(skip + jax.nn.sigmoid(gv[:, :d]) * gv[:, d:2 * d], lng, lnb)


def _grn(x, resid, w1, b1, w2, b2, wgv, bgv, lng, lnb):
    """Gated Residual Network: fc1 -> ELU -> fc2 -> GLU -> +resid -> LayerNorm."""
    h = _elu(jnp.dot(x, w1, preferred_element_type=jnp.float32) + b1)
    eta = jnp.dot(h, w2, preferred_element_type=jnp.float32) + b2
    return _gan(eta, resid, wgv, bgv, lng, lnb)


# ------------------------------- fused kernel --------------------------------
def _make_kernel(treedef, n_leaves):
    def kernel(*refs):
        x_ref = refs[0]
        pr = jax.tree_util.tree_unflatten(treedef, list(refs[1:1 + n_leaves]))
        out_ref = refs[1 + n_leaves]
        xg_ref, lstm_ref, qkv_ref, fin_ref = refs[2 + n_leaves:]

        def P(name):
            return pr[name][...]

        def mm(a, w):
            return jnp.dot(a, w, preferred_element_type=jnp.float32)

        M = B * T
        x2 = x_ref[...].reshape(M, V)                               # [M, V]

        # ---- 1) all-variable prescale: one matmul on block-diag weights ----
        e = mm(x2, P('pre_w')) + P('pre_b')                         # [M, V*HC]

        # ---- 2) lane-packed per-variable GRNs (block-diagonal weights) ----
        skip = mm(e, P('vg_wsk')) + P('vg_bsk')                     # [M, V*H]
        h1 = _elu(mm(e, P('vg_w1')) + P('vg_b1'))                   # [M, V*H]
        eta = mm(h1, P('vg_w2')) + P('vg_b2')                       # [M, V*H]
        gvv = mm(eta, P('vg_wglu')) + P('vg_bglu')                  # [M, 2*V*H] gates||values
        gated = jax.nn.sigmoid(gvv[:, :VH]) * gvv[:, VH:]
        var_out = _block_ln(skip + gated, P('blk_avg'),
                            P('vg_lng'), P('vg_lnb'))               # [M, V*H]

        # ---- 3) variable-selection weights (flat GRN) + lane-packed combine ----
        vskip = mm(e, P('vsn_wsk')) + P('vsn_bsk')                  # [M, V]
        logits = _grn(e, vskip,
                      P('vsn_w1'), P('vsn_b1'), P('vsn_w2'), P('vsn_b2'),
                      P('vsn_wglu'), P('vsn_bglu'), P('vsn_lng'), P('vsn_lnb'))
        wsel = jax.nn.softmax(logits, axis=-1)                      # [M, V]
        # expand weights to each variable's lane block, contract blocks -> [M, H]
        vsn_out = mm(var_out * mm(wsel, P('sel_expand')), P('sel_combine'))

        # ---- 4) LSTM: hoisted input projection + fully unrolled recurrence ----
        xg_ref[...] = (mm(vsn_out, P('lstm_wih')) + P('lstm_b')).reshape(B, T, 4 * H)
        w_hh = P('lstm_whh')
        h = jnp.zeros((B, H), jnp.float32)
        c = jnp.zeros((B, H), jnp.float32)
        for t in range(T):                                          # T=8, static unroll
            gates = xg_ref[:, pl.ds(t, 1), :].reshape(B, 4 * H) + mm(h, w_hh)
            i_g = jax.nn.sigmoid(gates[:, 0 * H:1 * H])
            f_g = jax.nn.sigmoid(gates[:, 1 * H:2 * H])
            g_g = jnp.tanh(gates[:, 2 * H:3 * H])
            o_g = jax.nn.sigmoid(gates[:, 3 * H:4 * H])
            c = f_g * c + i_g * g_g
            h = o_g * jnp.tanh(c)
            lstm_ref[:, pl.ds(t, 1), :] = h.reshape(B, 1, H)
        lstm_out = lstm_ref[...].reshape(M, H)

        # ---- 5) gate + add + norm (skip = variable-selection output) ----
        post_lstm = _gan(lstm_out, vsn_out, P('pg_wglu'), P('pg_bglu'),
                         P('pg_lng'), P('pg_lnb'))

        # ---- 6) static enrichment GRN (no static context in this setup) ----
        enriched = _grn(post_lstm, post_lstm,
                        P('en_w1'), P('en_b1'), P('en_w2'), P('en_b2'),
                        P('en_wglu'), P('en_bglu'), P('en_lng'), P('en_lnb'))

        # ---- 7) interpretable multi-head attention (fused QKV, shared value) ----
        # 1/sqrt(DK) is folded into the Q columns of attn_wqkv; 1/NH into attn_wo.
        qkv_ref[...] = mm(enriched, P('attn_wqkv')).reshape(B, T, QKV)
        vsh = qkv_ref[:, :, pl.ds(2 * NH * DK, DK)]                 # shared value [B,T,DK]
        row = lax.broadcasted_iota(jnp.int32, (T, T), 0)
        col = lax.broadcasted_iota(jnp.int32, (T, T), 1)
        allowed = (row >= col)[None, :, :]                          # causal mask
        psum = jnp.zeros((B, T, T), jnp.float32)
        for hd in range(NH):                                        # static head loop
            q = qkv_ref[:, :, pl.ds(hd * DK, DK)]
            k = qkv_ref[:, :, pl.ds(NH * DK + hd * DK, DK)]
            s = jnp.einsum('btd,bsd->bts', q, k,
                           preferred_element_type=jnp.float32)
            s = jnp.where(allowed, s, -1e9)
            psum = psum + jax.nn.softmax(s, axis=-1)
        # shared value => mean over heads == (sum_h P_h) @ V, one matmul per batch
        acc = jnp.einsum('bts,bsd->btd', psum, vsh,
                         preferred_element_type=jnp.float32)        # [B,T,DK]
        attn = mm(acc.reshape(M, DK), P('attn_wo')) + P('attn_bo')  # [M, H]

        # ---- 8) gate + add + norm (skip = enriched) ----
        post_attn = _gan(attn, enriched, P('pa_wglu'), P('pa_bglu'),
                         P('pa_lng'), P('pa_lnb'))

        # ---- 9) position-wise feed-forward GRN ----
        ff = _grn(post_attn, post_attn,
                  P('ff_w1'), P('ff_b1'), P('ff_w2'), P('ff_b2'),
                  P('ff_wglu'), P('ff_bglu'), P('ff_lng'), P('ff_lnb'))

        # ---- 10) final gate + add + norm (skip back to LSTM output) + output ----
        fin_ref[...] = _gan(ff, post_lstm, P('fg_wglu'), P('fg_bglu'),
                            P('fg_lng'), P('fg_lnb')).reshape(B, T, H)
        dec = fin_ref[:, pl.ds(T_ENC, T_DEC), :]                    # [B,T_DEC,H]
        out_ref[...] = (jnp.einsum('bth,ho->bto', dec, P('out_w'),
                                   preferred_element_type=jnp.float32)
                        + P('out_b'))

    return kernel


# ------------------------------ parameter init -------------------------------
def _bd(stack):
    """[V, a, c] per-variable weights -> [V*a, V*c] block-diagonal weight."""
    Vn, a, c = stack.shape
    eye = jnp.eye(Vn, dtype=stack.dtype)
    return (eye[:, None, :, None] * stack[:, :, None, :]).reshape(Vn * a, Vn * c)


def init_params(key):
    it = iter(jax.random.split(key, 128))

    def w(shape, fan_in):
        return jax.random.normal(next(it), shape, jnp.float32) / jnp.sqrt(float(fan_in))

    def b(shape):
        return 0.01 * jax.random.normal(next(it), shape, jnp.float32)

    # per-variable stacks (packed into block-diagonal / lane-packed form below)
    pre_w_s = w((V, 1, HC), 1)
    pre_b_s = b((V, 1, HC))
    vg_wsk_s = w((V, HC, H), HC)
    vg_bsk_s = b((V, 1, H))
    vg_w1_s = w((V, HC, H), HC)
    vg_b1_s = b((V, 1, H))
    vg_w2_s = w((V, H, H), H)
    vg_b2_s = b((V, 1, H))
    vg_wglu_s = w((V, H, 2 * H), H)
    vg_bglu_s = b((V, 1, 2 * H))

    # fold 1/sqrt(DK) score scale into Q columns; 1/NH head-average into Wo
    wqkv = w((H, QKV), H)
    wqkv = wqkv.at[:, :NH * DK].mul(1.0 / jnp.sqrt(float(DK)))

    p = {
        # all-variable prescaler (scalar -> HC per variable), block-diagonal
        'pre_w': _bd(pre_w_s), 'pre_b': pre_b_s.reshape(1, V * HC),
        # per-variable GRNs, lane-packed (block-diagonal), GLU gates||values fused
        'vg_wsk': _bd(vg_wsk_s), 'vg_bsk': vg_bsk_s.reshape(1, VH),
        'vg_w1': _bd(vg_w1_s), 'vg_b1': vg_b1_s.reshape(1, VH),
        'vg_w2': _bd(vg_w2_s), 'vg_b2': vg_b2_s.reshape(1, VH),
        'vg_wglu': jnp.concatenate(
            [_bd(vg_wglu_s[:, :, :H]), _bd(vg_wglu_s[:, :, H:])], axis=1),
        'vg_bglu': jnp.concatenate(
            [vg_bglu_s[:, :, :H].reshape(1, VH), vg_bglu_s[:, :, H:].reshape(1, VH)],
            axis=1),
        'vg_lng': jnp.ones((V, 1, H), jnp.float32).reshape(1, VH),
        'vg_lnb': jnp.zeros((V, 1, H), jnp.float32).reshape(1, VH),
        # constant lane-packing helpers
        'blk_avg': _bd(jnp.ones((V, H, H), jnp.float32) / float(H)),     # per-var LN mean
        'sel_expand': _bd(jnp.ones((V, 1, H), jnp.float32)),             # [V, V*H]
        'sel_combine': jnp.tile(jnp.eye(H, dtype=jnp.float32), (V, 1)),  # [V*H, H]
        # flat-embedding GRN for variable-selection weights
        'vsn_wsk': w((V * HC, V), V * HC), 'vsn_bsk': b((1, V)),
        'vsn_w1': w((V * HC, H), V * HC), 'vsn_b1': b((1, H)),
        'vsn_w2': w((H, V), H), 'vsn_b2': b((1, V)),
        'vsn_wglu': w((V, 2 * V), V), 'vsn_bglu': b((1, 2 * V)),
        'vsn_lng': jnp.ones((1, V), jnp.float32),
        'vsn_lnb': jnp.zeros((1, V), jnp.float32),
        # LSTM (gate order i,f,g,o)
        'lstm_wih': w((H, 4 * H), H), 'lstm_whh': w((H, 4 * H), H),
        'lstm_b': b((1, 4 * H)),
        # post-LSTM GateAddNorm
        'pg_wglu': w((H, 2 * H), H), 'pg_bglu': b((1, 2 * H)),
        'pg_lng': jnp.ones((1, H), jnp.float32), 'pg_lnb': jnp.zeros((1, H), jnp.float32),
        # static enrichment GRN
        'en_w1': w((H, H), H), 'en_b1': b((1, H)),
        'en_w2': w((H, H), H), 'en_b2': b((1, H)),
        'en_wglu': w((H, 2 * H), H), 'en_bglu': b((1, 2 * H)),
        'en_lng': jnp.ones((1, H), jnp.float32), 'en_lnb': jnp.zeros((1, H), jnp.float32),
        # interpretable multi-head attention (fused Q||K||V, shared value)
        'attn_wqkv': wqkv,
        'attn_wo': w((DK, H), DK) / float(NH), 'attn_bo': b((1, H)),
        # post-attention GateAddNorm
        'pa_wglu': w((H, 2 * H), H), 'pa_bglu': b((1, 2 * H)),
        'pa_lng': jnp.ones((1, H), jnp.float32), 'pa_lnb': jnp.zeros((1, H), jnp.float32),
        # position-wise feed-forward GRN
        'ff_w1': w((H, H), H), 'ff_b1': b((1, H)),
        'ff_w2': w((H, H), H), 'ff_b2': b((1, H)),
        'ff_wglu': w((H, 2 * H), H), 'ff_bglu': b((1, 2 * H)),
        'ff_lng': jnp.ones((1, H), jnp.float32), 'ff_lnb': jnp.zeros((1, H), jnp.float32),
        # final GateAddNorm
        'fg_wglu': w((H, 2 * H), H), 'fg_bglu': b((1, 2 * H)),
        'fg_lng': jnp.ones((1, H), jnp.float32), 'fg_lnb': jnp.zeros((1, H), jnp.float32),
        # output layer (7 quantiles)
        'out_w': w((H, OUT), H), 'out_b': b((1, OUT)),
    }
    return p


# --------------------------------- forward -----------------------------------
@jax.jit
def tft_forward(params, x):
    """x: [B, T, V] float32 time-varying continuous inputs -> [B, T_DEC, OUT]."""
    leaves, treedef = jax.tree_util.tree_flatten(params)
    n = len(leaves)
    kernel = _make_kernel(treedef, n)
    in_specs = [pl.BlockSpec(memory_space=pltpu.MemorySpace.VMEM)
                for _ in range(1 + n)]
    return pl.pallas_call(
        kernel,
        out_shape=jax.ShapeDtypeStruct((B, T_DEC, OUT), jnp.float32),
        in_specs=in_specs,
        out_specs=pl.BlockSpec(memory_space=pltpu.MemorySpace.VMEM),
        scratch_shapes=[
            pltpu.VMEM((B, T, 4 * H), jnp.float32),   # hoisted LSTM input projection
            pltpu.VMEM((B, T, H), jnp.float32),       # LSTM hidden-state sequence
            pltpu.VMEM((B, T, QKV), jnp.float32),     # fused q||k||v projection
            pltpu.VMEM((B, T, H), jnp.float32),       # final representation
        ],
    )(x, *leaves)


# ----------------------------------- main ------------------------------------
if __name__ == "__main__":
    key = jax.random.PRNGKey(0)
    k_params, k_x = jax.random.split(key)
    params = init_params(k_params)
    x = jax.random.normal(k_x, (B, T, V), jnp.float32)

    out = tft_forward(params, x)
    out = jax.block_until_ready(out)
    assert out.shape == (B, T_DEC, OUT), out.shape
    assert bool(jnp.all(jnp.isfinite(out)))
    print("KERNEL_OK")
</pallas_src>

<mosaic_0001>
module attributes {stable_mosaic.version = 11 : i64} {
  func.func @kernel(%arg0: memref<2x8x4xf32, #tpu.memory_space<vmem>>, %arg1: memref<1x32xf32, #tpu.memory_space<vmem>>, %arg2: memref<8x32xf32, #tpu.memory_space<vmem>>, %arg3: memref<32x72xf32, #tpu.memory_space<vmem>>, %arg4: memref<128x128xf32, #tpu.memory_space<vmem>>, %arg5: memref<1x32xf32, #tpu.memory_space<vmem>>, %arg6: memref<1x32xf32, #tpu.memory_space<vmem>>, %arg7: memref<1x64xf32, #tpu.memory_space<vmem>>, %arg8: memref<1x32xf32, #tpu.memory_space<vmem>>, %arg9: memref<1x32xf32, #tpu.memory_space<vmem>>, %arg10: memref<32x32xf32, #tpu.memory_space<vmem>>, %arg11: memref<32x32xf32, #tpu.memory_space<vmem>>, %arg12: memref<32x64xf32, #tpu.memory_space<vmem>>, %arg13: memref<1x32xf32, #tpu.memory_space<vmem>>, %arg14: memref<1x32xf32, #tpu.memory_space<vmem>>, %arg15: memref<1x64xf32, #tpu.memory_space<vmem>>, %arg16: memref<1x32xf32, #tpu.memory_space<vmem>>, %arg17: memref<1x32xf32, #tpu.memory_space<vmem>>, %arg18: memref<32x32xf32, #tpu.memory_space<vmem>>, %arg19: memref<32x32xf32, #tpu.memory_space<vmem>>, %arg20: memref<32x64xf32, #tpu.memory_space<vmem>>, %arg21: memref<1x64xf32, #tpu.memory_space<vmem>>, %arg22: memref<1x32xf32, #tpu.memory_space<vmem>>, %arg23: memref<1x32xf32, #tpu.memory_space<vmem>>, %arg24: memref<32x64xf32, #tpu.memory_space<vmem>>, %arg25: memref<1x128xf32, #tpu.memory_space<vmem>>, %arg26: memref<32x128xf32, #tpu.memory_space<vmem>>, %arg27: memref<32x128xf32, #tpu.memory_space<vmem>>, %arg28: memref<1x7xf32, #tpu.memory_space<vmem>>, %arg29: memref<32x7xf32, #tpu.memory_space<vmem>>, %arg30: memref<1x64xf32, #tpu.memory_space<vmem>>, %arg31: memref<1x32xf32, #tpu.memory_space<vmem>>, %arg32: memref<1x32xf32, #tpu.memory_space<vmem>>, %arg33: memref<32x64xf32, #tpu.memory_space<vmem>>, %arg34: memref<1x64xf32, #tpu.memory_space<vmem>>, %arg35: memref<1x32xf32, #tpu.memory_space<vmem>>, %arg36: memref<1x32xf32, #tpu.memory_space<vmem>>, %arg37: memref<32x64xf32, #tpu.memory_space<vmem>>, %arg38: memref<1x32xf32, #tpu.memory_space<vmem>>, %arg39: memref<4x32xf32, #tpu.memory_space<vmem>>, %arg40: memref<128x32xf32, #tpu.memory_space<vmem>>, %arg41: memref<4x128xf32, #tpu.memory_space<vmem>>, %arg42: memref<1x128xf32, #tpu.memory_space<vmem>>, %arg43: memref<1x128xf32, #tpu.memory_space<vmem>>, %arg44: memref<1x256xf32, #tpu.memory_space<vmem>>, %arg45: memref<1x128xf32, #tpu.memory_space<vmem>>, %arg46: memref<1x128xf32, #tpu.memory_space<vmem>>, %arg47: memref<1x128xf32, #tpu.memory_space<vmem>>, %arg48: memref<32x128xf32, #tpu.memory_space<vmem>>, %arg49: memref<128x128xf32, #tpu.memory_space<vmem>>, %arg50: memref<128x256xf32, #tpu.memory_space<vmem>>, %arg51: memref<32x128xf32, #tpu.memory_space<vmem>>, %arg52: memref<1x32xf32, #tpu.memory_space<vmem>>, %arg53: memref<1x4xf32, #tpu.memory_space<vmem>>, %arg54: memref<1x8xf32, #tpu.memory_space<vmem>>, %arg55: memref<1x4xf32, #tpu.memory_space<vmem>>, %arg56: memref<1x4xf32, #tpu.memory_space<vmem>>, %arg57: memref<1x4xf32, #tpu.memory_space<vmem>>, %arg58: memref<32x32xf32, #tpu.memory_space<vmem>>, %arg59: memref<32x4xf32, #tpu.memory_space<vmem>>, %arg60: memref<4x8xf32, #tpu.memory_space<vmem>>, %arg61: memref<32x4xf32, #tpu.memory_space<vmem>>, %arg62: memref<2x3x7xf32, #tpu.memory_space<vmem>>, %arg63: memref<2x8x128xf32, #tpu.memory_space<vmem>>, %arg64: memref<2x8x32xf32, #tpu.memory_space<vmem>>, %arg65: memref<2x8x72xf32, #tpu.memory_space<vmem>>, %arg66: memref<2x8x32xf32, #tpu.memory_space<vmem>>) attributes {dimension_semantics = [], scalar_prefetch = 0 : i64, scratch_operands = 4 : i64, tpu.core_type = #tpu.core_type<tc>} {
    %c0 = arith.constant 0 : index
    %c0_0 = arith.constant 0 : index
    %c0_1 = arith.constant 0 : index
    %0 = vector.load %arg0[%c0, %c0_0, %c0_1] : memref<2x8x4xf32, #tpu.memory_space<vmem>>, vector<2x8x4xf32>
    %1 = vector.shape_cast %0 : vector<2x8x4xf32> to vector<16x4xf32>
    %c0_2 = arith.constant 0 : index
    %c0_3 = arith.constant 0 : index
    %2 = vector.load %arg39[%c0_2, %c0_3] : memref<4x32xf32, #tpu.memory_space<vmem>>, vector<4x32xf32>
    %cst = arith.constant dense<0.000000e+00> : vector<16x32xf32>
    %3 = tpu.matmul %1, %2, %cst {dimension_numbers = #tpu.dot_dimension_numbers<[1], [0], [0], [1], [0, 0, 1, 1], [], []>} : vector<16x4xf32>, vector<4x32xf32>, vector<16x32xf32> -> vector<16x32xf32>
    %c0_4 = arith.constant 0 : index
    %c0_5 = arith.constant 0 : index
    %4 = vector.load %arg38[%c0_4, %c0_5] : memref<1x32xf32, #tpu.memory_space<vmem>>, vector<1x32xf32>
    %5 = vector.broadcast %4 : vector<1x32xf32> to vector<16x32xf32>
    %6 = arith.addf %3, %5 : vector<16x32xf32>
    %c0_6 = arith.constant 0 : index
    %c0_7 = arith.constant 0 : index
    %7 = vector.load %arg51[%c0_6, %c0_7] : memref<32x128xf32, #tpu.memory_space<vmem>>, vector<32x128xf32>
    %cst_8 = arith.constant dense<0.000000e+00> : vector<16x128xf32>
    %8 = tpu.matmul %6, %7, %cst_8 {dimension_numbers = #tpu.dot_dimension_numbers<[1], [0], [0], [1], [0, 0, 1, 1], [], []>} : vector<16x32xf32>, vector<32x128xf32>, vector<16x128xf32> -> vector<16x128xf32>
    %c0_9 = arith.constant 0 : index
    %c0_10 = arith.constant 0 : index
    %9 = vector.load %arg45[%c0_9, %c0_10] : memref<1x128xf32, #tpu.memory_space<vmem>>, vector<1x128xf32>
    %10 = vector.broadcast %9 : vector<1x128xf32> to vector<16x128xf32>
    %11 = arith.addf %8, %10 : vector<16x128xf32>
    %c0_11 = arith.constant 0 : index
    %c0_12 = arith.constant 0 : index
    %12 = vector.load %arg48[%c0_11, %c0_12] : memref<32x128xf32, #tpu.memory_space<vmem>>, vector<32x128xf32>
    %cst_13 = arith.constant dense<0.000000e+00> : vector<16x128xf32>
    %13 = tpu.matmul %6, %12, %cst_13 {dimension_numbers = #tpu.dot_dimension_numbers<[1], [0], [0], [1], [0, 0, 1, 1], [], []>} : vector<16x32xf32>, vector<32x128xf32>, vector<16x128xf32> -> vector<16x128xf32>
    %c0_14 = arith.constant 0 : index
    %c0_15 = arith.constant 0 : index
    %14 = vector.load %arg42[%c0_14, %c0_15] : memref<1x128xf32, #tpu.memory_space<vmem>>, vector<1x128xf32>
    %15 = vector.broadcast %14 : vector<1x128xf32> to vector<16x128xf32>
    %16 = arith.addf %13, %15 : vector<16x128xf32>
    %cst_16 = arith.constant 0.000000e+00 : f32
    %17 = vector.broadcast %cst_16 : f32 to vector<16x128xf32>
    %18 = arith.cmpf ogt, %16, %17 : vector<16x128xf32>
    %19 = math.exp %16 : vector<16x128xf32>
    %cst_17 = arith.constant 1.000000e+00 : f32
    %20 = vector.broadcast %cst_17 : f32 to vector<16x128xf32>
    %21 = arith.subf %19, %20 : vector<16x128xf32>
    %22 = arith.select %18, %16, %21 : vector<16x128xi1>, vector<16x128xf32>
    %c0_18 = arith.constant 0 : index
    %c0_19 = arith.constant 0 : index
    %23 = vector.load %arg49[%c0_18, %c0_19] : memref<128x128xf32, #tpu.memory_space<vmem>>, vector<128x128xf32>
    %cst_20 = arith.constant dense<0.000000e+00> : vector<16x128xf32>
    %24 = tpu.matmul %22, %23, %cst_20 {dimension_numbers = #tpu.dot_dimension_numbers<[1], [0], [0], [1], [0, 0, 1, 1], [], []>} : vector<16x128xf32>, vector<128x128xf32>, vector<16x128xf32> -> vector<16x128xf32>
    %c0_21 = arith.constant 0 : index
    %c0_22 = arith.constant 0 : index
    %25 = vector.load %arg43[%c0_21, %c0_22] : memref<1x128xf32, #tpu.memory_space<vmem>>, vector<1x128xf32>
    %26 = vector.broadcast %25 : vector<1x128xf32> to vector<16x128xf32>
    %27 = arith.addf %24, %26 : vector<16x128xf32>
    %c0_23 = arith.constant 0 : index
    %c0_24 = arith.constant 0 : index
    %28 = vector.load %arg50[%c0_23, %c0_24] : memref<128x256xf32, #tpu.memory_space<vmem>>, vector<128x256xf32>
    %cst_25 = arith.constant dense<0.000000e+00> : vector<16x256xf32>
    %29 = tpu.matmul %27, %28, %cst_25 {dimension_numbers = #tpu.dot_dimension_numbers<[1], [0], [0], [1], [0, 0, 1, 1], [], []>} : vector<16x128xf32>, vector<128x256xf32>, vector<16x256xf32> -> vector<16x256xf32>
    %c0_26 = arith.constant 0 : index
    %c0_27 = arith.constant 0 : index
    %30 = vector.load %arg44[%c0_26, %c0_27] : memref<1x256xf32, #tpu.memory_space<vmem>>, vector<1x256xf32>
    %31 = vector.broadcast %30 : vector<1x256xf32> to vector<16x256xf32>
    %32 = arith.addf %29, %31 : vector<16x256xf32>
    %33 = vector.extract_strided_slice %32 {offsets = [0, 0], sizes = [16, 128], strides = [1, 1]} : vector<16x256xf32> to vector<16x128xf32>
    %34 = arith.negf %33 : vector<16x128xf32>
    %35 = math.exp %34 : vector<16x128xf32>
    %cst_28 = arith.constant 1.000000e+00 : f32
    %36 = vector.broadcast %cst_28 : f32 to vector<16x128xf32>
    %37 = arith.addf %36, %35 : vector<16x128xf32>
    %38 = arith.divf %36, %37 : vector<16x128xf32>
    %39 = vector.extract_strided_slice %32 {offsets = [0, 128], sizes = [16, 128], strides = [1, 1]} : vector<16x256xf32> to vector<16x128xf32>
    %40 = arith.mulf %38, %39 : vector<16x128xf32>
    %41 = arith.addf %11, %40 : vector<16x128xf32>
    %c0_29 = arith.constant 0 : index
    %c0_30 = arith.constant 0 : index
    %42 = vector.load %arg4[%c0_29, %c0_30] : memref<128x128xf32, #tpu.memory_space<vmem>>, vector<128x128xf32>
    %c0_31 = arith.constant 0 : index
    %c0_32 = arith.constant 0 : index
    %43 = vector.load %arg47[%c0_31, %c0_32] : memref<1x128xf32, #tpu.memory_space<vmem>>, vector<1x128xf32>
    %c0_33 = arith.constant 0 : index
    %c0_34 = arith.constant 0 : index
    %44 = vector.load %arg46[%c0_33, %c0_34] : memref<1x128xf32, #tpu.memory_space<vmem>>, vector<1x128xf32>
    %cst_35 = arith.constant dense<0.000000e+00> : vector<16x128xf32>
    %45 = tpu.matmul %41, %42, %cst_35 {dimension_numbers = #tpu.dot_dimension_numbers<[1], [0], [0], [1], [0, 0, 1, 1], [], []>} : vector<16x128xf32>, vector<128x128xf32>, vector<16x128xf32> -> vector<16x128xf32>
    %46 = arith.mulf %41, %41 : vector<16x128xf32>
    %cst_36 = arith.constant dense<0.000000e+00> : vector<16x128xf32>
    %47 = tpu.matmul %46, %42, %cst_36 {dimension_numbers = #tpu.dot_dimension_numbers<[1], [0], [0], [1], [0, 0, 1, 1], [], []>} : vector<16x128xf32>, vector<128x128xf32>, vector<16x128xf32> -> vector<16x128xf32>
    %48 = arith.mulf %45, %45 : vector<16x128xf32>
    %49 = arith.subf %47, %48 : vector<16x128xf32>
    %cst_37 = arith.constant 0.000000e+00 : f32
    %50 = vector.broadcast %cst_37 : f32 to vector<16x128xf32>
    %51 = arith.maximumf %49, %50 : vector<16x128xf32>
    %52 = arith.subf %41, %45 : vector<16x128xf32>
    %cst_38 = arith.constant 9.99999974E-6 : f32
    %53 = vector.broadcast %cst_38 : f32 to vector<16x128xf32>
    %54 = arith.addf %51, %53 : vector<16x128xf32>
    %55 = math.rsqrt %54 : vector<16x128xf32>
    %56 = arith.mulf %52, %55 : vector<16x128xf32>
    %57 = vector.broadcast %43 : vector<1x128xf32> to vector<16x128xf32>
    %58 = arith.mulf %56, %57 : vector<16x128xf32>
    %59 = vector.broadcast %44 : vector<1x128xf32> to vector<16x128xf32>
    %60 = arith.addf %58, %59 : vector<16x128xf32>
    %c0_39 = arith.constant 0 : index
    %c0_40 = arith.constant 0 : index
    %61 = vector.load %arg61[%c0_39, %c0_40] : memref<32x4xf32, #tpu.memory_space<vmem>>, vector<32x4xf32>
    %cst_41 = arith.constant dense<0.000000e+00> : vector<16x4xf32>
    %62 = tpu.matmul %6, %61, %cst_41 {dimension_numbers = #tpu.dot_dimension_numbers<[1], [0], [0], [1], [0, 0, 1, 1], [], []>} : vector<16x32xf32>, vector<32x4xf32>, vector<16x4xf32> -> vector<16x4xf32>
    %c0_42 = arith.constant 0 : index
    %c0_43 = arith.constant 0 : index
    %63 = vector.load %arg55[%c0_42, %c0_43] : memref<1x4xf32, #tpu.memory_space<vmem>>, vector<1x4xf32>
    %64 = vector.broadcast %63 : vector<1x4xf32> to vector<16x4xf32>
    %65 = arith.addf %62, %64 : vector<16x4xf32>
    %c0_44 = arith.constant 0 : index
    %c0_45 = arith.constant 0 : index
    %66 = vector.load %arg58[%c0_44, %c0_45] : memref<32x32xf32, #tpu.memory_space<vmem>>, vector<32x32xf32>
    %c0_46 = arith.constant 0 : index
    %c0_47 = arith.constant 0 : index
    %67 = vector.load %arg52[%c0_46, %c0_47] : memref<1x32xf32, #tpu.memory_space<vmem>>, vector<1x32xf32>
    %c0_48 = arith.constant 0 : index
    %c0_49 = arith.constant 0 : index
    %68 = vector.load %arg59[%c0_48, %c0_49] : memref<32x4xf32, #tpu.memory_space<vmem>>, vector<32x4xf32>
    %c0_50 = arith.constant 0 : index
    %c0_51 = arith.constant 0 : index
    %69 = vector.load %arg53[%c0_50, %c0_51] : memref<1x4xf32, #tpu.memory_space<vmem>>, vector<1x4xf32>
    %c0_52 = arith.constant 0 : index
    %c0_53 = arith.constant 0 : index
    %70 = vector.load %arg60[%c0_52, %c0_53] : memref<4x8xf32, #tpu.memory_space<vmem>>, vector<4x8xf32>
    %c0_54 = arith.constant 0 : index
    %c0_55 = arith.constant 0 : index
    %71 = vector.load %arg54[%c0_54, %c0_55] : memref<1x8xf32, #tpu.memory_space<vmem>>, vector<1x8xf32>
    %c0_56 = arith.constant 0 : index
    %c0_57 = arith.constant 0 : index
    %72 = vector.load %arg57[%c0_56, %c0_57] : memref<1x4xf32, #tpu.memory_space<vmem>>, vector<1x4xf32>
    %c0_58 = arith.constant 0 : index
    %c0_59 = arith.constant 0 : index
    %73 = vector.load %arg56[%c0_58, %c0_59] : memref<1x4xf32, #tpu.memory_space<vmem>>, vector<1x4xf32>
    %cst_60 = arith.constant dense<0.000000e+00> : vector<16x32xf32>
    %74 = tpu.matmul %6, %66, %cst_60 {dimension_numbers = #tpu.dot_dimension_numbers<[1], [0], [0], [1], [0, 0, 1, 1], [], []>} : vector<16x32xf32>, vector<32x32xf32>, vector<16x32xf32> -> vector<16x32xf32>
    %75 = vector.broadcast %67 : vector<1x32xf32> to vector<16x32xf32>
    %76 = arith.addf %74, %75 : vector<16x32xf32>
    %cst_61 = arith.constant 0.000000e+00 : f32
    %77 = vector.broadcast %cst_61 : f32 to vector<16x32xf32>
    %78 = arith.cmpf ogt, %76, %77 : vector<16x32xf32>
    %79 = math.exp %76 : vector<16x32xf32>
    %cst_62 = arith.constant 1.000000e+00 : f32
    %80 = vector.broadcast %cst_62 : f32 to vector<16x32xf32>
    %81 = arith.subf %79, %80 : vector<16x32xf32>
    %82 = arith.select %78, %76, %81 : vector<16x32xi1>, vector<16x32xf32>
    %cst_63 = arith.constant dense<0.000000e+00> : vector<16x4xf32>
    %83 = tpu.matmul %82, %68, %cst_63 {dimension_numbers = #tpu.dot_dimension_numbers<[1], [0], [0], [1], [0, 0, 1, 1], [], []>} : vector<16x32xf32>, vector<32x4xf32>, vector<16x4xf32> -> vector<16x4xf32>
    %84 = vector.broadcast %69 : vector<1x4xf32> to vector<16x4xf32>
    %85 = arith.addf %83, %84 : vector<16x4xf32>
    %cst_64 = arith.constant dense<0.000000e+00> : vector<16x8xf32>
    %86 = tpu.matmul %85, %70, %cst_64 {dimension_numbers = #tpu.dot_dimension_numbers<[1], [0], [0], [1], [0, 0, 1, 1], [], []>} : vector<16x4xf32>, vector<4x8xf32>, vector<16x8xf32> -> vector<16x8xf32>
    %87 = vector.broadcast %71 : vector<1x8xf32> to vector<16x8xf32>
    %88 = arith.addf %86, %87 : vector<16x8xf32>
    %89 = vector.extract_strided_slice %88 {offsets = [0, 0], sizes = [16, 4], strides = [1, 1]} : vector<16x8xf32> to vector<16x4xf32>
    %90 = arith.negf %89 : vector<16x4xf32>
    %91 = math.exp %90 : vector<16x4xf32>
    %cst_65 = arith.constant 1.000000e+00 : f32
    %92 = vector.broadcast %cst_65 : f32 to vector<16x4xf32>
    %93 = arith.addf %92, %91 : vector<16x4xf32>
    %94 = arith.divf %92, %93 : vector<16x4xf32>
    %95 = vector.extract_strided_slice %88 {offsets = [0, 4], sizes = [16, 4], strides = [1, 1]} : vector<16x8xf32> to vector<16x4xf32>
    %96 = arith.mulf %94, %95 : vector<16x4xf32>
    %97 = arith.addf %65, %96 : vector<16x4xf32>
    %cst_66 = arith.constant dense<0.000000e+00> : vector<16xf32>
    %98 = vector.multi_reduction <add>, %97, %cst_66 [1] : vector<16x4xf32> to vector<16xf32>
    %99 = vector.shape_cast %98 : vector<16xf32> to vector<16x1xf32>
    %cst_67 = arith.constant 4.000000e+00 : f32
    %100 = vector.broadcast %cst_67 : f32 to vector<16x1xf32>
    %101 = arith.divf %99, %100 : vector<16x1xf32>
    %102 = vector.broadcast %101 : vector<16x1xf32> to vector<16x4xf32>
    %103 = arith.subf %97, %102 : vector<16x4xf32>
    %104 = arith.mulf %103, %103 : vector<16x4xf32>
    %cst_68 = arith.constant dense<0.000000e+00> : vector<16xf32>
    %105 = vector.multi_reduction <add>, %104, %cst_68 [1] : vector<16x4xf32> to vector<16xf32>
    %106 = vector.shape_cast %105 : vector<16xf32> to vector<16x1xf32>
    %cst_69 = arith.constant 4.000000e+00 : f32
    %107 = vector.broadcast %cst_69 : f32 to vector<16x1xf32>
    %108 = arith.divf %106, %107 : vector<16x1xf32>
    %109 = vector.broadcast %101 : vector<16x1xf32> to vector<16x4xf32>
    %110 = arith.subf %97, %109 : vector<16x4xf32>
    %cst_70 = arith.constant 9.99999974E-6 : f32
    %111 = vector.broadcast %cst_70 : f32 to vector<16x1xf32>
    %112 = arith.addf %108, %111 : vector<16x1xf32>
    %113 = math.rsqrt %112 : vector<16x1xf32>
    %114 = vector.broadcast %113 : vector<16x1xf32> to vector<16x4xf32>
    %115 = arith.mulf %110, %114 : vector<16x4xf32>
    %116 = vector.broadcast %72 : vector<1x4xf32> to vector<16x4xf32>
    %117 = arith.mulf %115, %116 : vector<16x4xf32>
    %118 = vector.broadcast %73 : vector<1x4xf32> to vector<16x4xf32>
    %119 = arith.addf %117, %118 : vector<16x4xf32>
    %cst_71 = arith.constant dense<0xFF800000> : vector<16xf32>
    %120 = vector.multi_reduction <maximumf>, %119, %cst_71 [1] : vector<16x4xf32> to vector<16xf32>
    %cst_72 = arith.constant 0xFF800000 : f32
    %121 = vector.broadcast %cst_72 : f32 to vector<16xf32>
    %122 = arith.maximumf %121, %120 : vector<16xf32>
    %123 = vector.shape_cast %122 : vector<16xf32> to vector<16x1xf32>
    %124 = vector.broadcast %123 : vector<16x1xf32> to vector<16x4xf32>
    %125 = arith.subf %119, %124 : vector<16x4xf32>
    %126 = math.exp %125 : vector<16x4xf32>
    %cst_73 = arith.constant dense<0.000000e+00> : vector<16xf32>
    %127 = vector.multi_reduction <add>, %126, %cst_73 [1] : vector<16x4xf32> to vector<16xf32>
    %128 = vector.shape_cast %127 : vector<16xf32> to vector<16x1xf32>
    %129 = vector.broadcast %128 : vector<16x1xf32> to vector<16x4xf32>
    %130 = arith.divf %126, %129 : vector<16x4xf32>
    %c0_74 = arith.constant 0 : index
    %c0_75 = arith.constant 0 : index
    %131 = vector.load %arg41[%c0_74, %c0_75] : memref<4x128xf32, #tpu.memory_space<vmem>>, vector<4x128xf32>
    %cst_76 = arith.constant dense<0.000000e+00> : vector<16x128xf32>
    %132 = tpu.matmul %130, %131, %cst_76 {dimension_numbers = #tpu.dot_dimension_numbers<[1], [0], [0], [1], [0, 0, 1, 1], [], []>} : vector<16x4xf32>, vector<4x128xf32>, vector<16x128xf32> -> vector<16x128xf32>
    %133 = arith.mulf %60, %132 : vector<16x128xf32>
    %c0_77 = arith.constant 0 : index
    %c0_78 = arith.constant 0 : index
    %134 = vector.load %arg40[%c0_77, %c0_78] : memref<128x32xf32, #tpu.memory_space<vmem>>, vector<128x32xf32>
    %cst_79 = arith.constant dense<0.000000e+00> : vector<16x32xf32>
    %135 = tpu.matmul %133, %134, %cst_79 {dimension_numbers = #tpu.dot_dimension_numbers<[1], [0], [0], [1], [0, 0, 1, 1], [], []>} : vector<16x128xf32>, vector<128x32xf32>, vector<16x32xf32> -> vector<16x32xf32>
    %c0_80 = arith.constant 0 : index
    %c0_81 = arith.constant 0 : index
    %136 = vector.load %arg27[%c0_80, %c0_81] : memref<32x128xf32, #tpu.memory_space<vmem>>, vector<32x128xf32>
    %cst_82 = arith.constant dense<0.000000e+00> : vector<16x128xf32>
    %137 = tpu.matmul %135, %136, %cst_82 {dimension_numbers = #tpu.dot_dimension_numbers<[1], [0], [0], [1], [0, 0, 1, 1], [], []>} : vector<16x32xf32>, vector<32x128xf32>, vector<16x128xf32> -> vector<16x128xf32>
    %c0_83 = arith.constant 0 : index
    %c0_84 = arith.constant 0 : index
    %138 = vector.load %arg25[%c0_83, %c0_84] : memref<1x128xf32, #tpu.memory_space<vmem>>, vector<1x128xf32>
    %139 = vector.broadcast %138 : vector<1x128xf32> to vector<16x128xf32>
    %140 = arith.addf %137, %139 : vector<16x128xf32>
    %141 = vector.shape_cast %140 : vector<16x128xf32> to vector<2x8x128xf32>
    %c0_85 = arith.constant 0 : index
    %c0_86 = arith.constant 0 : index
    %c0_87 = arith.constant 0 : index
    %142 = vector.load %arg63[%c0_85, %c0_86, %c0_87] : memref<2x8x128xf32, #tpu.memory_space<vmem>>, vector<2x8x128xf32>
    tpu.vector_store %arg63[%c0_85, %c0_86, %c0_87], %141 {strides = array<i32>} : memref<2x8x128xf32, #tpu.memory_space<vmem>>, vector<2x8x128xf32>,
    %c0_88 = arith.constant 0 : index
    %c0_89 = arith.constant 0 : index
    %143 = vector.load %arg26[%c0_88, %c0_89] : memref<32x128xf32, #tpu.memory_space<vmem>>, vector<32x128xf32>
    %cst_90 = arith.constant 0.000000e+00 : f32
    %144 = vector.broadcast %cst_90 : f32 to vector<2x32xf32>
    %cst_91 = arith.constant 0.000000e+00 : f32
    %145 = vector.broadcast %cst_91 : f32 to vector<2x32xf32>
    %c0_92 = arith.constant 0 : index
    %c0_93 = arith.constant 0 : index
    %c0_94 = arith.constant 0 : index
    %146 = vector.load %arg63[%c0_92, %c0_93, %c0_94] : memref<2x8x128xf32, #tpu.memory_space<vmem>>, vector<2x1x128xf32>
    %147 = vector.shape_cast %146 : vector<2x1x128xf32> to vector<2x128xf32>
    %cst_95 = arith.constant dense<0.000000e+00> : vector<2x128xf32>
    %148 = tpu.matmul %144, %143, %cst_95 {dimension_numbers = #tpu.dot_dimension_numbers<[1], [0], [0], [1], [0, 0, 1, 1], [], []>} : vector<2x32xf32>, vector<32x128xf32>, vector<2x128xf32> -> vector<2x128xf32>
    %149 = arith.addf %147, %148 : vector<2x128xf32>
    %150 = vector.extract_strided_slice %149 {offsets = [0, 0], sizes = [2, 32], strides = [1, 1]} : vector<2x128xf32> to vector<2x32xf32>
    %151 = arith.negf %150 : vector<2x32xf32>
    %152 = math.exp %151 : vector<2x32xf32>
    %cst_96 = arith.constant 1.000000e+00 : f32
    %153 = vector.broadcast %cst_96 : f32 to vector<2x32xf32>
    %154 = arith.addf %153, %152 : vector<2x32xf32>
    %155 = arith.divf %153, %154 : vector<2x32xf32>
    %156 = vector.extract_strided_slice %149 {offsets = [0, 32], sizes = [2, 32], strides = [1, 1]} : vector<2x128xf32> to vector<2x32xf32>
    %157 = arith.negf %156 : vector<2x32xf32>
    %158 = math.exp %157 : vector<2x32xf32>
    %cst_97 = arith.constant 1.000000e+00 : f32
    %159 = vector.broadcast %cst_97 : f32 to vector<2x32xf32>
    %160 = arith.addf %159, %158 : vector<2x32xf32>
    %161 = arith.divf %159, %160 : vector<2x32xf32>
    %162 = vector.extract_strided_slice %149 {offsets = [0, 64], sizes = [2, 32], strides = [1, 1]} : vector<2x128xf32> to vector<2x32xf32>
    %163 = math.tanh %162 : vector<2x32xf32>
    %164 = vector.extract_strided_slice %149 {offsets = [0, 96], sizes = [2, 32], strides = [1, 1]} : vector<2x128xf32> to vector<2x32xf32>
    %165 = arith.negf %164 : vector<2x32xf32>
    %166 = math.exp %165 : vector<2x32xf32>
    %cst_98 = arith.constant 1.000000e+00 : f32
    %167 = vector.broadcast %cst_98 : f32 to vector<2x32xf32>
    %168 = arith.addf %167, %166 : vector<2x32xf32>
    %169 = arith.divf %167, %168 : vector<2x32xf32>
    %170 = arith.mulf %161, %145 : vector<2x32xf32>
    %171 = arith.mulf %155, %163 : vector<2x32xf32>
    %172 = arith.addf %170, %171 : vector<2x32xf32>
    %173 = math.tanh %172 : vector<2x32xf32>
    %174 = arith.mulf %169, %173 : vector<2x32xf32>
    %175 = vector.shape_cast %174 : vector<2x32xf32> to vector<2x1x32xf32>
    %c0_99 = arith.constant 0 : index
    %c0_100 = arith.constant 0 : index
    %c0_101 = arith.constant 0 : index
    %176 = vector.load %arg64[%c0_99, %c0_100, %c0_101] : memref<2x8x32xf32, #tpu.memory_space<vmem>>, vector<2x1x32xf32>
    tpu.vector_store %arg64[%c0_99, %c0_100, %c0_101], %175 {strides = array<i32>} : memref<2x8x32xf32, #tpu.memory_space<vmem>>, vector<2x1x32xf32>,
    %c0_102 = arith.constant 0 : index
    %c1 = arith.constant 1 : index
    %c0_103 = arith.constant 0 : index
    %177 = vector.load %arg63[%c0_102, %c1, %c0_103] : memref<2x8x128xf32, #tpu.memory_space<vmem>>, vector<2x1x128xf32>
    %178 = vector.shape_cast %177 : vector<2x1x128xf32> to vector<2x128xf32>
    %cst_104 = arith.constant dense<0.000000e+00> : vector<2x128xf32>
    %179 = tpu.matmul %174, %143, %cst_104 {dimension_numbers = #tpu.dot_dimension_numbers<[1], [0], [0], [1], [0, 0, 1, 1], [], []>} : vector<2x32xf32>, vector<32x128xf32>, vector<2x128xf32> -> vector<2x128xf32>
    %180 = arith.addf %178, %179 : vector<2x128xf32>
    %181 = vector.extract_strided_slice %180 {offsets = [0, 0], sizes = [2, 32], strides = [1, 1]} : vector<2x128xf32> to vector<2x32xf32>
    %182 = arith.negf %181 : vector<2x32xf32>
    %183 = math.exp %182 : vector<2x32xf32>
    %cst_105 = arith.constant 1.000000e+00 : f32
    %184 = vector.broadcast %cst_105 : f32 to vector<2x32xf32>
    %185 = arith.addf %184, %183 : vector<2x32xf32>
    %186 = arith.divf %184, %185 : vector<2x32xf32>
    %187 = vector.extract_strided_slice %180 {offsets = [0, 32], sizes = [2, 32], strides = [1, 1]} : vector<2x128xf32> to vector<2x32xf32>
    %188 = arith.negf %187 : vector<2x32xf32>
    %189 = math.exp %188 : vector<2x32xf32>
    %cst_106 = arith.constant 1.000000e+00 : f32
    %190 = vector.broadcast %cst_106 : f32 to vector<2x32xf32>
    %191 = arith.addf %190, %189 : vector<2x32xf32>
    %192 = arith.divf %190, %191 : vector<2x32xf32>
    %193 = vector.extract_strided_slice %180 {offsets = [0, 64], sizes = [2, 32], strides = [1, 1]} : vector<2x128xf32> to vector<2x32xf32>
    %194 = math.tanh %193 : vector<2x32xf32>
    %195 = vector.extract_strided_slice %180 {offsets = [0, 96], sizes = [2, 32], strides = [1, 1]} : vector<2x128xf32> to vector<2x32xf32>
    %196 = arith.negf %195 : vector<2x32xf32>
    %197 = math.exp %196 : vector<2x32xf32>
    %cst_107 = arith.constant 1.000000e+00 : f32
    %198 = vector.broadcast %cst_107 : f32 to vector<2x32xf32>
    %199 = arith.addf %198, %197 : vector<2x32xf32>
    %200 = arith.divf %198, %199 : vector<2x32xf32>
    %201 = arith.mulf %192, %172 : vector<2x32xf32>
    %202 = arith.mulf %186, %194 : vector<2x32xf32>
    %203 = arith.addf %201, %202 : vector<2x32xf32>
    %204 = math.tanh %203 : vector<2x32xf32>
    %205 = arith.mulf %200, %204 : vector<2x32xf32>
    %206 = vector.shape_cast %205 : vector<2x32xf32> to vector<2x1x32xf32>
    %c0_108 = arith.constant 0 : index
    %c1_109 = arith.constant 1 : index
    %c0_110 = arith.constant 0 : index
    %207 = vector.load %arg64[%c0_108, %c1_109, %c0_110] : memref<2x8x32xf32, #tpu.memory_space<vmem>>, vector<2x1x32xf32>
    tpu.vector_store %arg64[%c0_108, %c1_109, %c0_110], %206 {strides = array<i32>} : memref<2x8x32xf32, #tpu.memory_space<vmem>>, vector<2x1x32xf32>,
    %c0_111 = arith.constant 0 : index
    %c2 = arith.constant 2 : index
    %c0_112 = arith.constant 0 : index
    %208 = vector.load %arg63[%c0_111, %c2, %c0_112] : memref<2x8x128xf32, #tpu.memory_space<vmem>>, vector<2x1x128xf32>
    %209 = vector.shape_cast %208 : vector<2x1x128xf32> to vector<2x128xf32>
    %cst_113 = arith.constant dense<0.000000e+00> : vector<2x128xf32>
    %210 = tpu.matmul %205, %143, %cst_113 {dimension_numbers = #tpu.dot_dimension_numbers<[1], [0], [0], [1], [0, 0, 1, 1], [], []>} : vector<2x32xf32>, vector<32x128xf32>, vector<2x128xf32> -> vector<2x128xf32>
    %211 = arith.addf %209, %210 : vector<2x128xf32>
    %212 = vector.extract_strided_slice %211 {offsets = [0, 0], sizes = [2, 32], strides = [1, 1]} : vector<2x128xf32> to vector<2x32xf32>
    %213 = arith.negf %212 : vector<2x32xf32>
    %214 = math.exp %213 : vector<2x32xf32>
    %cst_114 = arith.constant 1.000000e+00 : f32
    %215 = vector.broadcast %cst_114 : f32 to vector<2x32xf32>
    %216 = arith.addf %215, %214 : vector<2x32xf32>
    %217 = arith.divf %215, %216 : vector<2x32xf32>
    %218 = vector.extract_strided_slice %211 {offsets = [0, 32], sizes = [2, 32], strides = [1, 1]} : vector<2x128xf32> to vector<2x32xf32>
    %219 = arith.negf %218 : vector<2x32xf32>
    %220 = math.exp %219 : vector<2x32xf32>
    %cst_115 = arith.constant 1.000000e+00 : f32
    %221 = vector.broadcast %cst_115 : f32 to vector<2x32xf32>
    %222 = arith.addf %221, %220 : vector<2x32xf32>
    %223 = arith.divf %221, %222 : vector<2x32xf32>
    %224 = vector.extract_strided_slice %211 {offsets = [0, 64], sizes = [2, 32], strides = [1, 1]} : vector<2x128xf32> to vector<2x32xf32>
    %225 = math.tanh %224 : vector<2x32xf32>
    %226 = vector.extract_strided_slice %211 {offsets = [0, 96], sizes = [2, 32], strides = [1, 1]} : vector<2x128xf32> to vector<2x32xf32>
    %227 = arith.negf %226 : vector<2x32xf32>
    %228 = math.exp %227 : vector<2x32xf32>
    %cst_116 = arith.constant 1.000000e+00 : f32
    %229 = vector.broadcast %cst_116 : f32 to vector<2x32xf32>
    %230 = arith.addf %229, %228 : vector<2x32xf32>
    %231 = arith.divf %229, %230 : vector<2x32xf32>
    %232 = arith.mulf %223, %203 : vector<2x32xf32>
    %233 = arith.mulf %217, %225 : vector<2x32xf32>
    %234 = arith.addf %232, %233 : vector<2x32xf32>
    %235 = math.tanh %234 : vector<2x32xf32>
    %236 = arith.mulf %231, %235 : vector<2x32xf32>
    %237 = vector.shape_cast %236 : vector<2x32xf32> to vector<2x1x32xf32>
    %c0_117 = arith.constant 0 : index
    %c2_118 = arith.constant 2 : index
    %c0_119 = arith.constant 0 : index
    %238 = vector.load %arg64[%c0_117, %c2_118, %c0_119] : memref<2x8x32xf32, #tpu.memory_space<vmem>>, vector<2x1x32xf32>
    tpu.vector_store %arg64[%c0_117, %c2_118, %c0_119], %237 {strides = array<i32>} : memref<2x8x32xf32, #tpu.memory_space<vmem>>, vector<2x1x32xf32>,
    %c0_120 = arith.constant 0 : index
    %c3 = arith.constant 3 : index
    %c0_121 = arith.constant 0 : index
    %239 = vector.load %arg63[%c0_120, %c3, %c0_121] : memref<2x8x128xf32, #tpu.memory_space<vmem>>, vector<2x1x128xf32>
    %240 = vector.shape_cast %239 : vector<2x1x128xf32> to vector<2x128xf32>
    %cst_122 = arith.constant dense<0.000000e+00> : vector<2x128xf32>
    %241 = tpu.matmul %236, %143, %cst_122 {dimension_numbers = #tpu.dot_dimension_numbers<[1], [0], [0], [1], [0, 0, 1, 1], [], []>} : vector<2x32xf32>, vector<32x128xf32>, vector<2x128xf32> -> vector<2x128xf32>
    %242 = arith.addf %240, %241 : vector<2x128xf32>
    %243 = vector.extract_strided_slice %242 {offsets = [0, 0], sizes = [2, 32], strides = [1, 1]} : vector<2x128xf32> to vector<2x32xf32>
    %244 = arith.negf %243 : vector<2x32xf32>
    %245 = math.exp %244 : vector<2x32xf32>
    %cst_123 = arith.constant 1.000000e+00 : f32
    %246 = vector.broadcast %cst_123 : f32 to vector<2x32xf32>
    %247 = arith.addf %246, %245 : vector<2x32xf32>
    %248 = arith.divf %246, %247 : vector<2x32xf32>
    %249 = vector.extract_strided_slice %242 {offsets = [0, 32], sizes = [2, 32], strides = [1, 1]} : vector<2x128xf32> to vector<2x32xf32>
    %250 = arith.negf %249 : vector<2x32xf32>
    %251 = math.exp %250 : vector<2x32xf32>
    %cst_124 = arith.constant 1.000000e+00 : f32
    %252 = vector.broadcast %cst_124 : f32 to vector<2x32xf32>
    %253 = arith.addf %252, %251 : vector<2x32xf32>
    %254 = arith.divf %252, %253 : vector<2x32xf32>
    %255 = vector.extract_strided_slice %242 {offsets = [0, 64], sizes = [2, 32], strides = [1, 1]} : vector<2x128xf32> to vector<2x32xf32>
    %256 = math.tanh %255 : vector<2x32xf32>
    %257 = vector.extract_strided_slice %242 {offsets = [0, 96], sizes = [2, 32], strides = [1, 1]} : vector<2x128xf32> to vector<2x32xf32>
    %258 = arith.negf %257 : vector<2x32xf32>
    %259 = math.exp %258 : vector<2x32xf32>
    %cst_125 = arith.constant 1.000000e+00 : f32
    %260 = vector.broadcast %cst_125 : f32 to vector<2x32xf32>
    %261 = arith.addf %260, %259 : vector<2x32xf32>
    %262 = arith.divf %260, %261 : vector<2x32xf32>
    %263 = arith.mulf %254, %234 : vector<2x32xf32>
    %264 = arith.mulf %248, %256 : vector<2x32xf32>
    %265 = arith.addf %263, %264 : vector<2x32xf32>
    %266 = math.tanh %265 : vector<2x32xf32>
    %267 = arith.mulf %262, %266 : vector<2x32xf32>
    %268 = vector.shape_cast %267 : vector<2x32xf32> to vector<2x1x32xf32>
    %c0_126 = arith.constant 0 : index
    %c3_127 = arith.constant 3 : index
    %c0_128 = arith.constant 0 : index
    %269 = vector.load %arg64[%c0_126, %c3_127, %c0_128] : memref<2x8x32xf32, #tpu.memory_space<vmem>>, vector<2x1x32xf32>
    tpu.vector_store %arg64[%c0_126, %c3_127, %c0_128], %268 {strides = array<i32>} : memref<2x8x32xf32, #tpu.memory_space<vmem>>, vector<2x1x32xf32>,
    %c0_129 = arith.constant 0 : index
    %c4 = arith.constant 4 : index
    %c0_130 = arith.constant 0 : index
    %270 = vector.load %arg63[%c0_129, %c4, %c0_130] : memref<2x8x128xf32, #tpu.memory_space<vmem>>, vector<2x1x128xf32>
    %271 = vector.shape_cast %270 : vector<2x1x128xf32> to vector<2x128xf32>
    %cst_131 = arith.constant dense<0.000000e+00> : vector<2x128xf32>
    %272 = tpu.matmul %267, %143, %cst_131 {dimension_numbers = #tpu.dot_dimension_numbers<[1], [0], [0], [1], [0, 0, 1, 1], [], []>} : vector<2x32xf32>, vector<32x128xf32>, vector<2x128xf32> -> vector<2x128xf32>
    %273 = arith.addf %271, %272 : vector<2x128xf32>
    %274 = vector.extract_strided_slice %273 {offsets = [0, 0], sizes = [2, 32], strides = [1, 1]} : vector<2x128xf32> to vector<2x32xf32>
    %275 = arith.negf %274 : vector<2x32xf32>
    %276 = math.exp %275 : vector<2x32xf32>
    %cst_132 = arith.constant 1.000000e+00 : f32
    %277 = vector.broadcast %cst_132 : f32 to vector<2x32xf32>
    %278 = arith.addf %277, %276 : vector<2x32xf32>
    %279 = arith.divf %277, %278 : vector<2x32xf32>
    %280 = vector.extract_strided_slice %273 {offsets = [0, 32], sizes = [2, 32], strides = [1, 1]} : vector<2x128xf32> to vector<2x32xf32>
    %281 = arith.negf %280 : vector<2x32xf32>
    %282 = math.exp %281 : vector<2x32xf32>
    %cst_133 = arith.constant 1.000000e+00 : f32
    %283 = vector.broadcast %cst_133 : f32 to vector<2x32xf32>
    %284 = arith.addf %283, %282 : vector<2x32xf32>
    %285 = arith.divf %283, %284 : vector<2x32xf32>
    %286 = vector.extract_strided_slice %273 {offsets = [0, 64], sizes = [2, 32], strides = [1, 1]} : vector<2x128xf32> to vector<2x32xf32>
    %287 = math.tanh %286 : vector<2x32xf32>
    %288 = vector.extract_strided_slice %273 {offsets = [0, 96], sizes = [2, 32], strides = [1, 1]} : vector<2x128xf32> to vector<2x32xf32>
    %289 = arith.negf %288 : vector<2x32xf32>
    %290 = math.exp %289 : vector<2x32xf32>
    %cst_134 = arith.constant 1.000000e+00 : f32
    %291 = vector.broadcast %cst_134 : f32 to vector<2x32xf32>
    %292 = arith.addf %291, %290 : vector<2x32xf32>
    %293 = arith.divf %291, %292 : vector<2x32xf32>
    %294 = arith.mulf %285, %265 : vector<2x32xf32>
    %295 = arith.mulf %279, %287 : vector<2x32xf32>
    %296 = arith.addf %294, %295 : vector<2x32xf32>
    %297 = math.tanh %296 : vector<2x32xf32>
    %298 = arith.mulf %293, %297 : vector<2x32xf32>
    %299 = vector.shape_cast %298 : vector<2x32xf32> to vector<2x1x32xf32>
    %c0_135 = arith.constant 0 : index
    %c4_136 = arith.constant 4 : index
    %c0_137 = arith.constant 0 : index
    %300 = vector.load %arg64[%c0_135, %c4_136, %c0_137] : memref<2x8x32xf32, #tpu.memory_space<vmem>>, vector<2x1x32xf32>
    tpu.vector_store %arg64[%c0_135, %c4_136, %c0_137], %299 {strides = array<i32>} : memref<2x8x32xf32, #tpu.memory_space<vmem>>, vector<2x1x32xf32>,
    %c0_138 = arith.constant 0 : index
    %c5 = arith.constant 5 : index
    %c0_139 = arith.constant 0 : index
    %301 = vector.load %arg63[%c0_138, %c5, %c0_139] : memref<2x8x128xf32, #tpu.memory_space<vmem>>, vector<2x1x128xf32>
    %302 = vector.shape_cast %301 : vector<2x1x128xf32> to vector<2x128xf32>
    %cst_140 = arith.constant dense<0.000000e+00> : vector<2x128xf32>
    %303 = tpu.matmul %298, %143, %cst_140 {dimension_numbers = #tpu.dot_dimension_numbers<[1], [0], [0], [1], [0, 0, 1, 1], [], []>} : vector<2x32xf32>, vector<32x128xf32>, vector<2x128xf32> -> vector<2x128xf32>
    %304 = arith.addf %302, %303 : vector<2x128xf32>
    %305 = vector.extract_strided_slice %304 {offsets = [0, 0], sizes = [2, 32], strides = [1, 1]} : vector<2x128xf32> to vector<2x32xf32>
    %306 = arith.negf %305 : vector<2x32xf32>
    %307 = math.exp %306 : vector<2x32xf32>
    %cst_141 = arith.constant 1.000000e+00 : f32
    %308 = vector.broadcast %cst_141 : f32 to vector<2x32xf32>
    %309 = arith.addf %308, %307 : vector<2x32xf32>
    %310 = arith.divf %308, %309 : vector<2x32xf32>
    %311 = vector.extract_strided_slice %304 {offsets = [0, 32], sizes = [2, 32], strides = [1, 1]} : vector<2x128xf32> to vector<2x32xf32>
    %312 = arith.negf %311 : vector<2x32xf32>
    %313 = math.exp %312 : vector<2x32xf32>
    %cst_142 = arith.constant 1.000000e+00 : f32
    %314 = vector.broadcast %cst_142 : f32 to vector<2x32xf32>
    %315 = arith.addf %314, %313 : vector<2x32xf32>
    %316 = arith.divf %314, %315 : vector<2x32xf32>
    %317 = vector.extract_strided_slice %304 {offsets = [0, 64], sizes = [2, 32], strides = [1, 1]} : vector<2x128xf32> to vector<2x32xf32>
    %318 = math.tanh %317 : vector<2x32xf32>
    %319 = vector.extract_strided_slice %304 {offsets = [0, 96], sizes = [2, 32], strides = [1, 1]} : vector<2x128xf32> to vector<2x32xf32>
    %320 = arith.negf %319 : vector<2x32xf32>
    %321 = math.exp %320 : vector<2x32xf32>
    %cst_143 = arith.constant 1.000000e+00 : f32
    %322 = vector.broadcast %cst_143 : f32 to vector<2x32xf32>
    %323 = arith.addf %322, %321 : vector<2x32xf32>
    %324 = arith.divf %322, %323 : vector<2x32xf32>
    %325 = arith.mulf %316, %296 : vector<2x32xf32>
    %326 = arith.mulf %310, %318 : vector<2x32xf32>
    %327 = arith.addf %325, %326 : vector<2x32xf32>
    %328 = math.tanh %327 : vector<2x32xf32>
    %329 = arith.mulf %324, %328 : vector<2x32xf32>
    %330 = vector.shape_cast %329 : vector<2x32xf32> to vector<2x1x32xf32>
    %c0_144 = arith.constant 0 : index
    %c5_145 = arith.constant 5 : index
    %c0_146 = arith.constant 0 : index
    %331 = vector.load %arg64[%c0_144, %c5_145, %c0_146] : memref<2x8x32xf32, #tpu.memory_space<vmem>>, vector<2x1x32xf32>
    tpu.vector_store %arg64[%c0_144, %c5_145, %c0_146], %330 {strides = array<i32>} : memref<2x8x32xf32, #tpu.memory_space<vmem>>, vector<2x1x32xf32>,
    %c0_147 = arith.constant 0 : index
    %c6 = arith.constant 6 : index
    %c0_148 = arith.constant 0 : index
    %332 = vector.load %arg63[%c0_147, %c6, %c0_148] : memref<2x8x128xf32, #tpu.memory_space<vmem>>, vector<2x1x128xf32>
    %333 = vector.shape_cast %332 : vector<2x1x128xf32> to vector<2x128xf32>
    %cst_149 = arith.constant dense<0.000000e+00> : vector<2x128xf32>
    %334 = tpu.matmul %329, %143, %cst_149 {dimension_numbers = #tpu.dot_dimension_numbers<[1], [0], [0], [1], [0, 0, 1, 1], [], []>} : vector<2x32xf32>, vector<32x128xf32>, vector<2x128xf32> -> vector<2x128xf32>
    %335 = arith.addf %333, %334 : vector<2x128xf32>
    %336 = vector.extract_strided_slice %335 {offsets = [0, 0], sizes = [2, 32], strides = [1, 1]} : vector<2x128xf32> to vector<2x32xf32>
    %337 = arith.negf %336 : vector<2x32xf32>
    %338 = math.exp %337 : vector<2x32xf32>
    %cst_150 = arith.constant 1.000000e+00 : f32
    %339 = vector.broadcast %cst_150 : f32 to vector<2x32xf32>
    %340 = arith.addf %339, %338 : vector<2x32xf32>
    %341 = arith.divf %339, %340 : vector<2x32xf32>
    %342 = vector.extract_strided_slice %335 {offsets = [0, 32], sizes = [2, 32], strides = [1, 1]} : vector<2x128xf32> to vector<2x32xf32>
    %343 = arith.negf %342 : vector<2x32xf32>
    %344 = math.exp %343 : vector<2x32xf32>
    %cst_151 = arith.constant 1.000000e+00 : f32
    %345 = vector.broadcast %cst_151 : f32 to vector<2x32xf32>
    %346 = arith.addf %345, %344 : vector<2x32xf32>
    %347 = arith.divf %345, %346 : vector<2x32xf32>
    %348 = vector.extract_strided_slice %335 {offsets = [0, 64], sizes = [2, 32], strides = [1, 1]} : vector<2x128xf32> to vector<2x32xf32>
    %349 = math.tanh %348 : vector<2x32xf32>
    %350 = vector.extract_strided_slice %335 {offsets = [0, 96], sizes = [2, 32], strides = [1, 1]} : vector<2x128xf32> to vector<2x32xf32>
    %351 = arith.negf %350 : vector<2x32xf32>
    %352 = math.exp %351 : vector<2x32xf32>
    %cst_152 = arith.constant 1.000000e+00 : f32
    %353 = vector.broadcast %cst_152 : f32 to vector<2x32xf32>
    %354 = arith.addf %353, %352 : vector<2x32xf32>
    %355 = arith.divf %353, %354 : vector<2x32xf32>
    %356 = arith.mulf %347, %327 : vector<2x32xf32>
    %357 = arith.mulf %341, %349 : vector<2x32xf32>
    %358 = arith.addf %356, %357 : vector<2x32xf32>
    %359 = math.tanh %358 : vector<2x32xf32>
    %360 = arith.mulf %355, %359 : vector<2x32xf32>
    %361 = vector.shape_cast %360 : vector<2x32xf32> to vector<2x1x32xf32>
    %c0_153 = arith.constant 0 : index
    %c6_154 = arith.constant 6 : index
    %c0_155 = arith.constant 0 : index
    %362 = vector.load %arg64[%c0_153, %c6_154, %c0_155] : memref<2x8x32xf32, #tpu.memory_space<vmem>>, vector<2x1x32xf32>
    tpu.vector_store %arg64[%c0_153, %c6_154, %c0_155], %361 {strides = array<i32>} : memref<2x8x32xf32, #tpu.memory_space<vmem>>, vector<2x1x32xf32>,
    %c0_156 = arith.constant 0 : index
    %c7 = arith.constant 7 : index
    %c0_157 = arith.constant 0 : index
    %363 = vector.load %arg63[%c0_156, %c7, %c0_157] : memref<2x8x128xf32, #tpu.memory_space<vmem>>, vector<2x1x128xf32>
    %364 = vector.shape_cast %363 : vector<2x1x128xf32> to vector<2x128xf32>
    %cst_158 = arith.constant dense<0.000000e+00> : vector<2x128xf32>
    %365 = tpu.matmul %360, %143, %cst_158 {dimension_numbers = #tpu.dot_dimension_numbers<[1], [0], [0], [1], [0, 0, 1, 1], [], []>} : vector<2x32xf32>, vector<32x128xf32>, vector<2x128xf32> -> vector<2x128xf32>
    %366 = arith.addf %364, %365 : vector<2x128xf32>
    %367 = vector.extract_strided_slice %366 {offsets = [0, 0], sizes = [2, 32], strides = [1, 1]} : vector<2x128xf32> to vector<2x32xf32>
    %368 = arith.negf %367 : vector<2x32xf32>
    %369 = math.exp %368 : vector<2x32xf32>
    %cst_159 = arith.constant 1.000000e+00 : f32
    %370 = vector.broadcast %cst_159 : f32 to vector<2x32xf32>
    %371 = arith.addf %370, %369 : vector<2x32xf32>
    %372 = arith.divf %370, %371 : vector<2x32xf32>
    %373 = vector.extract_strided_slice %366 {offsets = [0, 32], sizes = [2, 32], strides = [1, 1]} : vector<2x128xf32> to vector<2x32xf32>
    %374 = arith.negf %373 : vector<2x32xf32>
    %375 = math.exp %374 : vector<2x32xf32>
    %cst_160 = arith.constant 1.000000e+00 : f32
    %376 = vector.broadcast %cst_160 : f32 to vector<2x32xf32>
    %377 = arith.addf %376, %375 : vector<2x32xf32>
    %378 = arith.divf %376, %377 : vector<2x32xf32>
    %379 = vector.extract_strided_slice %366 {offsets = [0, 64], sizes = [2, 32], strides = [1, 1]} : vector<2x128xf32> to vector<2x32xf32>
    %380 = math.tanh %379 : vector<2x32xf32>
    %381 = vector.extract_strided_slice %366 {offsets = [0, 96], sizes = [2, 32], strides = [1, 1]} : vector<2x128xf32> to vector<2x32xf32>
    %382 = arith.negf %381 : vector<2x32xf32>
    %383 = math.exp %382 : vector<2x32xf32>
    %cst_161 = arith.constant 1.000000e+00 : f32
    %384 = vector.broadcast %cst_161 : f32 to vector<2x32xf32>
    %385 = arith.addf %384, %383 : vector<2x32xf32>
    %386 = arith.divf %384, %385 : vector<2x32xf32>
    %387 = arith.mulf %378, %358 : vector<2x32xf32>
    %388 = arith.mulf %372, %380 : vector<2x32xf32>
    %389 = arith.addf %387, %388 : vector<2x32xf32>
    %390 = math.tanh %389 : vector<2x32xf32>
    %391 = arith.mulf %386, %390 : vector<2x32xf32>
    %392 = vector.shape_cast %391 : vector<2x32xf32> to vector<2x1x32xf32>
    %c0_162 = arith.constant 0 : index
    %c7_163 = arith.constant 7 : index
    %c0_164 = arith.constant 0 : index
    %393 = vector.load %arg64[%c0_162, %c7_163, %c0_164] : memref<2x8x32xf32, #tpu.memory_space<vmem>>, vector<2x1x32xf32>
    tpu.vector_store %arg64[%c0_162, %c7_163, %c0_164], %392 {strides = array<i32>} : memref<2x8x32xf32, #tpu.memory_space<vmem>>, vector<2x1x32xf32>,
    %c0_165 = arith.constant 0 : index
    %c0_166 = arith.constant 0 : index
    %c0_167 = arith.constant 0 : index
    %394 = vector.load %arg64[%c0_165, %c0_166, %c0_167] : memref<2x8x32xf32, #tpu.memory_space<vmem>>, vector<2x8x32xf32>
    %395 = vector.shape_cast %394 : vector<2x8x32xf32> to vector<16x32xf32>
    %c0_168 = arith.constant 0 : index
    %c0_169 = arith.constant 0 : index
    %396 = vector.load %arg37[%c0_168, %c0_169] : memref<32x64xf32, #tpu.memory_space<vmem>>, vector<32x64xf32>
    %c0_170 = arith.constant 0 : index
    %c0_171 = arith.constant 0 : index
    %397 = vector.load %arg34[%c0_170, %c0_171] : memref<1x64xf32, #tpu.memory_space<vmem>>, vector<1x64xf32>
    %c0_172 = arith.constant 0 : index
    %c0_173 = arith.constant 0 : index
    %398 = vector.load %arg36[%c0_172, %c0_173] : memref<1x32xf32, #tpu.memory_space<vmem>>, vector<1x32xf32>
    %c0_174 = arith.constant 0 : index
    %c0_175 = arith.constant 0 : index
    %399 = vector.load %arg35[%c0_174, %c0_175] : memref<1x32xf32, #tpu.memory_space<vmem>>, vector<1x32xf32>
    %cst_176 = arith.constant dense<0.000000e+00> : vector<16x64xf32>
    %400 = tpu.matmul %395, %396, %cst_176 {dimension_numbers = #tpu.dot_dimension_numbers<[1], [0], [0], [1], [0, 0, 1, 1], [], []>} : vector<16x32xf32>, vector<32x64xf32>, vector<16x64xf32> -> vector<16x64xf32>
    %401 = vector.broadcast %397 : vector<1x64xf32> to vector<16x64xf32>
    %402 = arith.addf %400, %401 : vector<16x64xf32>
    %403 = vector.extract_strided_slice %402 {offsets = [0, 0], sizes = [16, 32], strides = [1, 1]} : vector<16x64xf32> to vector<16x32xf32>
    %404 = arith.negf %403 : vector<16x32xf32>
    %405 = math.exp %404 : vector<16x32xf32>
    %cst_177 = arith.constant 1.000000e+00 : f32
    %406 = vector.broadcast %cst_177 : f32 to vector<16x32xf32>
    %407 = arith.addf %406, %405 : vector<16x32xf32>
    %408 = arith.divf %406, %407 : vector<16x32xf32>
    %409 = vector.extract_strided_slice %402 {offsets = [0, 32], sizes = [16, 32], strides = [1, 1]} : vector<16x64xf32> to vector<16x32xf32>
    %410 = arith.mulf %408, %409 : vector<16x32xf32>
    %411 = arith.addf %135, %410 : vector<16x32xf32>
    %cst_178 = arith.constant dense<0.000000e+00> : vector<16xf32>
    %412 = vector.multi_reduction <add>, %411, %cst_178 [1] : vector<16x32xf32> to vector<16xf32>
    %413 = vector.shape_cast %412 : vector<16xf32> to vector<16x1xf32>
    %cst_179 = arith.constant 3.200000e+01 : f32
    %414 = vector.broadcast %cst_179 : f32 to vector<16x1xf32>
    %415 = arith.divf %413, %414 : vector<16x1xf32>
    %416 = vector.broadcast %415 : vector<16x1xf32> to vector<16x32xf32>
    %417 = arith.subf %411, %416 : vector<16x32xf32>
    %418 = arith.mulf %417, %417 : vector<16x32xf32>
    %cst_180 = arith.constant dense<0.000000e+00> : vector<16xf32>
    %419 = vector.multi_reduction <add>, %418, %cst_180 [1] : vector<16x32xf32> to vector<16xf32>
    %420 = vector.shape_cast %419 : vector<16xf32> to vector<16x1xf32>
    %cst_181 = arith.constant 3.200000e+01 : f32
    %421 = vector.broadcast %cst_181 : f32 to vector<16x1xf32>
    %422 = arith.divf %420, %421 : vector<16x1xf32>
    %423 = vector.broadcast %415 : vector<16x1xf32> to vector<16x32xf32>
    %424 = arith.subf %411, %423 : vector<16x32xf32>
    %cst_182 = arith.constant 9.99999974E-6 : f32
    %425 = vector.broadcast %cst_182 : f32 to vector<16x1xf32>
    %426 = arith.addf %422, %425 : vector<16x1xf32>
    %427 = math.rsqrt %426 : vector<16x1xf32>
    %428 = vector.broadcast %427 : vector<16x1xf32> to vector<16x32xf32>
    %429 = arith.mulf %424, %428 : vector<16x32xf32>
    %430 = vector.broadcast %398 : vector<1x32xf32> to vector<16x32xf32>
    %431 = arith.mulf %429, %430 : vector<16x32xf32>
    %432 = vector.broadcast %399 : vector<1x32xf32> to vector<16x32xf32>
    %433 = arith.addf %431, %432 : vector<16x32xf32>
    %c0_183 = arith.constant 0 : index
    %c0_184 = arith.constant 0 : index
    %434 = vector.load %arg10[%c0_183, %c0_184] : memref<32x32xf32, #tpu.memory_space<vmem>>, vector<32x32xf32>
    %c0_185 = arith.constant 0 : index
    %c0_186 = arith.constant 0 : index
    %435 = vector.load %arg5[%c0_185, %c0_186] : memref<1x32xf32, #tpu.memory_space<vmem>>, vector<1x32xf32>
    %c0_187 = arith.constant 0 : index
    %c0_188 = arith.constant 0 : index
    %436 = vector.load %arg11[%c0_187, %c0_188] : memref<32x32xf32, #tpu.memory_space<vmem>>, vector<32x32xf32>
    %c0_189 = arith.constant 0 : index
    %c0_190 = arith.constant 0 : index
    %437 = vector.load %arg6[%c0_189, %c0_190] : memref<1x32xf32, #tpu.memory_space<vmem>>, vector<1x32xf32>
    %c0_191 = arith.constant 0 : index
    %c0_192 = arith.constant 0 : index
    %438 = vector.load %arg12[%c0_191, %c0_192] : memref<32x64xf32, #tpu.memory_space<vmem>>, vector<32x64xf32>
    %c0_193 = arith.constant 0 : index
    %c0_194 = arith.constant 0 : index
    %439 = vector.load %arg7[%c0_193, %c0_194] : memref<1x64xf32, #tpu.memory_space<vmem>>, vector<1x64xf32>
    %c0_195 = arith.constant 0 : index
    %c0_196 = arith.constant 0 : index
    %440 = vector.load %arg9[%c0_195, %c0_196] : memref<1x32xf32, #tpu.memory_space<vmem>>, vector<1x32xf32>
    %c0_197 = arith.constant 0 : index
    %c0_198 = arith.constant 0 : index
    %441 = vector.load %arg8[%c0_197, %c0_198] : memref<1x32xf32, #tpu.memory_space<vmem>>, vector<1x32xf32>
    %cst_199 = arith.constant dense<0.000000e+00> : vector<16x32xf32>
    %442 = tpu.matmul %433, %434, %cst_199 {dimension_numbers = #tpu.dot_dimension_numbers<[1], [0], [0], [1], [0, 0, 1, 1], [], []>} : vector<16x32xf32>, vector<32x32xf32>, vector<16x32xf32> -> vector<16x32xf32>
    %443 = vector.broadcast %435 : vector<1x32xf32> to vector<16x32xf32>
    %444 = arith.addf %442, %443 : vector<16x32xf32>
    %cst_200 = arith.constant 0.000000e+00 : f32
    %445 = vector.broadcast %cst_200 : f32 to vector<16x32xf32>
    %446 = arith.cmpf ogt, %444, %445 : vector<16x32xf32>
    %447 = math.exp %444 : vector<16x32xf32>
    %cst_201 = arith.constant 1.000000e+00 : f32
    %448 = vector.broadcast %cst_201 : f32 to vector<16x32xf32>
    %449 = arith.subf %447, %448 : vector<16x32xf32>
    %450 = arith.select %446, %444, %449 : vector<16x32xi1>, vector<16x32xf32>
    %cst_202 = arith.constant dense<0.000000e+00> : vector<16x32xf32>
    %451 = tpu.matmul %450, %436, %cst_202 {dimension_numbers = #tpu.dot_dimension_numbers<[1], [0], [0], [1], [0, 0, 1, 1], [], []>} : vector<16x32xf32>, vector<32x32xf32>, vector<16x32xf32> -> vector<16x32xf32>
    %452 = vector.broadcast %437 : vector<1x32xf32> to vector<16x32xf32>
    %453 = arith.addf %451, %452 : vector<16x32xf32>
    %cst_203 = arith.constant dense<0.000000e+00> : vector<16x64xf32>
    %454 = tpu.matmul %453, %438, %cst_203 {dimension_numbers = #tpu.dot_dimension_numbers<[1], [0], [0], [1], [0, 0, 1, 1], [], []>} : vector<16x32xf32>, vector<32x64xf32>, vector<16x64xf32> -> vector<16x64xf32>
    %455 = vector.broadcast %439 : vector<1x64xf32> to vector<16x64xf32>
    %456 = arith.addf %454, %455 : vector<16x64xf32>
    %457 = vector.extract_strided_slice %456 {offsets = [0, 0], sizes = [16, 32], strides = [1, 1]} : vector<16x64xf32> to vector<16x32xf32>
    %458 = arith.negf %457 : vector<16x32xf32>
    %459 = math.exp %458 : vector<16x32xf32>
    %cst_204 = arith.constant 1.000000e+00 : f32
    %460 = vector.broadcast %cst_204 : f32 to vector<16x32xf32>
    %461 = arith.addf %460, %459 : vector<16x32xf32>
    %462 = arith.divf %460, %461 : vector<16x32xf32>
    %463 = vector.extract_strided_slice %456 {offsets = [0, 32], sizes = [16, 32], strides = [1, 1]} : vector<16x64xf32> to vector<16x32xf32>
    %464 = arith.mulf %462, %463 : vector<16x32xf32>
    %465 = arith.addf %433, %464 : vector<16x32xf32>
    %cst_205 = arith.constant dense<0.000000e+00> : vector<16xf32>
    %466 = vector.multi_reduction <add>, %465, %cst_205 [1] : vector<16x32xf32> to vector<16xf32>
    %467 = vector.shape_cast %466 : vector<16xf32> to vector<16x1xf32>
    %cst_206 = arith.constant 3.200000e+01 : f32
    %468 = vector.broadcast %cst_206 : f32 to vector<16x1xf32>
    %469 = arith.divf %467, %468 : vector<16x1xf32>
    %470 = vector.broadcast %469 : vector<16x1xf32> to vector<16x32xf32>
    %471 = arith.subf %465, %470 : vector<16x32xf32>
    %472 = arith.mulf %471, %471 : vector<16x32xf32>
    %cst_207 = arith.constant dense<0.000000e+00> : vector<16xf32>
    %473 = vector.multi_reduction <add>, %472, %cst_207 [1] : vector<16x32xf32> to vector<16xf32>
    %474 = vector.shape_cast %473 : vector<16xf32> to vector<16x1xf32>
    %cst_208 = arith.constant 3.200000e+01 : f32
    %475 = vector.broadcast %cst_208 : f32 to vector<16x1xf32>
    %476 = arith.divf %474, %475 : vector<16x1xf32>
    %477 = vector.broadcast %469 : vector<16x1xf32> to vector<16x32xf32>
    %478 = arith.subf %465, %477 : vector<16x32xf32>
    %cst_209 = arith.constant 9.99999974E-6 : f32
    %479 = vector.broadcast %cst_209 : f32 to vector<16x1xf32>
    %480 = arith.addf %476, %479 : vector<16x1xf32>
    %481 = math.rsqrt %480 : vector<16x1xf32>
    %482 = vector.broadcast %481 : vector<16x1xf32> to vector<16x32xf32>
    %483 = arith.mulf %478, %482 : vector<16x32xf32>
    %484 = vector.broadcast %440 : vector<1x32xf32> to vector<16x32xf32>
    %485 = arith.mulf %483, %484 : vector<16x32xf32>
    %486 = vector.broadcast %441 : vector<1x32xf32> to vector<16x32xf32>
    %487 = arith.addf %485, %486 : vector<16x32xf32>
    %c0_210 = arith.constant 0 : index
    %c0_211 = arith.constant 0 : index
    %488 = vector.load %arg3[%c0_210, %c0_211] : memref<32x72xf32, #tpu.memory_space<vmem>>, vector<32x72xf32>
    %cst_212 = arith.constant dense<0.000000e+00> : vector<16x72xf32>
    %489 = tpu.matmul %487, %488, %cst_212 {dimension_numbers = #tpu.dot_dimension_numbers<[1], [0], [0], [1], [0, 0, 1, 1], [], []>} : vector<16x32xf32>, vector<32x72xf32>, vector<16x72xf32> -> vector<16x72xf32>
    %490 = vector.shape_cast %489 : vector<16x72xf32> to vector<2x8x72xf32>
    %c0_213 = arith.constant 0 : index
    %c0_214 = arith.constant 0 : index
    %c0_215 = arith.constant 0 : index
    %491 = vector.load %arg65[%c0_213, %c0_214, %c0_215] : memref<2x8x72xf32, #tpu.memory_space<vmem>>, vector<2x8x72xf32>
    tpu.vector_store %arg65[%c0_213, %c0_214, %c0_215], %490 {strides = array<i32>} : memref<2x8x72xf32, #tpu.memory_space<vmem>>, vector<2x8x72xf32>,
    %c0_216 = arith.constant 0 : index
    %c0_217 = arith.constant 0 : index
    %c64 = arith.constant 64 : index
    %492 = vector.load %arg65[%c0_216, %c0_217, %c64] : memref<2x8x72xf32, #tpu.memory_space<vmem>>, vector<2x8x8xf32>
    %493 = tpu.iota {dimensions = array<i32: 0>} : vector<8x8xi32>
    %494 = tpu.iota {dimensions = array<i32: 1>} : vector<8x8xi32>
    %495 = arith.cmpi sge, %493, %494 : vector<8x8xi32>
    %496 = vector.shape_cast %495 : vector<8x8xi1> to vector<1x8x8xi1>
    %cst_218 = arith.constant 0.000000e+00 : f32
    %497 = vector.broadcast %cst_218 : f32 to vector<2x8x8xf32>
    %c0_219 = arith.constant 0 : index
    %c0_220 = arith.constant 0 : index
    %c0_221 = arith.constant 0 : index
    %498 = vector.load %arg65[%c0_219, %c0_220, %c0_221] : memref<2x8x72xf32, #tpu.memory_space<vmem>>, vector<2x8x8xf32>
    %c0_222 = arith.constant 0 : index
    %c0_223 = arith.constant 0 : index
    %c32 = arith.constant 32 : index
    %499 = vector.load %arg65[%c0_222, %c0_223, %c32] : memref<2x8x72xf32, #tpu.memory_space<vmem>>, vector<2x8x8xf32>
    "tpu.trace_start"() <{level = 10 : i32, message = "btd,bsd->bts"}> : () -> ()
    %cst_224 = arith.constant dense<0.000000e+00> : vector<2x8x8xf32>
    %500 = tpu.matmul %498, %499, %cst_224 {dimension_numbers = #tpu.dot_dimension_numbers<[2], [2], [1], [1], [0, 0, 0, 1, 1, 1], [0], [0]>} : vector<2x8x8xf32>, vector<2x8x8xf32>, vector<2x8x8xf32> -> vector<2x8x8xf32>
    %cst_225 = arith.constant -1.000000e+09 : f32
    "tpu.trace_stop"() : () -> ()
    %501 = vector.shape_cast %496 : vector<1x8x8xi1> to vector<1x8x8xi1>
    %502 = vector.broadcast %501 : vector<1x8x8xi1> to vector<2x8x8xi1>
    %503 = vector.broadcast %cst_225 : f32 to vector<2x8x8xf32>
    %504 = arith.select %502, %500, %503 : vector<2x8x8xi1>, vector<2x8x8xf32>
    %cst_226 = arith.constant dense<0xFF800000> : vector<2x8xf32>
    %505 = vector.multi_reduction <maximumf>, %504, %cst_226 [2] : vector<2x8x8xf32> to vector<2x8xf32>
    %cst_227 = arith.constant 0xFF800000 : f32
    %506 = vector.broadcast %cst_227 : f32 to vector<2x8xf32>
    %507 = arith.maximumf %506, %505 : vector<2x8xf32>
    %508 = vector.shape_cast %507 : vector<2x8xf32> to vector<2x8x1xf32>
    %509 = vector.broadcast %508 : vector<2x8x1xf32> to vector<2x8x8xf32>
    %510 = arith.subf %504, %509 : vector<2x8x8xf32>
    %511 = math.exp %510 : vector<2x8x8xf32>
    %cst_228 = arith.constant dense<0.000000e+00> : vector<2x8xf32>
    %512 = vector.multi_reduction <add>, %511, %cst_228 [2] : vector<2x8x8xf32> to vector<2x8xf32>
    %513 = vector.shape_cast %512 : vector<2x8xf32> to vector<2x8x1xf32>
    %514 = vector.broadcast %513 : vector<2x8x1xf32> to vector<2x8x8xf32>
    %515 = arith.divf %511, %514 : vector<2x8x8xf32>
    %516 = arith.addf %497, %515 : vector<2x8x8xf32>
    %c0_229 = arith.constant 0 : index
    %c0_230 = arith.constant 0 : index
    %c8 = arith.constant 8 : index
    %517 = vector.load %arg65[%c0_229, %c0_230, %c8] : memref<2x8x72xf32, #tpu.memory_space<vmem>>, vector<2x8x8xf32>
    %c0_231 = arith.constant 0 : index
    %c0_232 = arith.constant 0 : index
    %c40 = arith.constant 40 : index
    %518 = vector.load %arg65[%c0_231, %c0_232, %c40] : memref<2x8x72xf32, #tpu.memory_space<vmem>>, vector<2x8x8xf32>
    "tpu.trace_start"() <{level = 10 : i32, message = "btd,bsd->bts"}> : () -> ()
    %cst_233 = arith.constant dense<0.000000e+00> : vector<2x8x8xf32>
    %519 = tpu.matmul %517, %518, %cst_233 {dimension_numbers = #tpu.dot_dimension_numbers<[2], [2], [1], [1], [0, 0, 0, 1, 1, 1], [0], [0]>} : vector<2x8x8xf32>, vector<2x8x8xf32>, vector<2x8x8xf32> -> vector<2x8x8xf32>
    %cst_234 = arith.constant -1.000000e+09 : f32
    "tpu.trace_stop"() : () -> ()
    %520 = vector.shape_cast %496 : vector<1x8x8xi1> to vector<1x8x8xi1>
    %521 = vector.broadcast %520 : vector<1x8x8xi1> to vector<2x8x8xi1>
    %522 = vector.broadcast %cst_234 : f32 to vector<2x8x8xf32>
    %523 = arith.select %521, %519, %522 : vector<2x8x8xi1>, vector<2x8x8xf32>
    %cst_235 = arith.constant dense<0xFF800000> : vector<2x8xf32>
    %524 = vector.multi_reduction <maximumf>, %523, %cst_235 [2] : vector<2x8x8xf32> to vector<2x8xf32>
    %cst_236 = arith.constant 0xFF800000 : f32
    %525 = vector.broadcast %cst_236 : f32 to vector<2x8xf32>
    %526 = arith.maximumf %525, %524 : vector<2x8xf32>
    %527 = vector.shape_cast %526 : vector<2x8xf32> to vector<2x8x1xf32>
    %528 = vector.broadcast %527 : vector<2x8x1xf32> to vector<2x8x8xf32>
    %529 = arith.subf %523, %528 : vector<2x8x8xf32>
    %530 = math.exp %529 : vector<2x8x8xf32>
    %cst_237 = arith.constant dense<0.000000e+00> : vector<2x8xf32>
    %531 = vector.multi_reduction <add>, %530, %cst_237 [2] : vector<2x8x8xf32> to vector<2x8xf32>
    %532 = vector.shape_cast %531 : vector<2x8xf32> to vector<2x8x1xf32>
    %533 = vector.broadcast %532 : vector<2x8x1xf32> to vector<2x8x8xf32>
    %534 = arith.divf %530, %533 : vector<2x8x8xf32>
    %535 = arith.addf %516, %534 : vector<2x8x8xf32>
    %c0_238 = arith.constant 0 : index
    %c0_239 = arith.constant 0 : index
    %c16 = arith.constant 16 : index
    %536 = vector.load %arg65[%c0_238, %c0_239, %c16] : memref<2x8x72xf32, #tpu.memory_space<vmem>>, vector<2x8x8xf32>
    %c0_240 = arith.constant 0 : index
    %c0_241 = arith.constant 0 : index
    %c48 = arith.constant 48 : index
    %537 = vector.load %arg65[%c0_240, %c0_241, %c48] : memref<2x8x72xf32, #tpu.memory_space<vmem>>, vector<2x8x8xf32>
    "tpu.trace_start"() <{level = 10 : i32, message = "btd,bsd->bts"}> : () -> ()
    %cst_242 = arith.constant dense<0.000000e+00> : vector<2x8x8xf32>
    %538 = tpu.matmul %536, %537, %cst_242 {dimension_numbers = #tpu.dot_dimension_numbers<[2], [2], [1], [1], [0, 0, 0, 1, 1, 1], [0], [0]>} : vector<2x8x8xf32>, vector<2x8x8xf32>, vector<2x8x8xf32> -> vector<2x8x8xf32>
    %cst_243 = arith.constant -1.000000e+09 : f32
    "tpu.trace_stop"() : () -> ()
    %539 = vector.shape_cast %496 : vector<1x8x8xi1> to vector<1x8x8xi1>
    %540 = vector.broadcast %539 : vector<1x8x8xi1> to vector<2x8x8xi1>
    %541 = vector.broadcast %cst_243 : f32 to vector<2x8x8xf32>
    %542 = arith.select %540, %538, %541 : vector<2x8x8xi1>, vector<2x8x8xf32>
    %cst_244 = arith.constant dense<0xFF800000> : vector<2x8xf32>
    %543 = vector.multi_reduction <maximumf>, %542, %cst_244 [2] : vector<2x8x8xf32> to vector<2x8xf32>
    %cst_245 = arith.constant 0xFF800000 : f32
    %544 = vector.broadcast %cst_245 : f32 to vector<2x8xf32>
    %545 = arith.maximumf %544, %543 : vector<2x8xf32>
    %546 = vector.shape_cast %545 : vector<2x8xf32> to vector<2x8x1xf32>
    %547 = vector.broadcast %546 : vector<2x8x1xf32> to vector<2x8x8xf32>
    %548 = arith.subf %542, %547 : vector<2x8x8xf32>
    %549 = math.exp %548 : vector<2x8x8xf32>
    %cst_246 = arith.constant dense<0.000000e+00> : vector<2x8xf32>
    %550 = vector.multi_reduction <add>, %549, %cst_246 [2] : vector<2x8x8xf32> to vector<2x8xf32>
    %551 = vector.shape_cast %550 : vector<2x8xf32> to vector<2x8x1xf32>
    %552 = vector.broadcast %551 : vector<2x8x1xf32> to vector<2x8x8xf32>
    %553 = arith.divf %549, %552 : vector<2x8x8xf32>
    %554 = arith.addf %535, %553 : vector<2x8x8xf32>
    %c0_247 = arith.constant 0 : index
    %c0_248 = arith.constant 0 : index
    %c24 = arith.constant 24 : index
    %555 = vector.load %arg65[%c0_247, %c0_248, %c24] : memref<2x8x72xf32, #tpu.memory_space<vmem>>, vector<2x8x8xf32>
    %c0_249 = arith.constant 0 : index
    %c0_250 = arith.constant 0 : index
    %c56 = arith.constant 56 : index
    %556 = vector.load %arg65[%c0_249, %c0_250, %c56] : memref<2x8x72xf32, #tpu.memory_space<vmem>>, vector<2x8x8xf32>
    "tpu.trace_start"() <{level = 10 : i32, message = "btd,bsd->bts"}> : () -> ()
    %cst_251 = arith.constant dense<0.000000e+00> : vector<2x8x8xf32>
    %557 = tpu.matmul %555, %556, %cst_251 {dimension_numbers = #tpu.dot_dimension_numbers<[2], [2], [1], [1], [0, 0, 0, 1, 1, 1], [0], [0]>} : vector<2x8x8xf32>, vector<2x8x8xf32>, vector<2x8x8xf32> -> vector<2x8x8xf32>
    %cst_252 = arith.constant -1.000000e+09 : f32
    "tpu.trace_stop"() : () -> ()
    %558 = vector.shape_cast %496 : vector<1x8x8xi1> to vector<1x8x8xi1>
    %559 = vector.broadcast %558 : vector<1x8x8xi1> to vector<2x8x8xi1>
    %560 = vector.broadcast %cst_252 : f32 to vector<2x8x8xf32>
    %561 = arith.select %559, %557, %560 : vector<2x8x8xi1>, vector<2x8x8xf32>
    %cst_253 = arith.constant dense<0xFF800000> : vector<2x8xf32>
    %562 = vector.multi_reduction <maximumf>, %561, %cst_253 [2] : vector<2x8x8xf32> to vector<2x8xf32>
    %cst_254 = arith.constant 0xFF800000 : f32
    %563 = vector.broadcast %cst_254 : f32 to vector<2x8xf32>
    %564 = arith.maximumf %563, %562 : vector<2x8xf32>
    %565 = vector.shape_cast %564 : vector<2x8xf32> to vector<2x8x1xf32>
    %566 = vector.broadcast %565 : vector<2x8x1xf32> to vector<2x8x8xf32>
    %567 = arith.subf %561, %566 : vector<2x8x8xf32>
    %568 = math.exp %567 : vector<2x8x8xf32>
    %cst_255 = arith.constant dense<0.000000e+00> : vector<2x8xf32>
    %569 = vector.multi_reduction <add>, %568, %cst_255 [2] : vector<2x8x8xf32> to vector<2x8xf32>
    %570 = vector.shape_cast %569 : vector<2x8xf32> to vector<2x8x1xf32>
    %571 = vector.broadcast %570 : vector<2x8x1xf32> to vector<2x8x8xf32>
    %572 = arith.divf %568, %571 : vector<2x8x8xf32>
    %573 = arith.addf %554, %572 : vector<2x8x8xf32>
    "tpu.trace_start"() <{level = 10 : i32, message = "bts,bsd->btd"}> : () -> ()
    %cst_256 = arith.constant dense<0.000000e+00> : vector<2x8x8xf32>
    %574 = tpu.matmul %573, %492, %cst_256 {dimension_numbers = #tpu.dot_dimension_numbers<[2], [1], [1], [2], [0, 0, 0, 1, 1, 2], [0], [0]>} : vector<2x8x8xf32>, vector<2x8x8xf32>, vector<2x8x8xf32> -> vector<2x8x8xf32>
    "tpu.trace_stop"() : () -> ()
    %575 = vector.shape_cast %574 : vector<2x8x8xf32> to vector<16x8xf32>
    %c0_257 = arith.constant 0 : index
    %c0_258 = arith.constant 0 : index
    %576 = vector.load %arg2[%c0_257, %c0_258] : memref<8x32xf32, #tpu.memory_space<vmem>>, vector<8x32xf32>
    %cst_259 = arith.constant dense<0.000000e+00> : vector<16x32xf32>
    %577 = tpu.matmul %575, %576, %cst_259 {dimension_numbers = #tpu.dot_dimension_numbers<[1], [0], [0], [1], [0, 0, 1, 1], [], []>} : vector<16x8xf32>, vector<8x32xf32>, vector<16x32xf32> -> vector<16x32xf32>
    %c0_260 = arith.constant 0 : index
    %c0_261 = arith.constant 0 : index
    %578 = vector.load %arg1[%c0_260, %c0_261] : memref<1x32xf32, #tpu.memory_space<vmem>>, vector<1x32xf32>
    %579 = vector.broadcast %578 : vector<1x32xf32> to vector<16x32xf32>
    %580 = arith.addf %577, %579 : vector<16x32xf32>
    %c0_262 = arith.constant 0 : index
    %c0_263 = arith.constant 0 : index
    %581 = vector.load %arg33[%c0_262, %c0_263] : memref<32x64xf32, #tpu.memory_space<vmem>>, vector<32x64xf32>
    %c0_264 = arith.constant 0 : index
    %c0_265 = arith.constant 0 : index
    %582 = vector.load %arg30[%c0_264, %c0_265] : memref<1x64xf32, #tpu.memory_space<vmem>>, vector<1x64xf32>
    %c0_266 = arith.constant 0 : index
    %c0_267 = arith.constant 0 : index
    %583 = vector.load %arg32[%c0_266, %c0_267] : memref<1x32xf32, #tpu.memory_space<vmem>>, vector<1x32xf32>
    %c0_268 = arith.constant 0 : index
    %c0_269 = arith.constant 0 : index
    %584 = vector.load %arg31[%c0_268, %c0_269] : memref<1x32xf32, #tpu.memory_space<vmem>>, vector<1x32xf32>
    %cst_270 = arith.constant dense<0.000000e+00> : vector<16x64xf32>
    %585 = tpu.matmul %580, %581, %cst_270 {dimension_numbers = #tpu.dot_dimension_numbers<[1], [0], [0], [1], [0, 0, 1, 1], [], []>} : vector<16x32xf32>, vector<32x64xf32>, vector<16x64xf32> -> vector<16x64xf32>
    %586 = vector.broadcast %582 : vector<1x64xf32> to vector<16x64xf32>
    %587 = arith.addf %585, %586 : vector<16x64xf32>
    %588 = vector.extract_strided_slice %587 {offsets = [0, 0], sizes = [16, 32], strides = [1, 1]} : vector<16x64xf32> to vector<16x32xf32>
    %589 = arith.negf %588 : vector<16x32xf32>
    %590 = math.exp %589 : vector<16x32xf32>
    %cst_271 = arith.constant 1.000000e+00 : f32
    %591 = vector.broadcast %cst_271 : f32 to vector<16x32xf32>
    %592 = arith.addf %591, %590 : vector<16x32xf32>
    %593 = arith.divf %591, %592 : vector<16x32xf32>
    %594 = vector.extract_strided_slice %587 {offsets = [0, 32], sizes = [16, 32], strides = [1, 1]} : vector<16x64xf32> to vector<16x32xf32>
    %595 = arith.mulf %593, %594 : vector<16x32xf32>
    %596 = arith.addf %487, %595 : vector<16x32xf32>
    %cst_272 = arith.constant dense<0.000000e+00> : vector<16xf32>
    %597 = vector.multi_reduction <add>, %596, %cst_272 [1] : vector<16x32xf32> to vector<16xf32>
    %598 = vector.shape_cast %597 : vector<16xf32> to vector<16x1xf32>
    %cst_273 = arith.constant 3.200000e+01 : f32
    %599 = vector.broadcast %cst_273 : f32 to vector<16x1xf32>
    %600 = arith.divf %598, %599 : vector<16x1xf32>
    %601 = vector.broadcast %600 : vector<16x1xf32> to vector<16x32xf32>
    %602 = arith.subf %596, %601 : vector<16x32xf32>
    %603 = arith.mulf %602, %602 : vector<16x32xf32>
    %cst_274 = arith.constant dense<0.000000e+00> : vector<16xf32>
    %604 = vector.multi_reduction <add>, %603, %cst_274 [1] : vector<16x32xf32> to vector<16xf32>
    %605 = vector.shape_cast %604 : vector<16xf32> to vector<16x1xf32>
    %cst_275 = arith.constant 3.200000e+01 : f32
    %606 = vector.broadcast %cst_275 : f32 to vector<16x1xf32>
    %607 = arith.divf %605, %606 : vector<16x1xf32>
    %608 = vector.broadcast %600 : vector<16x1xf32> to vector<16x32xf32>
    %609 = arith.subf %596, %608 : vector<16x32xf32>
    %cst_276 = arith.constant 9.99999974E-6 : f32
    %610 = vector.broadcast %cst_276 : f32 to vector<16x1xf32>
    %611 = arith.addf %607, %610 : vector<16x1xf32>
    %612 = math.rsqrt %611 : vector<16x1xf32>
    %613 = vector.broadcast %612 : vector<16x1xf32> to vector<16x32xf32>
    %614 = arith.mulf %609, %613 : vector<16x32xf32>
    %615 = vector.broadcast %583 : vector<1x32xf32> to vector<16x32xf32>
    %616 = arith.mulf %614, %615 : vector<16x32xf32>
    %617 = vector.broadcast %584 : vector<1x32xf32> to vector<16x32xf32>
    %618 = arith.addf %616, %617 : vector<16x32xf32>
    %c0_277 = arith.constant 0 : index
    %c0_278 = arith.constant 0 : index
    %619 = vector.load %arg18[%c0_277, %c0_278] : memref<32x32xf32, #tpu.memory_space<vmem>>, vector<32x32xf32>
    %c0_279 = arith.constant 0 : index
    %c0_280 = arith.constant 0 : index
    %620 = vector.load %arg13[%c0_279, %c0_280] : memref<1x32xf32, #tpu.memory_space<vmem>>, vector<1x32xf32>
    %c0_281 = arith.constant 0 : index
    %c0_282 = arith.constant 0 : index
    %621 = vector.load %arg19[%c0_281, %c0_282] : memref<32x32xf32, #tpu.memory_space<vmem>>, vector<32x32xf32>
    %c0_283 = arith.constant 0 : index
    %c0_284 = arith.constant 0 : index
    %622 = vector.load %arg14[%c0_283, %c0_284] : memref<1x32xf32, #tpu.memory_space<vmem>>, vector<1x32xf32>
    %c0_285 = arith.constant 0 : index
    %c0_286 = arith.constant 0 : index
    %623 = vector.load %arg20[%c0_285, %c0_286] : memref<32x64xf32, #tpu.memory_space<vmem>>, vector<32x64xf32>
    %c0_287 = arith.constant 0 : index
    %c0_288 = arith.constant 0 : index
    %624 = vector.load %arg15[%c0_287, %c0_288] : memref<1x64xf32, #tpu.memory_space<vmem>>, vector<1x64xf32>
    %c0_289 = arith.constant 0 : index
    %c0_290 = arith.constant 0 : index
    %625 = vector.load %arg17[%c0_289, %c0_290] : memref<1x32xf32, #tpu.memory_space<vmem>>, vector<1x32xf32>
    %c0_291 = arith.constant 0 : index
    %c0_292 = arith.constant 0 : index
    %626 = vector.load %arg16[%c0_291, %c0_292] : memref<1x32xf32, #tpu.memory_space<vmem>>, vector<1x32xf32>
    %cst_293 = arith.constant dense<0.000000e+00> : vector<16x32xf32>
    %627 = tpu.matmul %618, %619, %cst_293 {dimension_numbers = #tpu.dot_dimension_numbers<[1], [0], [0], [1], [0, 0, 1, 1], [], []>} : vector<16x32xf32>, vector<32x32xf32>, vector<16x32xf32> -> vector<16x32xf32>
    %628 = vector.broadcast %620 : vector<1x32xf32> to vector<16x32xf32>
    %629 = arith.addf %627, %628 : vector<16x32xf32>
    %cst_294 = arith.constant 0.000000e+00 : f32
    %630 = vector.broadcast %cst_294 : f32 to vector<16x32xf32>
    %631 = arith.cmpf ogt, %629, %630 : vector<16x32xf32>
    %632 = math.exp %629 : vector<16x32xf32>
    %cst_295 = arith.constant 1.000000e+00 : f32
    %633 = vector.broadcast %cst_295 : f32 to vector<16x32xf32>
    %634 = arith.subf %632, %633 : vector<16x32xf32>
    %635 = arith.select %631, %629, %634 : vector<16x32xi1>, vector<16x32xf32>
    %cst_296 = arith.constant dense<0.000000e+00> : vector<16x32xf32>
    %636 = tpu.matmul %635, %621, %cst_296 {dimension_numbers = #tpu.dot_dimension_numbers<[1], [0], [0], [1], [0, 0, 1, 1], [], []>} : vector<16x32xf32>, vector<32x32xf32>, vector<16x32xf32> -> vector<16x32xf32>
    %637 = vector.broadcast %622 : vector<1x32xf32> to vector<16x32xf32>
    %638 = arith.addf %636, %637 : vector<16x32xf32>
    %cst_297 = arith.constant dense<0.000000e+00> : vector<16x64xf32>
    %639 = tpu.matmul %638, %623, %cst_297 {dimension_numbers = #tpu.dot_dimension_numbers<[1], [0], [0], [1], [0, 0, 1, 1], [], []>} : vector<16x32xf32>, vector<32x64xf32>, vector<16x64xf32> -> vector<16x64xf32>
    %640 = vector.broadcast %624 : vector<1x64xf32> to vector<16x64xf32>
    %641 = arith.addf %639, %640 : vector<16x64xf32>
    %642 = vector.extract_strided_slice %641 {offsets = [0, 0], sizes = [16, 32], strides = [1, 1]} : vector<16x64xf32> to vector<16x32xf32>
    %643 = arith.negf %642 : vector<16x32xf32>
    %644 = math.exp %643 : vector<16x32xf32>
    %cst_298 = arith.constant 1.000000e+00 : f32
    %645 = vector.broadcast %cst_298 : f32 to vector<16x32xf32>
    %646 = arith.addf %645, %644 : vector<16x32xf32>
    %647 = arith.divf %645, %646 : vector<16x32xf32>
    %648 = vector.extract_strided_slice %641 {offsets = [0, 32], sizes = [16, 32], strides = [1, 1]} : vector<16x64xf32> to vector<16x32xf32>
    %649 = arith.mulf %647, %648 : vector<16x32xf32>
    %650 = arith.addf %618, %649 : vector<16x32xf32>
    %cst_299 = arith.constant dense<0.000000e+00> : vector<16xf32>
    %651 = vector.multi_reduction <add>, %650, %cst_299 [1] : vector<16x32xf32> to vector<16xf32>
    %652 = vector.shape_cast %651 : vector<16xf32> to vector<16x1xf32>
    %cst_300 = arith.constant 3.200000e+01 : f32
    %653 = vector.broadcast %cst_300 : f32 to vector<16x1xf32>
    %654 = arith.divf %652, %653 : vector<16x1xf32>
    %655 = vector.broadcast %654 : vector<16x1xf32> to vector<16x32xf32>
    %656 = arith.subf %650, %655 : vector<16x32xf32>
    %657 = arith.mulf %656, %656 : vector<16x32xf32>
    %cst_301 = arith.constant dense<0.000000e+00> : vector<16xf32>
    %658 = vector.multi_reduction <add>, %657, %cst_301 [1] : vector<16x32xf32> to vector<16xf32>
    %659 = vector.shape_cast %658 : vector<16xf32> to vector<16x1xf32>
    %cst_302 = arith.constant 3.200000e+01 : f32
    %660 = vector.broadcast %cst_302 : f32 to vector<16x1xf32>
    %661 = arith.divf %659, %660 : vector<16x1xf32>
    %662 = vector.broadcast %654 : vector<16x1xf32> to vector<16x32xf32>
    %663 = arith.subf %650, %662 : vector<16x32xf32>
    %cst_303 = arith.constant 9.99999974E-6 : f32
    %664 = vector.broadcast %cst_303 : f32 to vector<16x1xf32>
    %665 = arith.addf %661, %664 : vector<16x1xf32>
    %666 = math.rsqrt %665 : vector<16x1xf32>
    %667 = vector.broadcast %666 : vector<16x1xf32> to vector<16x32xf32>
    %668 = arith.mulf %663, %667 : vector<16x32xf32>
    %669 = vector.broadcast %625 : vector<1x32xf32> to vector<16x32xf32>
    %670 = arith.mulf %668, %669 : vector<16x32xf32>
    %671 = vector.broadcast %626 : vector<1x32xf32> to vector<16x32xf32>
    %672 = arith.addf %670, %671 : vector<16x32xf32>
    %c0_304 = arith.constant 0 : index
    %c0_305 = arith.constant 0 : index
    %673 = vector.load %arg24[%c0_304, %c0_305] : memref<32x64xf32, #tpu.memory_space<vmem>>, vector<32x64xf32>
    %c0_306 = arith.constant 0 : index
    %c0_307 = arith.constant 0 : index
    %674 = vector.load %arg21[%c0_306, %c0_307] : memref<1x64xf32, #tpu.memory_space<vmem>>, vector<1x64xf32>
    %c0_308 = arith.constant 0 : index
    %c0_309 = arith.constant 0 : index
    %675 = vector.load %arg23[%c0_308, %c0_309] : memref<1x32xf32, #tpu.memory_space<vmem>>, vector<1x32xf32>
    %c0_310 = arith.constant 0 : index
    %c0_311 = arith.constant 0 : index
    %676 = vector.load %arg22[%c0_310, %c0_311] : memref<1x32xf32, #tpu.memory_space<vmem>>, vector<1x32xf32>
    %cst_312 = arith.constant dense<0.000000e+00> : vector<16x64xf32>
    %677 = tpu.matmul %672, %673, %cst_312 {dimension_numbers = #tpu.dot_dimension_numbers<[1], [0], [0], [1], [0, 0, 1, 1], [], []>} : vector<16x32xf32>, vector<32x64xf32>, vector<16x64xf32> -> vector<16x64xf32>
    %678 = vector.broadcast %674 : vector<1x64xf32> to vector<16x64xf32>
    %679 = arith.addf %677, %678 : vector<16x64xf32>
    %680 = vector.extract_strided_slice %679 {offsets = [0, 0], sizes = [16, 32], strides = [1, 1]} : vector<16x64xf32> to vector<16x32xf32>
    %681 = arith.negf %680 : vector<16x32xf32>
    %682 = math.exp %681 : vector<16x32xf32>
    %cst_313 = arith.constant 1.000000e+00 : f32
    %683 = vector.broadcast %cst_313 : f32 to vector<16x32xf32>
    %684 = arith.addf %683, %682 : vector<16x32xf32>
    %685 = arith.divf %683, %684 : vector<16x32xf32>
    %686 = vector.extract_strided_slice %679 {offsets = [0, 32], sizes = [16, 32], strides = [1, 1]} : vector<16x64xf32> to vector<16x32xf32>
    %687 = arith.mulf %685, %686 : vector<16x32xf32>
    %688 = arith.addf %433, %687 : vector<16x32xf32>
    %cst_314 = arith.constant dense<0.000000e+00> : vector<16xf32>
    %689 = vector.multi_reduction <add>, %688, %cst_314 [1] : vector<16x32xf32> to vector<16xf32>
    %690 = vector.shape_cast %689 : vector<16xf32> to vector<16x1xf32>
    %cst_315 = arith.constant 3.200000e+01 : f32
    %691 = vector.broadcast %cst_315 : f32 to vector<16x1xf32>
    %692 = arith.divf %690, %691 : vector<16x1xf32>
    %693 = vector.broadcast %692 : vector<16x1xf32> to vector<16x32xf32>
    %694 = arith.subf %688, %693 : vector<16x32xf32>
    %695 = arith.mulf %694, %694 : vector<16x32xf32>
    %cst_316 = arith.constant dense<0.000000e+00> : vector<16xf32>
    %696 = vector.multi_reduction <add>, %695, %cst_316 [1] : vector<16x32xf32> to vector<16xf32>
    %697 = vector.shape_cast %696 : vector<16xf32> to vector<16x1xf32>
    %cst_317 = arith.constant 3.200000e+01 : f32
    %698 = vector.broadcast %cst_317 : f32 to vector<16x1xf32>
    %699 = arith.divf %697, %698 : vector<16x1xf32>
    %700 = vector.broadcast %692 : vector<16x1xf32> to vector<16x32xf32>
    %701 = arith.subf %688, %700 : vector<16x32xf32>
    %cst_318 = arith.constant 9.99999974E-6 : f32
    %702 = vector.broadcast %cst_318 : f32 to vector<16x1xf32>
    %703 = arith.addf %699, %702 : vector<16x1xf32>
    %704 = math.rsqrt %703 : vector<16x1xf32>
    %705 = vector.broadcast %704 : vector<16x1xf32> to vector<16x32xf32>
    %706 = arith.mulf %701, %705 : vector<16x32xf32>
    %707 = vector.broadcast %675 : vector<1x32xf32> to vector<16x32xf32>
    %708 = arith.mulf %706, %707 : vector<16x32xf32>
    %709 = vector.broadcast %676 : vector<1x32xf32> to vector<16x32xf32>
    %710 = arith.addf %708, %709 : vector<16x32xf32>
    %711 = vector.shape_cast %710 : vector<16x32xf32> to vector<2x8x32xf32>
    %c0_319 = arith.constant 0 : index
    %c0_320 = arith.constant 0 : index
    %c0_321 = arith.constant 0 : index
    %712 = vector.load %arg66[%c0_319, %c0_320, %c0_321] : memref<2x8x32xf32, #tpu.memory_space<vmem>>, vector<2x8x32xf32>
    tpu.vector_store %arg66[%c0_319, %c0_320, %c0_321], %711 {strides = array<i32>} : memref<2x8x32xf32, #tpu.memory_space<vmem>>, vector<2x8x32xf32>,
    %c0_322 = arith.constant 0 : index
    %c5_323 = arith.constant 5 : index
    %c0_324 = arith.constant 0 : index
    %713 = vector.load %arg66[%c0_322, %c5_323, %c0_324] : memref<2x8x32xf32, #tpu.memory_space<vmem>>, vector<2x3x32xf32>
    %c0_325 = arith.constant 0 : index
    %c0_326 = arith.constant 0 : index
    %714 = vector.load %arg29[%c0_325, %c0_326] : memref<32x7xf32, #tpu.memory_space<vmem>>, vector<32x7xf32>
    "tpu.trace_start"() <{level = 10 : i32, message = "bth,ho->bto"}> : () -> ()
    %cst_327 = arith.constant dense<0.000000e+00> : vector<2x3x7xf32>
    %715 = tpu.matmul %713, %714, %cst_327 {dimension_numbers = #tpu.dot_dimension_numbers<[2], [0], [0, 1], [1], [0, 0, 0, 1, 1, 1], [], []>} : vector<2x3x32xf32>, vector<32x7xf32>, vector<2x3x7xf32> -> vector<2x3x7xf32>
    "tpu.trace_stop"() : () -> ()
    %c0_328 = arith.constant 0 : index
    %c0_329 = arith.constant 0 : index
    %716 = vector.load %arg28[%c0_328, %c0_329] : memref<1x7xf32, #tpu.memory_space<vmem>>, vector<1x7xf32>
    %717 = vector.shape_cast %716 : vector<1x7xf32> to vector<1x1x7xf32>
    %718 = vector.broadcast %717 : vector<1x1x7xf32> to vector<2x3x7xf32>
    %719 = arith.addf %715, %718 : vector<2x3x7xf32>
    %c0_330 = arith.constant 0 : index
    %c0_331 = arith.constant 0 : index
    %c0_332 = arith.constant 0 : index
    %720 = vector.load %arg62[%c0_330, %c0_331, %c0_332] : memref<2x3x7xf32, #tpu.memory_space<vmem>>, vector<2x3x7xf32>
    tpu.vector_store %arg62[%c0_330, %c0_331, %c0_332], %719 {strides = array<i32>} : memref<2x3x7xf32, #tpu.memory_space<vmem>>, vector<2x3x7xf32>,
    return
  }
}

</mosaic_0001>

<bundles_post_ra>
// kernel: tft_forward.1
= control target key start
LH: loop header
LB: loop body
LE: loop exit
PB: predicated region body
PF: predicated region fallthrough
CT: control target
= control target key end

     0   :  { %s5646_s6 = smov 1   ;;  %s5647_s10 = smov 2   ;;  %s7036_s0 = inlined_call_operand.smem [shape: u32[63], index: -1, kind: input, shape index: {}] }
   0x1   :  { %s5770_s5 = sld [smem:[%s7036_s0]]   ;;  %s5648_s14 = smov 3  }
   0x2   :  { %s5775_s9 = sld [smem:[%s7036_s0 + %s5646_s6]]   ;;  %s5649_s18 = smov 4  }
   0x3   :  { %s5780_s13 = sld [smem:[%s7036_s0 + %s5647_s10]]   ;;  %s5650_s22 = smov 5  }
   0x4   :  { %s5785_s17 = sld [smem:[%s7036_s0 + %s5648_s14]]   ;;  %s5651_s26 = smov 6  }
   0x5   :  { %s5790_s21 = sld [smem:[%s7036_s0 + %s5649_s18]]   ;;  %s5652_s30 = smov 7  }
   0x6   :  { %s5795_s25 = sld [smem:[%s7036_s0 + %s5650_s22]]   ;;  %s5653_s4 = smov 8  }
   0x7   :  { %7068 = sst [smem:[#allocation81_spill]] %s5770_s5  ;;  %s5654_s10 = smov 9  }
   0x8   :  { %7069 = sst [smem:[#allocation82_spill]] %s5775_s9  ;;  %s5655_s15 = smov 10  }
   0x9   :  { %7070 = sst [smem:[#allocation83_spill]] %s5780_s13  ;;  %s5656_s20 = smov 11  }
   0xa   :  { %7071 = sst [smem:[#allocation84_spill]] %s5785_s17  ;;  %s5658_s1 = smov 13  }
   0xb   :  { %7072 = sst [smem:[#allocation85_spill]] %s5790_s21  ;;  %s5659_s7 = smov 14  }
   0xc   :  { %7073 = sst [smem:[#allocation86_spill]] %s5795_s25  ;;  %s5661_s22 = smov 16  }
   0xd   :  { %s5800_s29 = sld [smem:[%s7036_s0 + %s5651_s26]]   ;;  %s5657_s26 = smov 12  }
   0xe   :  { %s5805_s3 = sld [smem:[%s7036_s0 + %s5652_s30]]   ;;  %s5662_s28 = smov 17  }
   0xf   :  { %s5810_s8 = sld [smem:[%s7036_s0 + %s5653_s4]]  }
  0x10   :  { %s5815_s14 = sld [smem:[%s7036_s0 + %s5654_s10]]  }
  0x11   :  { %s5820_s19 = sld [smem:[%s7036_s0 + %s5655_s15]]   ;;  %s5660_s15 = smov 15  }
  0x12   :  { %s5825_s24 = sld [smem:[%s7036_s0 + %s5656_s20]]  }
  0x13   :  { %7074 = sst [smem:[#allocation87_spill]] %s5800_s29 }
  0x14   :  { %7075 = sst [smem:[#allocation88_spill]] %s5805_s3 }
  0x15   :  { %7076 = sst [smem:[#allocation89_spill]] %s5810_s8 }
  0x16   :  { %s5830_s30 = sld [smem:[%s7036_s0 + %s5657_s26]]  }
  0x17   :  { %7077 = sst [smem:[#allocation90_spill]] %s5820_s19 }
  0x18   :  { %7078 = sst [smem:[#allocation91_spill]] %s5825_s24 }
  0x19   :  { %s5835_s6 = sld [smem:[%s7036_s0 + %s5658_s1]]  }
  0x1a   :  { %s5840_s12 = sld [smem:[%s7036_s0 + %s5659_s7]]   ;;  %s5663_s7 = smov 18  }
  0x1b   :  { %s5845_s20 = sld [smem:[%s7036_s0 + %s5660_s15]]   ;;  %s5664_s15 = smov 19  }
  0x1c   :  { %7079 = sst [smem:[#allocation92_spill]] %s5830_s30 }
  0x1d   :  { %s5850_s27 = sld [smem:[%s7036_s0 + %s5661_s22]]   ;;  %s5665_s22 = smov 20  }
  0x1e   :  { %s5855_s4 = sld [smem:[%s7036_s0 + %s5662_s28]]   ;;  %s5666_s28 = smov 21  }
  0x1f   :  { %s5860_s9 = sld [smem:[%s7036_s0 + %s5663_s7]]   ;;  %s5667_s7 = smov 22  }
  0x20   :  { %7080 = sst [smem:[#allocation93_spill]] %s5840_s12 }
  0x21   :  { %s5865_s13 = sld [smem:[%s7036_s0 + %s5664_s15]]   ;;  %s5668_s15 = smov 23  }
  0x22   :  { %s5870_s17 = sld [smem:[%s7036_s0 + %s5665_s22]]   ;;  %s5669_s22 = smov 24  }
  0x23   :  { %7081 = sst [smem:[#allocation94_spill]] %s5850_s27 }
  0x24   :  { %s5875_s3 = sld [smem:[%s7036_s0 + %s5666_s28]]   ;;  %s5670_s28 = smov 25  }
  0x25   :  { %7082 = sst [smem:[#allocation95_spill]] %s5860_s9 }
  0x26   :  { %s5880_s29 = sld [smem:[%s7036_s0 + %s5667_s7]]   ;;  %s5671_s7 = smov 26  }
  0x27   :  { %s5885_s25 = sld [smem:[%s7036_s0 + %s5668_s15]]   ;;  %s5672_s15 = smov 27  }
  0x28   :  { %7083 = sst [smem:[#allocation96_spill]] %s5870_s17 }
  0x29   :  { %s5890_s24 = sld [smem:[%s7036_s0 + %s5669_s22]]   ;;  %s5673_s22 = smov 28  }
  0x2a   :  { %s5895_s19 = sld [smem:[%s7036_s0 + %s5670_s28]]   ;;  %s5674_s28 = smov 29  }
  0x2b   :  { %s5900_s21 = sld [smem:[%s7036_s0 + %s5671_s7]]   ;;  %s5675_s7 = smov 30  }
  0x2c   :  { %7084 = sst [smem:[#allocation97_spill]] %s5880_s29 }
  0x2d   :  { %s5905_s5 = sld [smem:[%s7036_s0 + %s5672_s15]]   ;;  %s5676_s15 = smov 31  }
  0x2e   :  { %s5915_s29 = sld [smem:[%s7036_s0 + %s5674_s28]]   ;;  %s5678_s28 = smov 33  }
  0x2f   :  { %7085 = sst [smem:[#allocation98_spill]] %s5890_s24 }
  0x30   :  { %s5910_s24 = sld [smem:[%s7036_s0 + %s5673_s22]]   ;;  %s5677_s22 = smov 32  }
  0x31   :  { %7086 = sst [smem:[#allocation99_spill]] %s5900_s21 }
  0x32   :  { %s5920_s21 = sld [smem:[%s7036_s0 + %s5675_s7]]   ;;  %s5679_s7 = smov 34  }
  0x33   :  { %s5925_s17 = sld [smem:[%s7036_s0 + %s5676_s15]]   ;;  %s5680_s15 = smov 35  }
  0x34   :  { %7088 = sst [smem:[#allocation101_spill]] %s5915_s29 }
  0x35   :  { %s5935_s29 = sld [smem:[%s7036_s0 + %s5678_s28]]   ;;  %s5682_s28 = smov 37  }
  0x36   :  { %7087 = sst [smem:[#allocation100_spill]] %s5910_s24 }
  0x37   :  { %s5930_s24 = sld [smem:[%s7036_s0 + %s5677_s22]]   ;;  %s5681_s22 = smov 36  }
  0x38   :  { %s5940_s9 = sld [smem:[%s7036_s0 + %s5679_s7]]   ;;  %s5683_s7 = smov 38  }
  0x39   :  { %7089 = sst [smem:[#allocation102_spill]] %s5925_s17 }
  0x3a   :  { %s5945_s17 = sld [smem:[%s7036_s0 + %s5680_s15]]   ;;  %s5684_s15 = smov 39  }
  0x3b   :  { %7090 = sst [smem:[#allocation103_spill]] %s5935_s29 }
  0x3c   :  { %s5950_s27 = sld [smem:[%s7036_s0 + %s5681_s22]]   ;;  %s5685_s22 = smov 40  }
  0x3d   :  { %s5955_s29 = sld [smem:[%s7036_s0 + %s5682_s28]]   ;;  %s5686_s28 = smov 41  }
  0x3e   :  { %s5960_s12 = sld [smem:[%s7036_s0 + %s5683_s7]]   ;;  %s5687_s7 = smov 42  }
  0x3f   :  { %s5970_s30 = sld [smem:[%s7036_s0 + %s5685_s22]]   ;;  %s5689_s22 = smov 44  }
  0x40   :  { %7091 = sst [smem:[#allocation104_spill]] %s5945_s17 }
  0x41   :  { %s5965_s17 = sld [smem:[%s7036_s0 + %s5684_s15]]   ;;  %s5688_s15 = smov 43  }
  0x42   :  { %s5980_s8 = sld [smem:[%s7036_s0 + %s5687_s7]]   ;;  %s5691_s7 = smov 46  }
  0x43   :  { %7092 = sst [smem:[#allocation105_spill]] %s5955_s29 }
  0x44   :  { %s5975_s29 = sld [smem:[%s7036_s0 + %s5686_s28]]   ;;  %s5690_s28 = smov 45  }
  0x45   :  { %7094 = sst [smem:[#allocation107_spill]] %s5970_s30 }
  0x46   :  { %s5990_s30 = sld [smem:[%s7036_s0 + %s5689_s22]]   ;;  %s5693_s22 = smov 48  }
  0x47   :  { %7093 = sst [smem:[#allocation106_spill]] %s5965_s17 }
  0x48   :  { %7096 = sst [smem:[#allocation109_spill]] %s5980_s8 }
  0x49   :  { %s5985_s17 = sld [smem:[%s7036_s0 + %s5688_s15]]   ;;  %s5692_s15 = smov 47  }
  0x4a   :  { %7095 = sst [smem:[#allocation108_spill]] %s5975_s29 }
  0x4b   :  { %s5995_s29 = sld [smem:[%s7036_s0 + %s5690_s28]]   ;;  %s5694_s28 = smov 49  }
  0x4c   :  { %7098 = sst [smem:[#allocation111_spill]] %s5990_s30 }
  0x4d   :  { %s6000_s8 = sld [smem:[%s7036_s0 + %s5691_s7]]   ;;  %s5695_s7 = smov 50  }
  0x4e   :  { %s6010_s30 = sld [smem:[%s7036_s0 + %s5693_s22]]   ;;  %s5697_s22 = smov 52  }
  0x4f   :  { %7097 = sst [smem:[#allocation110_spill]] %s5985_s17 }
  0x50   :  { %s6005_s17 = sld [smem:[%s7036_s0 + %s5692_s15]]   ;;  %s5696_s15 = smov 51  }
  0x51   :  { %7099 = sst [smem:[#allocation112_spill]] %s5995_s29 }
  0x52   :  { %s6015_s29 = sld [smem:[%s7036_s0 + %s5694_s28]]   ;;  %s5698_s28 = smov 53  }
  0x53   :  { %7100 = sst [smem:[#allocation113_spill]] %s6000_s8 }
  0x54   :  { %7102 = sst [smem:[#allocation115_spill]] %s6010_s30 }
  0x55   :  { %s6020_s8 = sld [smem:[%s7036_s0 + %s5695_s7]]   ;;  %s5699_s7 = smov 54  }
  0x56   :  { %7101 = sst [smem:[#allocation114_spill]] %s6005_s17 }
  0x57   :  { %s6025_s17 = sld [smem:[%s7036_s0 + %s5696_s15]]   ;;  %s5700_s15 = smov 55  }
  0x58   :  { %7103 = sst [smem:[#allocation116_spill]] %s6015_s29 }
  0x59   :  { %s6030_s30 = sld [smem:[%s7036_s0 + %s5697_s22]]   ;;  %s5701_s22 = smov 56  }
  0x5a   :  { %s6035_s29 = sld [smem:[%s7036_s0 + %s5698_s28]]   ;;  %s5702_s28 = smov 57  }
  0x5b   :  { %7104 = sst [smem:[#allocation117_spill]] %s6020_s8 }
  0x5c   :  { %s6040_s8 = sld [smem:[%s7036_s0 + %s5699_s7]]   ;;  %s5703_s7 = smov 58  }
  0x5d   :  { %7105 = sst [smem:[#allocation118_spill]] %s6025_s17 }
  0x5e   :  { %s6045_s17 = sld [smem:[%s7036_s0 + %s5700_s15]]   ;;  %s5704_s15 = smov 59  }
  0x5f   :  { %7106 = sst [smem:[#allocation119_spill]] %s6030_s30 }
  0x60   :  { %7107 = sst [smem:[#allocation120_spill]] %s6035_s29 }
  0x61   :  { %s6050_s30 = sld [smem:[%s7036_s0 + %s5701_s22]]   ;;  %s5705_s22 = smov 60  }
  0x62   :  { %7108 = sst [smem:[#allocation121_spill]] %s6040_s8 }
  0x63   :  { %s6055_s29 = sld [smem:[%s7036_s0 + %s5702_s28]]   ;;  %s5706_s28 = smov 61  }
  0x64   :  { %7109 = sst [smem:[#allocation122_spill]] %s6045_s17 }
  0x65   :  { %s6060_s8 = sld [smem:[%s7036_s0 + %s5703_s7]]   ;;  %s5707_s7 = smov 62  }
  0x66   :  { %s6065_s17 = sld [smem:[%s7036_s0 + %s5704_s15]]  }
  0x67   :  { %7110 = sst [smem:[#allocation123_spill]] %s6050_s30 }
  0x68   :  { %s6070_s30 = sld [smem:[%s7036_s0 + %s5705_s22]]  }
  0x69   :  { %7111 = sst [smem:[#allocation124_spill]] %s6055_s29 }
  0x6a   :  { %s6075_s29 = sld [smem:[%s7036_s0 + %s5706_s28]]  }
  0x6b   :  { %7112 = sst [smem:[#allocation125_spill]] %s6060_s8 }
  0x6c   :  { %s6080_s8 = sld [smem:[%s7036_s0 + %s5707_s7]]  }
  0x6d   :  { %130 = vsyncpa [#allocation7], 0 }
  0x6e   :  { %131 = vsyncpa [#allocation9], 0 }
  0x6f   :  { %132 = vsyncpa [#allocation12], 0 }
  0x70   :  { %133 = vsyncpa [#allocation15], 0 }
  0x71   :  { %134 = vsyncpa [#allocation18], 0 }
  0x72   :  { %135 = vsyncpa [#allocation21], 0 }
  0x73   :  { %136 = vsyncpa [#allocation24], 0 }
  0x74   :  { %137 = vsyncpa [#allocation27], 0 }
  0x75   :  { %138 = vsyncpa [#allocation30], 0 }
  0x76   :  { %139 = vsyncpa [#allocation33], 0 }
  0x77   :  { %140 = vsyncpa [#allocation36], 0 }
  0x78   :  { %141 = vsyncpa [#allocation39], 0 }
  0x79   :  { %142 = vsyncpa [#allocation42], 0 }
  0x7a   :  { %143 = vsyncpa [#allocation45], 0 }
  0x7b   :  { %144 = vsyncpa [#allocation48], 0 }
  0x7c   :  { %145 = vsyncpa [#allocation51], 0 }
  0x7d   :  { %146 = vsyncpa [#allocation54], 0 }
  0x7e   :  { %147 = vsyncpa [#allocation57], 0  ;;  %s181_s0 = sshll.u32 %s5815_s14, 4  ;;  %s182_s0 = int_to_ptr.hbm [resolvable:$true] %s181_s0 }
  0x7f   :  { %148 = vsyncpa [#allocation60], 0  ;;  %s5708_s15 = smov [#allocation8]   ;;  %s209_s18 = sshll.u32 %s5835_s6, 4  ;;  %s210_s18 = int_to_ptr.hbm [resolvable:$true] %s209_s18 }
  0x80   :  { %s183_s16 = sshll.u32 %s5708_s15, 4  ;;  %s4720_s22 = sshra.s32 %s182_s0, 4  ;;  %s184_s16 = int_to_ptr.vmem [resolvable:$true] %s183_s16  ;;  %s4721_s22 = int_to_ptr.hbm [resolvable:$true] %s4720_s22 }
  0x81   :  { %s4722_s23 = scalar_lea.hbm %s4721_s22, 1  ;;  %s4724_s26 = scalar_lea.hbm %s5815_s14, 1 }
  0x82   :  { %p4723_p0 = scmp.ne.s32.totalorder %s4721_s22, %s4722_s23  ;;  %p4725_p1 = scmp.lt.s32.totalorder %s4721_s22, %s5815_s14 }
  0x83   :  { %p4726_p2 = scmp.lt.s32.totalorder %s4724_s26, %s4722_s23 }
  0x85   :  { %p4727_p3 = por %p4726_p2, %p4725_p1 }
  0x87   :  { %p4728_p4 = pnand %p4727_p3, %p4723_p0 }
  0x89   :  { %4731 = shalt.err (!%p4728_p4)
}
  0x8a   :  { %186 = dma.hbm_to_vmem [thread:$0]  %s182_s0, 16, %s184_s16, [#allocation9]  }
  0x8b   :  { %s5709_s28 = smov [#allocation11]   ;;  %s231_s2 = sshll.u32 %s5845_s20, 4  ;;  %s232_s2 = int_to_ptr.hbm [resolvable:$true] %s231_s2 }
  0x8c   :  { %s211_s1 = sshll.u32 %s5709_s28, 4  ;;  %s4744_s7 = sshra.s32 %s210_s18, 4  ;;  %s212_s1 = int_to_ptr.vmem [resolvable:$true] %s211_s1  ;;  %s4745_s7 = int_to_ptr.hbm [resolvable:$true] %s4744_s7 }
  0x8d   :  { %s4746_s10 = scalar_lea.hbm %s4745_s7, 1  ;;  %s4748_s11 = scalar_lea.hbm %s5835_s6, 1 }
  0x8e   :  { %p4747_p5 = scmp.ne.s32.totalorder %s4745_s7, %s4746_s10  ;;  %p4749_p6 = scmp.lt.s32.totalorder %s4745_s7, %s5835_s6 }
  0x8f   :  { %p4750_p7 = scmp.lt.s32.totalorder %s4748_s11, %s4746_s10 }
  0x91   :  { %p4751_p8 = por %p4750_p7, %p4749_p6 }
  0x93   :  { %p4752_p9 = pnand %p4751_p8, %p4747_p5 }
  0x95   :  { %4755 = shalt.err (!%p4752_p9)
}
  0x96   :  { %214 = dma.hbm_to_vmem [thread:$0]  %s210_s18, 16, %s212_s1, [#allocation12]  }
  0x97   :  { %s253_s14 = sshll.u32 %s5855_s4, 4  ;;  %s5710_s0 = smov [#allocation14]   ;;  %s254_s14 = int_to_ptr.hbm [resolvable:$true] %s253_s14 }
  0x98   :  { %s233_s15 = sshll.u32 %s5710_s0, 4  ;;  %s4768_s16 = sshra.s32 %s232_s2, 4  ;;  %s234_s15 = int_to_ptr.vmem [resolvable:$true] %s233_s15  ;;  %s4769_s16 = int_to_ptr.hbm [resolvable:$true] %s4768_s16 }
  0x99   :  { %s4770_s22 = scalar_lea.hbm %s4769_s16, 1  ;;  %s4772_s23 = scalar_lea.hbm %s5845_s20, 1 }
  0x9a   :  { %p4771_p10 = scmp.ne.s32.totalorder %s4769_s16, %s4770_s22  ;;  %p4773_p11 = scmp.lt.s32.totalorder %s4769_s16, %s5845_s20 }
  0x9b   :  { %p4774_p12 = scmp.lt.s32.totalorder %s4772_s23, %s4770_s22 }
  0x9d   :  { %p4775_p13 = por %p4774_p12, %p4773_p11 }
  0x9f   :  { %p4776_p0 = pnand %p4775_p13, %p4771_p10 }
  0xa1   :  { %4779 = shalt.err (!%p4776_p0)
}
  0xa2   :  { %236 = dma.hbm_to_vmem [thread:$0]  %s232_s2, 16, %s234_s15, [#allocation15]  }
  0xa3   :  { %s5711_s6 = smov [#allocation17]   ;;  %s4792_s26 = sshra.s32 %s254_s14, 4  ;;  %s4793_s26 = int_to_ptr.hbm [resolvable:$true] %s4792_s26 }
  0xa4   :  { %s255_s18 = sshll.u32 %s5711_s6, 4  ;;  %s4794_s28 = scalar_lea.hbm %s4793_s26, 1  ;;  %s256_s18 = int_to_ptr.vmem [resolvable:$true] %s255_s18 }
  0xa5   :  { %p4795_p1 = scmp.ne.s32.totalorder %s4793_s26, %s4794_s28  ;;  %s4796_s1 = scalar_lea.hbm %s5855_s4, 1 }
  0xa6   :  { %p4797_p2 = scmp.lt.s32.totalorder %s4793_s26, %s5855_s4  ;;  %p4798_p3 = scmp.lt.s32.totalorder %s4796_s1, %s4794_s28 }
  0xa8   :  { %p4799_p4 = por %p4798_p3, %p4797_p2 }
  0xaa   :  { %p4800_p5 = pnand %p4799_p4, %p4795_p1 }
  0xac   :  { %4803 = shalt.err (!%p4800_p5)
}
  0xad   :  { %258 = dma.hbm_to_vmem [thread:$0]  %s254_s14, 16, %s256_s18, [#allocation18]  }
  0xae   :  { %s276_s20 = sshll.u32 %s5865_s13, 4  ;;  %s5712_s2 = smov [#allocation20]   ;;  %s277_s20 = int_to_ptr.hbm [resolvable:$true] %s276_s20 }
  0xaf   :  { %s278_s7 = sshll.u32 %s5712_s2, 4  ;;  %s303_s10 = sshll.u32 %s5875_s3, 4  ;;  %s279_s7 = int_to_ptr.vmem [resolvable:$true] %s278_s7  ;;  %s304_s10 = int_to_ptr.hbm [resolvable:$true] %s303_s10 }
  0xb0   :  { %s4816_s11 = sshra.s32 %s277_s20, 4  ;;  %s4820_s4 = scalar_lea.hbm %s5865_s13, 32  ;;  %s4817_s11 = int_to_ptr.hbm [resolvable:$true] %s4816_s11 }
  0xb1   :  { %s4818_s0 = scalar_lea.hbm %s4817_s11, 32  ;;  %p4821_p7 = scmp.lt.s32.totalorder %s4817_s11, %s5865_s13 }
  0xb2   :  { %p4819_p6 = scmp.ne.s32.totalorder %s4817_s11, %s4818_s0  ;;  %p4822_p8 = scmp.lt.s32.totalorder %s4820_s4, %s4818_s0 }
  0xb4   :  { %p4823_p9 = por %p4822_p8, %p4821_p7 }
  0xb6   :  { %p4824_p10 = pnand %p4823_p9, %p4819_p6 }
  0xb8   :  { %4827 = shalt.err (!%p4824_p10)
}
  0xb9   :  { %s5713_s14 = smov 128   ;;  %s5714_s15 = smov 8  }
  0xba   :  { %284 = dma.hbm_to_vmem [thread:$0]  %s277_s20, 512, %s279_s7, [#allocation21], %s5713_s14, %s5713_s14, %s5714_s15  }
  0xbb   :  { %s5715_s16 = smov [#allocation23]   ;;  %s325_s23 = sshll.u32 %s5885_s25, 4  ;;  %s326_s23 = int_to_ptr.hbm [resolvable:$true] %s325_s23 }
  0xbc   :  { %s305_s22 = sshll.u32 %s5715_s16, 4  ;;  %s4840_s13 = sshra.s32 %s304_s10, 4  ;;  %s306_s22 = int_to_ptr.vmem [resolvable:$true] %s305_s22  ;;  %s4841_s13 = int_to_ptr.hbm [resolvable:$true] %s4840_s13 }
  0xbd   :  { %s4842_s6 = scalar_lea.hbm %s4841_s13, 1  ;;  %s4844_s18 = scalar_lea.hbm %s5875_s3, 1 }
  0xbe   :  { %p4843_p11 = scmp.ne.s32.totalorder %s4841_s13, %s4842_s6  ;;  %p4845_p12 = scmp.lt.s32.totalorder %s4841_s13, %s5875_s3 }
  0xbf   :  { %p4846_p13 = scmp.lt.s32.totalorder %s4844_s18, %s4842_s6 }
  0xc1   :  { %p4847_p0 = por %p4846_p13, %p4845_p12 }
  0xc3   :  { %p4848_p1 = pnand %p4847_p0, %p4843_p11 }
  0xc5   :  { %4851 = shalt.err (!%p4848_p1)
}
  0xc6   :  { %308 = dma.hbm_to_vmem [thread:$0]  %s304_s10, 16, %s306_s22, [#allocation24]  }
  0xc7   :  { %s349_s26 = sshll.u32 %s5895_s19, 4  ;;  %s5716_s28 = smov [#allocation26]   ;;  %s350_s26 = int_to_ptr.hbm [resolvable:$true] %s349_s26 }
  0xc8   :  { %s327_s1 = sshll.u32 %s5716_s28, 4  ;;  %s4864_s20 = sshra.s32 %s326_s23, 4  ;;  %s328_s1 = int_to_ptr.vmem [resolvable:$true] %s327_s1  ;;  %s4865_s20 = int_to_ptr.hbm [resolvable:$true] %s4864_s20 }
  0xc9   :  { %s4866_s2 = scalar_lea.hbm %s4865_s20, 1  ;;  %s4868_s7 = scalar_lea.hbm %s5885_s25, 1 }
  0xca   :  { %p4867_p2 = scmp.ne.s32.totalorder %s4865_s20, %s4866_s2  ;;  %p4869_p3 = scmp.lt.s32.totalorder %s4865_s20, %s5885_s25 }
  0xcb   :  { %p4870_p4 = scmp.lt.s32.totalorder %s4868_s7, %s4866_s2 }
  0xcd   :  { %p4871_p5 = por %p4870_p4, %p4869_p3 }
  0xcf   :  { %p4872_p6 = pnand %p4871_p5, %p4867_p2 }
  0xd1   :  { %4875 = shalt.err (!%p4872_p6)
}
  0xd2   :  { %330 = dma.hbm_to_vmem [thread:$0]  %s326_s23, 16, %s328_s1, [#allocation27]  }
  0xd3   :  { %s5717_s3 = smov [#allocation29]   ;;  %s372_s11 = sshll.u32 %s5905_s5, 4  ;;  %s6108_s11 = int_to_ptr.hbm [resolvable:$true] %s372_s11 }
  0xd4   :  { %s351_s10 = sshll.u32 %s5717_s3, 4  ;;  %s4888_s0 = sshra.s32 %s350_s26, 4  ;;  %s352_s10 = int_to_ptr.vmem [resolvable:$true] %s351_s10  ;;  %s4889_s0 = int_to_ptr.hbm [resolvable:$true] %s4888_s0 }
  0xd5   :  { %s4890_s4 = scalar_lea.hbm %s4889_s0, 1  ;;  %s4892_s16 = scalar_lea.hbm %s5895_s19, 1 }
  0xd6   :  { %p4891_p7 = scmp.ne.s32.totalorder %s4889_s0, %s4890_s4  ;;  %p4893_p8 = scmp.lt.s32.totalorder %s4889_s0, %s5895_s19 }
  0xd7   :  { %p4894_p9 = scmp.lt.s32.totalorder %s4892_s16, %s4890_s4 }
  0xd9   :  { %p4895_p10 = por %p4894_p9, %p4893_p8 }
  0xdb   :  { %p4896_p11 = pnand %p4895_p10, %p4891_p7 }
  0xdd   :  { %4899 = shalt.err (!%p4896_p11)
}
  0xde   :  { %354 = dma.hbm_to_vmem [thread:$0]  %s350_s26, 16, %s352_s10, [#allocation30]  }
  0xdf   :  { %s399_s25 = sshll.u32 %s5920_s21, 4  ;;  %s5718_s22 = smov [#allocation32]   ;;  %s400_s25 = int_to_ptr.hbm [resolvable:$true] %s399_s25 }
  0xe0   :  { %s374_s23 = sshll.u32 %s5718_s22, 4  ;;  %s4912_s13 = sshra.s32 %s6108_s11, 4  ;;  %s375_s23 = int_to_ptr.vmem [resolvable:$true] %s374_s23  ;;  %s4913_s13 = int_to_ptr.hbm [resolvable:$true] %s4912_s13 }
  0xe1   :  { %s4914_s6 = scalar_lea.hbm %s4913_s13, 32  ;;  %s4916_s18 = scalar_lea.hbm %s5905_s5, 32 }
  0xe2   :  { %p4915_p12 = scmp.ne.s32.totalorder %s4913_s13, %s4914_s6  ;;  %p4917_p13 = scmp.lt.s32.totalorder %s4913_s13, %s5905_s5 }
  0xe3   :  { %p4918_p0 = scmp.lt.s32.totalorder %s4916_s18, %s4914_s6 }
  0xe5   :  { %p4919_p1 = por %p4918_p0, %p4917_p13 }
  0xe7   :  { %p4920_p2 = pnand %p4919_p1, %p4915_p12 }
  0xe9   :  { %4923 = shalt.err (!%p4920_p2)
}
  0xea   :  { %380 = dma.hbm_to_vmem [thread:$0]  %s6108_s11, 512, %s375_s23, [#allocation33], %s5713_s14, %s5713_s14, %s5714_s15  }
  0xeb   :  { %s5719_s19 = smov [#allocation35]   ;;  %s421_s28 = sshll.u32 %s5930_s24, 4  ;;  %s422_s28 = int_to_ptr.hbm [resolvable:$true] %s421_s28 }
  0xec   :  { %s401_s26 = sshll.u32 %s5719_s19, 4  ;;  %s4936_s1 = sshra.s32 %s400_s25, 4  ;;  %s402_s26 = int_to_ptr.vmem [resolvable:$true] %s401_s26  ;;  %s4937_s1 = int_to_ptr.hbm [resolvable:$true] %s4936_s1 }
  0xed   :  { %s4938_s5 = scalar_lea.hbm %s4937_s1, 1  ;;  %s4940_s20 = scalar_lea.hbm %s5920_s21, 1 }
  0xee   :  { %p4939_p3 = scmp.ne.s32.totalorder %s4937_s1, %s4938_s5  ;;  %p4941_p4 = scmp.lt.s32.totalorder %s4937_s1, %s5920_s21 }
  0xef   :  { %p4942_p5 = scmp.lt.s32.totalorder %s4940_s20, %s4938_s5 }
  0xf1   :  { %p4943_p6 = por %p4942_p5, %p4941_p4 }
  0xf3   :  { %p4944_p7 = pnand %p4943_p6, %p4939_p3 }
  0xf5   :  { %4947 = shalt.err (!%p4944_p7)
}
  0xf6   :  { %404 = dma.hbm_to_vmem [thread:$0]  %s400_s25, 16, %s402_s26, [#allocation36]  }
  0xf7   :  { %s445_s2 = sshll.u32 %s5940_s9, 4  ;;  %s5720_s7 = smov [#allocation38]   ;;  %s446_s2 = int_to_ptr.hbm [resolvable:$true] %s445_s2 }
  0xf8   :  { %s423_s3 = sshll.u32 %s5720_s7, 4  ;;  %s4960_s10 = sshra.s32 %s422_s28, 4  ;;  %s424_s3 = int_to_ptr.vmem [resolvable:$true] %s423_s3  ;;  %s4961_s10 = int_to_ptr.hbm [resolvable:$true] %s4960_s10 }
  0xf9   :  { %s4962_s11 = scalar_lea.hbm %s4961_s10, 1  ;;  %s4964_s0 = scalar_lea.hbm %s5930_s24, 1 }
  0xfa   :  { %p4963_p8 = scmp.ne.s32.totalorder %s4961_s10, %s4962_s11  ;;  %p4965_p9 = scmp.lt.s32.totalorder %s4961_s10, %s5930_s24 }
  0xfb   :  { %p4966_p10 = scmp.lt.s32.totalorder %s4964_s0, %s4962_s11 }
  0xfd   :  { %p4967_p11 = por %p4966_p10, %p4965_p9 }
  0xff   :  { %p4968_p12 = pnand %p4967_p11, %p4963_p8 }
 0x101   :  { %4971 = shalt.err (!%p4968_p12)
}
 0x102   :  { %426 = dma.hbm_to_vmem [thread:$0]  %s422_s28, 16, %s424_s3, [#allocation39]  }
 0x103   :  { %s5721_s21 = smov [#allocation41]   ;;  %s467_s16 = sshll.u32 %s5950_s27, 4  ;;  %s468_s16 = int_to_ptr.hbm [resolvable:$true] %s467_s16 }
 0x104   :  { %s447_s4 = sshll.u32 %s5721_s21, 4  ;;  %s4984_s25 = sshra.s32 %s446_s2, 4  ;;  %s448_s4 = int_to_ptr.vmem [resolvable:$true] %s447_s4  ;;  %s4985_s25 = int_to_ptr.hbm [resolvable:$true] %s4984_s25 }
 0x105   :  { %s4986_s22 = scalar_lea.hbm %s4985_s25, 1  ;;  %s4988_s23 = scalar_lea.hbm %s5940_s9, 1 }
 0x106   :  { %p4987_p13 = scmp.ne.s32.totalorder %s4985_s25, %s4986_s22  ;;  %p4989_p0 = scmp.lt.s32.totalorder %s4985_s25, %s5940_s9 }
 0x107   :  { %p4990_p1 = scmp.lt.s32.totalorder %s4988_s23, %s4986_s22 }
 0x109   :  { %p4991_p2 = por %p4990_p1, %p4989_p0 }
 0x10b   :  { %p4992_p3 = pnand %p4991_p2, %p4987_p13 }
 0x10d   :  { %4995 = shalt.err (!%p4992_p3)
}
 0x10e   :  { %450 = dma.hbm_to_vmem [thread:$0]  %s446_s2, 16, %s448_s4, [#allocation42]  }
 0x10f   :  { %s491_s24 = sshll.u32 %s5960_s12, 4  ;;  %s5722_s13 = smov [#allocation44]   ;;  %s492_s24 = int_to_ptr.hbm [resolvable:$true] %s491_s24 }
 0x110   :  { %s469_s6 = sshll.u32 %s5722_s13, 4  ;;  %s5008_s18 = sshra.s32 %s468_s16, 4  ;;  %s470_s6 = int_to_ptr.vmem [resolvable:$true] %s469_s6  ;;  %s5009_s18 = int_to_ptr.hbm [resolvable:$true] %s5008_s18 }
 0x111   :  { %s5010_s19 = scalar_lea.hbm %s5009_s18, 1  ;;  %s5012_s26 = scalar_lea.hbm %s5950_s27, 1 }
 0x112   :  { %p5011_p4 = scmp.ne.s32.totalorder %s5009_s18, %s5010_s19  ;;  %p5013_p5 = scmp.lt.s32.totalorder %s5009_s18, %s5950_s27 }
 0x113   :  { %p5014_p6 = scmp.lt.s32.totalorder %s5012_s26, %s5010_s19 }
 0x115   :  { %p5015_p7 = por %p5014_p6, %p5013_p5 }
 0x117   :  { %p5016_p8 = pnand %p5015_p7, %p5011_p4 }
 0x119   :  { %5019 = shalt.err (!%p5016_p8)
}
 0x11a   :  { %472 = dma.hbm_to_vmem [thread:$0]  %s468_s16, 16, %s470_s6, [#allocation45]  }
 0x11b   :  { %s7113_s9 = sld [smem:[#allocation110_spill]]  ;;  %s5723_s28 = smov [#allocation47]  }
 0x11c   :  { %s493_s1 = sshll.u32 %s5723_s28, 4  ;;  %s5032_s20 = sshra.s32 %s492_s24, 4  ;;  %s494_s1 = int_to_ptr.vmem [resolvable:$true] %s493_s1  ;;  %s5033_s20 = int_to_ptr.hbm [resolvable:$true] %s5032_s20 }
 0x11d   :  { %s5034_s2 = scalar_lea.hbm %s5033_s20, 1  ;;  %s5036_s7 = scalar_lea.hbm %s5960_s12, 1 }
 0x11e   :  { %p5035_p9 = scmp.ne.s32.totalorder %s5033_s20, %s5034_s2  ;;  %p5037_p10 = scmp.lt.s32.totalorder %s5033_s20, %s5960_s12 }
 0x11f   :  { %p5038_p11 = scmp.lt.s32.totalorder %s5036_s7, %s5034_s2 }
 0x121   :  { %s519_s5 = sshll.u32 %s7113_s9, 4  ;;  %p5039_p12 = por %p5038_p11, %p5037_p10  ;;  %s520_s5 = int_to_ptr.hbm [resolvable:$true] %s519_s5 }
 0x123   :  { %p5040_p13 = pnand %p5039_p12, %p5035_p9 }
 0x125   :  { %5043 = shalt.err (!%p5040_p13)
}
 0x126   :  { %496 = dma.hbm_to_vmem [thread:$0]  %s492_s24, 16, %s494_s1, [#allocation48]  }
 0x127   :  { %s7114_s27 = sld [smem:[#allocation113_spill]]  ;;  %s5724_s10 = smov [#allocation50]  }
 0x128   :  { %s521_s11 = sshll.u32 %s5724_s10, 4  ;;  %s5056_s0 = sshra.s32 %s520_s5, 4  ;;  %s522_s11 = int_to_ptr.vmem [resolvable:$true] %s521_s11  ;;  %s5057_s0 = int_to_ptr.hbm [resolvable:$true] %s5056_s0 }
 0x129   :  { %s5058_s21 = scalar_lea.hbm %s5057_s0, 1  ;;  %s5060_s4 = scalar_lea.hbm %s7113_s9, 1 }
 0x12a   :  { %p5059_p0 = scmp.ne.s32.totalorder %s5057_s0, %s5058_s21  ;;  %p5061_p1 = scmp.lt.s32.totalorder %s5057_s0, %s7113_s9 }
 0x12b   :  { %p5062_p2 = scmp.lt.s32.totalorder %s5060_s4, %s5058_s21 }
 0x12d   :  { %s543_s3 = sshll.u32 %s7114_s27, 4  ;;  %p5063_p3 = por %p5062_p2, %p5061_p1  ;;  %s544_s3 = int_to_ptr.hbm [resolvable:$true] %s543_s3 }
 0x12f   :  { %p5064_p4 = pnand %p5063_p3, %p5059_p0 }
 0x131   :  { %5067 = shalt.err (!%p5064_p4)
}
 0x132   :  { %524 = dma.hbm_to_vmem [thread:$0]  %s520_s5, 16, %s522_s11, [#allocation51]  }
 0x133   :  { %s7115_s12 = sld [smem:[#allocation116_spill]]  ;;  %s5725_s16 = smov [#allocation53]  }
 0x134   :  { %s545_s25 = sshll.u32 %s5725_s16, 4  ;;  %s5080_s23 = sshra.s32 %s544_s3, 4  ;;  %s546_s25 = int_to_ptr.vmem [resolvable:$true] %s545_s25  ;;  %s5081_s23 = int_to_ptr.hbm [resolvable:$true] %s5080_s23 }
 0x135   :  { %s5082_s24 = scalar_lea.hbm %s5081_s23, 1  ;;  %s5084_s13 = scalar_lea.hbm %s7114_s27, 1 }
 0x136   :  { %p5083_p5 = scmp.ne.s32.totalorder %s5081_s23, %s5082_s24  ;;  %p5085_p6 = scmp.lt.s32.totalorder %s5081_s23, %s7114_s27 }
 0x137   :  { %p5086_p7 = scmp.lt.s32.totalorder %s5084_s13, %s5082_s24 }
 0x139   :  { %s566_s22 = sshll.u32 %s7115_s12, 4  ;;  %p5087_p8 = por %p5086_p7, %p5085_p6  ;;  %s6139_s22 = int_to_ptr.hbm [resolvable:$true] %s566_s22 }
 0x13b   :  { %p5088_p9 = pnand %p5087_p8, %p5083_p5 }
 0x13d   :  { %5091 = shalt.err (!%p5088_p9)
}
 0x13e   :  { %548 = dma.hbm_to_vmem [thread:$0]  %s544_s3, 16, %s546_s25, [#allocation54]  }
 0x13f   :  { %s7116_s6 = sld [smem:[#allocation118_spill]]  ;;  %s5726_s19 = smov [#allocation56]  }
 0x140   :  { %s568_s26 = sshll.u32 %s5726_s19, 4  ;;  %s5104_s9 = sshra.s32 %s6139_s22, 4  ;;  %s569_s26 = int_to_ptr.vmem [resolvable:$true] %s568_s26  ;;  %s5105_s9 = int_to_ptr.hbm [resolvable:$true] %s5104_s9 }
 0x141   :  { %s5106_s28 = scalar_lea.hbm %s5105_s9, 128  ;;  %s5108_s1 = scalar_lea.hbm %s7115_s12, 128 }
 0x142   :  { %p5107_p10 = scmp.ne.s32.totalorder %s5105_s9, %s5106_s28  ;;  %p5109_p11 = scmp.lt.s32.totalorder %s5105_s9, %s7115_s12 }
 0x143   :  { %p5110_p12 = scmp.lt.s32.totalorder %s5108_s1, %s5106_s28 }
 0x145   :  { %s592_s18 = sshll.u32 %s7116_s6, 4  ;;  %p5111_p13 = por %p5110_p12, %p5109_p11  ;;  %s6144_s18 = int_to_ptr.hbm [resolvable:$true] %s592_s18 }
 0x147   :  { %p5112_p0 = pnand %p5111_p13, %p5107_p10 }
 0x149   :  { %5115 = shalt.err (!%p5112_p0)
}
 0x14a   :  { %s7117_s5 = sld [smem:[#allocation89_spill]]  ;;  %s5727_s20 = smov [#allocation59]  }
 0x14b   :  { %574 = dma.hbm_to_vmem [thread:$0]  %s6139_s22, 2048, %s569_s26, [#allocation57], %s5713_s14, %s5713_s14, %s5714_s15  }
 0x14c   :  { %s594_s2 = sshll.u32 %s5727_s20, 4  ;;  %s5128_s27 = sshra.s32 %s6144_s18, 4  ;;  %s595_s2 = int_to_ptr.vmem [resolvable:$true] %s594_s2  ;;  %s5129_s27 = int_to_ptr.hbm [resolvable:$true] %s5128_s27 }
 0x14d   :  { %s5130_s3 = scalar_lea.hbm %s5129_s27, 32  ;;  %s5132_s10 = scalar_lea.hbm %s7116_s6, 32 }
 0x14e   :  { %p5131_p1 = scmp.ne.s32.totalorder %s5129_s27, %s5130_s3  ;;  %p5133_p2 = scmp.lt.s32.totalorder %s5129_s27, %s7116_s6 }
 0x14f   :  { %p5134_p3 = scmp.lt.s32.totalorder %s5132_s10, %s5130_s3 }
 0x150   :  { %s170_s7 = sshll.u32 %s7117_s5, 4  ;;  %s171_s7 = int_to_ptr.hbm [resolvable:$true] %s170_s7 }
 0x151   :  { %p5135_p4 = por %p5134_p3, %p5133_p2 }
 0x153   :  { %p5136_p5 = pnand %p5135_p4, %p5131_p1 }
 0x155   :  { %5139 = shalt.err (!%p5136_p5)
}
 0x156   :  { %s7118_s11 = sld [smem:[#allocation92_spill]]  ;;  %s5728_s21 = smov [#allocation6]  }
 0x157   :  { %600 = dma.hbm_to_vmem [thread:$0]  %s6144_s18, 512, %s595_s2, [#allocation60], %s5713_s14, %s5713_s14, %s5714_s15  }
 0x158   :  { %s172_s4 = sshll.u32 %s5728_s21, 4  ;;  %s5152_s12 = sshra.s32 %s171_s7, 4  ;;  %s173_s4 = int_to_ptr.vmem [resolvable:$true] %s172_s4  ;;  %s5153_s12 = int_to_ptr.hbm [resolvable:$true] %s5152_s12 }
 0x159   :  { %s5154_s16 = scalar_lea.hbm %s5153_s12, 1  ;;  %s5156_s25 = scalar_lea.hbm %s7117_s5, 1 }
 0x15a   :  { %p5155_p6 = scmp.ne.s32.totalorder %s5153_s12, %s5154_s16  ;;  %p5157_p7 = scmp.lt.s32.totalorder %s5153_s12, %s7117_s5 }
 0x15b   :  { %p5158_p8 = scmp.lt.s32.totalorder %s5156_s25, %s5154_s16 }
 0x15c   :  { %s195_s0 = sshll.u32 %s7118_s11, 4  ;;  %s6162_s0 = int_to_ptr.hbm [resolvable:$true] %s195_s0 }
 0x15d   :  { %p5159_p9 = por %p5158_p8, %p5157_p7 }
 0x15f   :  { %p5160_p10 = pnand %p5159_p9, %p5155_p6 }
 0x161   :  { %5163 = shalt.err (!%p5160_p10)
}
 0x162   :  { %175 = dma.hbm_to_vmem [thread:$0]  %s171_s7, 16, %s173_s4, [#allocation7]  }
 0x163   :  { %s7119_s22 = sld [smem:[#allocation93_spill]]  ;;  %s5729_s23 = smov [#allocation10]  }
 0x164   :  { %s197_s24 = sshll.u32 %s5729_s23, 4  ;;  %s5176_s6 = sshra.s32 %s6162_s0, 4  ;;  %s198_s24 = int_to_ptr.vmem [resolvable:$true] %s197_s24  ;;  %s5177_s6 = int_to_ptr.hbm [resolvable:$true] %s5176_s6 }
 0x165   :  { %s5178_s18 = scalar_lea.hbm %s5177_s6, 32  ;;  %s5180_s19 = scalar_lea.hbm %s7118_s11, 32 }
 0x166   :  { %p5179_p11 = scmp.ne.s32.totalorder %s5177_s6, %s5178_s18  ;;  %p5181_p12 = scmp.lt.s32.totalorder %s5177_s6, %s7118_s11 }
 0x167   :  { %p5182_p13 = scmp.lt.s32.totalorder %s5180_s19, %s5178_s18 }
 0x169   :  { %s220_s13 = sshll.u32 %s7119_s22, 4  ;;  %p5183_p0 = por %p5182_p13, %p5181_p12  ;;  %s221_s13 = int_to_ptr.hbm [resolvable:$true] %s220_s13 }
 0x16b   :  { %p5184_p1 = pnand %p5183_p0, %p5179_p11 }
 0x16d   :  { %5187 = shalt.err (!%p5184_p1)
}
 0x16e   :  { %s7120_s26 = sld [smem:[#allocation94_spill]]  ;;  %s5730_s28 = smov [#allocation13]  }
 0x16f   :  { %203 = dma.hbm_to_vmem [thread:$0]  %s6162_s0, 512, %s198_s24, [#allocation9], %s5713_s14, %s5713_s14, %s5714_s15  }
 0x170   :  { %s222_s1 = sshll.u32 %s5730_s28, 4  ;;  %s5200_s5 = sshra.s32 %s221_s13, 4  ;;  %s223_s1 = int_to_ptr.vmem [resolvable:$true] %s222_s1  ;;  %s5201_s5 = int_to_ptr.hbm [resolvable:$true] %s5200_s5 }
 0x171   :  { %s5202_s20 = scalar_lea.hbm %s5201_s5, 1  ;;  %s5204_s2 = scalar_lea.hbm %s7119_s22, 1 }
 0x172   :  { %p5203_p2 = scmp.ne.s32.totalorder %s5201_s5, %s5202_s20  ;;  %p5205_p3 = scmp.lt.s32.totalorder %s5201_s5, %s7119_s22 }
 0x173   :  { %p5206_p4 = scmp.lt.s32.totalorder %s5204_s2, %s5202_s20 }
 0x174   :  { %s242_s9 = sshll.u32 %s7120_s26, 4  ;;  %s243_s9 = int_to_ptr.hbm [resolvable:$true] %s242_s9 }
 0x175   :  { %p5207_p5 = por %p5206_p4, %p5205_p3 }
 0x177   :  { %p5208_p6 = pnand %p5207_p5, %p5203_p2 }
 0x179   :  { %5211 = shalt.err (!%p5208_p6)
}
 0x17a   :  { %225 = dma.hbm_to_vmem [thread:$0]  %s221_s13, 16, %s223_s1, [#allocation12]  }
 0x17b   :  { %s7121_s7 = sld [smem:[#allocation95_spill]]  ;;  %s5731_s27 = smov [#allocation16]  }
 0x17c   :  { %s244_s3 = sshll.u32 %s5731_s27, 4  ;;  %s5224_s11 = sshra.s32 %s243_s9, 4  ;;  %s245_s3 = int_to_ptr.vmem [resolvable:$true] %s244_s3  ;;  %s5225_s11 = int_to_ptr.hbm [resolvable:$true] %s5224_s11 }
 0x17d   :  { %s5226_s0 = scalar_lea.hbm %s5225_s11, 1  ;;  %s5228_s21 = scalar_lea.hbm %s7120_s26, 1 }
 0x17e   :  { %p5227_p7 = scmp.ne.s32.totalorder %s5225_s11, %s5226_s0  ;;  %p5229_p8 = scmp.lt.s32.totalorder %s5225_s11, %s7120_s26 }
 0x17f   :  { %p5230_p9 = scmp.lt.s32.totalorder %s5228_s21, %s5226_s0 }
 0x181   :  { %s263_s10 = sshll.u32 %s7121_s7, 4  ;;  %p5231_p10 = por %p5230_p9, %p5229_p8  ;;  %s6178_s10 = int_to_ptr.hbm [resolvable:$true] %s263_s10 }
 0x183   :  { %p5232_p11 = pnand %p5231_p10, %p5227_p7 }
 0x185   :  { %5235 = shalt.err (!%p5232_p11)
}
 0x186   :  { %247 = dma.hbm_to_vmem [thread:$0]  %s243_s9, 16, %s245_s3, [#allocation15]  }
 0x187   :  { %s7122_s4 = sld [smem:[#allocation96_spill]]  ;;  %s5732_s16 = smov [#allocation19]  }
 0x188   :  { %s265_s25 = sshll.u32 %s5732_s16, 4  ;;  %s5248_s22 = sshra.s32 %s6178_s10, 4  ;;  %s266_s25 = int_to_ptr.vmem [resolvable:$true] %s265_s25  ;;  %s5249_s22 = int_to_ptr.hbm [resolvable:$true] %s5248_s22 }
 0x189   :  { %s5250_s23 = scalar_lea.hbm %s5249_s22, 32  ;;  %s5252_s24 = scalar_lea.hbm %s7121_s7, 32 }
 0x18a   :  { %p5251_p12 = scmp.ne.s32.totalorder %s5249_s22, %s5250_s23  ;;  %p5253_p13 = scmp.lt.s32.totalorder %s5249_s22, %s7121_s7 }
 0x18b   :  { %p5254_p0 = scmp.lt.s32.totalorder %s5252_s24, %s5250_s23 }
 0x18d   :  { %s289_s12 = sshll.u32 %s7122_s4, 4  ;;  %p5255_p1 = por %p5254_p0, %p5253_p13  ;;  %s6183_s12 = int_to_ptr.hbm [resolvable:$true] %s289_s12 }
 0x18f   :  { %p5256_p2 = pnand %p5255_p1, %p5251_p12 }
 0x191   :  { %5259 = shalt.err (!%p5256_p2)
}
 0x192   :  { %s7123_s13 = sld [smem:[#allocation97_spill]]  ;;  %s5733_s6 = smov [#allocation22]  }
 0x193   :  { %271 = dma.hbm_to_vmem [thread:$0]  %s6178_s10, 512, %s266_s25, [#allocation18], %s5713_s14, %s5713_s14, %s5714_s15  }
 0x194   :  { %s291_s18 = sshll.u32 %s5733_s6, 4  ;;  %s5272_s26 = sshra.s32 %s6183_s12, 4  ;;  %s292_s18 = int_to_ptr.vmem [resolvable:$true] %s291_s18  ;;  %s5273_s26 = int_to_ptr.hbm [resolvable:$true] %s5272_s26 }
 0x195   :  { %s5274_s9 = scalar_lea.hbm %s5273_s26, 32  ;;  %s5276_s28 = scalar_lea.hbm %s7122_s4, 32 }
 0x196   :  { %p5275_p3 = scmp.ne.s32.totalorder %s5273_s26, %s5274_s9  ;;  %p5277_p4 = scmp.lt.s32.totalorder %s5273_s26, %s7122_s4 }
 0x197   :  { %p5278_p5 = scmp.lt.s32.totalorder %s5276_s28, %s5274_s9 }
 0x198   :  { %s314_s19 = sshll.u32 %s7123_s13, 4  ;;  %s315_s19 = int_to_ptr.hbm [resolvable:$true] %s314_s19 }
 0x199   :  { %p5279_p6 = por %p5278_p5, %p5277_p4 }
 0x19b   :  { %p5280_p7 = pnand %p5279_p6, %p5275_p3 }
 0x19d   :  { %5283 = shalt.err (!%p5280_p7)
}
 0x19e   :  { %s7124_s1 = sld [smem:[#allocation98_spill]]  ;;  %s5734_s20 = smov [#allocation25]  }
 0x19f   :  { %297 = dma.hbm_to_vmem [thread:$0]  %s6183_s12, 512, %s292_s18, [#allocation21], %s5713_s14, %s5713_s14, %s5714_s15  }
 0x1a0   :  { %s316_s2 = sshll.u32 %s5734_s20, 4  ;;  %s5296_s7 = sshra.s32 %s315_s19, 4  ;;  %s317_s2 = int_to_ptr.vmem [resolvable:$true] %s316_s2  ;;  %s5297_s7 = int_to_ptr.hbm [resolvable:$true] %s5296_s7 }
 0x1a1   :  { %s5298_s27 = scalar_lea.hbm %s5297_s7, 1  ;;  %s5300_s3 = scalar_lea.hbm %s7123_s13, 1 }
 0x1a2   :  { %p5299_p8 = scmp.ne.s32.totalorder %s5297_s7, %s5298_s27  ;;  %p5301_p9 = scmp.lt.s32.totalorder %s5297_s7, %s7123_s13 }
 0x1a3   :  { %p5302_p10 = scmp.lt.s32.totalorder %s5300_s3, %s5298_s27 }
 0x1a4   :  { %s335_s5 = sshll.u32 %s7124_s1, 4  ;;  %s6201_s5 = int_to_ptr.hbm [resolvable:$true] %s335_s5 }
 0x1a5   :  { %p5303_p11 = por %p5302_p10, %p5301_p9 }
 0x1a7   :  { %p5304_p12 = pnand %p5303_p11, %p5299_p8 }
 0x1a9   :  { %5307 = shalt.err (!%p5304_p12)
}
 0x1aa   :  { %319 = dma.hbm_to_vmem [thread:$0]  %s315_s19, 16, %s317_s2, [#allocation24]  }
 0x1ab   :  { %s7125_s10 = sld [smem:[#allocation99_spill]]  ;;  %s5735_s11 = smov [#allocation28]  }
 0x1ac   :  { %s337_s0 = sshll.u32 %s5735_s11, 4  ;;  %s5320_s4 = sshra.s32 %s6201_s5, 4  ;;  %s338_s0 = int_to_ptr.vmem [resolvable:$true] %s337_s0  ;;  %s5321_s4 = int_to_ptr.hbm [resolvable:$true] %s5320_s4 }
 0x1ad   :  { %s5322_s12 = scalar_lea.hbm %s5321_s4, 32  ;;  %s5324_s16 = scalar_lea.hbm %s7124_s1, 32 }
 0x1ae   :  { %p5323_p13 = scmp.ne.s32.totalorder %s5321_s4, %s5322_s12  ;;  %p5325_p0 = scmp.lt.s32.totalorder %s5321_s4, %s7124_s1 }
 0x1af   :  { %p5326_p1 = scmp.lt.s32.totalorder %s5324_s16, %s5322_s12 }
 0x1b1   :  { %s359_s21 = sshll.u32 %s7125_s10, 4  ;;  %p5327_p2 = por %p5326_p1, %p5325_p0  ;;  %s6206_s21 = int_to_ptr.hbm [resolvable:$true] %s359_s21 }
 0x1b3   :  { %p5328_p3 = pnand %p5327_p2, %p5323_p13 }
 0x1b5   :  { %5331 = shalt.err (!%p5328_p3)
}
 0x1b6   :  { %s7126_s25 = sld [smem:[#allocation100_spill]]  ;;  %s5736_s23 = smov [#allocation31]  }
 0x1b7   :  { %343 = dma.hbm_to_vmem [thread:$0]  %s6201_s5, 512, %s338_s0, [#allocation27], %s5713_s14, %s5713_s14, %s5714_s15  }
 0x1b8   :  { %s361_s24 = sshll.u32 %s5736_s23, 4  ;;  %s5344_s13 = sshra.s32 %s6206_s21, 4  ;;  %s362_s24 = int_to_ptr.vmem [resolvable:$true] %s361_s24  ;;  %s5345_s13 = int_to_ptr.hbm [resolvable:$true] %s5344_s13 }
 0x1b9   :  { %s5346_s6 = scalar_lea.hbm %s5345_s13, 32  ;;  %s5348_s18 = scalar_lea.hbm %s7125_s10, 32 }
 0x1ba   :  { %p5347_p4 = scmp.ne.s32.totalorder %s5345_s13, %s5346_s6  ;;  %p5349_p5 = scmp.lt.s32.totalorder %s5345_s13, %s7125_s10 }
 0x1bb   :  { %p5350_p6 = scmp.lt.s32.totalorder %s5348_s18, %s5346_s6 }
 0x1bc   :  { %s386_s22 = sshll.u32 %s7126_s25, 4  ;;  %s387_s22 = int_to_ptr.hbm [resolvable:$true] %s386_s22 }
 0x1bd   :  { %p5351_p7 = por %p5350_p6, %p5349_p5 }
 0x1bf   :  { %p5352_p8 = pnand %p5351_p7, %p5347_p4 }
 0x1c1   :  { %5355 = shalt.err (!%p5352_p8)
}
 0x1c2   :  { %s7127_s19 = sld [smem:[#allocation102_spill]]  ;;  %s5737_s26 = smov [#allocation34]  }
 0x1c3   :  { %367 = dma.hbm_to_vmem [thread:$0]  %s6206_s21, 512, %s362_s24, [#allocation30], %s5713_s14, %s5713_s14, %s5714_s15  }
 0x1c4   :  { %s388_s9 = sshll.u32 %s5737_s26, 4  ;;  %s5368_s1 = sshra.s32 %s387_s22, 4  ;;  %s389_s9 = int_to_ptr.vmem [resolvable:$true] %s388_s9  ;;  %s5369_s1 = int_to_ptr.hbm [resolvable:$true] %s5368_s1 }
 0x1c5   :  { %s5370_s5 = scalar_lea.hbm %s5369_s1, 1  ;;  %s5372_s20 = scalar_lea.hbm %s7126_s25, 1 }
 0x1c6   :  { %p5371_p9 = scmp.ne.s32.totalorder %s5369_s1, %s5370_s5  ;;  %p5373_p10 = scmp.lt.s32.totalorder %s5369_s1, %s7126_s25 }
 0x1c7   :  { %p5374_p11 = scmp.lt.s32.totalorder %s5372_s20, %s5370_s5 }
 0x1c8   :  { %s410_s28 = sshll.u32 %s7127_s19, 4  ;;  %s411_s28 = int_to_ptr.hbm [resolvable:$true] %s410_s28 }
 0x1c9   :  { %p5375_p12 = por %p5374_p11, %p5373_p10 }
 0x1cb   :  { %p5376_p13 = pnand %p5375_p12, %p5371_p9 }
 0x1cd   :  { %5379 = shalt.err (!%p5376_p13)
}
 0x1ce   :  { %391 = dma.hbm_to_vmem [thread:$0]  %s387_s22, 16, %s389_s9, [#allocation33]  }
 0x1cf   :  { %s7128_s2 = sld [smem:[#allocation103_spill]]  ;;  %s5738_s27 = smov [#allocation37]  }
 0x1d0   :  { %s412_s3 = sshll.u32 %s5738_s27, 4  ;;  %s5392_s10 = sshra.s32 %s411_s28, 4  ;;  %s413_s3 = int_to_ptr.vmem [resolvable:$true] %s412_s3  ;;  %s5393_s10 = int_to_ptr.hbm [resolvable:$true] %s5392_s10 }
 0x1d1   :  { %s5394_s11 = scalar_lea.hbm %s5393_s10, 1  ;;  %s5396_s0 = scalar_lea.hbm %s7127_s19, 1 }
 0x1d2   :  { %p5395_p0 = scmp.ne.s32.totalorder %s5393_s10, %s5394_s11  ;;  %p5397_p1 = scmp.lt.s32.totalorder %s5393_s10, %s7127_s19 }
 0x1d3   :  { %p5398_p2 = scmp.lt.s32.totalorder %s5396_s0, %s5394_s11 }
 0x1d5   :  { %s431_s7 = sshll.u32 %s7128_s2, 4  ;;  %p5399_p3 = por %p5398_p2, %p5397_p1  ;;  %s6227_s7 = int_to_ptr.hbm [resolvable:$true] %s431_s7 }
 0x1d7   :  { %p5400_p4 = pnand %p5399_p3, %p5395_p0 }
 0x1d9   :  { %5403 = shalt.err (!%p5400_p4)
}
 0x1da   :  { %415 = dma.hbm_to_vmem [thread:$0]  %s411_s28, 16, %s413_s3, [#allocation36]  }
 0x1db   :  { %s7129_s21 = sld [smem:[#allocation104_spill]]  ;;  %s5739_s4 = smov [#allocation40]  }
 0x1dc   :  { %s433_s12 = sshll.u32 %s5739_s4, 4  ;;  %s5416_s25 = sshra.s32 %s6227_s7, 4  ;;  %s434_s12 = int_to_ptr.vmem [resolvable:$true] %s433_s12  ;;  %s5417_s25 = int_to_ptr.hbm [resolvable:$true] %s5416_s25 }
 0x1dd   :  { %s5418_s22 = scalar_lea.hbm %s5417_s25, 32  ;;  %s5420_s23 = scalar_lea.hbm %s7128_s2, 32 }
 0x1de   :  { %p5419_p5 = scmp.ne.s32.totalorder %s5417_s25, %s5418_s22  ;;  %p5421_p6 = scmp.lt.s32.totalorder %s5417_s25, %s7128_s2 }
 0x1df   :  { %p5422_p7 = scmp.lt.s32.totalorder %s5420_s23, %s5418_s22 }
 0x1e1   :  { %s456_s16 = sshll.u32 %s7129_s21, 4  ;;  %p5423_p8 = por %p5422_p7, %p5421_p6  ;;  %s457_s16 = int_to_ptr.hbm [resolvable:$true] %s456_s16 }
 0x1e3   :  { %p5424_p9 = pnand %p5423_p8, %p5419_p5 }
 0x1e5   :  { %5427 = shalt.err (!%p5424_p9)
}
 0x1e6   :  { %s7130_s24 = sld [smem:[#allocation105_spill]]  ;;  %s5740_s6 = smov [#allocation43]  }
 0x1e7   :  { %439 = dma.hbm_to_vmem [thread:$0]  %s6227_s7, 512, %s434_s12, [#allocation39], %s5713_s14, %s5713_s14, %s5714_s15  }
 0x1e8   :  { %s458_s18 = sshll.u32 %s5740_s6, 4  ;;  %s5440_s19 = sshra.s32 %s457_s16, 4  ;;  %s459_s18 = int_to_ptr.vmem [resolvable:$true] %s458_s18  ;;  %s5441_s19 = int_to_ptr.hbm [resolvable:$true] %s5440_s19 }
 0x1e9   :  { %s5442_s26 = scalar_lea.hbm %s5441_s19, 1  ;;  %s5444_s9 = scalar_lea.hbm %s7129_s21, 1 }
 0x1ea   :  { %p5443_p10 = scmp.ne.s32.totalorder %s5441_s19, %s5442_s26  ;;  %p5445_p11 = scmp.lt.s32.totalorder %s5441_s19, %s7129_s21 }
 0x1eb   :  { %p5446_p12 = scmp.lt.s32.totalorder %s5444_s9, %s5442_s26 }
 0x1ec   :  { %s477_s13 = sshll.u32 %s7130_s24, 4  ;;  %s6240_s13 = int_to_ptr.hbm [resolvable:$true] %s477_s13 }
 0x1ed   :  { %p5447_p13 = por %p5446_p12, %p5445_p11 }
 0x1ef   :  { %p5448_p0 = pnand %p5447_p13, %p5443_p10 }
 0x1f1   :  { %5451 = shalt.err (!%p5448_p0)
}
 0x1f2   :  { %461 = dma.hbm_to_vmem [thread:$0]  %s457_s16, 16, %s459_s18, [#allocation42]  }
 0x1f3   :  { %s7131_s28 = sld [smem:[#allocation109_spill]]  ;;  %s5741_s1 = smov [#allocation46]  }
 0x1f4   :  { %s479_s5 = sshll.u32 %s5741_s1, 4  ;;  %s5464_s2 = sshra.s32 %s6240_s13, 4  ;;  %s480_s5 = int_to_ptr.vmem [resolvable:$true] %s479_s5  ;;  %s5465_s2 = int_to_ptr.hbm [resolvable:$true] %s5464_s2 }
 0x1f5   :  { %s5466_s7 = scalar_lea.hbm %s5465_s2, 32  ;;  %s5468_s27 = scalar_lea.hbm %s7130_s24, 32 }
 0x1f6   :  { %p5467_p1 = scmp.ne.s32.totalorder %s5465_s2, %s5466_s7  ;;  %p5469_p2 = scmp.lt.s32.totalorder %s5465_s2, %s7130_s24 }
 0x1f7   :  { %p5470_p3 = scmp.lt.s32.totalorder %s5468_s27, %s5466_s7 }
 0x1f9   :  { %s508_s20 = sshll.u32 %s7131_s28, 4  ;;  %p5471_p4 = por %p5470_p3, %p5469_p2  ;;  %s509_s20 = int_to_ptr.hbm [resolvable:$true] %s508_s20 }
 0x1fb   :  { %p5472_p5 = pnand %p5471_p4, %p5467_p1 }
 0x1fd   :  { %5475 = shalt.err (!%p5472_p5)
}
 0x1fe   :  { %s7132_s3 = sld [smem:[#allocation112_spill]]  ;;  %s5742_s11 = smov [#allocation49]  }
 0x1ff   :  { %485 = dma.hbm_to_vmem [thread:$0]  %s6240_s13, 512, %s480_s5, [#allocation45], %s5713_s14, %s5713_s14, %s5714_s15  }
 0x200   :  { %s510_s0 = sshll.u32 %s5742_s11, 4  ;;  %s5488_s21 = sshra.s32 %s509_s20, 4  ;;  %s511_s0 = int_to_ptr.vmem [resolvable:$true] %s510_s0  ;;  %s5489_s21 = int_to_ptr.hbm [resolvable:$true] %s5488_s21 }
 0x201   :  { %s5490_s4 = scalar_lea.hbm %s5489_s21, 1  ;;  %s5492_s12 = scalar_lea.hbm %s7131_s28, 1 }
 0x202   :  { %p5491_p6 = scmp.ne.s32.totalorder %s5489_s21, %s5490_s4  ;;  %p5493_p7 = scmp.lt.s32.totalorder %s5489_s21, %s7131_s28 }
 0x203   :  { %p5494_p8 = scmp.lt.s32.totalorder %s5492_s12, %s5490_s4 }
 0x204   :  { %s532_s10 = sshll.u32 %s7132_s3, 4  ;;  %s533_s10 = int_to_ptr.hbm [resolvable:$true] %s532_s10 }
 0x205   :  { %p5495_p9 = por %p5494_p8, %p5493_p7 }
 0x207   :  { %p5496_p10 = pnand %p5495_p9, %p5491_p6 }
 0x209   :  { %5499 = shalt.err (!%p5496_p10)
}
 0x20a   :  { %513 = dma.hbm_to_vmem [thread:$0]  %s509_s20, 16, %s511_s0, [#allocation48]  }
 0x20b   :  { %s7133_s16 = sld [smem:[#allocation114_spill]]  ;;  %s5743_s25 = smov [#allocation52]  }
 0x20c   :  { %s534_s22 = sshll.u32 %s5743_s25, 4  ;;  %s5512_s24 = sshra.s32 %s533_s10, 4  ;;  %s535_s22 = int_to_ptr.vmem [resolvable:$true] %s534_s22  ;;  %s5513_s24 = int_to_ptr.hbm [resolvable:$true] %s5512_s24 }
 0x20d   :  { %s5514_s13 = scalar_lea.hbm %s5513_s24, 1  ;;  %s5516_s6 = scalar_lea.hbm %s7132_s3, 1 }
 0x20e   :  { %p5515_p11 = scmp.ne.s32.totalorder %s5513_s24, %s5514_s13  ;;  %p5517_p12 = scmp.lt.s32.totalorder %s5513_s24, %s7132_s3 }
 0x20f   :  { %p5518_p13 = scmp.lt.s32.totalorder %s5516_s6, %s5514_s13 }
 0x211   :  { %s554_s23 = sshll.u32 %s7133_s16, 4  ;;  %p5519_p0 = por %p5518_p13, %p5517_p12  ;;  %s555_s23 = int_to_ptr.hbm [resolvable:$true] %s554_s23 }
 0x213   :  { %p5520_p1 = pnand %p5519_p0, %p5515_p11 }
 0x215   :  { %5523 = shalt.err (!%p5520_p1)
}
 0x216   :  { %537 = dma.hbm_to_vmem [thread:$0]  %s533_s10, 16, %s535_s22, [#allocation51]  }
 0x217   :  { %s7134_s18 = sld [smem:[#allocation117_spill]]  ;;  %s5744_s26 = smov [#allocation55]  }
 0x218   :  { %s556_s9 = sshll.u32 %s5744_s26, 4  ;;  %s5536_s28 = sshra.s32 %s555_s23, 4  ;;  %s557_s9 = int_to_ptr.vmem [resolvable:$true] %s556_s9  ;;  %s5537_s28 = int_to_ptr.hbm [resolvable:$true] %s5536_s28 }
 0x219   :  { %s5538_s1 = scalar_lea.hbm %s5537_s28, 1  ;;  %s5540_s5 = scalar_lea.hbm %s7133_s16, 1 }
 0x21a   :  { %p5539_p2 = scmp.ne.s32.totalorder %s5537_s28, %s5538_s1  ;;  %p5541_p3 = scmp.lt.s32.totalorder %s5537_s28, %s7133_s16 }
 0x21b   :  { %p5542_p4 = scmp.lt.s32.totalorder %s5540_s5, %s5538_s1 }
 0x21d   :  { %s579_s19 = sshll.u32 %s7134_s18, 4  ;;  %p5543_p5 = por %p5542_p4, %p5541_p3  ;;  %s6259_s19 = int_to_ptr.hbm [resolvable:$true] %s579_s19 }
 0x21f   :  { %p5544_p6 = pnand %p5543_p5, %p5539_p2 }
 0x221   :  { %5547 = shalt.err (!%p5544_p6)
}
 0x222   :  { %559 = dma.hbm_to_vmem [thread:$0]  %s555_s23, 16, %s557_s9, [#allocation54]  }
 0x223   :  { %s5745_s20 = smov [#allocation58]   ;;  %s5560_s7 = sshra.s32 %s6259_s19, 4  ;;  %s5561_s7 = int_to_ptr.hbm [resolvable:$true] %s5560_s7 }
 0x224   :  { %s581_s2 = sshll.u32 %s5745_s20, 4  ;;  %s5562_s27 = scalar_lea.hbm %s5561_s7, 256  ;;  %s582_s2 = int_to_ptr.vmem [resolvable:$true] %s581_s2 }
 0x225   :  { %p5563_p7 = scmp.ne.s32.totalorder %s5561_s7, %s5562_s27  ;;  %s5564_s3 = scalar_lea.hbm %s7134_s18, 256 }
 0x226   :  { %p5565_p8 = scmp.lt.s32.totalorder %s5561_s7, %s7134_s18  ;;  %p5566_p9 = scmp.lt.s32.totalorder %s5564_s3, %s5562_s27 }
 0x228   :  { %p5567_p10 = por %p5566_p9, %p5565_p8 }
 0x22a   :  { %p5568_p11 = pnand %p5567_p10, %p5563_p7 }
 0x22c   :  { %5571 = shalt.err (!%p5568_p11)
}
 0x22d   :  { %s5746_s10 = smov 256   ;;  %s7135_s11 = sld [smem:[#allocation125_spill]] }
 0x22e   :  { %s5747_s0 = smov 16   ;;  %s5748_s4 = smov [#allocation61]  }
 0x22f   :  { %587 = dma.hbm_to_vmem [thread:$0]  %s6259_s19, 4096, %s582_s2, [#allocation57], %s5746_s10, %s5746_s10, %s5747_s0  }
 0x230   :  { %s619_s12 = sshll.u32 %s5748_s4, 4  ;;  %s620_s12 = int_to_ptr.vmem [resolvable:$true] %s619_s12 }
 0x233   :  { %s617_s21 = sshll.u32 %s7135_s11, 4  ;;  %s5588_s22 = scalar_lea.hbm %s7135_s11, 32  ;;  %s618_s21 = int_to_ptr.hbm [resolvable:$true] %s617_s21 }
 0x234   :  { %s5584_s16 = sshra.s32 %s618_s21, 4  ;;  %s5585_s16 = int_to_ptr.hbm [resolvable:$true] %s5584_s16 }
 0x235   :  { %s5586_s25 = scalar_lea.hbm %s5585_s16, 32  ;;  %p5589_p13 = scmp.lt.s32.totalorder %s5585_s16, %s7135_s11 }
 0x236   :  { %p5587_p12 = scmp.ne.s32.totalorder %s5585_s16, %s5586_s25  ;;  %p5590_p0 = scmp.lt.s32.totalorder %s5588_s22, %s5586_s25 }
 0x238   :  { %p5591_p1 = por %p5590_p0, %p5589_p13 }
 0x23a   :  { %p5592_p2 = pnand %p5591_p1, %p5587_p12 }
 0x23c   :  { %5595 = shalt.err (!%p5592_p2)
}
 0x23d   :  { %625 = dma.hbm_to_vmem [thread:$0]  %s618_s21, 512, %s620_s12, [#allocation60], %s5713_s14, %s5713_s14, %s5714_s15  }
 0x23e   :  { %5608 = dma.done.wait [#allocation7], 16  }
 0x23f   :  { %5609 = vsyncadd [#allocation7], 4294967280 }
 0x240   :  { %5610 = dma.done.wait [#allocation9], 528  }
 0x241   :  { %5611 = vsyncadd [#allocation9], 4294966768 }
 0x242   :  { %5612 = dma.done.wait [#allocation12], 32  }
 0x243   :  { %5613 = vsyncadd [#allocation12], 4294967264 }
 0x244   :  { %5614 = dma.done.wait [#allocation15], 32  }
 0x245   :  { %5615 = vsyncadd [#allocation15], 4294967264 }
 0x246   :  { %5616 = dma.done.wait [#allocation18], 528  }
 0x247   :  { %5617 = vsyncadd [#allocation18], 4294966768 }
 0x248   :  { %5618 = dma.done.wait [#allocation21], 1024  }
 0x249   :  { %5619 = vsyncadd [#allocation21], 4294966272 }
 0x24a   :  { %5620 = dma.done.wait [#allocation24], 32  }
 0x24b   :  { %5621 = vsyncadd [#allocation24], 4294967264 }
 0x24c   :  { %5622 = dma.done.wait [#allocation27], 528  }
 0x24d   :  { %5623 = vsyncadd [#allocation27], 4294966768 }
 0x24e   :  { %5624 = dma.done.wait [#allocation30], 528  }
 0x24f   :  { %5625 = vsyncadd [#allocation30], 4294966768 }
 0x250   :  { %5626 = dma.done.wait [#allocation33], 528  }
 0x251   :  { %5627 = vsyncadd [#allocation33], 4294966768 }
 0x252   :  { %5628 = dma.done.wait [#allocation36], 32  }
 0x253   :  { %5629 = vsyncadd [#allocation36], 4294967264 }
 0x254   :  { %5630 = dma.done.wait [#allocation39], 528  }
 0x255   :  { %5631 = vsyncadd [#allocation39], 4294966768 }
 0x256   :  { %5632 = dma.done.wait [#allocation42], 32  }
 0x257   :  { %5633 = vsyncadd [#allocation42], 4294967264 }
 0x258   :  { %5634 = dma.done.wait [#allocation45], 528  }
 0x259   :  { %5635 = vsyncadd [#allocation45], 4294966768 }
 0x25a   :  { %5636 = dma.done.wait [#allocation48], 32  }
 0x25b   :  { %5637 = vsyncadd [#allocation48], 4294967264 }
 0x25c   :  { %5638 = dma.done.wait [#allocation51], 32  }
 0x25d   :  { %5639 = vsyncadd [#allocation51], 4294967264 }
 0x25e   :  { %5640 = dma.done.wait [#allocation54], 32  }
 0x25f   :  { %5641 = vsyncadd [#allocation54], 4294967264 }
 0x260   :  { %5642 = dma.done.wait [#allocation57], 6144  }
 0x261   :  { %5643 = vsyncadd [#allocation57], 4294961152 }
 0x262   :  { %5644 = dma.done.wait [#allocation60], 1024  }
 0x263   :  { %5645 = vsyncadd [#allocation60], 4294966272  ;;  %s7136_s14 = sld [smem:[#allocation106_spill]]  ;;  %vm794_vm0 = vcmask 1043456   ;;  %vm787_vm1 = vcmask 31744   ;;  %v824_v2 = vld [vmem:[#allocation59 + $0x18] sm:$0xff] }
 0x264   :  { %s7137_s15 = sld [smem:[#allocation81_spill]]  ;;  %v823_v4 = vld [vmem:[#allocation59 + $0x10] sm:$0xff]  ;;  %848 = vmatpush.msra.mxu1 %v824_v2  ;;  %v822_v7 = vld [vmem:[#allocation59 + $0x8] sm:$0xff]  ;;  %v821_v9 = vld [vmem:[#allocation59] sm:$0xff]  ;;  %vm829_vm2 = vcmask 261120   ;;  %s5752_s1 = smov 64  }
 0x265   :  { %s7138_s23 = sld [smem:[#allocation115_spill]]  ;;  %v915_v11 = vld [vmem:[#allocation56 + $0x78] sm:$0xff]  ;;  %v914_v12 = vld [vmem:[#allocation56 + $0x70] sm:$0xff]  ;;  %v913_v13 = vld [vmem:[#allocation56 + $0x68] sm:$0xff]  ;;  %s5753_s5 = smov 32  }
 0x266   :  { %849 = vmatpush.msra.mxu1 %v823_v4  ;;  %920 = vmatpush.msra.mxu3 %v915_v11  ;;  %v912_v14 = vld [vmem:[#allocation56 + $0x60] sm:$0xff]  ;;  %v911_v15 = vld [vmem:[#allocation56 + $0x58] sm:$0xff]  ;;  %v4414_v16 = vld [vmem:[#allocation47] ss:$0 sm:$0xff]  ;;  %s7139_s24 = sld [smem:[#allocation85_spill]]  ;;  %s5754_s20 = smov 96  }
 0x267   :  { %v910_v21 = vld [vmem:[#allocation56 + $0x50] sm:$0xff]  ;;  %v909_v22 = vld [vmem:[#allocation56 + $0x48] sm:$0xff]  ;;  %v908_v23 = vld [vmem:[#allocation56 + $0x40] sm:$0xff]  ;;  %s7141_s13 = sld [smem:[#allocation119_spill]]  ;;  %s5756_s0 = smov 88  }
 0x268   :  { %850 = vmatpush.msra.mxu1 %v822_v7  ;;  %921 = vmatpush.msra.mxu3 %v914_v12  ;;  %v907_v24 = vld [vmem:[#allocation56 + $0x38] sm:$0xff]  ;;  %v906_v25 = vld [vmem:[#allocation56 + $0x30] sm:$0xff]  ;;  %v905_v26 = vld [vmem:[#allocation56 + $0x28] sm:$0xff]  ;;  %s7143_s6 = sld [smem:[#allocation121_spill]]  ;;  %s5757_s21 = smov 72  }
 0x269   :  { %v782_v0 = vld [vmem:[%s7136_s14] sm:$0xf]  ;;  %v904_v27 = vld [vmem:[#allocation56 + $0x20] sm:$0xff]  ;;  %v903_v28 = vld [vmem:[#allocation56 + $0x18] sm:$0xff]  ;;  %s7144_s18 = sld [smem:[#allocation122_spill]]  ;;  %s5758_s4 = smov 120  }
 0x26a   :  { %v780_v1 = vld [vmem:[%s7137_s15] sm:$0xff]  ;;  %4182 = vmatpush.msk.msra.mxu0 %vm794_vm0, %v782_v0  ;;  %v781_v6 = vld [vmem:[%s7137_s15 + $0x8] sm:$0xff]  ;;  %851 = vmatpush.msra.mxu1 %v821_v9  ;;  %v900_v31 = vld [vmem:[#allocation56] sm:$0xff]  ;;  %s7145_s19 = sld [smem:[#allocation124_spill]]  ;;  %s5759_s12 = smov 112  }
 0x26b   :  { %v862_v3 = vld [vmem:[%s7138_s23 + $0x18] sm:$0xff]  ;;  %4183 = vmatmul.msk.f32.vlgmr.msra.gmra.mxu0 %vm787_vm1, %v780_v1  ;;  %v861_v5 = vld [vmem:[%s7138_s23 + $0x10] sm:$0xff]  ;;  %v860_v8 = vld [vmem:[%s7138_s23 + $0x8] sm:$0xff]  ;;  %922 = vmatpush.msra.mxu3 %v913_v13  ;;  %s7146_s26 = sld [smem:[#allocation123_spill]]  ;;  %s5760_s16 = smov 104  }
 0x26c   :  { %879 = vmatpush.msra.mxu2 %v862_v3  ;;  %v859_v10 = vld [vmem:[%s7138_s23] sm:$0xff]  ;;  %v902_v29 = vld [vmem:[#allocation56 + $0x10] sm:$0xff]  ;;  %v974_v33 = vld [vmem:[#allocation58 + $0xf8] sm:$0xff]  ;;  %s7147_s9 = sld [smem:[#allocation108_spill]]  ;;  %s5761_s25 = smov 80  }
 0x26d   :  { %923 = vmatpush.msra.mxu3 %v912_v14  ;;  %v901_v30 = vld [vmem:[#allocation56 + $0x8] sm:$0xff]  ;;  %v973_v32 = vld [vmem:[#allocation58 + $0xf0] sm:$0xff]  ;;  %v971_v34 = vld [vmem:[#allocation58 + $0xe0] sm:$0xff]  ;;  %1004 = vmatpush.msrb.mxu1 %v974_v33  ;;  %s7148_s28 = sld [smem:[#allocation107_spill]] }
 0x26e   :  { %880 = vmatpush.msra.mxu2 %v861_v5  ;;  %981 = vmatpush.msrb.mxu0 %v973_v32  ;;  %v972_v35 = vld [vmem:[#allocation58 + $0xe8] sm:$0xff]  ;;  %v969_v36 = vld [vmem:[#allocation58 + $0xd0] sm:$0xff]  ;;  %v970_v37 = vld [vmem:[#allocation58 + $0xd8] sm:$0xff]  ;;  %s7149_s2 = sld [smem:[#allocation90_spill]] }
 0x26f   :  { %924 = vmatpush.msra.mxu3 %v911_v15  ;;  %1005 = vmatpush.msrb.mxu1 %v972_v35  ;;  %v967_v38 = vld [vmem:[#allocation58 + $0xc0] sm:$0xff]  ;;  %v968_v39 = vld [vmem:[#allocation58 + $0xc8] sm:$0xff]  ;;  %v4416_v40 = vld [vmem:[#allocation49] ss:$0 sm:$0xff]  ;;  %s7150_s7 = sld [smem:[#allocation91_spill]] }
 0x270   :  { %881 = vmatpush.msra.mxu2 %v860_v8  ;;  %982 = vmatpush.msrb.mxu0 %v971_v34  ;;  %v965_v41 = vld [vmem:[#allocation58 + $0xb0] sm:$0xff]  ;;  %v966_v42 = vld [vmem:[#allocation58 + $0xb8] sm:$0xff]  ;;  %v963_v43 = vld [vmem:[#allocation58 + $0xa0] sm:$0xff]  ;;  %s7151_s27 = sld [smem:[#allocation86_spill]] }
 0x271   :  { %925 = vmatpush.msra.mxu3 %v910_v21  ;;  %1006 = vmatpush.msrb.mxu1 %v970_v37  ;;  %v964_v44 = vld [vmem:[#allocation58 + $0xa8] sm:$0xff]  ;;  %v961_v47 = vld [vmem:[#allocation58 + $0x90] sm:$0xff]  ;;  %v962_v48 = vld [vmem:[#allocation58 + $0x98] sm:$0xff]  ;;  %s7152_s3 = sld [smem:[#allocation87_spill]] }
 0x272   :  { %882 = vmatpush.msra.mxu2 %v859_v10  ;;  %983 = vmatpush.msrb.mxu0 %v969_v36  ;;  %v959_v50 = vld [vmem:[#allocation58 + $0x80] sm:$0xff]  ;;  %v960_v51 = vld [vmem:[#allocation58 + $0x88] sm:$0xff]  ;;  %v957_v52 = vld [vmem:[#allocation58 + $0x70] sm:$0xff]  ;;  %s7153_s10 = sld [smem:[#allocation88_spill]] }
 0x273   :  { %4184 = vmatmul.msk.f32.gmra.mxu0 %vm787_vm1, %v781_v6  ;;  %926 = vmatpush.msra.mxu3 %v909_v22  ;;  %v958_v53 = vld [vmem:[#allocation58 + $0x78] sm:$0xff]  ;;  %v955_v54 = vld [vmem:[#allocation58 + $0x60] sm:$0xff]  ;;  %v956_v55 = vld [vmem:[#allocation58 + $0x68] sm:$0xff]  ;;  %s7154_s11 = sld [smem:[#allocation84_spill]] }
 0x274   :  { %984 = vmatpush.msrb.mxu0 %v967_v38  ;;  %1007 = vmatpush.msrb.mxu1 %v968_v39  ;;  %v953_v58 = vld [vmem:[#allocation58 + $0x50] sm:$0xff]  ;;  %v954_v59 = vld [vmem:[#allocation58 + $0x58] sm:$0xff]  ;;  %v951_v62 = vld [vmem:[#allocation58 + $0x40] sm:$0xff]  ;;  %s7171_s22 = sld [smem:[#allocation83_spill]] }
 0x275   :  { %927 = vmatpush.msra.mxu3 %v908_v23  ;;  %v952_v63 = vld [vmem:[#allocation58 + $0x48] sm:$0xff]  ;;  %v949_v1 = vld [vmem:[#allocation58 + $0x30] sm:$0xff]  ;;  %v950_v2 = vld [vmem:[#allocation58 + $0x38] sm:$0xff]  ;;  %s7172_s14 = sld [smem:[#allocation82_spill]] }
 0x276   :  { %985 = vmatpush.msrb.mxu0 %v965_v41  ;;  %1008 = vmatpush.msrb.mxu1 %v966_v42  ;;  %v947_v4 = vld [vmem:[#allocation58 + $0x20] sm:$0xff]  ;;  %v948_v5 = vld [vmem:[#allocation58 + $0x28] sm:$0xff]  ;;  %v945_v9 = vld [vmem:[#allocation58 + $0x10] sm:$0xff]  ;;  %s7173_s15 = sld [smem:[#allocation101_spill]] }
 0x277   :  { %928 = vmatpush.msra.mxu3 %v907_v24  ;;  %v946_v10 = vld [vmem:[#allocation58 + $0x18] sm:$0xff]  ;;  %v943_v11 = vld [vmem:[#allocation58] sm:$0xff]  ;;  %v944_v12 = vld [vmem:[#allocation58 + $0x8] sm:$0xff] }
 0x278   :  { %986 = vmatpush.msrb.mxu0 %v963_v43  ;;  %1009 = vmatpush.msrb.mxu1 %v964_v44  ;;  %v6296_v13 = vld [vmem:[%s6075_s29 + $0x18] sm:$0xff]  ;;  %v1211_v14 = vld [vmem:[#allocation61 + $0x18] sm:$0xff]  ;;  %v6307_v21 = vld [vmem:[%s6075_s29] sm:$0xff] }
 0x279   :  { %929 = vmatpush.msra.mxu3 %v906_v25  ;;  %v6299_v15 = vld [vmem:[%s6075_s29 + $0x10] sm:$0xff]  ;;  %v1208_v22 = vld [vmem:[#allocation61] sm:$0xff]  ;;  %v1078_v33 = vld [vmem:[%s7139_s24 + $0x48] sm:$0xff] }
 0x27a   :  { %987 = vmatpush.msrb.mxu0 %v961_v47  ;;  %1010 = vmatpush.msrb.mxu1 %v962_v48  ;;  %v4417_v23 = vld [vmem:[#allocation50] ss:$0 sm:$0xff]  ;;  %v1077_v34 = vld [vmem:[%s7139_s24 + $0x40] sm:$0xff]  ;;  %v1076_v35 = vld [vmem:[%s7139_s24 + $0x38] sm:$0xff] }
 0x27b   :  { %930 = vmatpush.msra.mxu3 %v905_v26  ;;  %v1079_v32 = vld [vmem:[%s7139_s24 + $0x50] sm:$0xff]  ;;  %v1074_v37 = vld [vmem:[%s7139_s24 + $0x28] sm:$0xff]  ;;  %v1073_v38 = vld [vmem:[%s7139_s24 + $0x20] sm:$0xff] }
 0x27c   :  { %988 = vmatpush.msrb.mxu0 %v959_v50  ;;  %1011 = vmatpush.msrb.mxu1 %v960_v51  ;;  %v1075_v36 = vld [vmem:[%s7139_s24 + $0x30] sm:$0xff]  ;;  %v1072_v41 = vld [vmem:[%s7139_s24 + $0x18] sm:$0xff]  ;;  %v1070_v44 = vld [vmem:[%s7139_s24 + $0x8] sm:$0xff] }
 0x27d   :  { %931 = vmatpush.msra.mxu3 %v904_v27  ;;  %v1071_v43 = vld [vmem:[%s7139_s24 + $0x10] sm:$0xff]  ;;  %v1069_v47 = vld [vmem:[%s7139_s24] sm:$0xff] }
 0x27e   :  { %989 = vmatpush.msrb.mxu0 %v957_v52  ;;  %1012 = vmatpush.msrb.mxu1 %v958_v53 }
 0x27f   :  { %932 = vmatpush.msra.mxu3 %v903_v28  ;;  %v1084_v28 = vld [vmem:[%s7139_s24 + $0x78] sm:$0xff] }
 0x280   :  { %990 = vmatpush.msrb.mxu0 %v955_v54  ;;  %1013 = vmatpush.msrb.mxu1 %v956_v55 }
 0x281   :  { %933 = vmatpush.msra.mxu3 %v902_v29  ;;  %1087 = vmatpush.msrb.mxu2 %v1084_v28  ;;  %v1083_v29 = vld [vmem:[%s7139_s24 + $0x70] sm:$0xff] }
 0x282   :  { %991 = vmatpush.msrb.mxu0 %v953_v58  ;;  %1014 = vmatpush.msrb.mxu1 %v954_v59 }
 0x283   :  { %934 = vmatpush.msra.mxu3 %v901_v30  ;;  %1088 = vmatpush.msrb.mxu2 %v1083_v29  ;;  %v1082_v30 = vld [vmem:[%s7139_s24 + $0x68] sm:$0xff] }
 0x284   :  { %992 = vmatpush.msrb.mxu0 %v951_v62  ;;  %1015 = vmatpush.msrb.mxu1 %v952_v63 }
 0x285   :  { %935 = vmatpush.msra.mxu3 %v900_v31  ;;  %1089 = vmatpush.msrb.mxu2 %v1082_v30  ;;  %v1081_v31 = vld [vmem:[%s7139_s24 + $0x60] sm:$0xff] }
 0x286   :  { %993 = vmatpush.msrb.mxu0 %v949_v1  ;;  %1016 = vmatpush.msrb.mxu1 %v950_v2  ;;  %v4415_v2 = vld [vmem:[#allocation52] ss:$0 sm:$0xff] }
 0x287   :  { %1112 = vmatpush.msrb.mxu3 %v1084_v28  ;;  %1090 = vmatpush.msrb.mxu2 %v1081_v31 }
 0x288   :  { %994 = vmatpush.msrb.mxu0 %v947_v4  ;;  %1017 = vmatpush.msrb.mxu1 %v948_v5 }
 0x289   :  { %1113 = vmatpush.msrb.mxu3 %v1083_v29  ;;  %v1214_v29 = vld [vmem:[%s6065_s17 + $0x8] sm:$0xff] }
 0x28a   :  { %995 = vmatpush.msrb.mxu0 %v945_v9  ;;  %1018 = vmatpush.msrb.mxu1 %v946_v10 }
 0x28b   :  { %1114 = vmatpush.msrb.mxu3 %v1082_v30 }
 0x28c   :  { %996 = vmatpush.msrb.mxu0 %v943_v11  ;;  %1019 = vmatpush.msrb.mxu1 %v944_v12 }
 0x28d   :  { %1115 = vmatpush.msrb.mxu3 %v1081_v31 }
 0x28e   :  { %1197 = vmatpush.msra.mxu0 %v6296_v13 }
 0x290   :  { %1198 = vmatpush.msra.mxu0 %v6299_v15 }
 0x2e8   :  { %v815_v17 = vpop.f32.mrf.mxu0 }
 0x2e9   :  { %v6283_v18 = vadd.f32 %v4414_v16, %v815_v17  ;;  %v6303_v17 = vld [vmem:[%s6075_s29 + $0x8] sm:$0xff]  ;;  %s7140_s29 = sld [smem:[#allocation111_spill]] }
 0x2ea   :  { %1199 = vmatpush.msra.mxu0 %v6303_v17 }
 0x2eb   :  { %4185 = vmatmul.msk.f32.vlgmr.msra.gmra.mxu1 %vm829_vm2, %v6283_v18  ;;  %4187 = vmatmul.msk.f32.vlgmr.msra.gmra.mxu2 %vm829_vm2, %v6283_v18 }
 0x2ec   :  { %1237 = vmatpush.msra.mxu1 %v1211_v14  ;;  %1200 = vmatpush.msra.mxu0 %v6307_v21 }
 0x2f0   :  { %v818_v19 = vpop.f32.mrf.mxu0 }
 0x2f1   :  { %v6289_v20 = vadd.f32 %v4414_v16, %v818_v19  ;;  %v1210_v16 = vld [vmem:[#allocation61 + $0x10] sm:$0xff]  ;;  %v1209_v19 = vld [vmem:[#allocation61 + $0x8] sm:$0xff] }
 0x2f2   :  { %1238 = vmatpush.msra.mxu1 %v1210_v16 }
 0x2f3   :  { %4186 = vmatmul.msk.f32.gmra.mxu1 %vm829_vm2, %v6289_v20  ;;  %4188 = vmatmul.msk.f32.gmra.mxu2 %vm829_vm2, %v6289_v20 }
 0x2f4   :  { %1239 = vmatpush.msra.mxu1 %v1209_v19 }
 0x2f6   :  { %1240 = vmatpush.msra.mxu1 %v1208_v22 }
 0x368   :  { %v853_v39 = vpop.f32.mrf.mxu1 }
 0x369   :  { %v854_v10 = vadd.f32 %v4415_v2, %v853_v39 }
 0x36e   :  { %v884_v45 = vpop.f32.mrf.mxu2 }
 0x36f   :  { %v885_v46 = vadd.f32 %v4416_v40, %v884_v45 }
 0x371   :  { %v892_v49 = vmul.f32 1.442695, %v885_v46  ;;  %vm890_vm3 = vcmp.gt.f32.partialorder %v885_v46, 0.0 }
 0x373   :  { %4448 = vpow2.f32 %v892_v49  ;;  %v6338_v49 = vpop.f32.mrf.mxu1 }
 0x374   :  { %v857_v31 = vadd.f32 %v4415_v2, %v6338_v49 }
 0x376   :  { %v887_v56 = vpop.f32.mrf.mxu2 }
 0x377   :  { %v888_v57 = vadd.f32 %v4416_v40, %v887_v56  ;;  %v6330_v40 = vld [vmem:[%s7140_s29] sm:$0x3] }
 0x378   :  { %v977_v42 = vperm.slane %v6330_v40, 0  ;;  %v978_v63 = vperm.slane %v6330_v40, 1 }
 0x379   :  { %v4449_v60 = vpop.eup %4448  ;;  %v894_v61 = vmul.f32 1.442695, %v888_v57  ;;  %vm891_vm4 = vcmp.gt.f32.partialorder %v888_v57, 0.0 }
 0x37a   :  { %v4189_v0 = vadd.f32 -1.0, %v4449_v60 }
 0x37b   :  { %4450 = vpow2.f32 %v894_v61 }
 0x37c   :  { %v898_v3 = vsel %vm890_vm3, %v885_v46, %v4189_v0 }
 0x37d   :  { %936 = vmatmul.f32.vlgmr.msra.gmra.mxu3 %v898_v3 }
 0x381   :  { %v4451_v6 = vpop.eup %4450 }
 0x382   :  { %v4190_v7 = vadd.f32 -1.0, %v4451_v6 }
 0x384   :  { %v899_v8 = vsel %vm891_vm4, %v888_v57, %v4190_v7 }
 0x385   :  { %939 = vmatmul.f32.gmra.mxu3 %v899_v8 }
 0x400   :  { %v937_v24 = vpop.f32.mrf.mxu3 }
 0x401   :  { %v938_v25 = vadd.f32 %v4417_v23, %v937_v24  ;;  %v1215_v24 = vld [vmem:[%s6065_s17 + $0x10] sm:$0xff] }
 0x403   :  { %997 = vmatmul.f32.vlgmr.msrb.gmra.mxu0 %v938_v25  ;;  %1020 = vmatmul.f32.vlgmr.msrb.gmra.mxu1 %v938_v25 }
 0x408   :  { %v940_v26 = vpop.f32.mrf.mxu3 }
 0x409   :  { %v941_v27 = vadd.f32 %v4417_v23, %v940_v26 }
 0x40b   :  { %1000 = vmatmul.f32.gmra.mxu0 %v941_v27  ;;  %1023 = vmatmul.f32.gmra.mxu1 %v941_v27 }
 0x413   :  { %4193 = vmatmul.msk.f32.vlgmr.msra.gmra.mxu0 %vm829_vm2, %v6283_v18  ;;  %4195 = vmatmul.msk.f32.vlgmr.msra.gmra.mxu1 %vm829_vm2, %v6283_v18  ;;  %v1080_v18 = vld [vmem:[%s7139_s24 + $0x58] sm:$0xff] }
 0x414   :  { %1091 = vmatpush.msrb.mxu2 %v1080_v18  ;;  %1116 = vmatpush.msrb.mxu3 %v1080_v18 }
 0x416   :  { %1092 = vmatpush.msrb.mxu2 %v1079_v32  ;;  %1117 = vmatpush.msrb.mxu3 %v1079_v32  ;;  %v1213_v32 = vld [vmem:[%s6065_s17] sm:$0xff] }
 0x418   :  { %1093 = vmatpush.msrb.mxu2 %v1078_v33  ;;  %1118 = vmatpush.msrb.mxu3 %v1078_v33 }
 0x41a   :  { %1094 = vmatpush.msrb.mxu2 %v1077_v34  ;;  %1119 = vmatpush.msrb.mxu3 %v1077_v34 }
 0x41b   :  { %4196 = vmatmul.msk.f32.gmra.mxu1 %vm829_vm2, %v6289_v20 }
 0x41c   :  { %1095 = vmatpush.msrb.mxu2 %v1076_v35  ;;  %1120 = vmatpush.msrb.mxu3 %v1076_v35 }
 0x41e   :  { %1096 = vmatpush.msrb.mxu2 %v1075_v36  ;;  %1121 = vmatpush.msrb.mxu3 %v1075_v36 }
 0x420   :  { %1097 = vmatpush.msrb.mxu2 %v1074_v37  ;;  %1122 = vmatpush.msrb.mxu3 %v1074_v37 }
 0x422   :  { %1098 = vmatpush.msrb.mxu2 %v1073_v38  ;;  %1123 = vmatpush.msrb.mxu3 %v1073_v38 }
 0x424   :  { %1099 = vmatpush.msrb.mxu2 %v1072_v41  ;;  %1124 = vmatpush.msrb.mxu3 %v1072_v41 }
 0x426   :  { %1100 = vmatpush.msrb.mxu2 %v1071_v43  ;;  %1125 = vmatpush.msrb.mxu3 %v1071_v43 }
 0x428   :  { %1101 = vmatpush.msrb.mxu2 %v1070_v44  ;;  %1126 = vmatpush.msrb.mxu3 %v1070_v44 }
 0x42a   :  { %1102 = vmatpush.msrb.mxu2 %v1069_v47  ;;  %1127 = vmatpush.msrb.mxu3 %v1069_v47 }
 0x42c   :  { %4289 = vmatpush.msra.mxu2 %v6296_v13 }
 0x42e   :  { %4290 = vmatpush.msra.mxu2 %v6299_v15 }
 0x430   :  { %4291 = vmatpush.msra.mxu2 %v6303_v17  ;;  %v4419_v17 = vld [vmem:[%s7141_s13] ss:$0 sm:$0xff] }
 0x432   :  { %4292 = vmatpush.msra.mxu2 %v6307_v21  ;;  %v1216_v21 = vld [vmem:[%s6065_s17 + $0x18] sm:$0xff]  ;;  %s7142_s17 = sld [smem:[#allocation120_spill]] }
 0x480   :  { %v998_v45 = vpop.f32.mrf.mxu0  ;;  %v1021_v55 = vpop.f32.mrf.mxu1 }
 0x481   :  { %v999_v46 = vadd.f32 %v998_v45, %v977_v42  ;;  %v1022_v6 = vadd.f32 %v1021_v55, %v978_v63  ;;  %v1218_v45 = vld [vmem:[%s6070_s30] sm:$0xf]  ;;  %s5749_s30 = smov 124  }
 0x482   :  { %4201 = vmatpush.msk.msrb.mxu0 %vm794_vm0, %v1218_v45 }
 0x483   :  { %v4191_v48 = vmul.f32 -1.442695, %v999_v46 }
 0x485   :  { %4452 = vpow2.f32 %v4191_v48  ;;  %v4420_v48 = vld [vmem:[%s7142_s17] ss:$0 sm:$0xff] }
 0x488   :  { %v1001_v50 = vpop.f32.mrf.mxu0  ;;  %v1024_v60 = vpop.f32.mrf.mxu1 }
 0x489   :  { %v1002_v51 = vadd.f32 %v1001_v50, %v977_v42  ;;  %v1025_v26 = vadd.f32 %v1024_v60, %v978_v63 }
 0x48b   :  { %v4453_v52 = vpop.eup %4452  ;;  %v4192_v53 = vmul.f32 -1.442695, %v1002_v51 }
 0x48c   :  { %v1033_v54 = vadd.f32 1.0, %v4453_v52 }
 0x48d   :  { %4454 = vpow2.f32 %v4192_v53 }
 0x48e   :  { %4456 = vrcp.f32 %v1033_v54  ;;  %v1046_v62 = vand.u32 2147483648, %v1033_v54  ;;  %v1044_v1 = vand.u32 2147483647, %v1033_v54  ;;  %vm1040_vm6 = vweird.f32 %v1033_v54 }
 0x490   :  { %v1047_v5 = vor.u32 1.1754944e-38, %v1046_v62  ;;  %vm1045_vm8 = vcmp.eq.f32.partialorder %v1044_v1, 8.507059e+37  ;;  %v1242_v14 = vpop.f32.mrf.mxu1  ;;  %v1202_v53 = vpop.f32.mrf.mxu0 }
 0x491   :  { %v1243_v28 = vadd.f32 %v4419_v17, %v1242_v14 }
 0x493   :  { %v4455_v56 = vpop.eup %4454  ;;  %v1250_v33 = vmul.f32 1.442695, %v1243_v28  ;;  %vm1248_vm13 = vcmp.gt.f32.partialorder %v1243_v28, 0.0 }
 0x494   :  { %v4457_v57 = vpop.eup %4456  ;;  %v1034_v58 = vadd.f32 1.0, %v4455_v56 }
 0x495   :  { %v1036_v59 = vmul.f32 %v4457_v57, %v1033_v54  ;;  %vm1041_vm5 = vweird.f32 %v4457_v57  ;;  %v4421_v54 = vld [vmem:[%s7143_s6] ss:$0 sm:$0xff] }
 0x496   :  { %4458 = vrcp.f32 %v1034_v58  ;;  %vm1042_vm7 = vmor %vm1040_vm6, %vm1041_vm5  ;;  %v1061_v13 = vand.u32 2147483648, %v1034_v58  ;;  %v1059_v16 = vand.u32 2147483647, %v1034_v58  ;;  %vm1055_vm10 = vweird.f32 %v1034_v58 }
 0x497   :  { %v1037_v61 = vsub.f32 1.0, %v1036_v59  ;;  %4460 = vpow2.f32 %v1250_v33 }
 0x498   :  { %v1062_v25 = vor.u32 1.1754944e-38, %v1061_v13  ;;  %vm1060_vm12 = vcmp.eq.f32.partialorder %v1059_v16, 8.507059e+37  ;;  %v1245_v35 = vpop.f32.mrf.mxu1 }
 0x499   :  { %v1038_v0 = vmul.f32 %v4457_v57, %v1037_v61  ;;  %v1246_v37 = vadd.f32 %v4419_v17, %v1245_v35  ;;  %v5750_v35 = vmov 4.0  }
 0x49b   :  { %v1039_v3 = vadd.f32 %v4457_v57, %v1038_v0  ;;  %v1252_v38 = vmul.f32 1.442695, %v1246_v37  ;;  %vm1249_vm14 = vcmp.gt.f32.partialorder %v1246_v37, 0.0 }
 0x49c   :  { %v4459_v4 = vpop.eup %4458 }
 0x49d   :  { %v1043_v7 = vsel %vm1042_vm7, %v4457_v57, %v1039_v3  ;;  %v1051_v8 = vmul.f32 %v4459_v4, %v1034_v58  ;;  %vm1056_vm9 = vweird.f32 %v4459_v4  ;;  %v4461_v39 = vpop.eup %4460  ;;  %4462 = vpow2.f32 %v1252_v38 }
 0x49e   :  { %v1048_v9 = vsel %vm1045_vm8, %v1047_v5, %v1043_v7  ;;  %vm1057_vm11 = vmor %vm1055_vm10, %vm1056_vm9  ;;  %v4197_v40 = vadd.f32 -1.0, %v4461_v39 }
 0x49f   :  { %v1065_v11 = vmul.f32 %v1048_v9, %v1022_v6  ;;  %v1052_v12 = vsub.f32 1.0, %v1051_v8 }
 0x4a0   :  { %v1256_v41 = vsel %vm1248_vm13, %v1243_v28, %v4197_v40 }
 0x4a1   :  { %v1053_v15 = vmul.f32 %v4459_v4, %v1052_v12  ;;  %v6345_v19 = vadd.f32 %v1065_v11, %v854_v10  ;;  %v4418_v11 = vld [vmem:[%s7144_s18] ss:$0 sm:$0xff] }
 0x4a2   :  { %v1203_v17 = vadd.f32 %v4418_v11, %v1202_v53 }
 0x4a3   :  { %v1054_v22 = vadd.f32 %v4459_v4, %v1053_v15  ;;  %1103 = vmatmul.f32.vlgmr.msrb.gmra.mxu2 %v6345_v19  ;;  %v1110_v23 = vmul.f32 %v6345_v19, %v6345_v19  ;;  %v4463_v42 = vpop.eup %4462 }
 0x4a4   :  { %1279 = vmatpush.msrb.mxu2 %v1216_v21  ;;  %v4198_v43 = vadd.f32 -1.0, %v4463_v42 }
 0x4a5   :  { %v1058_v27 = vsel %vm1057_vm11, %v4459_v4, %v1054_v22  ;;  %1128 = vmatmul.f32.vlgmr.msrb.gmra.mxu3 %v1110_v23 }
 0x4a6   :  { %v1063_v30 = vsel %vm1060_vm12, %v1062_v25, %v1058_v27  ;;  %1280 = vmatpush.msrb.mxu2 %v1215_v24  ;;  %v1257_v44 = vsel %vm1249_vm14, %v1246_v37, %v4198_v43 }
 0x4a7   :  { %v1066_v18 = vmul.f32 %v1063_v30, %v1025_v26 }
 0x4a8   :  { %1281 = vmatpush.msrb.mxu2 %v1214_v29 }
 0x4a9   :  { %v6355_v34 = vadd.f32 %v1066_v18, %v857_v31 }
 0x4aa   :  { %1282 = vmatpush.msrb.mxu2 %v1213_v32 }
 0x4ab   :  { %1106 = vmatmul.f32.gmra.mxu2 %v6355_v34  ;;  %v1111_v36 = vmul.f32 %v6355_v34, %v6355_v34 }
 0x4ad   :  { %1131 = vmatmul.f32.gmra.mxu3 %v1111_v36 }
 0x4b3   :  { %4194 = vmatmul.msk.f32.vlgmr.msra.gmra.mxu2 %vm829_vm2, %v6289_v20 }
 0x4bb   :  { %4199 = vmatmul.msk.f32.vlgmr.msrb.gmra.mxu2 %vm829_vm2, %v1256_v41 }
 0x4c3   :  { %4200 = vmatmul.msk.f32.gmra.mxu2 %vm829_vm2, %v1257_v44 }
 0x526   :  { %v6366_v46 = vpop.f32.mrf.mxu2 }
 0x52e   :  { %v6368_v20 = vpop.f32.mrf.mxu2 }
 0x536   :  { %v6370_v47 = vpop.f32.mrf.mxu2 }
 0x537   :  { %v1206_v31 = vadd.f32 %v4418_v11, %v6370_v47 }
 0x53e   :  { %v1284_v49 = vpop.f32.mrf.mxu2 }
 0x53f   :  { %v1285_v50 = vadd.f32 %v4420_v48, %v1284_v49 }
 0x541   :  { %4202 = vmatmul.msk.f32.vlgmr.msrb.gmra.mxu0 %vm787_vm1, %v1285_v50 }
 0x546   :  { %v1287_v51 = vpop.f32.mrf.mxu2 }
 0x547   :  { %v1288_v52 = vadd.f32 %v4420_v48, %v1287_v51 }
 0x549   :  { %4203 = vmatmul.msk.f32.gmra.mxu0 %vm787_vm1, %v1288_v52 }
 0x5be   :  { %v1319_v55 = vpop.f32.mrf.mxu0 }
 0x5bf   :  { %v1320_v56 = vadd.f32 %v4421_v54, %v1319_v55 }
 0x5c1   :  { %1365 = vrot.lane.b32.xlu0 %v1320_v56, %s5749_s30  ;;  %v4204_v59 = vmul.f32 -1.442695, %v1320_v56 }
 0x5c3   :  { %4464 = vpow2.f32 %v4204_v59 }
 0x5c6   :  { %v1322_v57 = vpop.f32.mrf.mxu0 }
 0x5c7   :  { %v1323_v58 = vadd.f32 %v4421_v54, %v1322_v57 }
 0x5c9   :  { %1367 = vrot.lane.b32.xlu0 %v1323_v58, %s5749_s30  ;;  %v4205_v60 = vmul.f32 -1.442695, %v1323_v58  ;;  %v4465_v61 = vpop.eup %4464 }
 0x5ca   :  { %v1331_v62 = vadd.f32 1.0, %v4465_v61 }
 0x5cb   :  { %4466 = vpow2.f32 %v4205_v60 }
 0x5cc   :  { %4468 = vrcp.f32 %v1331_v62  ;;  %v1344_v9 = vand.u32 2147483648, %v1331_v62  ;;  %vm1338_vm3 = vweird.f32 %v1331_v62  ;;  %v1342_v10 = vand.u32 2147483647, %v1331_v62 }
 0x5ce   :  { %v1345_v14 = vor.u32 1.1754944e-38, %v1344_v9  ;;  %vm1343_vm5 = vcmp.eq.f32.partialorder %v1342_v10, 8.507059e+37 }
 0x5d1   :  { %v4467_v63 = vpop.eup %4466 }
 0x5d2   :  { %v1332_v0 = vadd.f32 1.0, %v4467_v63  ;;  %v4469_v1 = vpop.eup %4468 }
 0x5d3   :  { %v1334_v2 = vmul.f32 %v4469_v1, %v1331_v62  ;;  %vm1339_vm15 = vweird.f32 %v4469_v1 }
 0x5d4   :  { %4470 = vrcp.f32 %v1332_v0  ;;  %vm1340_vm4 = vmor %vm1338_vm3, %vm1339_vm15  ;;  %v1359_v23 = vand.u32 2147483648, %v1332_v0  ;;  %vm1353_vm7 = vweird.f32 %v1332_v0  ;;  %v1357_v25 = vand.u32 2147483647, %v1332_v0 }
 0x5d5   :  { %v1335_v3 = vsub.f32 1.0, %v1334_v2  ;;  %4472 = vrcp.f32 %v5750_v35  ;;  %v1532_v35 = vld [vmem:[%s7148_s28 + $0x68] sm:$0xff] }
 0x5d6   :  { %v1360_v28 = vor.u32 1.1754944e-38, %v1359_v23  ;;  %vm1358_vm9 = vcmp.eq.f32.partialorder %v1357_v25, 8.507059e+37 }
 0x5d7   :  { %v1336_v5 = vmul.f32 %v4469_v1, %v1335_v3  ;;  %v4422_v3 = vld [vmem:[%s7145_s19] ss:$0 sm:$0xff] }
 0x5d9   :  { %v1337_v7 = vadd.f32 %v4469_v1, %v1336_v5 }
 0x5da   :  { %v4471_v4 = vpop.eup %4470 }
 0x5db   :  { %v1349_v6 = vmul.f32 %v4471_v4, %v1332_v0  ;;  %v1341_v12 = vsel %vm1340_vm4, %v4469_v1, %v1337_v7  ;;  %vm1354_vm6 = vweird.f32 %v4471_v4  ;;  %v4473_v36 = vpop.eup %4472  ;;  %v4423_v7 = vld [vmem:[%s7146_s26] ss:$0 sm:$0xff] }
 0x5dc   :  { %v1346_v16 = vsel %vm1343_vm5, %v1345_v14, %v1341_v12  ;;  %vm1355_vm8 = vmor %vm1353_vm7, %vm1354_vm6  ;;  %v1382_v37 = vmul.f32 4.0, %v4473_v36  ;;  %vm1386_vm10 = vweird.f32 %v4473_v36 }
 0x5dd   :  { %v1350_v8 = vsub.f32 1.0, %v1349_v6 }
 0x5de   :  { %v1383_v38 = vsub.f32 1.0, %v1382_v37  ;;  %v1531_v37 = vld [vmem:[%s7148_s28 + $0x60] sm:$0xff] }
 0x5df   :  { %v1351_v13 = vmul.f32 %v4471_v4, %v1350_v8 }
 0x5e0   :  { %v1384_v39 = vmul.f32 %v4473_v36, %v1383_v38  ;;  %v1530_v38 = vld [vmem:[%s7148_s28 + $0x58] sm:$0xff] }
 0x5e1   :  { %v1352_v22 = vadd.f32 %v4471_v4, %v1351_v13 }
 0x5e2   :  { %v1385_v40 = vadd.f32 %v4473_v36, %v1384_v39  ;;  %v1529_v39 = vld [vmem:[%s7148_s28 + $0x50] sm:$0xff] }
 0x5e3   :  { %v1356_v27 = vsel %vm1355_vm8, %v4471_v4, %v1352_v22 }
 0x5e4   :  { %v1361_v29 = vsel %vm1358_vm9, %v1360_v28, %v1356_v27  ;;  %v1387_v41 = vsel %vm1386_vm10, %v4473_v36, %v1385_v40  ;;  %v1528_v40 = vld [vmem:[%s7148_s28 + $0x48] sm:$0xff] }
 0x633   :  { %v1366_v15 = vpop.permute.xlu0 %1365 }
 0x634   :  { %v1371_v21 = vmul.f32 %v1366_v15, %v1346_v16 }
 0x636   :  { %v1373_v24 = vadd.f32 %v1371_v21, %v1203_v17 }
 0x638   :  { %v1375_v26 = vsel %vm787_vm1, %v1373_v24, 0.0 }
 0x639   :  { %1376 = vadd.xlane.f32.xlu1 %v1375_v26 }
 0x63b   :  { %v1368_v30 = vpop.permute.xlu0 %1367 }
 0x63c   :  { %v1372_v18 = vmul.f32 %v1368_v30, %v1361_v29 }
 0x63e   :  { %v1374_v32 = vadd.f32 %v1372_v18, %v1206_v31  ;;  %v1484_v18 = vld [vmem:[%s7147_s9] sm:$0xf] }
 0x63f   :  { %4206 = vmatpush.msk.msrb.mxu1 %vm794_vm0, %v1484_v18 }
 0x640   :  { %v1378_v33 = vsel %vm787_vm1, %v1374_v32, 0.0 }
 0x641   :  { %1379 = vadd.xlane.f32.xlu1 %v1378_v33  ;;  %v1533_v33 = vld [vmem:[%s7148_s28 + $0x70] sm:$0xff] }
 0x6ac   :  { %v1377_v42 = vpop.xlane.xlu1 %1376 }
 0x6ad   :  { %v1388_v43 = vmul.f32 %v1387_v41, %v1377_v42 }
 0x6af   :  { %v1390_v44 = vsub.f32 %v1373_v24, %v1388_v43 }
 0x6b1   :  { %v1392_v45 = vmul.f32 %v1390_v44, %v1390_v44 }
 0x6b3   :  { %v1394_v47 = vsel %vm787_vm1, %v1392_v45, 0.0 }
 0x6b4   :  { %1395 = vadd.xlane.f32.xlu2 %v1394_v47  ;;  %v1380_v48 = vpop.xlane.xlu1 %1379  ;;  %v1526_v47 = vld [vmem:[%s7148_s28 + $0x38] sm:$0xff] }
 0x6b5   :  { %v1389_v49 = vmul.f32 %v1387_v41, %v1380_v48 }
 0x6b7   :  { %v1391_v50 = vsub.f32 %v1374_v32, %v1389_v49  ;;  %v1534_v32 = vld [vmem:[%s7148_s28 + $0x78] sm:$0xff] }
 0x6b8   :  { %1535 = vmatpush.msra.mxu2 %v1534_v32  ;;  %v1559_v32 = vld [vmem:[#allocation32 + $0x8] sm:$0xff] }
 0x6b9   :  { %v1393_v51 = vmul.f32 %v1391_v50, %v1391_v50 }
 0x6ba   :  { %1536 = vmatpush.msra.mxu2 %v1533_v33 }
 0x6bb   :  { %v1397_v52 = vsel %vm787_vm1, %v1393_v51, 0.0  ;;  %v1525_v51 = vld [vmem:[%s7148_s28 + $0x30] sm:$0xff] }
 0x6bc   :  { %1398 = vadd.xlane.f32.xlu2 %v1397_v52  ;;  %1537 = vmatpush.msra.mxu2 %v1532_v35 }
 0x6be   :  { %1538 = vmatpush.msra.mxu2 %v1531_v37 }
 0x6c0   :  { %1539 = vmatpush.msra.mxu2 %v1530_v38  ;;  %v1141_v38 = vsub.f32 %v6345_v19, %v6366_v46 }
 0x6c2   :  { %1540 = vmatpush.msra.mxu2 %v1529_v39 }
 0x6c4   :  { %1541 = vmatpush.msra.mxu2 %v1528_v40  ;;  %v4424_v40 = vld [vmem:[#allocation55] ss:$0 sm:$0xff] }
 0x727   :  { %v1396_v53 = vpop.xlane.xlu2 %1395 }
 0x728   :  { %v1400_v54 = vmul.f32 %v1396_v53, %v1387_v41  ;;  %v1524_v53 = vld [vmem:[%s7148_s28 + $0x28] sm:$0xff] }
 0x72a   :  { %v1402_v55 = vadd.f32 1e-05, %v1400_v54 }
 0x72c   :  { %4474 = vrsqrt.f32 %v1402_v55  ;;  %vm1410_vm12 = vweird.f32 %v1402_v55 }
 0x72f   :  { %v1399_v56 = vpop.xlane.xlu2 %1398 }
 0x730   :  { %v1401_v57 = vmul.f32 %v1399_v56, %v1387_v41 }
 0x732   :  { %v4475_v58 = vpop.eup %4474  ;;  %v1403_v59 = vadd.f32 1e-05, %v1401_v57 }
 0x733   :  { %v1405_v60 = vmul.f32 %v4475_v58, %v1402_v55  ;;  %vm1411_vm11 = vweird.f32 %v4475_v58 }
 0x734   :  { %4476 = vrsqrt.f32 %v1403_v59  ;;  %vm1412_vm13 = vmor %vm1410_vm12, %vm1411_vm11  ;;  %vm1420_vm15 = vweird.f32 %v1403_v59 }
 0x735   :  { %v1406_v61 = vmul.f32 %v4475_v58, %v1405_v60 }
 0x737   :  { %v1407_v62 = vmul.f32 0.5, %v1406_v61 }
 0x739   :  { %v1408_v63 = vsub.f32 1.5, %v1407_v62  ;;  %v1522_v62 = vld [vmem:[%s7148_s28 + $0x18] sm:$0xff] }
 0x73a   :  { %v4477_v0 = vpop.eup %4476 }
 0x73b   :  { %v1409_v1 = vmul.f32 %v4475_v58, %v1408_v63  ;;  %v1415_v2 = vmul.f32 %v4477_v0, %v1403_v59  ;;  %vm1421_vm14 = vweird.f32 %v4477_v0 }
 0x73c   :  { %vm1422_vm3 = vmor %vm1420_vm15, %vm1421_vm14 }
 0x73d   :  { %v1416_v4 = vmul.f32 %v4477_v0, %v1415_v2  ;;  %v1413_v5 = vsel %vm1412_vm13, %v4475_v58, %v1409_v1  ;;  %v1523_v58 = vld [vmem:[%s7148_s28 + $0x20] sm:$0xff]  ;;  %v1521_v2 = vld [vmem:[%s7148_s28 + $0x10] sm:$0xff] }
 0x73e   :  { %v1424_v6 = vmul.f32 %v1413_v5, %v1390_v44  ;;  %v1527_v44 = vld [vmem:[%s7148_s28 + $0x40] sm:$0xff] }
 0x73f   :  { %v1417_v8 = vmul.f32 0.5, %v1416_v4  ;;  %1542 = vmatpush.msra.mxu2 %v1527_v44 }
 0x740   :  { %v1429_v9 = vmul.f32 %v4422_v3, %v1424_v6 }
 0x741   :  { %v1418_v10 = vsub.f32 1.5, %v1417_v8  ;;  %1543 = vmatpush.msra.mxu2 %v1526_v47  ;;  %v1129_v8 = vpop.f32.mrf.mxu3 }
 0x742   :  { %v1434_v11 = vadd.f32 %v4423_v7, %v1429_v9  ;;  %v1135_v9 = vmul.f32 %v6366_v46, %v6366_v46 }
 0x743   :  { %v1419_v12 = vmul.f32 %v4477_v0, %v1418_v10  ;;  %1544 = vmatpush.msra.mxu2 %v1525_v51 }
 0x744   :  { %v1436_v13 = vsel %vm787_vm1, %v1434_v11, -inf  ;;  %v1137_v10 = vsub.f32 %v1129_v8, %v1135_v9 }
 0x745   :  { %1437 = vmax.xlane.f32.xlu0 %v1436_v13  ;;  %v1423_v14 = vsel %vm1422_vm3, %v4477_v0, %v1419_v12  ;;  %1545 = vmatpush.msra.mxu2 %v1524_v53  ;;  %v1136_v12 = vmul.f32 %v6368_v20, %v6368_v20  ;;  %v1558_v53 = vld [vmem:[#allocation32] sm:$0xff] }
 0x746   :  { %v1425_v15 = vmul.f32 %v1423_v14, %v1391_v50 }
 0x747   :  { %1546 = vmatpush.msra.mxu2 %v1523_v58 }
 0x748   :  { %v1430_v16 = vmul.f32 %v4422_v3, %v1425_v15 }
 0x749   :  { %1547 = vmatpush.msra.mxu2 %v1522_v62  ;;  %v1132_v13 = vpop.f32.mrf.mxu3 }
 0x74a   :  { %v1435_v17 = vadd.f32 %v4423_v7, %v1430_v16  ;;  %v1138_v15 = vsub.f32 %v1132_v13, %v1136_v12 }
 0x74b   :  { %1548 = vmatpush.msra.mxu2 %v1521_v2 }
 0x74c   :  { %v1439_v21 = vsel %vm787_vm1, %v1435_v17, -inf  ;;  %v1140_v16 = vmax.f32 %v1138_v15, 0.0 }
 0x74d   :  { %1440 = vmax.xlane.f32.xlu1 %v1439_v21 }
 0x7b8   :  { %v1438_v22 = vpop.xlane.xlu0 %1437 }
 0x7b9   :  { %v1442_v23 = vsub.f32 %v1434_v11, %v1438_v22  ;;  %v1139_v11 = vmax.f32 %v1137_v10, 0.0  ;;  %v1520_v22 = vld [vmem:[%s7148_s28 + $0x8] sm:$0xff] }
 0x7ba   :  { %1549 = vmatpush.msra.mxu2 %v1520_v22 }
 0x7bb   :  { %v1444_v24 = vmul.f32 1.442695, %v1442_v23  ;;  %v1143_v14 = vadd.f32 1e-05, %v1139_v11 }
 0x7bd   :  { %4478 = vpow2.f32 %v1444_v24  ;;  %v1519_v24 = vld [vmem:[%s7148_s28] sm:$0xff]  ;;  %vm1151_vm11 = vweird.f32 %v1143_v14 }
 0x7be   :  { %1550 = vmatpush.msra.mxu2 %v1519_v24 }
 0x7c0   :  { %v1441_v25 = vpop.xlane.xlu1 %1440 }
 0x7c1   :  { %v1443_v26 = vsub.f32 %v1435_v17, %v1441_v25  ;;  %v1144_v17 = vadd.f32 1e-05, %v1140_v16 }
 0x7c3   :  { %v4479_v27 = vpop.eup %4478  ;;  %v1446_v28 = vmul.f32 1.442695, %v1443_v26  ;;  %vm1161_vm14 = vweird.f32 %v1144_v17 }
 0x7c4   :  { %v1448_v29 = vsel %vm787_vm1, %v4479_v27, 0.0 }
 0x7c5   :  { %4480 = vpow2.f32 %v1446_v28  ;;  %1449 = vadd.xlane.f32.xlu2 %v1448_v29  ;;  %v1561_v29 = vld [vmem:[#allocation32 + $0x18] sm:$0xff] }
 0x7c6   :  { %1584 = vmatpush.msra.mxu3 %v1561_v29 }
 0x7cb   :  { %v6387_v30 = vpop.eup %4480 }
 0x7cc   :  { %v1451_v31 = vsel %vm787_vm1, %v6387_v30, 0.0 }
 0x7cd   :  { %1452 = vadd.xlane.f32.xlu1 %v1451_v31 }
 0x838   :  { %v1450_v36 = vpop.xlane.xlu2 %1449 }
 0x839   :  { %4482 = vrcp.f32 %v1450_v36  ;;  %v1465_v48 = vand.u32 2147483648, %v1450_v36  ;;  %v1463_v50 = vand.u32 2147483647, %v1450_v36  ;;  %vm1459_vm4 = vweird.f32 %v1450_v36 }
 0x83b   :  { %v1466_v55 = vor.u32 1.1754944e-38, %v1465_v48  ;;  %vm1464_vm6 = vcmp.eq.f32.partialorder %v1463_v50, 8.507059e+37 }
 0x83f   :  { %v4483_v41 = vpop.eup %4482 }
 0x840   :  { %v1455_v42 = vmul.f32 %v4483_v41, %v1450_v36  ;;  %v1453_v43 = vpop.xlane.xlu1 %1452  ;;  %vm1460_vm0 = vweird.f32 %v4483_v41 }
 0x841   :  { %4484 = vrcp.f32 %v1453_v43  ;;  %vm1461_vm5 = vmor %vm1459_vm4, %vm1460_vm0  ;;  %v1480_v63 = vand.u32 2147483648, %v1453_v43  ;;  %v1478_v1 = vand.u32 2147483647, %v1453_v43  ;;  %vm1474_vm8 = vweird.f32 %v1453_v43 }
 0x842   :  { %v1456_v45 = vsub.f32 1.0, %v1455_v42  ;;  %4486 = vrsqrt.f32 %v1143_v14 }
 0x843   :  { %v1481_v4 = vor.u32 1.1754944e-38, %v1480_v63  ;;  %vm1479_vm10 = vcmp.eq.f32.partialorder %v1478_v1, 8.507059e+37  ;;  %4488 = vrsqrt.f32 %v1144_v17 }
 0x844   :  { %v1457_v49 = vmul.f32 %v4483_v41, %v1456_v45  ;;  %v1142_v45 = vsub.f32 %v6355_v34, %v6368_v20  ;;  %v6426_v34 = vld [vmem:[#allocation31 + $0x10] sm:$0xff]  ;;  %v6428_v20 = vld [vmem:[#allocation31 + $0x8] sm:$0xff] }
 0x846   :  { %v1458_v52 = vadd.f32 %v4483_v41, %v1457_v49 }
 0x847   :  { %v4485_v54 = vpop.eup %4484 }
 0x848   :  { %v1462_v56 = vsel %vm1461_vm5, %v4483_v41, %v1458_v52  ;;  %v1470_v57 = vmul.f32 %v4485_v54, %v1453_v43  ;;  %vm1475_vm7 = vweird.f32 %v4485_v54  ;;  %v4487_v21 = vpop.eup %4486  ;;  %v4425_v43 = vld [vmem:[#allocation53] ss:$0 sm:$0xff] }
 0x849   :  { %v1467_v59 = vsel %vm1464_vm6, %v1466_v55, %v1462_v56  ;;  %vm1476_vm9 = vmor %vm1474_vm8, %vm1475_vm7  ;;  %v1146_v23 = vmul.f32 %v4487_v21, %v1143_v14  ;;  %v4489_v26 = vpop.eup %4488  ;;  %v6432_v55 = vld [vmem:[#allocation31] sm:$0xff]  ;;  %v5751_v56 = vmov 0.0  }
 0x84a   :  { %v1471_v60 = vsub.f32 1.0, %v1470_v57  ;;  %v1468_v61 = vmul.f32 %v4479_v27, %v1467_v59  ;;  %v1156_v28 = vmul.f32 %v4489_v26, %v1144_v17  ;;  %vm1162_vm13 = vweird.f32 %v4489_v26  ;;  %v4426_v59 = vld [vmem:[#allocation29] ss:$0 sm:$0xff] }
 0x84b   :  { %v1147_v25 = vmul.f32 %v4487_v21, %v1146_v23  ;;  %vm1163_vm15 = vmor %vm1161_vm14, %vm1162_vm13 }
 0x84c   :  { %v1472_v0 = vmul.f32 %v4485_v54, %v1471_v60  ;;  %4207 = vmatmul.msk.f32.vlgmr.msrb.gmra.mxu1 %vm787_vm1, %v1468_v61  ;;  %v1157_v18 = vmul.f32 %v4489_v26, %v1156_v28 }
 0x84d   :  { %v1148_v27 = vmul.f32 0.5, %v1147_v25 }
 0x84e   :  { %v1473_v3 = vadd.f32 %v4485_v54, %v1472_v0  ;;  %v1158_v35 = vmul.f32 0.5, %v1157_v18 }
 0x84f   :  { %v1149_v31 = vsub.f32 1.5, %v1148_v27 }
 0x850   :  { %v1477_v5 = vsel %vm1476_vm9, %v4485_v54, %v1473_v3  ;;  %v1159_v36 = vsub.f32 1.5, %v1158_v35  ;;  %v6420_v54 = vld [vmem:[#allocation31 + $0x18] sm:$0xff] }
 0x851   :  { %v1482_v6 = vsel %vm1479_vm10, %v1481_v4, %v1477_v5  ;;  %v1150_v33 = vmul.f32 %v4487_v21, %v1149_v31  ;;  %1618 = vmatpush.msra.mxu0 %v6420_v54  ;;  %1738 = vmatpush.msra.mxu1 %v6420_v54  ;;  %vm1720_vm10 = vcmask 1041409  }
 0x852   :  { %v1483_v7 = vmul.f32 %v6387_v30, %v1482_v6  ;;  %v1560_v30 = vld [vmem:[#allocation32 + $0x10] sm:$0xff]  ;;  %v1160_v41 = vmul.f32 %v4489_v26, %v1159_v36  ;;  %2446 = vmatpush.msrb.mxu2 %v6420_v54 }
 0x853   :  { %1585 = vmatpush.msra.mxu3 %v1560_v30  ;;  %1619 = vmatpush.msra.mxu0 %v6426_v34 }
 0x854   :  { %4208 = vmatmul.msk.f32.gmra.mxu1 %vm787_vm1, %v1483_v7  ;;  %vm1152_vm1 = vweird.f32 %v4487_v21  ;;  %v1164_v44 = vsel %vm1163_vm15, %v4489_v26, %v1160_v41  ;;  %2447 = vmatpush.msrb.mxu2 %v6426_v34 }
 0x855   :  { %1586 = vmatpush.msra.mxu3 %v1559_v32  ;;  %vm1153_vm12 = vmor %vm1151_vm11, %vm1152_vm1  ;;  %v1166_v48 = vmul.f32 %v1164_v44, %v1142_v45  ;;  %1739 = vmatpush.msra.mxu1 %v6426_v34 }
 0x856   :  { %v1154_v37 = vsel %vm1153_vm12, %v4487_v21, %v1150_v33  ;;  %1620 = vmatpush.msra.mxu0 %v6428_v20  ;;  %2448 = vmatpush.msrb.mxu2 %v6428_v20 }
 0x857   :  { %v1165_v39 = vmul.f32 %v1154_v37, %v1141_v38  ;;  %v1171_v51 = vmul.f32 %v4424_v40, %v1166_v48  ;;  %1587 = vmatpush.msra.mxu3 %v1558_v53  ;;  %1740 = vmatpush.msra.mxu1 %v6428_v20 }
 0x858   :  { %1621 = vmatpush.msra.mxu0 %v6432_v55  ;;  %2449 = vmatpush.msrb.mxu2 %v6432_v55 }
 0x859   :  { %v1170_v42 = vmul.f32 %v4424_v40, %v1165_v39  ;;  %v1176_v52 = vadd.f32 %v4425_v43, %v1171_v51  ;;  %2092 = vmatpush.msrb.mxu3 %v6420_v54  ;;  %1741 = vmatpush.msra.mxu1 %v6432_v55 }
 0x85a   :  { %1622 = vmatmul.f32.vlgmr.msra.gmra.mxu0 %v5751_v56 }
 0x85b   :  { %v1175_v47 = vadd.f32 %v4425_v43, %v1170_v42  ;;  %2093 = vmatpush.msrb.mxu3 %v6426_v34  ;;  %1974 = vmatpush.msrb.mxu1 %v6420_v54 }
 0x85c   :  { %1856 = vmatpush.msrb.mxu0 %v6420_v54 }
 0x85d   :  { %2094 = vmatpush.msrb.mxu3 %v6428_v20  ;;  %1975 = vmatpush.msrb.mxu1 %v6426_v34 }
 0x85e   :  { %1857 = vmatpush.msrb.mxu0 %v6426_v34 }
 0x85f   :  { %2095 = vmatpush.msrb.mxu3 %v6432_v55  ;;  %1976 = vmatpush.msrb.mxu1 %v6428_v20 }
 0x860   :  { %1858 = vmatpush.msrb.mxu0 %v6428_v20 }
 0x861   :  { %1977 = vmatpush.msrb.mxu1 %v6432_v55 }
 0x862   :  { %1859 = vmatpush.msrb.mxu0 %v6432_v55 }
 0x864   :  { %2210 = vmatpush.msra.mxu0 %v6420_v54 }
 0x866   :  { %2211 = vmatpush.msra.mxu0 %v6426_v34 }
 0x868   :  { %2212 = vmatpush.msra.mxu0 %v6428_v20 }
 0x86a   :  { %2213 = vmatpush.msra.mxu0 %v6432_v55 }
 0x8c9   :  { %v1511_v49 = vpop.f32.mrf.mxu1 }
 0x8ca   :  { %v1517_v50 = vmul.f32 %v1511_v49, %v1175_v47 }
 0x8cc   :  { %1551 = vmatmul.f32.vlgmr.msra.gmra.mxu2 %v1517_v50 }
 0x8d1   :  { %v1514_v19 = vpop.f32.mrf.mxu1 }
 0x8d2   :  { %v1518_v46 = vmul.f32 %v1514_v19, %v1176_v52 }
 0x8d4   :  { %1554 = vmatmul.f32.gmra.mxu2 %v1518_v46 }
 0x8d7   :  { %v1623_v63 = vpop.f32.mrf.mxu0 }
 0x8d8   :  { %v1627_v3 = vrot.slane %v1623_v63, 1 }
 0x94f   :  { %v6456_v57 = vpop.f32.mrf.mxu2 }
 0x950   :  { %4209 = vmatmul.msk.f32.vlgmr.msra.gmra.mxu3 %vm829_vm2, %v6456_v57 }
 0x957   :  { %v6460_v58 = vpop.f32.mrf.mxu2 }
 0x958   :  { %4210 = vmatmul.msk.f32.gmra.mxu3 %vm829_vm2, %v6460_v58 }
 0x9d3   :  { %v1589_v60 = vpop.f32.mrf.mxu3 }
 0x9d4   :  { %v1590_v61 = vadd.f32 %v4426_v59, %v1589_v60 }
 0x9d6   :  { %1595 = vst [vmem:[#allocation2] sm:$0xff] %v1590_v61 }
 0x9db   :  { %v1592_v62 = vpop.f32.mrf.mxu3 }
 0x9dc   :  { %v1593_v0 = vadd.f32 %v4426_v59, %v1592_v62 }
 0x9dd   :  { %v1601_v1 = vld [vmem:[#allocation2] sm:$0x1]  ;;  %v1717_v59 = vld [vmem:[#allocation2 + $0x1] sm:$0x1] }
 0x9de   :  { %1596 = vst [vmem:[#allocation2 + $0x8] sm:$0xff] %v1593_v0  ;;  %v1630_v2 = vadd.f32 %v1623_v63, %v1601_v1 }
 0x9e0   :  { %4490 = vtanh.f32 %v1630_v2  ;;  %v4211_v11 = vmul.f32 -1.442695, %v1630_v2 }
 0x9e5   :  { %v1602_v4 = vld [vmem:[#allocation2 + $0x8] sm:$0x1]  ;;  %v1718_v63 = vld [vmem:[#allocation2 + $0x9] sm:$0x1] }
 0x9e6   :  { %v4491_v5 = vpop.eup %4490  ;;  %v1631_v6 = vadd.f32 %v1627_v3, %v1602_v4 }
 0x9e7   :  { %1676 = vrot.lane.b32.xlu1 %v4491_v5, %s5752_s1 }
 0x9e8   :  { %4492 = vtanh.f32 %v1631_v6  ;;  %v4212_v8 = vmul.f32 -1.442695, %v1631_v6 }
 0x9ea   :  { %4494 = vpow2.f32 %v4212_v8 }
 0x9ee   :  { %v4493_v7 = vpop.eup %4492 }
 0x9ef   :  { %1678 = vrot.lane.b32.xlu2 %v4493_v7, %s5752_s1 }
 0x9f0   :  { %v4495_v9 = vpop.eup %4494 }
 0x9f1   :  { %v1639_v10 = vadd.f32 1.0, %v4495_v9 }
 0x9f3   :  { %4496 = vrcp.f32 %v1639_v10  ;;  %v1666_v23 = vand.u32 2147483648, %v1639_v10  ;;  %vm1660_vm0 = vweird.f32 %v1639_v10  ;;  %v1664_v24 = vand.u32 2147483647, %v1639_v10 }
 0x9f4   :  { %4498 = vpow2.f32 %v4211_v11 }
 0x9f5   :  { %v1667_v27 = vor.u32 1.1754944e-38, %v1666_v23  ;;  %vm1665_vm5 = vcmp.eq.f32.partialorder %v1664_v24, 8.507059e+37 }
 0x9f9   :  { %v4497_v12 = vpop.eup %4496 }
 0x9fa   :  { %v4499_v13 = vpop.eup %4498  ;;  %v1656_v14 = vmul.f32 %v4497_v12, %v1639_v10  ;;  %vm1661_vm3 = vweird.f32 %v4497_v12 }
 0x9fb   :  { %v1638_v15 = vadd.f32 1.0, %v4499_v13  ;;  %vm1662_vm4 = vmor %vm1660_vm0, %vm1661_vm3 }
 0x9fc   :  { %v1657_v16 = vsub.f32 1.0, %v1656_v14 }
 0x9fd   :  { %4500 = vrcp.f32 %v1638_v15  ;;  %v1651_v33 = vand.u32 2147483648, %v1638_v15  ;;  %vm1645_vm7 = vweird.f32 %v1638_v15  ;;  %v1649_v35 = vand.u32 2147483647, %v1638_v15 }
 0x9fe   :  { %v1658_v17 = vmul.f32 %v4497_v12, %v1657_v16 }
 0x9ff   :  { %v1652_v37 = vor.u32 1.1754944e-38, %v1651_v33  ;;  %vm1650_vm9 = vcmp.eq.f32.partialorder %v1649_v35, 8.507059e+37 }
 0xa00   :  { %v1659_v21 = vadd.f32 %v4497_v12, %v1658_v17 }
 0xa02   :  { %v1663_v25 = vsel %vm1662_vm4, %v4497_v12, %v1659_v21 }
 0xa03   :  { %v4501_v22 = vpop.eup %4500  ;;  %v1668_v29 = vsel %vm1665_vm5, %v1667_v27, %v1663_v25 }
 0xa04   :  { %v1641_v26 = vmul.f32 %v4501_v22, %v1638_v15  ;;  %vm1646_vm6 = vweird.f32 %v4501_v22  ;;  %v1673_v41 = vmul.f32 0.0, %v1668_v29 }
 0xa05   :  { %vm1647_vm8 = vmor %vm1645_vm7, %vm1646_vm6 }
 0xa06   :  { %v1642_v31 = vsub.f32 1.0, %v1641_v26 }
 0xa08   :  { %v1643_v18 = vmul.f32 %v4501_v22, %v1642_v31 }
 0xa0a   :  { %v1644_v32 = vadd.f32 %v4501_v22, %v1643_v18 }
 0xa0c   :  { %v1648_v36 = vsel %vm1647_vm8, %v4501_v22, %v1644_v32 }
 0xa0d   :  { %v1653_v39 = vsel %vm1650_vm9, %v1652_v37, %v1648_v36 }
 0xa0e   :  { %v1672_v45 = vmul.f32 0.0, %v1653_v39 }
 0xa49   :  { %v1679_v28 = vpop.permute.xlu2 %1678 }
 0xa4a   :  { %v1683_v30 = vmul.f32 %v1679_v28, %v1668_v29 }
 0xa4c   :  { %1688 = vrot.lane.b32.xlu2 %v1683_v30, %s5753_s5 }
 0xa59   :  { %v1677_v38 = vpop.permute.xlu1 %1676 }
 0xa5a   :  { %v1682_v40 = vmul.f32 %v1677_v38, %v1653_v39 }
 0xa5c   :  { %1686 = vrot.lane.b32.xlu2 %v1682_v40, %s5753_s5 }
 0xaa6   :  { %v1689_v42 = vpop.permute.xlu2 %1688 }
 0xaa7   :  { %v6468_v43 = vadd.f32 %v1689_v42, %v1673_v41 }
 0xaa9   :  { %4502 = vtanh.f32 %v6468_v43 }
 0xaaf   :  { %v4503_v44 = vpop.eup %4502 }
 0xab0   :  { %1700 = vrot.lane.b32.xlu1 %v4503_v44, %s5752_s1 }
 0xab6   :  { %v1687_v47 = vpop.permute.xlu2 %1686 }
 0xab7   :  { %v6472_v48 = vadd.f32 %v1687_v47, %v1672_v45 }
 0xab9   :  { %4504 = vtanh.f32 %v6472_v48 }
 0xabf   :  { %v4505_v49 = vpop.eup %4504 }
 0xac0   :  { %1698 = vrot.lane.b32.xlu0 %v4505_v49, %s5752_s1 }
 0xb22   :  { %v1701_v50 = vpop.permute.xlu1 %1700 }
 0xb23   :  { %v6476_v51 = vmul.f32 %v1701_v50, %v1668_v29 }
 0xb25   :  { %v1719_v19 = vrot.slane %v6476_v51, 7 }
 0xb32   :  { %v1699_v52 = vpop.permute.xlu0 %1698 }
 0xb33   :  { %v6479_v46 = vmul.f32 %v1699_v52, %v1653_v39 }
 0xb35   :  { %v1721_v53 = vsel %vm1720_vm10, %v1719_v19, %v6479_v46  ;;  %v1837_v19 = vld [vmem:[#allocation2 + $0xa] sm:$0x1] }
 0xb36   :  { %1722 = vrot.lane.b32.xlu2 %v1721_v53, %s5753_s5 }
 0xb90   :  { %v1723_v56 = vpop.permute.xlu2 %1722 }
 0xb91   :  { %4213 = vmatmul.msk.f32.vlgmr.msra.gmra.mxu1 %vm829_vm2, %v1723_v56 }
 0xb92   :  { %2328 = vmatpush.msra.mxu1 %v6420_v54 }
 0xb94   :  { %2329 = vmatpush.msra.mxu1 %v6426_v34 }
 0xb96   :  { %2330 = vmatpush.msra.mxu1 %v6428_v20 }
 0xb98   :  { %2331 = vmatpush.msra.mxu1 %v6432_v55 }
 0xc0e   :  { %v1743_v60 = vpop.f32.mrf.mxu1 }
 0xc0f   :  { %v1747_v61 = vrot.slane %v1743_v60, 1  ;;  %v1750_v62 = vadd.f32 %v1743_v60, %v1717_v59 }
 0xc11   :  { %v1751_v0 = vadd.f32 %v1747_v61, %v1718_v63  ;;  %4506 = vtanh.f32 %v1750_v62  ;;  %v4214_v54 = vmul.f32 -1.442695, %v1750_v62 }
 0xc13   :  { %4508 = vtanh.f32 %v1751_v0  ;;  %v4215_v4 = vmul.f32 -1.442695, %v1751_v0 }
 0xc14   :  { %4510 = vpow2.f32 %v4214_v54 }
 0xc17   :  { %v4507_v1 = vpop.eup %4506 }
 0xc18   :  { %1796 = vrot.lane.b32.xlu2 %v4507_v1, %s5752_s1 }
 0xc19   :  { %v4509_v2 = vpop.eup %4508 }
 0xc1a   :  { %1798 = vrot.lane.b32.xlu1 %v4509_v2, %s5752_s1  ;;  %v4511_v34 = vpop.eup %4510 }
 0xc1b   :  { %v1758_v20 = vadd.f32 1.0, %v4511_v34 }
 0xc1d   :  { %4512 = vrcp.f32 %v1758_v20  ;;  %v1771_v9 = vand.u32 2147483648, %v1758_v20  ;;  %vm1765_vm11 = vweird.f32 %v1758_v20  ;;  %v1769_v11 = vand.u32 2147483647, %v1758_v20 }
 0xc1e   :  { %4514 = vpow2.f32 %v4215_v4 }
 0xc1f   :  { %v1772_v13 = vor.u32 1.1754944e-38, %v1771_v9  ;;  %vm1770_vm13 = vcmp.eq.f32.partialorder %v1769_v11, 8.507059e+37 }
 0xc23   :  { %v4513_v55 = vpop.eup %4512 }
 0xc24   :  { %v1761_v3 = vmul.f32 %v4513_v55, %v1758_v20  ;;  %v4515_v7 = vpop.eup %4514  ;;  %vm1766_vm1 = vweird.f32 %v4513_v55 }
 0xc25   :  { %v1759_v10 = vadd.f32 1.0, %v4515_v7  ;;  %vm1767_vm12 = vmor %vm1765_vm11, %vm1766_vm1 }
 0xc26   :  { %v1762_v5 = vsub.f32 1.0, %v1761_v3 }
 0xc27   :  { %4516 = vrcp.f32 %v1759_v10  ;;  %v1786_v25 = vand.u32 2147483648, %v1759_v10  ;;  %vm1780_vm15 = vweird.f32 %v1759_v10  ;;  %v1784_v26 = vand.u32 2147483647, %v1759_v10 }
 0xc28   :  { %v1763_v6 = vmul.f32 %v4513_v55, %v1762_v5 }
 0xc29   :  { %v1787_v28 = vor.u32 1.1754944e-38, %v1786_v25  ;;  %vm1785_vm0 = vcmp.eq.f32.partialorder %v1784_v26, 8.507059e+37 }
 0xc2a   :  { %v1764_v8 = vadd.f32 %v4513_v55, %v1763_v6 }
 0xc2c   :  { %v1768_v12 = vsel %vm1767_vm12, %v4513_v55, %v1764_v8 }
 0xc2d   :  { %v1773_v15 = vsel %vm1770_vm13, %v1772_v13, %v1768_v12  ;;  %v4517_v17 = vpop.eup %4516 }
 0xc2e   :  { %v1776_v21 = vmul.f32 %v4517_v17, %v1759_v10  ;;  %vm1781_vm14 = vweird.f32 %v4517_v17  ;;  %v1792_v18 = vmul.f32 %v1773_v15, %v6472_v48  ;;  %v1836_v48 = vld [vmem:[#allocation2 + $0x2] sm:$0x1] }
 0xc2f   :  { %vm1782_vm3 = vmor %vm1780_vm15, %vm1781_vm14 }
 0xc30   :  { %v1777_v22 = vsub.f32 1.0, %v1776_v21 }
 0xc32   :  { %v1778_v23 = vmul.f32 %v4517_v17, %v1777_v22 }
 0xc34   :  { %v1779_v24 = vadd.f32 %v4517_v17, %v1778_v23 }
 0xc36   :  { %v1783_v27 = vsel %vm1782_vm3, %v4517_v17, %v1779_v24 }
 0xc37   :  { %v1788_v30 = vsel %vm1785_vm0, %v1787_v28, %v1783_v27 }
 0xc38   :  { %v1793_v36 = vmul.f32 %v1788_v30, %v6468_v43 }
 0xc72   :  { %v1797_v14 = vpop.permute.xlu2 %1796 }
 0xc73   :  { %v1802_v16 = vmul.f32 %v1797_v14, %v1773_v15 }
 0xc75   :  { %1806 = vrot.lane.b32.xlu0 %v1802_v16, %s5753_s5 }
 0xc8c   :  { %v1799_v29 = vpop.permute.xlu1 %1798 }
 0xc8d   :  { %v1803_v31 = vmul.f32 %v1799_v29, %v1788_v30 }
 0xc8f   :  { %1808 = vrot.lane.b32.xlu1 %v1803_v31, %s5753_s5 }
 0xce7   :  { %v1807_v32 = vpop.permute.xlu0 %1806 }
 0xce8   :  { %v6494_v33 = vadd.f32 %v1807_v32, %v1792_v18 }
 0xcea   :  { %4518 = vtanh.f32 %v6494_v33 }
 0xcf0   :  { %v4519_v35 = vpop.eup %4518 }
 0xcf1   :  { %1818 = vrot.lane.b32.xlu1 %v4519_v35, %s5752_s1 }
 0xd01   :  { %v1809_v37 = vpop.permute.xlu1 %1808 }
 0xd02   :  { %v6499_v38 = vadd.f32 %v1809_v37, %v1793_v36 }
 0xd04   :  { %4520 = vtanh.f32 %v6499_v38 }
 0xd0a   :  { %v4521_v39 = vpop.eup %4520 }
 0xd0b   :  { %1820 = vrot.lane.b32.xlu2 %v4521_v39, %s5752_s1 }
 0xd63   :  { %v1819_v40 = vpop.permute.xlu1 %1818 }
 0xd64   :  { %v6505_v44 = vmul.f32 %v1819_v40, %v1773_v15  ;;  %v1954_v40 = vld [vmem:[#allocation2 + $0x3] sm:$0x1] }
 0xd65   :  { %v1821_v41 = vpop.permute.xlu2 %1820 }
 0xd66   :  { %v6503_v42 = vmul.f32 %v1821_v41, %v1788_v30 }
 0xd68   :  { %v1838_v45 = vrot.slane %v6503_v42, 7 }
 0xd6a   :  { %v1839_v47 = vsel %vm1720_vm10, %v1838_v45, %v6505_v44 }
 0xd6b   :  { %1840 = vrot.lane.b32.xlu0 %v1839_v47, %s5753_s5 }
 0xddd   :  { %v1841_v43 = vpop.permute.xlu0 %1840 }
 0xdde   :  { %4216 = vmatmul.msk.f32.vlgmr.msrb.gmra.mxu0 %vm829_vm2, %v1841_v43  ;;  %v1955_v43 = vld [vmem:[#allocation2 + $0xb] sm:$0x1] }
 0xe5b   :  { %v1861_v49 = vpop.f32.mrf.mxu0 }
 0xe5c   :  { %v1865_v50 = vrot.slane %v1861_v49, 1  ;;  %v1868_v52 = vadd.f32 %v1861_v49, %v1836_v48 }
 0xe5e   :  { %v1869_v53 = vadd.f32 %v1865_v50, %v1837_v19  ;;  %4522 = vtanh.f32 %v1868_v52  ;;  %v4217_v63 = vmul.f32 -1.442695, %v1868_v52 }
 0xe60   :  { %4524 = vtanh.f32 %v1869_v53  ;;  %v4218_v60 = vmul.f32 -1.442695, %v1869_v53 }
 0xe62   :  { %4526 = vpow2.f32 %v4218_v60 }
 0xe64   :  { %v4523_v56 = vpop.eup %4522 }
 0xe65   :  { %1914 = vrot.lane.b32.xlu1 %v4523_v56, %s5752_s1 }
 0xe66   :  { %v4525_v59 = vpop.eup %4524 }
 0xe67   :  { %1916 = vrot.lane.b32.xlu2 %v4525_v59, %s5752_s1 }
 0xe68   :  { %v4527_v61 = vpop.eup %4526 }
 0xe69   :  { %v1877_v62 = vadd.f32 1.0, %v4527_v61 }
 0xe6b   :  { %4528 = vrcp.f32 %v1877_v62  ;;  %v1904_v3 = vand.u32 2147483648, %v1877_v62  ;;  %vm1898_vm5 = vweird.f32 %v1877_v62  ;;  %v1902_v4 = vand.u32 2147483647, %v1877_v62 }
 0xe6c   :  { %4530 = vpow2.f32 %v4217_v63 }
 0xe6d   :  { %v1905_v6 = vor.u32 1.1754944e-38, %v1904_v3  ;;  %vm1903_vm7 = vcmp.eq.f32.partialorder %v1902_v4, 8.507059e+37 }
 0xe71   :  { %v4529_v0 = vpop.eup %4528 }
 0xe72   :  { %v1894_v1 = vmul.f32 %v4529_v0, %v1877_v62  ;;  %v4531_v54 = vpop.eup %4530  ;;  %vm1899_vm4 = vweird.f32 %v4529_v0 }
 0xe73   :  { %v1876_v34 = vadd.f32 1.0, %v4531_v54  ;;  %vm1900_vm6 = vmor %vm1898_vm5, %vm1899_vm4 }
 0xe74   :  { %v1895_v2 = vsub.f32 1.0, %v1894_v1 }
 0xe75   :  { %4532 = vrcp.f32 %v1876_v34  ;;  %v1889_v15 = vand.u32 2147483648, %v1876_v34  ;;  %vm1883_vm9 = vweird.f32 %v1876_v34  ;;  %v1887_v16 = vand.u32 2147483647, %v1876_v34 }
 0xe76   :  { %v1896_v20 = vmul.f32 %v4529_v0, %v1895_v2 }
 0xe77   :  { %v1890_v21 = vor.u32 1.1754944e-38, %v1889_v15  ;;  %vm1888_vm11 = vcmp.eq.f32.partialorder %v1887_v16, 8.507059e+37 }
 0xe78   :  { %v1897_v55 = vadd.f32 %v4529_v0, %v1896_v20 }
 0xe7a   :  { %v1901_v5 = vsel %vm1900_vm6, %v4529_v0, %v1897_v55 }
 0xe7b   :  { %v4533_v7 = vpop.eup %4532  ;;  %v1906_v9 = vsel %vm1903_vm7, %v1905_v6, %v1901_v5 }
 0xe7c   :  { %v1879_v11 = vmul.f32 %v4533_v7, %v1876_v34  ;;  %vm1884_vm8 = vweird.f32 %v4533_v7  ;;  %v1911_v28 = vmul.f32 %v1906_v9, %v6499_v38 }
 0xe7d   :  { %vm1885_vm1 = vmor %vm1883_vm9, %vm1884_vm8 }
 0xe7e   :  { %v1880_v12 = vsub.f32 1.0, %v1879_v11 }
 0xe80   :  { %v1881_v13 = vmul.f32 %v4533_v7, %v1880_v12 }
 0xe82   :  { %v1882_v14 = vadd.f32 %v4533_v7, %v1881_v13 }
 0xe84   :  { %v1886_v17 = vsel %vm1885_vm1, %v4533_v7, %v1882_v14 }
 0xe85   :  { %v1891_v23 = vsel %vm1888_vm11, %v1890_v21, %v1886_v17 }
 0xe86   :  { %v1910_v25 = vmul.f32 %v1891_v23, %v6494_v33 }
 0xec1   :  { %v1917_v8 = vpop.permute.xlu2 %1916 }
 0xec2   :  { %v1921_v10 = vmul.f32 %v1917_v8, %v1906_v9 }
 0xec4   :  { %1926 = vrot.lane.b32.xlu0 %v1921_v10, %s5753_s5 }
 0xed7   :  { %v1915_v22 = vpop.permute.xlu1 %1914 }
 0xed8   :  { %v1920_v24 = vmul.f32 %v1915_v22, %v1891_v23 }
 0xeda   :  { %1924 = vrot.lane.b32.xlu2 %v1920_v24, %s5753_s5 }
 0xf34   :  { %v1925_v26 = vpop.permute.xlu2 %1924 }
 0xf35   :  { %v6517_v27 = vadd.f32 %v1925_v26, %v1910_v25 }
 0xf36   :  { %v1927_v29 = vpop.permute.xlu0 %1926 }
 0xf37   :  { %4534 = vtanh.f32 %v6517_v27  ;;  %v6521_v30 = vadd.f32 %v1927_v29, %v1911_v28 }
 0xf39   :  { %4536 = vtanh.f32 %v6521_v30 }
 0xf3d   :  { %v4535_v31 = vpop.eup %4534 }
 0xf3e   :  { %1936 = vrot.lane.b32.xlu0 %v4535_v31, %s5752_s1 }
 0xf3f   :  { %v4537_v18 = vpop.eup %4536 }
 0xf40   :  { %1938 = vrot.lane.b32.xlu1 %v4537_v18, %s5752_s1 }
 0xfb0   :  { %v1937_v32 = vpop.permute.xlu0 %1936 }
 0xfb1   :  { %v6528_v36 = vmul.f32 %v1937_v32, %v1891_v23 }
 0xfb2   :  { %v1939_v33 = vpop.permute.xlu1 %1938 }
 0xfb3   :  { %v6526_v35 = vmul.f32 %v1939_v33, %v1906_v9 }
 0xfb5   :  { %v1956_v37 = vrot.slane %v6526_v35, 7 }
 0xfb7   :  { %v1957_v38 = vsel %vm1720_vm10, %v1956_v37, %v6528_v36  ;;  %v2072_v37 = vld [vmem:[#allocation2 + $0x4] sm:$0x1] }
 0xfb8   :  { %1958 = vrot.lane.b32.xlu2 %v1957_v38, %s5753_s5 }
0x1012   :  { %v1959_v39 = vpop.permute.xlu2 %1958 }
0x1013   :  { %4219 = vmatmul.msk.f32.vlgmr.msrb.gmra.mxu1 %vm829_vm2, %v1959_v39 }
0x1090   :  { %v1979_v41 = vpop.f32.mrf.mxu1 }
0x1091   :  { %v1983_v45 = vrot.slane %v1979_v41, 1  ;;  %v1986_v47 = vadd.f32 %v1979_v41, %v1954_v40  ;;  %v2073_v41 = vld [vmem:[#allocation2 + $0xc] sm:$0x1] }
0x1093   :  { %v1987_v48 = vadd.f32 %v1983_v45, %v1955_v43  ;;  %4538 = vtanh.f32 %v1986_v47  ;;  %v4220_v52 = vmul.f32 -1.442695, %v1986_v47 }
0x1095   :  { %4540 = vtanh.f32 %v1987_v48  ;;  %v4221_v19 = vmul.f32 -1.442695, %v1987_v48 }
0x1096   :  { %4542 = vpow2.f32 %v4220_v52 }
0x1097   :  { %4544 = vpow2.f32 %v4221_v19 }
0x1099   :  { %v4539_v49 = vpop.eup %4538 }
0x109a   :  { %2032 = vrot.lane.b32.xlu0 %v4539_v49, %s5752_s1 }
0x109b   :  { %v4541_v50 = vpop.eup %4540 }
0x109c   :  { %2034 = vrot.lane.b32.xlu1 %v4541_v50, %s5752_s1  ;;  %v4543_v53 = vpop.eup %4542 }
0x109d   :  { %v4545_v56 = vpop.eup %4544  ;;  %v1994_v59 = vadd.f32 1.0, %v4543_v53 }
0x109e   :  { %v1995_v60 = vadd.f32 1.0, %v4545_v56 }
0x109f   :  { %4546 = vrcp.f32 %v1994_v59  ;;  %v2007_v55 = vand.u32 2147483648, %v1994_v59  ;;  %vm2001_vm13 = vweird.f32 %v1994_v59  ;;  %v2005_v3 = vand.u32 2147483647, %v1994_v59 }
0x10a0   :  { %4548 = vrcp.f32 %v1995_v60  ;;  %v2022_v6 = vand.u32 2147483648, %v1995_v60  ;;  %vm2016_vm3 = vweird.f32 %v1995_v60  ;;  %v2020_v8 = vand.u32 2147483647, %v1995_v60 }
0x10a1   :  { %v2008_v7 = vor.u32 1.1754944e-38, %v2007_v55  ;;  %vm2006_vm0 = vcmp.eq.f32.partialorder %v2005_v3, 8.507059e+37 }
0x10a2   :  { %v2023_v13 = vor.u32 1.1754944e-38, %v2022_v6  ;;  %vm2021_vm5 = vcmp.eq.f32.partialorder %v2020_v8, 8.507059e+37 }
0x10a5   :  { %v4547_v61 = vpop.eup %4546 }
0x10a6   :  { %v4549_v62 = vpop.eup %4548  ;;  %v1997_v63 = vmul.f32 %v4547_v61, %v1994_v59  ;;  %vm2002_vm12 = vweird.f32 %v4547_v61 }
0x10a7   :  { %v2012_v0 = vmul.f32 %v4549_v62, %v1995_v60  ;;  %vm2003_vm14 = vmor %vm2001_vm13, %vm2002_vm12  ;;  %vm2017_vm15 = vweird.f32 %v4549_v62 }
0x10a8   :  { %v1998_v1 = vsub.f32 1.0, %v1997_v63  ;;  %vm2018_vm4 = vmor %vm2016_vm3, %vm2017_vm15 }
0x10a9   :  { %v2013_v2 = vsub.f32 1.0, %v2012_v0 }
0x10aa   :  { %v1999_v54 = vmul.f32 %v4547_v61, %v1998_v1 }
0x10ab   :  { %v2014_v34 = vmul.f32 %v4549_v62, %v2013_v2 }
0x10ac   :  { %v2000_v20 = vadd.f32 %v4547_v61, %v1999_v54 }
0x10ad   :  { %v2015_v4 = vadd.f32 %v4549_v62, %v2014_v34 }
0x10ae   :  { %v2004_v5 = vsel %vm2003_vm14, %v4547_v61, %v2000_v20 }
0x10af   :  { %v2009_v10 = vsel %vm2006_vm0, %v2008_v7, %v2004_v5  ;;  %v2019_v11 = vsel %vm2018_vm4, %v4549_v62, %v2015_v4 }
0x10b0   :  { %v2024_v15 = vsel %vm2021_vm5, %v2023_v13, %v2019_v11  ;;  %v2028_v24 = vmul.f32 %v2009_v10, %v6517_v27 }
0x10b1   :  { %v2029_v17 = vmul.f32 %v2024_v15, %v6521_v30 }
0x110c   :  { %v2033_v9 = vpop.permute.xlu0 %2032 }
0x110d   :  { %v2038_v12 = vmul.f32 %v2033_v9, %v2009_v10 }
0x110e   :  { %v2035_v14 = vpop.permute.xlu1 %2034 }
0x110f   :  { %2042 = vrot.lane.b32.xlu1 %v2038_v12, %s5753_s5  ;;  %v2039_v16 = vmul.f32 %v2035_v14, %v2024_v15 }
0x1111   :  { %2044 = vrot.lane.b32.xlu2 %v2039_v16, %s5753_s5 }
0x116b   :  { %v2045_v21 = vpop.permute.xlu2 %2044 }
0x116c   :  { %v6540_v22 = vadd.f32 %v2045_v21, %v2029_v17 }
0x116e   :  { %4550 = vtanh.f32 %v6540_v22 }
0x1174   :  { %v4551_v23 = vpop.eup %4550 }
0x1175   :  { %2056 = vrot.lane.b32.xlu0 %v4551_v23, %s5752_s1 }
0x1181   :  { %v2043_v25 = vpop.permute.xlu1 %2042 }
0x1182   :  { %v6545_v26 = vadd.f32 %v2043_v25, %v2028_v24 }
0x1184   :  { %4552 = vtanh.f32 %v6545_v26 }
0x118a   :  { %v4553_v28 = vpop.eup %4552 }
0x118b   :  { %2054 = vrot.lane.b32.xlu2 %v4553_v28, %s5752_s1 }
0x11e5   :  { %v2055_v29 = vpop.permute.xlu2 %2054 }
0x11e6   :  { %v6551_v18 = vmul.f32 %v2055_v29, %v2009_v10 }
0x11e7   :  { %v2057_v30 = vpop.permute.xlu0 %2056 }
0x11e8   :  { %v6549_v31 = vmul.f32 %v2057_v30, %v2024_v15 }
0x11ea   :  { %v2074_v32 = vrot.slane %v6549_v31, 7 }
0x11ec   :  { %v2075_v33 = vsel %vm1720_vm10, %v2074_v32, %v6551_v18 }
0x11ed   :  { %2076 = vrot.lane.b32.xlu1 %v2075_v33, %s5753_s5 }
0x125f   :  { %v2077_v27 = vpop.permute.xlu1 %2076 }
0x1260   :  { %4222 = vmatmul.msk.f32.vlgmr.msrb.gmra.mxu3 %vm829_vm2, %v2077_v27  ;;  %v2190_v27 = vld [vmem:[#allocation2 + $0x5] sm:$0x1] }
0x12e3   :  { %v2097_v38 = vpop.f32.mrf.mxu3 }
0x12e4   :  { %v2101_v39 = vrot.slane %v2097_v38, 1  ;;  %v2104_v40 = vadd.f32 %v2097_v38, %v2072_v37 }
0x12e6   :  { %v2105_v45 = vadd.f32 %v2101_v39, %v2073_v41  ;;  %4554 = vtanh.f32 %v2104_v40  ;;  %v4223_v48 = vmul.f32 -1.442695, %v2104_v40  ;;  %v2191_v40 = vld [vmem:[#allocation2 + $0xd] sm:$0x1] }
0x12e8   :  { %4556 = vtanh.f32 %v2105_v45  ;;  %v4224_v53 = vmul.f32 -1.442695, %v2105_v45 }
0x12e9   :  { %4558 = vpow2.f32 %v4223_v48 }
0x12ec   :  { %v4555_v47 = vpop.eup %4554 }
0x12ed   :  { %2150 = vrot.lane.b32.xlu2 %v4555_v47, %s5752_s1 }
0x12ee   :  { %v4557_v43 = vpop.eup %4556 }
0x12ef   :  { %2152 = vrot.lane.b32.xlu0 %v4557_v43, %s5752_s1  ;;  %v4559_v49 = vpop.eup %4558 }
0x12f0   :  { %v2112_v50 = vadd.f32 1.0, %v4559_v49 }
0x12f2   :  { %4560 = vrcp.f32 %v2112_v50  ;;  %v2125_v62 = vand.u32 2147483648, %v2112_v50  ;;  %vm2119_vm7 = vweird.f32 %v2112_v50  ;;  %v2123_v0 = vand.u32 2147483647, %v2112_v50 }
0x12f3   :  { %4562 = vpow2.f32 %v4224_v53 }
0x12f4   :  { %v2126_v2 = vor.u32 1.1754944e-38, %v2125_v62  ;;  %vm2124_vm9 = vcmp.eq.f32.partialorder %v2123_v0, 8.507059e+37 }
0x12f8   :  { %v4561_v52 = vpop.eup %4560 }
0x12f9   :  { %v2115_v19 = vmul.f32 %v4561_v52, %v2112_v50  ;;  %v4563_v60 = vpop.eup %4562  ;;  %vm2120_vm6 = vweird.f32 %v4561_v52 }
0x12fa   :  { %v2113_v63 = vadd.f32 1.0, %v4563_v60  ;;  %vm2121_vm8 = vmor %vm2119_vm7, %vm2120_vm6 }
0x12fb   :  { %v2116_v56 = vsub.f32 1.0, %v2115_v19 }
0x12fc   :  { %4564 = vrcp.f32 %v2113_v63  ;;  %v2140_v7 = vand.u32 2147483648, %v2113_v63  ;;  %vm2134_vm11 = vweird.f32 %v2113_v63  ;;  %v2138_v8 = vand.u32 2147483647, %v2113_v63 }
0x12fd   :  { %v2117_v59 = vmul.f32 %v4561_v52, %v2116_v56 }
0x12fe   :  { %v2141_v10 = vor.u32 1.1754944e-38, %v2140_v7  ;;  %vm2139_vm13 = vcmp.eq.f32.partialorder %v2138_v8, 8.507059e+37 }
0x12ff   :  { %v2118_v61 = vadd.f32 %v4561_v52, %v2117_v59 }
0x1301   :  { %v2122_v1 = vsel %vm2121_vm8, %v4561_v52, %v2118_v61 }
0x1302   :  { %v2127_v34 = vsel %vm2124_vm9, %v2126_v2, %v2122_v1  ;;  %v4565_v55 = vpop.eup %4564 }
0x1303   :  { %v2130_v3 = vmul.f32 %v4565_v55, %v2113_v63  ;;  %vm2135_vm1 = vweird.f32 %v4565_v55  ;;  %v2146_v14 = vmul.f32 %v2127_v34, %v6545_v26 }
0x1304   :  { %vm2136_vm12 = vmor %vm2134_vm11, %vm2135_vm1 }
0x1305   :  { %v2131_v4 = vsub.f32 1.0, %v2130_v3 }
0x1307   :  { %v2132_v5 = vmul.f32 %v4565_v55, %v2131_v4 }
0x1309   :  { %v2133_v6 = vadd.f32 %v4565_v55, %v2132_v5 }
0x130b   :  { %v2137_v9 = vsel %vm2136_vm12, %v4565_v55, %v2133_v6 }
0x130c   :  { %v2142_v12 = vsel %vm2139_vm13, %v2141_v10, %v2137_v9 }
0x130d   :  { %v2147_v21 = vmul.f32 %v2142_v12, %v6540_v22 }
0x1347   :  { %v2151_v54 = vpop.permute.xlu2 %2150 }
0x1348   :  { %v2156_v20 = vmul.f32 %v2151_v54, %v2127_v34 }
0x134a   :  { %2160 = vrot.lane.b32.xlu0 %v2156_v20, %s5753_s5 }
0x1361   :  { %v2153_v11 = vpop.permute.xlu0 %2152 }
0x1362   :  { %v2157_v13 = vmul.f32 %v2153_v11, %v2142_v12 }
0x1364   :  { %2162 = vrot.lane.b32.xlu1 %v2157_v13, %s5753_s5 }
0x13bc   :  { %v2161_v15 = vpop.permute.xlu0 %2160 }
0x13bd   :  { %v6563_v16 = vadd.f32 %v2161_v15, %v2146_v14 }
0x13bf   :  { %4566 = vtanh.f32 %v6563_v16 }
0x13c5   :  { %v4567_v17 = vpop.eup %4566 }
0x13c6   :  { %2172 = vrot.lane.b32.xlu1 %v4567_v17, %s5752_s1 }
0x13d6   :  { %v2163_v23 = vpop.permute.xlu1 %2162 }
0x13d7   :  { %v6568_v24 = vadd.f32 %v2163_v23, %v2147_v21 }
0x13d9   :  { %4568 = vtanh.f32 %v6568_v24 }
0x13df   :  { %v4569_v25 = vpop.eup %4568 }
0x13e0   :  { %2174 = vrot.lane.b32.xlu2 %v4569_v25, %s5752_s1 }
0x1438   :  { %v2173_v28 = vpop.permute.xlu1 %2172 }
0x1439   :  { %v6574_v30 = vmul.f32 %v2173_v28, %v2127_v34 }
0x143a   :  { %v2175_v26 = vpop.permute.xlu2 %2174 }
0x143b   :  { %v6572_v29 = vmul.f32 %v2175_v26, %v2142_v12 }
0x143d   :  { %v2192_v32 = vrot.slane %v6572_v29, 7 }
0x143f   :  { %v2193_v33 = vsel %vm1720_vm10, %v2192_v32, %v6574_v30 }
0x1440   :  { %2194 = vrot.lane.b32.xlu0 %v2193_v33, %s5753_s5 }
0x14b2   :  { %v2195_v22 = vpop.permute.xlu0 %2194 }
0x14b3   :  { %4225 = vmatmul.msk.f32.vlgmr.msra.gmra.mxu0 %vm829_vm2, %v2195_v22 }
0x1530   :  { %v2215_v37 = vpop.f32.mrf.mxu0 }
0x1531   :  { %v2219_v38 = vrot.slane %v2215_v37, 1  ;;  %v2222_v39 = vadd.f32 %v2215_v37, %v2190_v27  ;;  %v2308_v37 = vld [vmem:[#allocation2 + $0x6] sm:$0x1] }
0x1533   :  { %v2223_v41 = vadd.f32 %v2219_v38, %v2191_v40  ;;  %4570 = vtanh.f32 %v2222_v39  ;;  %v4226_v50 = vmul.f32 -1.442695, %v2222_v39 }
0x1535   :  { %4572 = vtanh.f32 %v2223_v41  ;;  %v4227_v43 = vmul.f32 -1.442695, %v2223_v41  ;;  %v2309_v41 = vld [vmem:[#allocation2 + $0xe] sm:$0x1] }
0x1537   :  { %4574 = vpow2.f32 %v4227_v43 }
0x1539   :  { %v4571_v45 = vpop.eup %4570 }
0x153a   :  { %2268 = vrot.lane.b32.xlu1 %v4571_v45, %s5752_s1 }
0x153b   :  { %v4573_v47 = vpop.eup %4572 }
0x153c   :  { %2270 = vrot.lane.b32.xlu2 %v4573_v47, %s5752_s1 }
0x153d   :  { %v4575_v48 = vpop.eup %4574 }
0x153e   :  { %v2231_v49 = vadd.f32 1.0, %v4575_v48 }
0x1540   :  { %4576 = vrcp.f32 %v2231_v49  ;;  %v2258_v62 = vand.u32 2147483648, %v2231_v49  ;;  %vm2252_vm15 = vweird.f32 %v2231_v49  ;;  %v2256_v63 = vand.u32 2147483647, %v2231_v49 }
0x1541   :  { %4578 = vpow2.f32 %v4226_v50 }
0x1542   :  { %v2259_v1 = vor.u32 1.1754944e-38, %v2258_v62  ;;  %vm2257_vm0 = vcmp.eq.f32.partialorder %v2256_v63, 8.507059e+37 }
0x1546   :  { %v4577_v52 = vpop.eup %4576 }
0x1547   :  { %v2248_v19 = vmul.f32 %v4577_v52, %v2231_v49  ;;  %v4579_v56 = vpop.eup %4578  ;;  %vm2253_vm14 = vweird.f32 %v4577_v52 }
0x1548   :  { %v2230_v59 = vadd.f32 1.0, %v4579_v56  ;;  %vm2254_vm3 = vmor %vm2252_vm15, %vm2253_vm14 }
0x1549   :  { %v2249_v53 = vsub.f32 1.0, %v2248_v19 }
0x154a   :  { %4580 = vrcp.f32 %v2230_v59  ;;  %v2243_v6 = vand.u32 2147483648, %v2230_v59  ;;  %vm2237_vm5 = vweird.f32 %v2230_v59  ;;  %v2241_v7 = vand.u32 2147483647, %v2230_v59 }
0x154b   :  { %v2250_v60 = vmul.f32 %v4577_v52, %v2249_v53 }
0x154c   :  { %v2244_v9 = vor.u32 1.1754944e-38, %v2243_v6  ;;  %vm2242_vm7 = vcmp.eq.f32.partialorder %v2241_v7, 8.507059e+37 }
0x154d   :  { %v2251_v61 = vadd.f32 %v4577_v52, %v2250_v60 }
0x154f   :  { %v2255_v0 = vsel %vm2254_vm3, %v4577_v52, %v2251_v61 }
0x1550   :  { %v4581_v2 = vpop.eup %4580  ;;  %v2260_v34 = vsel %vm2257_vm0, %v2259_v1, %v2255_v0 }
0x1551   :  { %v2233_v55 = vmul.f32 %v4581_v2, %v2230_v59  ;;  %vm2238_vm4 = vweird.f32 %v4581_v2  ;;  %v2265_v17 = vmul.f32 %v2260_v34, %v6568_v24 }
0x1552   :  { %vm2239_vm6 = vmor %vm2237_vm5, %vm2238_vm4 }
0x1553   :  { %v2234_v3 = vsub.f32 1.0, %v2233_v55 }
0x1555   :  { %v2235_v4 = vmul.f32 %v4581_v2, %v2234_v3 }
0x1557   :  { %v2236_v5 = vadd.f32 %v4581_v2, %v2235_v4 }
0x1559   :  { %v2240_v8 = vsel %vm2239_vm6, %v4581_v2, %v2236_v5 }
0x155a   :  { %v2245_v11 = vsel %vm2242_vm7, %v2244_v9, %v2240_v8 }
0x155b   :  { %v2264_v13 = vmul.f32 %v2245_v11, %v6563_v16 }
0x1596   :  { %v2271_v54 = vpop.permute.xlu2 %2270 }
0x1597   :  { %v2275_v20 = vmul.f32 %v2271_v54, %v2260_v34 }
0x1599   :  { %2280 = vrot.lane.b32.xlu0 %v2275_v20, %s5753_s5 }
0x15ac   :  { %v2269_v10 = vpop.permute.xlu1 %2268 }
0x15ad   :  { %v2274_v12 = vmul.f32 %v2269_v10, %v2245_v11 }
0x15af   :  { %2278 = vrot.lane.b32.xlu2 %v2274_v12, %s5753_s5 }
0x1609   :  { %v2279_v14 = vpop.permute.xlu2 %2278 }
0x160a   :  { %v6586_v15 = vadd.f32 %v2279_v14, %v2264_v13 }
0x160b   :  { %v2281_v21 = vpop.permute.xlu0 %2280 }
0x160c   :  { %4582 = vtanh.f32 %v6586_v15  ;;  %v6590_v23 = vadd.f32 %v2281_v21, %v2265_v17 }
0x160e   :  { %4584 = vtanh.f32 %v6590_v23 }
0x1612   :  { %v4583_v25 = vpop.eup %4582 }
0x1613   :  { %2290 = vrot.lane.b32.xlu0 %v4583_v25, %s5752_s1 }
0x1614   :  { %v4585_v28 = vpop.eup %4584 }
0x1615   :  { %2292 = vrot.lane.b32.xlu1 %v4585_v28, %s5752_s1 }
0x1685   :  { %v2291_v26 = vpop.permute.xlu0 %2290 }
0x1686   :  { %v6597_v33 = vmul.f32 %v2291_v26, %v2245_v11 }
0x1687   :  { %v2293_v16 = vpop.permute.xlu1 %2292 }
0x1688   :  { %v6595_v32 = vmul.f32 %v2293_v16, %v2260_v34 }
0x168a   :  { %v2310_v24 = vrot.slane %v6595_v32, 7 }
0x168c   :  { %v2311_v22 = vsel %vm1720_vm10, %v2310_v24, %v6597_v33 }
0x168d   :  { %2312 = vrot.lane.b32.xlu2 %v2311_v22, %s5753_s5 }
0x16e7   :  { %v2313_v27 = vpop.permute.xlu2 %2312 }
0x16e8   :  { %4228 = vmatmul.msk.f32.vlgmr.msra.gmra.mxu1 %vm829_vm2, %v2313_v27 }
0x1765   :  { %v2333_v38 = vpop.f32.mrf.mxu1 }
0x1766   :  { %v2337_v39 = vrot.slane %v2333_v38, 1  ;;  %v2340_v40 = vadd.f32 %v2333_v38, %v2308_v37 }
0x1768   :  { %v2341_v45 = vadd.f32 %v2337_v39, %v2309_v41  ;;  %4586 = vtanh.f32 %v2340_v40  ;;  %v4229_v48 = vmul.f32 -1.442695, %v2340_v40  ;;  %v2426_v40 = vld [vmem:[#allocation2 + $0x7] sm:$0x1] }
0x176a   :  { %4588 = vtanh.f32 %v2341_v45  ;;  %v4230_v49 = vmul.f32 -1.442695, %v2341_v45 }
0x176b   :  { %4590 = vpow2.f32 %v4229_v48 }
0x176c   :  { %4592 = vpow2.f32 %v4230_v49 }
0x176e   :  { %v4587_v47 = vpop.eup %4586 }
0x176f   :  { %2386 = vrot.lane.b32.xlu0 %v4587_v47, %s5752_s1 }
0x1770   :  { %v4589_v43 = vpop.eup %4588 }
0x1771   :  { %2388 = vrot.lane.b32.xlu1 %v4589_v43, %s5752_s1  ;;  %v4591_v50 = vpop.eup %4590  ;;  %v2427_v43 = vld [vmem:[#allocation2 + $0xf] sm:$0x1] }
0x1772   :  { %v4593_v52 = vpop.eup %4592  ;;  %v2348_v19 = vadd.f32 1.0, %v4591_v50 }
0x1773   :  { %v2349_v53 = vadd.f32 1.0, %v4593_v52 }
0x1774   :  { %4594 = vrcp.f32 %v2348_v19  ;;  %v2361_v54 = vand.u32 2147483648, %v2348_v19  ;;  %vm2355_vm9 = vweird.f32 %v2348_v19  ;;  %v2359_v34 = vand.u32 2147483647, %v2348_v19 }
0x1775   :  { %4596 = vrcp.f32 %v2349_v53  ;;  %v2376_v3 = vand.u32 2147483648, %v2349_v53  ;;  %vm2370_vm12 = vweird.f32 %v2349_v53  ;;  %v2374_v5 = vand.u32 2147483647, %v2349_v53 }
0x1776   :  { %v2362_v4 = vor.u32 1.1754944e-38, %v2361_v54  ;;  %vm2360_vm13 = vcmp.eq.f32.partialorder %v2359_v34, 8.507059e+37 }
0x1777   :  { %v2377_v10 = vor.u32 1.1754944e-38, %v2376_v3  ;;  %vm2375_vm15 = vcmp.eq.f32.partialorder %v2374_v5, 8.507059e+37 }
0x177a   :  { %v4595_v56 = vpop.eup %4594 }
0x177b   :  { %v4597_v59 = vpop.eup %4596  ;;  %v2351_v60 = vmul.f32 %v4595_v56, %v2348_v19  ;;  %vm2356_vm8 = vweird.f32 %v4595_v56 }
0x177c   :  { %v2366_v61 = vmul.f32 %v4597_v59, %v2349_v53  ;;  %vm2357_vm1 = vmor %vm2355_vm9, %vm2356_vm8  ;;  %vm2371_vm11 = vweird.f32 %v4597_v59  ;;  %vm1714_vm9 = vcmask 253952  }
0x177d   :  { %v2352_v62 = vsub.f32 1.0, %v2351_v60  ;;  %vm2372_vm14 = vmor %vm2370_vm12, %vm2371_vm11 }
0x177e   :  { %v2367_v63 = vsub.f32 1.0, %v2366_v61 }
0x177f   :  { %v2353_v0 = vmul.f32 %v4595_v56, %v2352_v62 }
0x1780   :  { %v2368_v1 = vmul.f32 %v4597_v59, %v2367_v63 }
0x1781   :  { %v2354_v2 = vadd.f32 %v4595_v56, %v2353_v0 }
0x1782   :  { %v2369_v20 = vadd.f32 %v4597_v59, %v2368_v1 }
0x1783   :  { %v2358_v55 = vsel %vm2357_vm1, %v4595_v56, %v2354_v2 }
0x1784   :  { %v2363_v7 = vsel %vm2360_vm13, %v2362_v4, %v2358_v55  ;;  %v2373_v8 = vsel %vm2372_vm14, %v4597_v59, %v2369_v20 }
0x1785   :  { %v2378_v12 = vsel %vm2375_vm15, %v2377_v10, %v2373_v8  ;;  %v2382_v28 = vmul.f32 %v2363_v7, %v6586_v15 }
0x1786   :  { %v2383_v14 = vmul.f32 %v2378_v12, %v6590_v23 }
0x17e1   :  { %v2387_v6 = vpop.permute.xlu0 %2386 }
0x17e2   :  { %v2392_v9 = vmul.f32 %v2387_v6, %v2363_v7 }
0x17e3   :  { %v2389_v11 = vpop.permute.xlu1 %2388 }
0x17e4   :  { %2396 = vrot.lane.b32.xlu1 %v2392_v9, %s5753_s5  ;;  %v2393_v13 = vmul.f32 %v2389_v11, %v2378_v12 }
0x17e6   :  { %2398 = vrot.lane.b32.xlu2 %v2393_v13, %s5753_s5 }
0x1840   :  { %v2399_v17 = vpop.permute.xlu2 %2398 }
0x1841   :  { %v6609_v21 = vadd.f32 %v2399_v17, %v2383_v14 }
0x1843   :  { %4598 = vtanh.f32 %v6609_v21 }
0x1849   :  { %v4599_v25 = vpop.eup %4598 }
0x184a   :  { %2410 = vrot.lane.b32.xlu0 %v4599_v25, %s5752_s1 }
0x1856   :  { %v2397_v26 = vpop.permute.xlu1 %2396 }
0x1857   :  { %v6614_v16 = vadd.f32 %v2397_v26, %v2382_v28 }
0x1859   :  { %4600 = vtanh.f32 %v6614_v16 }
0x185f   :  { %v4601_v24 = vpop.eup %4600 }
0x1860   :  { %2408 = vrot.lane.b32.xlu2 %v4601_v24, %s5752_s1 }
0x18ba   :  { %v2409_v22 = vpop.permute.xlu2 %2408 }
0x18bb   :  { %v6620_v37 = vmul.f32 %v2409_v22, %v2363_v7 }
0x18bc   :  { %v2411_v23 = vpop.permute.xlu0 %2410 }
0x18bd   :  { %v6618_v27 = vmul.f32 %v2411_v23, %v2378_v12 }
0x18bf   :  { %v2428_v38 = vrot.slane %v6618_v27, 7 }
0x18c1   :  { %v2429_v39 = vsel %vm1720_vm10, %v2428_v38, %v6620_v37 }
0x18c2   :  { %2430 = vrot.lane.b32.xlu1 %v2429_v39, %s5753_s5 }
0x1934   :  { %v2431_v15 = vpop.permute.xlu1 %2430 }
0x1935   :  { %4231 = vmatmul.msk.f32.vlgmr.msrb.gmra.mxu2 %vm829_vm2, %v2431_v15 }
0x19b8   :  { %v2451_v41 = vpop.f32.mrf.mxu2 }
0x19b9   :  { %v2455_v45 = vrot.slane %v2451_v41, 1  ;;  %v2458_v47 = vadd.f32 %v2451_v41, %v2426_v40 }
0x19bb   :  { %v2459_v48 = vadd.f32 %v2455_v45, %v2427_v43  ;;  %4602 = vtanh.f32 %v2458_v47  ;;  %v4232_v56 = vmul.f32 -1.442695, %v2458_v47  ;;  %v2548_v45 = vld [vmem:[#allocation46 + $0x10] sm:$0xff]  ;;  %v2547_v47 = vld [vmem:[#allocation46 + $0x8] sm:$0xff]  ;;  %v2546_v43 = vld [vmem:[#allocation46] sm:$0xff] }
0x19bd   :  { %4604 = vtanh.f32 %v2459_v48  ;;  %v4233_v52 = vmul.f32 -1.442695, %v2459_v48 }
0x19bf   :  { %4606 = vpow2.f32 %v4233_v52 }
0x19c1   :  { %v4603_v49 = vpop.eup %4602 }
0x19c2   :  { %2504 = vrot.lane.b32.xlu0 %v4603_v49, %s5752_s1 }
0x19c3   :  { %v4605_v50 = vpop.eup %4604 }
0x19c4   :  { %2506 = vrot.lane.b32.xlu2 %v4605_v50, %s5752_s1 }
0x19c5   :  { %v4607_v19 = vpop.eup %4606 }
0x19c6   :  { %v2467_v53 = vadd.f32 1.0, %v4607_v19 }
0x19c8   :  { %4608 = vrcp.f32 %v2467_v53  ;;  %v2494_v2 = vand.u32 2147483648, %v2467_v53  ;;  %vm2488_vm3 = vweird.f32 %v2467_v53  ;;  %v2492_v54 = vand.u32 2147483647, %v2467_v53 }
0x19c9   :  { %4610 = vpow2.f32 %v4232_v56 }
0x19ca   :  { %v2495_v20 = vor.u32 1.1754944e-38, %v2494_v2  ;;  %vm2493_vm4 = vcmp.eq.f32.partialorder %v2492_v54, 8.507059e+37 }
0x19ce   :  { %v4609_v59 = vpop.eup %4608 }
0x19cf   :  { %v2484_v60 = vmul.f32 %v4609_v59, %v2467_v53  ;;  %v4611_v62 = vpop.eup %4610  ;;  %vm2489_vm10 = vweird.f32 %v4609_v59  ;;  %v4427_v53 = vld [vmem:[#allocation41] ss:$0 sm:$0xff] }
0x19d0   :  { %v2466_v63 = vadd.f32 1.0, %v4611_v62  ;;  %vm2490_vm0 = vmor %vm2488_vm3, %vm2489_vm10 }
0x19d1   :  { %v2485_v61 = vsub.f32 1.0, %v2484_v60 }
0x19d2   :  { %4612 = vrcp.f32 %v2466_v63  ;;  %v2479_v10 = vand.u32 2147483648, %v2466_v63  ;;  %vm2473_vm6 = vweird.f32 %v2466_v63  ;;  %v2477_v11 = vand.u32 2147483647, %v2466_v63 }
0x19d3   :  { %v2486_v0 = vmul.f32 %v4609_v59, %v2485_v61 }
0x19d4   :  { %v2480_v13 = vor.u32 1.1754944e-38, %v2479_v10  ;;  %vm2478_vm8 = vcmp.eq.f32.partialorder %v2477_v11, 8.507059e+37 }
0x19d5   :  { %v2487_v1 = vadd.f32 %v4609_v59, %v2486_v0 }
0x19d7   :  { %v2491_v34 = vsel %vm2490_vm0, %v4609_v59, %v2487_v1 }
0x19d8   :  { %v4613_v55 = vpop.eup %4612  ;;  %v2496_v4 = vsel %vm2493_vm4, %v2495_v20, %v2491_v34 }
0x19d9   :  { %v2469_v6 = vmul.f32 %v4613_v55, %v2466_v63  ;;  %vm2474_vm5 = vweird.f32 %v4613_v55 }
0x19da   :  { %vm2475_vm7 = vmor %vm2473_vm6, %vm2474_vm5 }
0x19db   :  { %v2470_v7 = vsub.f32 1.0, %v2469_v6 }
0x19dd   :  { %v2471_v8 = vmul.f32 %v4613_v55, %v2470_v7 }
0x19df   :  { %v2472_v9 = vadd.f32 %v4613_v55, %v2471_v8 }
0x19e1   :  { %v2476_v12 = vsel %vm2475_vm7, %v4613_v55, %v2472_v9 }
0x19e2   :  { %v2481_v17 = vsel %vm2478_vm8, %v2480_v13, %v2476_v12 }
0x1a1e   :  { %v2507_v3 = vpop.permute.xlu2 %2506 }
0x1a1f   :  { %v2511_v5 = vmul.f32 %v2507_v3, %v2496_v4 }
0x1a21   :  { %2516 = vrot.lane.b32.xlu0 %v2511_v5, %s5753_s5 }
0x1a29   :  { %1708 = vrot.lane.b32.xlu0 %v6479_v46, %s5753_s5  ;;  %v2501_v46 = vmul.f32 %v2496_v4, %v6609_v21 }
0x1a31   :  { %2064 = vrot.lane.b32.xlu0 %v6551_v18, %s5753_s5 }
0x1a34   :  { %v2505_v14 = vpop.permute.xlu0 %2504 }
0x1a35   :  { %v2510_v25 = vmul.f32 %v2505_v14, %v2481_v17 }
0x1a37   :  { %2514 = vrot.lane.b32.xlu1 %v2510_v25, %s5753_s5 }
0x1a39   :  { %2418 = vrot.lane.b32.xlu0 %v6620_v37, %s5753_s5 }
0x1a41   :  { %1830 = vrot.lane.b32.xlu0 %v6503_v42, %s5753_s5  ;;  %v2500_v42 = vmul.f32 %v2481_v17, %v6614_v16 }
0x1a49   :  { %2184 = vrot.lane.b32.xlu0 %v6572_v29, %s5753_s5 }
0x1a93   :  { %v2517_v28 = vpop.permute.xlu0 %2516 }
0x1a94   :  { %v2521_v18 = vadd.f32 %v2517_v28, %v2501_v46 }
0x1a96   :  { %4614 = vtanh.f32 %v2521_v18 }
0x1a9b   :  { %v1709_v26 = vpop.permute.xlu0 %1708 }
0x1a9c   :  { %v4615_v24 = vpop.eup %4614  ;;  %1715 = vst.msk [vmem:[#allocation3] sm:$0x1] %vm1714_vm9, %v1709_v26 }
0x1a9d   :  { %2528 = vrot.lane.b32.xlu1 %v4615_v24, %s5752_s1 }
0x1aa3   :  { %v2065_v22 = vpop.permute.xlu0 %2064 }
0x1aa4   :  { %2070 = vst.msk [vmem:[#allocation3 + $0x3] sm:$0x1] %vm1714_vm9, %v2065_v22 }
0x1aa5   :  { %1946 = vrot.lane.b32.xlu1 %v6528_v36, %s5753_s5 }
0x1aa9   :  { %v2515_v29 = vpop.permute.xlu1 %2514 }
0x1aaa   :  { %v2520_v21 = vadd.f32 %v2515_v29, %v2500_v42 }
0x1aab   :  { %v2419_v23 = vpop.permute.xlu0 %2418 }
0x1aac   :  { %4616 = vtanh.f32 %v2520_v21  ;;  %2424 = vst.msk [vmem:[#allocation3 + $0x6] sm:$0x1] %vm1714_vm9, %v2419_v23 }
0x1aad   :  { %2300 = vrot.lane.b32.xlu1 %v6597_v33, %s5753_s5 }
0x1ab2   :  { %v4617_v37 = vpop.eup %4616 }
0x1ab3   :  { %2526 = vrot.lane.b32.xlu2 %v4617_v37, %s5752_s1  ;;  %v1831_v38 = vpop.permute.xlu0 %1830  ;;  %v5755_v37 = vmov 32.0  }
0x1ab4   :  { %1835 = vst.msk [vmem:[#allocation3 + $0x9] sm:$0x1] %vm1714_vm9, %v1831_v38 }
0x1ab5   :  { %1710 = vrot.lane.b32.xlu1 %v6476_v51, %s5753_s5 }
0x1abb   :  { %1828 = vrot.lane.b32.xlu2 %v6505_v44, %s5753_s5  ;;  %v2185_v36 = vpop.permute.xlu0 %2184 }
0x1abc   :  { %2189 = vst.msk [vmem:[#allocation3 + $0xc] sm:$0x1] %vm1714_vm9, %v2185_v36 }
0x1abd   :  { %2066 = vrot.lane.b32.xlu1 %v6549_v31, %s5753_s5 }
0x1ac3   :  { %2182 = vrot.lane.b32.xlu2 %v6574_v30, %s5753_s5 }
0x1ac5   :  { %2420 = vrot.lane.b32.xlu1 %v6618_v27, %s5753_s5 }
0x1acb   :  { %1948 = vrot.lane.b32.xlu2 %v6526_v35, %s5753_s5 }
0x1b0d   :  { %v2527_v33 = vpop.permute.xlu2 %2526 }
0x1b0e   :  { %v2532_v51 = vmul.f32 %v2527_v33, %v2481_v17 }
0x1b0f   :  { %v2529_v16 = vpop.permute.xlu1 %2528 }
0x1b10   :  { %2536 = vrot.lane.b32.xlu2 %v2532_v51, %s5753_s5  ;;  %v2533_v44 = vmul.f32 %v2529_v16, %v2496_v4 }
0x1b12   :  { %2538 = vrot.lane.b32.xlu0 %v2533_v44, %s5753_s5 }
0x1b15   :  { %v1829_v39 = vpop.permute.xlu2 %1828 }
0x1b16   :  { %1834 = vst.msk [vmem:[#allocation3 + $0x1] sm:$0x1] %vm1714_vm9, %v1829_v39 }
0x1b17   :  { %v1947_v31 = vpop.permute.xlu1 %1946 }
0x1b18   :  { %2302 = vrot.lane.b32.xlu2 %v6595_v32, %s5753_s5  ;;  %1952 = vst.msk [vmem:[#allocation3 + $0x2] sm:$0x1] %vm1714_vm9, %v1947_v31  ;;  %v2549_v32 = vld [vmem:[#allocation46 + $0x18] sm:$0xff] }
0x1b19   :  { %2574 = vmatpush.msra.mxu3 %v2549_v32 }
0x1b1b   :  { %2575 = vmatpush.msra.mxu3 %v2548_v45  ;;  %v2699_v45 = vld [vmem:[%s7149_s2 + $0x18] sm:$0xff] }
0x1b1c   :  { %2734 = vmatpush.msrb.mxu0 %v2699_v45 }
0x1b1d   :  { %v2183_v30 = vpop.permute.xlu2 %2182  ;;  %2576 = vmatpush.msra.mxu3 %v2547_v47  ;;  %v2698_v47 = vld [vmem:[%s7149_s2 + $0x10] sm:$0xff] }
0x1b1e   :  { %2188 = vst.msk [vmem:[#allocation3 + $0x4] sm:$0x1] %vm1714_vm9, %v2183_v30  ;;  %2735 = vmatpush.msrb.mxu0 %v2698_v47 }
0x1b1f   :  { %v2301_v35 = vpop.permute.xlu1 %2300  ;;  %2577 = vmatpush.msra.mxu3 %v2546_v43  ;;  %v2697_v43 = vld [vmem:[%s7149_s2 + $0x8] sm:$0xff] }
0x1b20   :  { %2306 = vst.msk [vmem:[#allocation3 + $0x5] sm:$0x1] %vm1714_vm9, %v2301_v35  ;;  %2736 = vmatpush.msrb.mxu0 %v2697_v43 }
0x1b25   :  { %v1949_v27 = vpop.permute.xlu2 %1948 }
0x1b26   :  { %1953 = vst.msk [vmem:[#allocation3 + $0xa] sm:$0x1] %vm1714_vm9, %v1949_v27 }
0x1b27   :  { %v1711_v15 = vpop.permute.xlu1 %1710 }
0x1b28   :  { %1716 = vst.msk [vmem:[#allocation3 + $0x8] sm:$0x1] %vm1714_vm9, %v1711_v15 }
0x1b2f   :  { %v2067_v40 = vpop.permute.xlu1 %2066 }
0x1b30   :  { %2071 = vst.msk [vmem:[#allocation3 + $0xb] sm:$0x1] %vm1714_vm9, %v2067_v40 }
0x1b37   :  { %v2421_v41 = vpop.permute.xlu1 %2420 }
0x1b38   :  { %2425 = vst.msk [vmem:[#allocation3 + $0xe] sm:$0x1] %vm1714_vm9, %v2421_v41 }
0x1b6a   :  { %v2537_v48 = vpop.permute.xlu2 %2536 }
0x1b6b   :  { %2542 = vst.msk [vmem:[#allocation3 + $0x7] sm:$0x1] %vm1714_vm9, %v2537_v48  ;;  %v2696_v48 = vld [vmem:[%s7149_s2] sm:$0xff] }
0x1b6c   :  { %2737 = vmatpush.msrb.mxu0 %v2696_v48 }
0x1b72   :  { %v2303_v49 = vpop.permute.xlu2 %2302  ;;  %v2544_v50 = vld [vmem:[#allocation3] sm:$0xff] }
0x1b73   :  { %2307 = vst.msk [vmem:[#allocation3 + $0xd] sm:$0x1] %vm1714_vm9, %v2303_v49  ;;  %4234 = vmatmul.msk.f32.vlgmr.msra.gmra.mxu3 %vm829_vm2, %v2544_v50 }
0x1b84   :  { %v2539_v52 = vpop.permute.xlu0 %2538 }
0x1b85   :  { %2543 = vst.msk [vmem:[#allocation3 + $0xf] sm:$0x1] %vm1714_vm9, %v2539_v52 }
0x1b8c   :  { %v2545_v19 = vld [vmem:[#allocation3 + $0x8] sm:$0xff] }
0x1b8d   :  { %4235 = vmatmul.msk.f32.gmra.mxu3 %vm829_vm2, %v2545_v19 }
0x1bf6   :  { %v2579_v56 = vpop.f32.mrf.mxu3 }
0x1bf7   :  { %v2580_v59 = vadd.f32 %v4427_v53, %v2579_v56 }
0x1bf9   :  { %2625 = vrot.lane.b32.xlu2 %v2580_v59, %s5754_s20  ;;  %v4236_v62 = vmul.f32 -1.442695, %v2580_v59 }
0x1bfb   :  { %4618 = vpow2.f32 %v4236_v62  ;;  %v4428_v62 = vld [vmem:[#allocation44] ss:$0 sm:$0xff] }
0x1c01   :  { %v4619_v63 = vpop.eup %4618 }
0x1c02   :  { %v2591_v0 = vadd.f32 1.0, %v4619_v63 }
0x1c04   :  { %4620 = vrcp.f32 %v2591_v0  ;;  %v2604_v55 = vand.u32 2147483648, %v2591_v0  ;;  %vm2598_vm11 = vweird.f32 %v2591_v0  ;;  %v2602_v3 = vand.u32 2147483647, %v2591_v0 }
0x1c06   :  { %v2605_v5 = vor.u32 1.1754944e-38, %v2604_v55  ;;  %vm2603_vm13 = vcmp.eq.f32.partialorder %v2602_v3, 8.507059e+37 }
0x1c0a   :  { %v4621_v1 = vpop.eup %4620 }
0x1c0b   :  { %v2594_v2 = vmul.f32 %v4621_v1, %v2591_v0  ;;  %vm2599_vm1 = vweird.f32 %v4621_v1 }
0x1c0c   :  { %vm2600_vm12 = vmor %vm2598_vm11, %vm2599_vm1 }
0x1c0d   :  { %v2595_v54 = vsub.f32 1.0, %v2594_v2 }
0x1c0f   :  { %v2596_v34 = vmul.f32 %v4621_v1, %v2595_v54 }
0x1c10   :  { %v2582_v60 = vpop.f32.mrf.mxu3 }
0x1c11   :  { %v2583_v61 = vadd.f32 %v4427_v53, %v2582_v60  ;;  %v2597_v20 = vadd.f32 %v4621_v1, %v2596_v34 }
0x1c13   :  { %2627 = vrot.lane.b32.xlu1 %v2583_v61, %s5754_s20  ;;  %v2601_v4 = vsel %vm2600_vm12, %v4621_v1, %v2597_v20  ;;  %v4237_v11 = vmul.f32 -1.442695, %v2583_v61  ;;  %v4429_v1 = vld [vmem:[#allocation43] ss:$0 sm:$0xff] }
0x1c14   :  { %v2606_v7 = vsel %vm2603_vm13, %v2605_v5, %v2601_v4 }
0x1c15   :  { %4622 = vpow2.f32 %v4237_v11 }
0x1c1b   :  { %v4623_v12 = vpop.eup %4622 }
0x1c1c   :  { %v2592_v13 = vadd.f32 1.0, %v4623_v12 }
0x1c1e   :  { %4624 = vrcp.f32 %v2592_v13  ;;  %v2619_v18 = vand.u32 2147483648, %v2592_v13  ;;  %vm2613_vm15 = vweird.f32 %v2592_v13  ;;  %v2617_v26 = vand.u32 2147483647, %v2592_v13 }
0x1c1f   :  { %4626 = vrcp.f32 %v5755_v37 }
0x1c20   :  { %vm2618_vm3 = vcmp.eq.f32.partialorder %v2617_v26, 8.507059e+37 }
0x1c24   :  { %v4625_v14 = vpop.eup %4624 }
0x1c25   :  { %v2609_v17 = vmul.f32 %v4625_v14, %v2592_v13  ;;  %vm2614_vm14 = vweird.f32 %v4625_v14  ;;  %v4627_v38 = vpop.eup %4626  ;;  %v2704_v13 = vld [vmem:[%s7150_s7 + $0x18] sm:$0xff] }
0x1c26   :  { %vm2615_vm10 = vmor %vm2613_vm15, %vm2614_vm14  ;;  %v2642_v36 = vmul.f32 32.0, %v4627_v38  ;;  %vm2646_vm0 = vweird.f32 %v4627_v38  ;;  %2776 = vmatpush.msrb.mxu1 %v2704_v13 }
0x1c27   :  { %v2610_v25 = vsub.f32 1.0, %v2609_v17  ;;  %v2702_v17 = vld [vmem:[%s7150_s7 + $0x8] sm:$0xff] }
0x1c28   :  { %v2643_v33 = vsub.f32 1.0, %v2642_v36 }
0x1c29   :  { %v2611_v46 = vmul.f32 %v4625_v14, %v2610_v25  ;;  %v2701_v25 = vld [vmem:[%s7150_s7] sm:$0xff] }
0x1c2a   :  { %v2644_v51 = vmul.f32 %v4627_v38, %v2643_v33 }
0x1c2b   :  { %v2612_v28 = vadd.f32 %v4625_v14, %v2611_v46  ;;  %v4430_v46 = vld [vmem:[%s7151_s27] ss:$0 sm:$0xff] }
0x1c2c   :  { %v2645_v16 = vadd.f32 %v4627_v38, %v2644_v51  ;;  %v2707_v51 = vld [vmem:[#allocation10 + $0x8] sm:$0xff] }
0x1c2d   :  { %v2616_v24 = vsel %vm2615_vm10, %v4625_v14, %v2612_v28  ;;  %v2703_v14 = vld [vmem:[%s7150_s7 + $0x10] sm:$0xff] }
0x1c2e   :  { %v6689_v44 = vsel %vm2646_vm0, %v4627_v38, %v2645_v16  ;;  %2777 = vmatpush.msrb.mxu1 %v2703_v14  ;;  %v2706_v16 = vld [vmem:[#allocation10] sm:$0xff] }
0x1c30   :  { %2778 = vmatpush.msrb.mxu1 %v2702_v17 }
0x1c32   :  { %2779 = vmatpush.msrb.mxu1 %v2701_v25 }
0x1c53   :  { %v2626_v6 = vpop.permute.xlu2 %2625 }
0x1c54   :  { %v2631_v8 = vmul.f32 %v2626_v6, %v2606_v7 }
0x1c56   :  { %v2633_v9 = vadd.f32 %v2631_v8, %v6456_v57  ;;  %v2620_v57 = vor.u32 1.1754944e-38, %v2619_v18 }
0x1c58   :  { %v2635_v10 = vsel %vm829_vm2, %v2633_v9, 0.0  ;;  %v2621_v42 = vsel %vm2618_vm3, %v2620_v57, %v2616_v24 }
0x1c59   :  { %2636 = vadd.xlane.f32.xlu0 %v2635_v10 }
0x1c85   :  { %v2628_v22 = vpop.permute.xlu1 %2627 }
0x1c86   :  { %v2632_v29 = vmul.f32 %v2628_v22, %v2621_v42  ;;  %v2709_v42 = vld [vmem:[#allocation10 + $0x18] sm:$0xff] }
0x1c87   :  { %2808 = vmatpush.msra.mxu2 %v2709_v42 }
0x1c88   :  { %v2634_v21 = vadd.f32 %v2632_v29, %v6460_v58  ;;  %v2708_v29 = vld [vmem:[#allocation10 + $0x10] sm:$0xff] }
0x1c89   :  { %2809 = vmatpush.msra.mxu2 %v2708_v29 }
0x1c8a   :  { %v2638_v23 = vsel %vm829_vm2, %v2634_v21, 0.0 }
0x1c8b   :  { %2639 = vadd.xlane.f32.xlu2 %v2638_v23  ;;  %2810 = vmatpush.msra.mxu2 %v2707_v51 }
0x1c8d   :  { %2811 = vmatpush.msra.mxu2 %v2706_v16 }
0x1ccc   :  { %v2637_v39 = vpop.xlane.xlu0 %2636 }
0x1ccd   :  { %v2648_v31 = vmul.f32 %v6689_v44, %v2637_v39  ;;  %v4431_v39 = vld [vmem:[%s7152_s3] ss:$0 sm:$0xff] }
0x1ccf   :  { %v2650_v58 = vsub.f32 %v2633_v9, %v2648_v31 }
0x1cd1   :  { %v2652_v30 = vmul.f32 %v2650_v58, %v2650_v58 }
0x1cd3   :  { %v2654_v35 = vsel %vm829_vm2, %v2652_v30, 0.0 }
0x1cd4   :  { %2655 = vadd.xlane.f32.xlu1 %v2654_v35 }
0x1cfe   :  { %v2640_v27 = vpop.xlane.xlu2 %2639 }
0x1cff   :  { %v2649_v15 = vmul.f32 %v6689_v44, %v2640_v27  ;;  %v4432_v27 = vld [vmem:[%s7153_s10] ss:$0 sm:$0xff] }
0x1d01   :  { %v2651_v40 = vsub.f32 %v2634_v21, %v2649_v15 }
0x1d03   :  { %v2653_v41 = vmul.f32 %v2651_v40, %v2651_v40 }
0x1d05   :  { %v2657_v32 = vsel %vm829_vm2, %v2653_v41, 0.0 }
0x1d06   :  { %2658 = vadd.xlane.f32.xlu0 %v2657_v32 }
0x1d47   :  { %v2656_v49 = vpop.xlane.xlu1 %2655 }
0x1d48   :  { %v2660_v50 = vmul.f32 %v2656_v49, %v6689_v44 }
0x1d4a   :  { %v2662_v52 = vadd.f32 1e-05, %v2660_v50 }
0x1d4c   :  { %4628 = vrsqrt.f32 %v2662_v52  ;;  %vm2670_vm5 = vweird.f32 %v2662_v52 }
0x1d52   :  { %v4629_v19 = vpop.eup %4628 }
0x1d53   :  { %v2665_v53 = vmul.f32 %v4629_v19, %v2662_v52  ;;  %vm2671_vm4 = vweird.f32 %v4629_v19 }
0x1d54   :  { %vm2672_vm6 = vmor %vm2670_vm5, %vm2671_vm4 }
0x1d55   :  { %v2666_v56 = vmul.f32 %v4629_v19, %v2665_v53 }
0x1d57   :  { %v2667_v59 = vmul.f32 0.5, %v2666_v56 }
0x1d59   :  { %v2668_v60 = vsub.f32 1.5, %v2667_v59 }
0x1d5b   :  { %v2669_v61 = vmul.f32 %v4629_v19, %v2668_v60 }
0x1d5d   :  { %v2673_v63 = vsel %vm2672_vm6, %v4629_v19, %v2669_v61 }
0x1d5e   :  { %v2684_v0 = vmul.f32 %v2673_v63, %v2650_v58 }
0x1d60   :  { %v2689_v2 = vmul.f32 %v4428_v62, %v2684_v0 }
0x1d62   :  { %v6700_v54 = vadd.f32 %v4429_v1, %v2689_v2 }
0x1d64   :  { %4238 = vmatmul.msk.f32.vlgmr.msrb.gmra.mxu0 %vm829_vm2, %v6700_v54 }
0x1d79   :  { %v2659_v34 = vpop.xlane.xlu0 %2658 }
0x1d7a   :  { %v2661_v20 = vmul.f32 %v2659_v34, %v6689_v44 }
0x1d7c   :  { %v2663_v55 = vadd.f32 1e-05, %v2661_v20 }
0x1d7e   :  { %4630 = vrsqrt.f32 %v2663_v55  ;;  %vm2680_vm8 = vweird.f32 %v2663_v55 }
0x1d84   :  { %v4631_v3 = vpop.eup %4630 }
0x1d85   :  { %v2675_v4 = vmul.f32 %v4631_v3, %v2663_v55  ;;  %vm2681_vm7 = vweird.f32 %v4631_v3 }
0x1d86   :  { %vm2682_vm9 = vmor %vm2680_vm8, %vm2681_vm7 }
0x1d87   :  { %v2676_v5 = vmul.f32 %v4631_v3, %v2675_v4 }
0x1d89   :  { %v2677_v6 = vmul.f32 0.5, %v2676_v5 }
0x1d8b   :  { %v2678_v7 = vsub.f32 1.5, %v2677_v6 }
0x1d8d   :  { %v2679_v8 = vmul.f32 %v4631_v3, %v2678_v7 }
0x1d8f   :  { %v2683_v9 = vsel %vm2682_vm9, %v4631_v3, %v2679_v8 }
0x1d90   :  { %v2685_v10 = vmul.f32 %v2683_v9, %v2651_v40 }
0x1d92   :  { %v2690_v11 = vmul.f32 %v4428_v62, %v2685_v10 }
0x1d94   :  { %v6705_v12 = vadd.f32 %v4429_v1, %v2690_v11 }
0x1d96   :  { %4239 = vmatmul.msk.f32.gmra.mxu0 %vm829_vm2, %v6705_v12 }
0x1de1   :  { %v2739_v28 = vpop.f32.mrf.mxu0 }
0x1de2   :  { %v2740_v18 = vadd.f32 %v4430_v46, %v2739_v28 }
0x1de4   :  { %v2747_v26 = vmul.f32 1.442695, %v2740_v18  ;;  %vm2745_vm1 = vcmp.gt.f32.partialorder %v2740_v18, 0.0 }
0x1de6   :  { %4632 = vpow2.f32 %v2747_v26 }
0x1dec   :  { %v4633_v24 = vpop.eup %4632 }
0x1ded   :  { %v4240_v57 = vadd.f32 -1.0, %v4633_v24 }
0x1def   :  { %v2753_v22 = vsel %vm2745_vm1, %v2740_v18, %v4240_v57 }
0x1df0   :  { %4242 = vmatmul.msk.f32.vlgmr.msrb.gmra.mxu1 %vm829_vm2, %v2753_v22 }
0x1e13   :  { %v2742_v21 = vpop.f32.mrf.mxu0 }
0x1e14   :  { %v2743_v23 = vadd.f32 %v4430_v46, %v2742_v21 }
0x1e16   :  { %v2749_v37 = vmul.f32 1.442695, %v2743_v23  ;;  %vm2746_vm11 = vcmp.gt.f32.partialorder %v2743_v23, 0.0 }
0x1e18   :  { %4634 = vpow2.f32 %v2749_v37  ;;  %v2925_v37 = vld [vmem:[%s7154_s11 + $0x10] sm:$0xff] }
0x1e1e   :  { %v4635_v38 = vpop.eup %4634 }
0x1e1f   :  { %v4241_v36 = vadd.f32 -1.0, %v4635_v38  ;;  %v2924_v38 = vld [vmem:[%s7154_s11 + $0x8] sm:$0xff] }
0x1e21   :  { %v2754_v33 = vsel %vm2746_vm11, %v2743_v23, %v4241_v36  ;;  %v2926_v23 = vld [vmem:[%s7154_s11 + $0x18] sm:$0xff]  ;;  %v2923_v36 = vld [vmem:[%s7154_s11] sm:$0xff]  ;;  %vm2956_vm11 = vcmask 588800  }
0x1e22   :  { %4243 = vmatmul.msk.f32.gmra.mxu1 %vm829_vm2, %v2754_v33  ;;  %2945 = vmatpush.msrb.mxu3 %v2926_v23 }
0x1e24   :  { %2946 = vmatpush.msrb.mxu3 %v2925_v37 }
0x1e26   :  { %2947 = vmatpush.msrb.mxu3 %v2924_v38 }
0x1e28   :  { %2948 = vmatpush.msrb.mxu3 %v2923_v36 }
0x1e6d   :  { %v2781_v31 = vpop.f32.mrf.mxu1 }
0x1e6e   :  { %v2782_v58 = vadd.f32 %v4431_v39, %v2781_v31 }
0x1e70   :  { %4244 = vmatmul.msk.f32.vlgmr.msra.gmra.mxu2 %vm829_vm2, %v2782_v58 }
0x1e9f   :  { %v2784_v30 = vpop.f32.mrf.mxu1 }
0x1ea0   :  { %v2785_v35 = vadd.f32 %v4431_v39, %v2784_v30 }
0x1ea2   :  { %4245 = vmatmul.msk.f32.gmra.mxu2 %vm829_vm2, %v2785_v35 }
0x1ef3   :  { %v2813_v15 = vpop.f32.mrf.mxu2 }
0x1ef4   :  { %v2814_v40 = vadd.f32 %v4432_v27, %v2813_v15  ;;  %v4433_v15 = vld [vmem:[#allocation8] ss:$0 sm:$0xff] }
0x1ef6   :  { %2859 = vrot.lane.b32.xlu2 %v2814_v40, %s5754_s20  ;;  %v4246_v41 = vmul.f32 -1.442695, %v2814_v40 }
0x1ef8   :  { %4636 = vpow2.f32 %v4246_v41 }
0x1efe   :  { %v4637_v47 = vpop.eup %4636 }
0x1eff   :  { %v2825_v43 = vadd.f32 1.0, %v4637_v47 }
0x1f01   :  { %4638 = vrcp.f32 %v2825_v43  ;;  %v2838_v53 = vand.u32 2147483648, %v2825_v43  ;;  %vm2832_vm13 = vweird.f32 %v2825_v43  ;;  %v2836_v56 = vand.u32 2147483647, %v2825_v43 }
0x1f03   :  { %v2839_v60 = vor.u32 1.1754944e-38, %v2838_v53  ;;  %vm2837_vm15 = vcmp.eq.f32.partialorder %v2836_v56, 8.507059e+37 }
0x1f07   :  { %v4639_v48 = vpop.eup %4638 }
0x1f08   :  { %v2828_v49 = vmul.f32 %v4639_v48, %v2825_v43  ;;  %vm2833_vm12 = vweird.f32 %v4639_v48 }
0x1f09   :  { %vm2834_vm14 = vmor %vm2832_vm13, %vm2833_vm12  ;;  %vm2969_vm12 = vcmask 64512  }
0x1f0a   :  { %v2829_v50 = vsub.f32 1.0, %v2828_v49 }
0x1f0c   :  { %v2830_v52 = vmul.f32 %v4639_v48, %v2829_v50 }
0x1f0e   :  { %v2831_v19 = vadd.f32 %v4639_v48, %v2830_v52 }
0x1f10   :  { %v2835_v59 = vsel %vm2834_vm14, %v4639_v48, %v2831_v19 }
0x1f11   :  { %v2840_v61 = vsel %vm2837_vm15, %v2839_v60, %v2835_v59 }
0x1f25   :  { %v2816_v32 = vpop.f32.mrf.mxu2 }
0x1f26   :  { %v2817_v45 = vadd.f32 %v4432_v27, %v2816_v32  ;;  %v4434_v32 = vld [vmem:[#allocation6] ss:$0 sm:$0xff] }
0x1f28   :  { %2861 = vrot.lane.b32.xlu1 %v2817_v45, %s5754_s20  ;;  %v4247_v2 = vmul.f32 -1.442695, %v2817_v45 }
0x1f2a   :  { %4640 = vpow2.f32 %v4247_v2 }
0x1f30   :  { %v4641_v34 = vpop.eup %4640 }
0x1f31   :  { %v2826_v20 = vadd.f32 1.0, %v4641_v34 }
0x1f33   :  { %4642 = vrcp.f32 %v2826_v20  ;;  %v2853_v7 = vand.u32 2147483648, %v2826_v20  ;;  %vm2847_vm3 = vweird.f32 %v2826_v20  ;;  %v2851_v8 = vand.u32 2147483647, %v2826_v20 }
0x1f35   :  { %v2854_v10 = vor.u32 1.1754944e-38, %v2853_v7  ;;  %vm2852_vm4 = vcmp.eq.f32.partialorder %v2851_v8, 8.507059e+37 }
0x1f39   :  { %v4643_v55 = vpop.eup %4642 }
0x1f3a   :  { %v2843_v3 = vmul.f32 %v4643_v55, %v2826_v20  ;;  %vm2848_vm10 = vweird.f32 %v4643_v55 }
0x1f3b   :  { %vm2849_vm0 = vmor %vm2847_vm3, %vm2848_vm10 }
0x1f3c   :  { %v2844_v4 = vsub.f32 1.0, %v2843_v3 }
0x1f3e   :  { %v2845_v5 = vmul.f32 %v4643_v55, %v2844_v4 }
0x1f40   :  { %v2846_v6 = vadd.f32 %v4643_v55, %v2845_v5 }
0x1f42   :  { %v2850_v9 = vsel %vm2849_vm0, %v4643_v55, %v2846_v6 }
0x1f43   :  { %v2855_v13 = vsel %vm2852_vm4, %v2854_v10, %v2850_v9 }
0x1f50   :  { %v2860_v62 = vpop.permute.xlu2 %2859 }
0x1f51   :  { %v2865_v63 = vmul.f32 %v2860_v62, %v2840_v61 }
0x1f53   :  { %v2867_v0 = vadd.f32 %v2865_v63, %v6700_v54 }
0x1f55   :  { %v2869_v1 = vsel %vm829_vm2, %v2867_v0, 0.0 }
0x1f56   :  { %2870 = vadd.xlane.f32.xlu0 %v2869_v1 }
0x1f9a   :  { %v2862_v11 = vpop.permute.xlu1 %2861 }
0x1f9b   :  { %v2866_v14 = vmul.f32 %v2862_v11, %v2855_v13 }
0x1f9d   :  { %v2868_v17 = vadd.f32 %v2866_v14, %v6705_v12 }
0x1f9f   :  { %v2872_v25 = vsel %vm829_vm2, %v2868_v17, 0.0 }
0x1fa0   :  { %2873 = vadd.xlane.f32.xlu0 %v2872_v25  ;;  %v2961_v25 = vlaneseq }
0x1fc9   :  { %v2871_v46 = vpop.xlane.xlu0 %2870 }
0x1fca   :  { %v2875_v28 = vmul.f32 %v2871_v46, %v6689_v44  ;;  %v2962_v46 = vshrl.u32 %v2961_v25, 7 }
0x1fcc   :  { %v2877_v18 = vsub.f32 %v2867_v0, %v2875_v28  ;;  %v2964_v28 = vand.u32 127, %v2961_v25 }
0x1fce   :  { %v2879_v26 = vmul.f32 %v2877_v18, %v2877_v18  ;;  %vm6782_vm13 = vcmp.ge.s32.totalorder %v2962_v46, %v2964_v28 }
0x1fd0   :  { %v2881_v24 = vsel %vm829_vm2, %v2879_v26, 0.0 }
0x1fd1   :  { %2882 = vadd.xlane.f32.xlu0 %v2881_v24 }
0x2013   :  { %v2874_v57 = vpop.xlane.xlu0 %2873 }
0x2014   :  { %v2876_v22 = vmul.f32 %v2874_v57, %v6689_v44 }
0x2016   :  { %v2878_v42 = vsub.f32 %v2868_v17, %v2876_v22 }
0x2018   :  { %v2880_v29 = vmul.f32 %v2878_v42, %v2878_v42 }
0x201a   :  { %v2884_v21 = vsel %vm829_vm2, %v2880_v29, 0.0 }
0x201b   :  { %2885 = vadd.xlane.f32.xlu2 %v2884_v21 }
0x2044   :  { %v2883_v33 = vpop.xlane.xlu0 %2882 }
0x2045   :  { %v2887_v51 = vmul.f32 %v2883_v33, %v6689_v44 }
0x2047   :  { %v2889_v16 = vadd.f32 1e-05, %v2887_v51 }
0x2049   :  { %4644 = vrsqrt.f32 %v2889_v16  ;;  %vm2897_vm6 = vweird.f32 %v2889_v16 }
0x204f   :  { %v4645_v39 = vpop.eup %4644 }
0x2050   :  { %v2892_v31 = vmul.f32 %v4645_v39, %v2889_v16  ;;  %vm2898_vm5 = vweird.f32 %v4645_v39 }
0x2051   :  { %vm2899_vm7 = vmor %vm2897_vm6, %vm2898_vm5 }
0x2052   :  { %v2893_v58 = vmul.f32 %v4645_v39, %v2892_v31 }
0x2054   :  { %v2894_v30 = vmul.f32 0.5, %v2893_v58 }
0x2056   :  { %v2895_v35 = vsub.f32 1.5, %v2894_v30 }
0x2058   :  { %v2896_v27 = vmul.f32 %v4645_v39, %v2895_v35 }
0x205a   :  { %v2900_v40 = vsel %vm2899_vm7, %v4645_v39, %v2896_v27 }
0x205b   :  { %v2911_v41 = vmul.f32 %v2900_v40, %v2877_v18 }
0x205d   :  { %v2916_v45 = vmul.f32 %v4433_v15, %v2911_v41 }
0x205f   :  { %v6735_v47 = vadd.f32 %v4434_v32, %v2916_v45 }
0x2061   :  { %4248 = vmatmul.msk.f32.vlgmr.msrb.gmra.mxu3 %vm829_vm2, %v6735_v47 }
0x208e   :  { %v2886_v43 = vpop.xlane.xlu2 %2885 }
0x208f   :  { %v2888_v48 = vmul.f32 %v2886_v43, %v6689_v44 }
0x2091   :  { %v2890_v49 = vadd.f32 1e-05, %v2888_v48 }
0x2093   :  { %4646 = vrsqrt.f32 %v2890_v49  ;;  %vm2907_vm9 = vweird.f32 %v2890_v49 }
0x2099   :  { %v4647_v50 = vpop.eup %4646 }
0x209a   :  { %v2902_v52 = vmul.f32 %v4647_v50, %v2890_v49  ;;  %vm2908_vm8 = vweird.f32 %v4647_v50 }
0x209b   :  { %vm2909_vm1 = vmor %vm2907_vm9, %vm2908_vm8 }
0x209c   :  { %v2903_v19 = vmul.f32 %v4647_v50, %v2902_v52 }
0x209e   :  { %v2904_v53 = vmul.f32 0.5, %v2903_v19 }
0x20a0   :  { %v2905_v56 = vsub.f32 1.5, %v2904_v53 }
0x20a2   :  { %v2906_v59 = vmul.f32 %v4647_v50, %v2905_v56 }
0x20a4   :  { %v2910_v60 = vsel %vm2909_vm1, %v4647_v50, %v2906_v59 }
0x20a5   :  { %v2912_v61 = vmul.f32 %v2910_v60, %v2878_v42 }
0x20a7   :  { %v2917_v62 = vmul.f32 %v4433_v15, %v2912_v61 }
0x20a9   :  { %v6740_v63 = vadd.f32 %v4434_v32, %v2917_v62 }
0x20ab   :  { %4249 = vmatmul.msk.f32.gmra.mxu3 %vm829_vm2, %v6740_v63 }
0x20e4   :  { %v2950_v0 = vpop.f32.mrf.mxu3 }
0x20e5   :  { %2957 = vst.msk [vmem:[#allocation4] sm:$0xff] %vm2956_vm11, %v2950_v0 }
0x20ec   :  { %v6744_v1 = vld [vmem:[#allocation4] sm:$0xff] }
0x20ed   :  { %3080 = vrot.lane.b32.xlu0 %v6744_v1, %s5756_s0  ;;  %2967 = vrot.lane.b32.xlu1 %v6744_v1, %s5754_s20 }
0x20f5   :  { %3304 = vrot.lane.b32.xlu0 %v6744_v1, %s5757_s21  ;;  %3078 = vrot.lane.b32.xlu1 %v6744_v1, %s5758_s4 }
0x212e   :  { %v2953_v2 = vpop.f32.mrf.mxu3 }
0x212f   :  { %2958 = vst.msk [vmem:[#allocation4 + $0x8] sm:$0xff] %vm2956_vm11, %v2953_v2 }
0x2136   :  { %v6751_v34 = vld [vmem:[#allocation4 + $0x8] sm:$0xff] }
0x2137   :  { %3219 = vrot.lane.b32.xlu2 %v6751_v34, %s5759_s12  ;;  %3109 = vrot.lane.b32.xlu0 %v6751_v34, %s5756_s0 }
0x2138   :  { %2995 = vrot.lane.b32.xlu1 %v6751_v34, %s5754_s20 }
0x213f   :  { %3302 = vrot.lane.b32.xlu0 %v6744_v1, %s5760_s16 }
0x2140   :  { %3221 = vrot.lane.b32.xlu1 %v6751_v34, %s5761_s25 }
0x2147   :  { %3190 = vrot.lane.b32.xlu0 %v6744_v1, %s5759_s12 }
0x2148   :  { %3107 = vrot.lane.b32.xlu1 %v6751_v34, %s5758_s4 }
0x214f   :  { %3331 = vrot.lane.b32.xlu0 %v6751_v34, %s5760_s16 }
0x2150   :  { %3192 = vrot.lane.b32.xlu1 %v6744_v1, %s5761_s25 }
0x2158   :  { %3333 = vrot.lane.b32.xlu1 %v6751_v34, %s5757_s21 }
0x215f   :  { %v3081_v20 = vpop.permute.xlu0 %3080  ;;  %v2968_v55 = vpop.permute.xlu1 %2967 }
0x2160   :  { %4250 = vmatpush.xpose.msk.msra.mxu0 %vm2969_vm12, %v2968_v55  ;;  %4254 = vmatpush.xpose.msk.msrb.mxu2 %vm2969_vm12, %v3081_v20 }
0x2163   :  { %4251 = vmatmul.msk.f32.vlgmr.msra.gmra.mxu0 %vm2969_vm12, %v6744_v1 }
0x2167   :  { %v3305_v3 = vpop.permute.xlu0 %3304  ;;  %v3079_v4 = vpop.permute.xlu1 %3078 }
0x2168   :  { %4255 = vmatmul.msk.f32.vlgmr.msrb.gmra.mxu2 %vm2969_vm12, %v3079_v4  ;;  %4262 = vmatpush.xpose.msk.msra.mxu3 %vm2969_vm12, %v3305_v3 }
0x2191   :  { %v3220_v9 = vpop.permute.xlu2 %3219 }
0x21a9   :  { %v3110_v5 = vpop.permute.xlu0 %3109 }
0x21aa   :  { %v2996_v6 = vpop.permute.xlu1 %2995  ;;  %4256 = vmatpush.xpose.msk.msrb.mxu0 %vm2969_vm12, %v3110_v5 }
0x21ab   :  { %4252 = vmatpush.xpose.msk.msra.mxu1 %vm2969_vm12, %v2996_v6 }
0x21ae   :  { %4253 = vmatmul.msk.f32.vlgmr.msra.gmra.mxu1 %vm2969_vm12, %v6751_v34 }
0x21b1   :  { %v3303_v7 = vpop.permute.xlu0 %3302 }
0x21b2   :  { %v3222_v8 = vpop.permute.xlu1 %3221  ;;  %4263 = vmatmul.msk.f32.vlgmr.msra.gmra.mxu3 %vm2969_vm12, %v3303_v7 }
0x21b3   :  { %4260 = vmatpush.xpose.msk.msra.mxu2 %vm2969_vm12, %v3222_v8 }
0x21b6   :  { %4261 = vmatmul.msk.f32.vlgmr.msra.gmra.mxu2 %vm2969_vm12, %v3220_v9 }
0x21b9   :  { %v3191_v13 = vpop.permute.xlu0 %3190 }
0x21ba   :  { %v3108_v10 = vpop.permute.xlu1 %3107 }
0x21bb   :  { %4257 = vmatmul.msk.f32.vlgmr.msrb.gmra.mxu0 %vm2969_vm12, %v3108_v10 }
0x21c1   :  { %v3332_v17 = vpop.permute.xlu0 %3331 }
0x21c2   :  { %v3193_v11 = vpop.permute.xlu1 %3192 }
0x21c3   :  { %4258 = vmatpush.xpose.msk.msrb.mxu1 %vm2969_vm12, %v3193_v11 }
0x21c6   :  { %4259 = vmatmul.msk.f32.vlgmr.msrb.gmra.mxu1 %vm2969_vm12, %v3191_v13 }
0x21ca   :  { %v3334_v14 = vpop.permute.xlu1 %3333 }
0x21cb   :  { %4264 = vmatpush.xpose.msk.msra.mxu0 %vm2969_vm12, %v3334_v14 }
0x21ce   :  { %4265 = vmatmul.msk.f32.vlgmr.msra.gmra.mxu0 %vm2969_vm12, %v3332_v17 }
0x21e0   :  { %v2991_v26 = vpop.f32.mrf.mxu0 }
0x21e1   :  { %v3023_v24 = vsel %vm6782_vm13, %v2991_v26, -1e+09 }
0x21e2   :  { %v3025_v57 = vsel %vm2969_vm12, %v3023_v24, -inf }
0x21e3   :  { %3026 = vmax.xlane.f32.xlu1 %v3025_v57 }
0x21eb   :  { %v3103_v22 = vpop.f32.mrf.mxu2 }
0x21ec   :  { %v3135_v42 = vsel %vm6782_vm13, %v3103_v22, -1e+09 }
0x21ed   :  { %v3137_v29 = vsel %vm2969_vm12, %v3135_v42, -inf }
0x21ee   :  { %3138 = vmax.xlane.f32.xlu2 %v3137_v29 }
0x222b   :  { %v3018_v21 = vpop.f32.mrf.mxu1 }
0x222c   :  { %v3024_v23 = vsel %vm6782_vm13, %v3018_v21, -1e+09 }
0x222d   :  { %v3028_v37 = vsel %vm2969_vm12, %v3024_v23, -inf }
0x222e   :  { %3029 = vmax.xlane.f32.xlu0 %v3028_v37 }
0x2235   :  { %v3327_v31 = vpop.f32.mrf.mxu3 }
0x2236   :  { %v3359_v58 = vsel %vm6782_vm13, %v3327_v31, -1e+09 }
0x2237   :  { %v3361_v30 = vsel %vm2969_vm12, %v3359_v58, -inf }
0x2238   :  { %v3132_v38 = vpop.f32.mrf.mxu0 }
0x2239   :  { %v3136_v36 = vsel %vm6782_vm13, %v3132_v38, -1e+09  ;;  %v3244_v33 = vpop.f32.mrf.mxu2 }
0x223a   :  { %v3248_v51 = vsel %vm6782_vm13, %v3244_v33, -1e+09  ;;  %v3140_v16 = vsel %vm2969_vm12, %v3136_v36, -inf }
0x223b   :  { %3141 = vmax.xlane.f32.xlu1 %v3140_v16  ;;  %v3252_v39 = vsel %vm2969_vm12, %v3248_v51, -inf }
0x223c   :  { %3253 = vmax.xlane.f32.xlu0 %v3252_v39 }
0x2243   :  { %3362 = vmax.xlane.f32.xlu1 %v3361_v30  ;;  %v3215_v35 = vpop.f32.mrf.mxu1 }
0x2244   :  { %v3247_v27 = vsel %vm6782_vm13, %v3215_v35, -1e+09 }
0x2245   :  { %v3249_v15 = vsel %vm2969_vm12, %v3247_v27, -inf }
0x2246   :  { %3250 = vmax.xlane.f32.xlu2 %v3249_v15 }
0x224b   :  { %v3356_v40 = vpop.f32.mrf.mxu0 }
0x224c   :  { %v3360_v41 = vsel %vm6782_vm13, %v3356_v40, -1e+09 }
0x224d   :  { %v3364_v32 = vsel %vm2969_vm12, %v3360_v41, -inf }
0x224e   :  { %3365 = vmax.xlane.f32.xlu2 %v3364_v32 }
0x2256   :  { %v3027_v45 = vpop.xlane.xlu1 %3026 }
0x2257   :  { %v3031_v43 = vsub.f32 %v3023_v24, %v3027_v45 }
0x2259   :  { %v3033_v48 = vmul.f32 1.442695, %v3031_v43 }
0x225b   :  { %4648 = vpow2.f32 %v3033_v48 }
0x2261   :  { %v6810_v49 = vpop.eup %4648  ;;  %v3139_v50 = vpop.xlane.xlu2 %3138 }
0x2262   :  { %v3143_v52 = vsub.f32 %v3135_v42, %v3139_v50  ;;  %v3037_v19 = vsel %vm2969_vm12, %v6810_v49, 0.0 }
0x2263   :  { %3038 = vadd.xlane.f32.xlu0 %v3037_v19 }
0x2264   :  { %v3145_v53 = vmul.f32 1.442695, %v3143_v52 }
0x2266   :  { %4650 = vpow2.f32 %v3145_v53 }
0x226c   :  { %v6814_v56 = vpop.eup %4650 }
0x226d   :  { %v3149_v59 = vsel %vm2969_vm12, %v6814_v56, 0.0 }
0x226e   :  { %3150 = vadd.xlane.f32.xlu1 %v3149_v59 }
0x22a1   :  { %v3030_v60 = vpop.xlane.xlu0 %3029 }
0x22a2   :  { %v3032_v61 = vsub.f32 %v3024_v23, %v3030_v60  ;;  %v4409_v23 = vpack.i.bf16 %v6751_v34, %v6744_v1 }
0x22a4   :  { %v3035_v62 = vmul.f32 1.442695, %v3032_v61 }
0x22a6   :  { %4652 = vpow2.f32 %v3035_v62 }
0x22ac   :  { %v6818_v0 = vpop.eup %4652 }
0x22ad   :  { %v3040_v2 = vsel %vm2969_vm12, %v6818_v0, 0.0 }
0x22ae   :  { %3041 = vadd.xlane.f32.xlu2 %v3040_v2  ;;  %v3142_v20 = vpop.xlane.xlu1 %3141 }
0x22af   :  { %v3144_v55 = vsub.f32 %v3136_v36, %v3142_v20  ;;  %v3254_v3 = vpop.xlane.xlu0 %3253 }
0x22b0   :  { %v3256_v4 = vsub.f32 %v3248_v51, %v3254_v3 }
0x22b1   :  { %v3147_v5 = vmul.f32 1.442695, %v3144_v55 }
0x22b2   :  { %v3259_v6 = vmul.f32 1.442695, %v3256_v4 }
0x22b3   :  { %4654 = vpow2.f32 %v3147_v5 }
0x22b4   :  { %4656 = vpow2.f32 %v3259_v6 }
0x22b6   :  { %v3363_v7 = vpop.xlane.xlu1 %3362 }
0x22b7   :  { %v3367_v8 = vsub.f32 %v3359_v58, %v3363_v7 }
0x22b9   :  { %v6822_v9 = vpop.eup %4654  ;;  %v3369_v10 = vmul.f32 1.442695, %v3367_v8  ;;  %v3251_v11 = vpop.xlane.xlu2 %3250 }
0x22ba   :  { %v6824_v13 = vpop.eup %4656  ;;  %v3255_v14 = vsub.f32 %v3247_v27, %v3251_v11  ;;  %v3152_v17 = vsel %vm2969_vm12, %v6822_v9, 0.0 }
0x22bb   :  { %4658 = vpow2.f32 %v3369_v10  ;;  %3153 = vadd.xlane.f32.xlu0 %v3152_v17  ;;  %v3264_v25 = vsel %vm2969_vm12, %v6824_v13, 0.0 }
0x22bc   :  { %v3257_v46 = vmul.f32 1.442695, %v3255_v14  ;;  %3265 = vadd.xlane.f32.xlu2 %v3264_v25 }
0x22be   :  { %4660 = vpow2.f32 %v3257_v46 }
0x22c1   :  { %v6830_v28 = vpop.eup %4658  ;;  %v3366_v18 = vpop.xlane.xlu2 %3365 }
0x22c2   :  { %v3368_v26 = vsub.f32 %v3360_v41, %v3366_v18  ;;  %v3373_v24 = vsel %vm2969_vm12, %v6830_v28, 0.0 }
0x22c3   :  { %3374 = vadd.xlane.f32.xlu0 %v3373_v24 }
0x22c4   :  { %v6834_v57 = vpop.eup %4660  ;;  %v3371_v22 = vmul.f32 1.442695, %v3368_v26 }
0x22c5   :  { %v3261_v42 = vsel %vm2969_vm12, %v6834_v57, 0.0 }
0x22c6   :  { %4662 = vpow2.f32 %v3371_v22  ;;  %3262 = vadd.xlane.f32.xlu1 %v3261_v42 }
0x22cc   :  { %v6838_v29 = vpop.eup %4662 }
0x22cd   :  { %v3376_v21 = vsel %vm2969_vm12, %v6838_v29, 0.0 }
0x22ce   :  { %3377 = vadd.xlane.f32.xlu1 %v3376_v21 }
0x22d4   :  { %4410 = vrot.lane.b32.xlu2 %v4409_v23, %s5752_s1 }
0x22d6   :  { %v3039_v37 = vpop.xlane.xlu0 %3038 }
0x22d7   :  { %4664 = vrcp.f32 %v3039_v37  ;;  %v3054_v40 = vand.u32 2147483648, %v3039_v37  ;;  %vm3048_vm10 = vweird.f32 %v3039_v37  ;;  %v3052_v19 = vand.u32 2147483647, %v3039_v37 }
0x22d9   :  { %v3055_v61 = vor.u32 1.1754944e-38, %v3054_v40  ;;  %vm3053_vm5 = vcmp.eq.f32.partialorder %v3052_v19, 8.507059e+37 }
0x22dd   :  { %v4665_v36 = vpop.eup %4664 }
0x22de   :  { %v3044_v16 = vmul.f32 %v4665_v36, %v3039_v37  ;;  %vm3049_vm14 = vweird.f32 %v4665_v36 }
0x22df   :  { %vm6862_vm3 = vmor %vm3048_vm10, %vm3049_vm14 }
0x22e0   :  { %v3045_v31 = vsub.f32 1.0, %v3044_v16 }
0x22e1   :  { %v3151_v38 = vpop.xlane.xlu1 %3150 }
0x22e2   :  { %4666 = vrcp.f32 %v3151_v38  ;;  %v3046_v34 = vmul.f32 %v4665_v36, %v3045_v31  ;;  %v3166_v43 = vand.u32 2147483648, %v3151_v38  ;;  %vm3160_vm0 = vweird.f32 %v3151_v38 }
0x22e3   :  { %v3164_v53 = vand.u32 2147483647, %v3151_v38 }
0x22e4   :  { %v3047_v41 = vadd.f32 %v4665_v36, %v3046_v34  ;;  %v3167_v5 = vor.u32 1.1754944e-38, %v3166_v43 }
0x22e5   :  { %vm3165_vm6 = vcmp.eq.f32.partialorder %v3164_v53, 8.507059e+37 }
0x22e6   :  { %v3051_v20 = vsel %vm6862_vm3, %v4665_v36, %v3047_v41 }
0x22e7   :  { %v3056_v11 = vsel %vm3053_vm5, %v3055_v61, %v3051_v20 }
0x22e8   :  { %v4667_v33 = vpop.eup %4666  ;;  %v3057_v22 = vmul.f32 %v6810_v49, %v3056_v11 }
0x22e9   :  { %v3156_v39 = vmul.f32 %v4667_v33, %v3151_v38  ;;  %vm3161_vm15 = vweird.f32 %v4667_v33 }
0x22ea   :  { %vm6870_vm4 = vmor %vm3160_vm0, %vm3161_vm15 }
0x22eb   :  { %v3157_v58 = vsub.f32 1.0, %v3156_v39 }
0x22ed   :  { %v3158_v27 = vmul.f32 %v4667_v33, %v3157_v58 }
0x22ef   :  { %v3159_v32 = vadd.f32 %v4667_v33, %v3158_v27 }
0x22f1   :  { %v3163_v55 = vsel %vm6870_vm4, %v4667_v33, %v3159_v32 }
0x22f2   :  { %v3168_v14 = vsel %vm3165_vm6, %v3167_v5, %v3163_v55 }
0x22f3   :  { %v3169_v42 = vmul.f32 %v6814_v56, %v3168_v14 }
0x2321   :  { %v6845_v51 = vpop.xlane.xlu2 %3041 }
0x2322   :  { %4668 = vrcp.f32 %v6845_v51  ;;  %v3067_v17 = vand.u32 2147483647, %v6845_v51  ;;  %v3069_v25 = vand.u32 2147483648, %v6845_v51  ;;  %vm3063_vm8 = vweird.f32 %v6845_v51 }
0x2324   :  { %vm6897_vm9 = vcmp.eq.f32.partialorder %v3067_v17, 8.507059e+37  ;;  %v3070_v37 = vor.u32 1.1754944e-38, %v3069_v25 }
0x2328   :  { %v6848_v30 = vpop.eup %4668 }
0x2329   :  { %v3059_v15 = vmul.f32 %v6848_v30, %v6845_v51  ;;  %vm3064_vm7 = vweird.f32 %v6848_v30 }
0x232a   :  { %vm6903_vm11 = vmor %vm3063_vm8, %vm3064_vm7 }
0x232b   :  { %v3060_v48 = vsub.f32 1.0, %v3059_v15 }
0x232d   :  { %v3061_v6 = vmul.f32 %v6848_v30, %v3060_v48 }
0x232e   :  { %v6850_v35 = vpop.xlane.xlu0 %3153 }
0x232f   :  { %4670 = vrcp.f32 %v6850_v35  ;;  %v6853_v1 = vpop.xlane.xlu2 %3265  ;;  %v3062_v26 = vadd.f32 %v6848_v30, %v3061_v6  ;;  %vm3175_vm1 = vweird.f32 %v6850_v35  ;;  %v3179_v38 = vand.u32 2147483647, %v6850_v35 }
0x2330   :  { %4672 = vrcp.f32 %v6853_v1  ;;  %v3181_v49 = vand.u32 2147483648, %v6850_v35  ;;  %vm3287_vm13 = vweird.f32 %v6853_v1  ;;  %v3293_v34 = vand.u32 2147483648, %v6853_v1 }
0x2331   :  { %v3066_v16 = vsel %vm6903_vm11, %v6848_v30, %v3062_v26  ;;  %vm3180_vm5 = vcmp.eq.f32.partialorder %v3179_v38, 8.507059e+37  ;;  %v3291_v61 = vand.u32 2147483647, %v6853_v1 }
0x2332   :  { %v3071_v53 = vsel %vm6897_vm9, %v3070_v37, %v3066_v16 }
0x2335   :  { %v6858_v45 = vpop.eup %4670 }
0x2336   :  { %v6860_v50 = vpop.eup %4672  ;;  %v3171_v59 = vmul.f32 %v6858_v45, %v6850_v35  ;;  %v6868_v60 = vpop.xlane.xlu0 %3374  ;;  %vm3176_vm14 = vweird.f32 %v6858_v45 }
0x2337   :  { %4674 = vrcp.f32 %v6868_v60  ;;  %v4411_v2 = vpop.permute.xlu2 %4410  ;;  %v3283_v3 = vmul.f32 %v6860_v50, %v6853_v1  ;;  %vm3288_vm15 = vweird.f32 %v6860_v50  ;;  %vm3384_vm10 = vweird.f32 %v6868_v60  ;;  %vm6924_vm0 = vmor %vm3175_vm1, %vm3176_vm14 }
0x2338   :  { %v4413_v4 = vunpack.i.h.bf16 %v4411_v2  ;;  %v3172_v7 = vsub.f32 1.0, %v3171_v59  ;;  %v4412_v8 = vunpack.i.l.bf16 %v4411_v2  ;;  %v3388_v30 = vand.u32 2147483647, %v6868_v60  ;;  %vm6951_vm7 = vmor %vm3287_vm13, %vm3288_vm15 }
0x2339   :  { %v6882_v10 = vpop.xlane.xlu1 %3262  ;;  %v3284_v46 = vsub.f32 1.0, %v3283_v3  ;;  %v3390_v43 = vand.u32 2147483648, %v6868_v60  ;;  %v3182_v59 = vor.u32 1.1754944e-38, %v3181_v49  ;;  %v3294_v2 = vor.u32 1.1754944e-38, %v3293_v34  ;;  %v3463_v49 = vld [vmem:[%s7171_s22] sm:$0xff] }
0x233a   :  { %4676 = vrcp.f32 %v6882_v10  ;;  %3458 = vmatpush.msrb.mxu2 %v4413_v4  ;;  %3432 = vmatpush.msra.mxu1 %v4412_v8  ;;  %v3173_v24 = vmul.f32 %v6858_v45, %v3172_v7  ;;  %v3278_v48 = vand.u32 2147483648, %v6882_v10  ;;  %v3276_v35 = vand.u32 2147483647, %v6882_v10 }
0x233b   :  { %v3285_v56 = vmul.f32 %v6860_v50, %v3284_v46  ;;  %vm3272_vm8 = vweird.f32 %v6882_v10  ;;  %v3391_v5 = vor.u32 1.1754944e-38, %v3390_v43  ;;  %vm3389_vm1 = vcmp.eq.f32.partialorder %v3388_v30, 8.507059e+37  ;;  %3489 = vmatpush.msrb.mxu3 %v3463_v49 }
0x233c   :  { %v3174_v39 = vadd.f32 %v6858_v45, %v3173_v24  ;;  %v3279_v1 = vor.u32 1.1754944e-38, %v3278_v48  ;;  %vm3277_vm11 = vcmp.eq.f32.partialorder %v3276_v35, 8.507059e+37  ;;  %v3185_v8 = vadd.f32 %v3169_v42, %v3057_v22 }
0x233d   :  { %v6887_v18 = vpop.eup %4674  ;;  %v3286_v41 = vadd.f32 %v6860_v50, %v3285_v56  ;;  %vm3292_vm13 = vcmp.eq.f32.partialorder %v3291_v61, 8.507059e+37  ;;  %v3499_v56 = vld [vmem:[#allocation40 + $0x10] sm:$0xff] }
0x233e   :  { %v3380_v21 = vmul.f32 %v6887_v18, %v6868_v60  ;;  %vm3385_vm3 = vweird.f32 %v6887_v18  ;;  %v3178_v52 = vsel %vm6924_vm0, %v6858_v45, %v3174_v39  ;;  %v3498_v39 = vld [vmem:[#allocation40 + $0x8] sm:$0xff] }
0x233f   :  { %vm6943_vm6 = vmor %vm3384_vm10, %vm3385_vm3  ;;  %v3183_v3 = vsel %vm3180_vm5, %v3182_v59, %v3178_v52  ;;  %v3290_v4 = vsel %vm6951_vm7, %v6860_v50, %v3286_v41  ;;  %v3072_v50 = vmul.f32 %v6818_v0, %v3071_v53 }
0x2340   :  { %v4677_v36 = vpop.eup %4676  ;;  %v3381_v51 = vsub.f32 1.0, %v3380_v21  ;;  %v3295_v17 = vsel %vm3292_vm13, %v3294_v2, %v3290_v4 }
0x2341   :  { %v3268_v31 = vmul.f32 %v4677_v36, %v6882_v10  ;;  %v3378_v58 = vpop.xlane.xlu1 %3377  ;;  %vm3273_vm4 = vweird.f32 %v4677_v36  ;;  %v3184_v10 = vmul.f32 %v6822_v9, %v3183_v3  ;;  %v3296_v22 = vmul.f32 %v6824_v13, %v3295_v17  ;;  %v3500_v13 = vld [vmem:[#allocation40 + $0x18] sm:$0xff] }
0x2342   :  { %v3382_v27 = vmul.f32 %v6887_v18, %v3381_v51  ;;  %4678 = vrcp.f32 %v3378_v58  ;;  %vm3274_vm9 = vmor %vm3272_vm8, %vm3273_vm4  ;;  %v3405_v26 = vand.u32 2147483648, %v3378_v58  ;;  %vm3399_vm15 = vweird.f32 %v3378_v58  ;;  %3525 = vmatpush.msrb.mxu0 %v3500_v13  ;;  %v3642_v13 = vld [vmem:[#allocation19 + $0x10] sm:$0xff] }
0x2343   :  { %v3269_v15 = vsub.f32 1.0, %v3268_v31  ;;  %v3186_v42 = vadd.f32 %v3184_v10, %v3072_v50  ;;  %v4435_v31 = vld [vmem:[%s7172_s14] ss:$0 sm:$0xff] }
0x2344   :  { %v3383_v32 = vadd.f32 %v6887_v18, %v3382_v27  ;;  %v3406_v38 = vor.u32 1.1754944e-38, %v3405_v26  ;;  %3526 = vmatpush.msrb.mxu0 %v3499_v56  ;;  %v3641_v56 = vld [vmem:[#allocation19 + $0x8] sm:$0xff] }
0x2345   :  { %v3270_v19 = vmul.f32 %v4677_v36, %v3269_v15  ;;  %v4436_v15 = vld [vmem:[#allocation35] ss:$0 sm:$0xff] }
0x2346   :  { %v3387_v20 = vsel %vm6943_vm6, %v6887_v18, %v3383_v32  ;;  %v3403_v18 = vand.u32 2147483647, %v3378_v58  ;;  %3527 = vmatpush.msrb.mxu0 %v3498_v39 }
0x2347   :  { %v3271_v55 = vadd.f32 %v4677_v36, %v3270_v19  ;;  %v3392_v11 = vsel %vm3389_vm1, %v3391_v5, %v3387_v20 }
0x2348   :  { %v4679_v60 = vpop.eup %4678  ;;  %v3393_v24 = vmul.f32 %v6830_v28, %v3392_v11  ;;  %vm3404_vm3 = vcmp.eq.f32.partialorder %v3403_v18, 8.507059e+37  ;;  %v3298_v28 = vadd.f32 %v3296_v22, %v3186_v42 }
0x2349   :  { %v3275_v6 = vsel %vm3274_vm9, %v4677_v36, %v3271_v55  ;;  %v3395_v7 = vmul.f32 %v4679_v60, %v3378_v58  ;;  %vm3400_vm14 = vweird.f32 %v4679_v60 }
0x234a   :  { %v3280_v14 = vsel %vm3277_vm11, %v3279_v1, %v3275_v6  ;;  %vm3401_vm10 = vmor %vm3399_vm15, %vm3400_vm14 }
0x234b   :  { %v3281_v25 = vmul.f32 %v6834_v57, %v3280_v14  ;;  %v3396_v46 = vsub.f32 1.0, %v3395_v7 }
0x234d   :  { %v3397_v21 = vmul.f32 %v4679_v60, %v3396_v46  ;;  %v3297_v23 = vadd.f32 %v3281_v25, %v3185_v8 }
0x234f   :  { %v3398_v37 = vadd.f32 %v4679_v60, %v3397_v21  ;;  %v3409_v9 = vadd.f32 %v3393_v24, %v3297_v23 }
0x2351   :  { %v3402_v57 = vsel %vm3401_vm10, %v4679_v60, %v3398_v37  ;;  %4266 = vmatmul.msk.f32.vlgmr.msra.gmra.mxu1 %vm2969_vm12, %v3409_v9 }
0x2352   :  { %v3407_v0 = vsel %vm3404_vm3, %v3406_v38, %v3402_v57 }
0x2353   :  { %v3408_v36 = vmul.f32 %v6838_v29, %v3407_v0  ;;  %v3497_v29 = vld [vmem:[#allocation40] sm:$0xff] }
0x2354   :  { %3528 = vmatpush.msrb.mxu0 %v3497_v29 }
0x2355   :  { %v3410_v33 = vadd.f32 %v3408_v36, %v3298_v28 }
0x2357   :  { %4267 = vmatmul.msk.f32.vlgmr.msrb.gmra.mxu2 %vm2969_vm12, %v3410_v33 }
0x23ce   :  { %v3434_v51 = vpop.f32.mrf.mxu1 }
0x23cf   :  { %4268 = vmatmul.msk.f32.vlgmr.msrb.gmra.mxu3 %vm2969_vm12, %v3434_v51  ;;  %v3640_v51 = vld [vmem:[#allocation19] sm:$0xff] }
0x23da   :  { %v3460_v16 = vpop.f32.mrf.mxu2 }
0x23db   :  { %4269 = vmatmul.msk.f32.gmra.mxu3 %vm2969_vm12, %v3460_v16 }
0x2452   :  { %v3491_v58 = vpop.f32.mrf.mxu3 }
0x2453   :  { %v3492_v34 = vadd.f32 %v4435_v31, %v3491_v58 }
0x2455   :  { %4270 = vmatmul.msk.f32.vlgmr.msrb.gmra.mxu0 %vm829_vm2, %v3492_v34 }
0x245e   :  { %v3494_v27 = vpop.f32.mrf.mxu3 }
0x245f   :  { %v3495_v30 = vadd.f32 %v4435_v31, %v3494_v27 }
0x2461   :  { %4271 = vmatmul.msk.f32.gmra.mxu0 %vm829_vm2, %v3495_v30 }
0x24d2   :  { %v3530_v40 = vpop.f32.mrf.mxu0 }
0x24d3   :  { %v3531_v41 = vadd.f32 %v4436_v15, %v3530_v40 }
0x24d5   :  { %3576 = vrot.lane.b32.xlu0 %v3531_v41, %s5754_s20  ;;  %v4272_v48 = vmul.f32 -1.442695, %v3531_v41 }
0x24d7   :  { %4680 = vpow2.f32 %v4272_v48 }
0x24dd   :  { %v4681_v52 = vpop.eup %4680 }
0x24de   :  { %v3533_v32 = vpop.f32.mrf.mxu0  ;;  %v3542_v35 = vadd.f32 1.0, %v4681_v52 }
0x24df   :  { %v3534_v43 = vadd.f32 %v4436_v15, %v3533_v32 }
0x24e0   :  { %v3555_v3 = vand.u32 2147483648, %v3542_v35  ;;  %vm3549_vm0 = vweird.f32 %v3542_v35  ;;  %v3553_v4 = vand.u32 2147483647, %v3542_v35 }
0x24e1   :  { %3578 = vrot.lane.b32.xlu1 %v3534_v43, %s5754_s20  ;;  %v4273_v19 = vmul.f32 -1.442695, %v3534_v43  ;;  %v4437_v43 = vld [vmem:[#allocation38] ss:$0 sm:$0xff] }
0x24e2   :  { %v3556_v6 = vor.u32 1.1754944e-38, %v3555_v3  ;;  %vm3554_vm5 = vcmp.eq.f32.partialorder %v3553_v4, 8.507059e+37 }
0x24e3   :  { %4682 = vpow2.f32 %v4273_v19 }
0x24e4   :  { %4684 = vrcp.f32 %v3542_v35 }
0x24e9   :  { %v4683_v53 = vpop.eup %4682 }
0x24ea   :  { %v4685_v59 = vpop.eup %4684  ;;  %v3543_v61 = vadd.f32 1.0, %v4683_v53 }
0x24eb   :  { %v3545_v62 = vmul.f32 %v4685_v59, %v3542_v35  ;;  %vm3550_vm12 = vweird.f32 %v4685_v59  ;;  %v4438_v35 = vld [vmem:[#allocation37] ss:$0 sm:$0xff] }
0x24ec   :  { %4686 = vrcp.f32 %v3543_v61  ;;  %vm3551_vm4 = vmor %vm3549_vm0, %vm3550_vm12  ;;  %v3570_v46 = vand.u32 2147483648, %v3543_v61  ;;  %vm3564_vm7 = vweird.f32 %v3543_v61  ;;  %v3568_v50 = vand.u32 2147483647, %v3543_v61 }
0x24ed   :  { %v3546_v45 = vsub.f32 1.0, %v3545_v62 }
0x24ee   :  { %v3571_v26 = vor.u32 1.1754944e-38, %v3570_v46  ;;  %vm3569_vm9 = vcmp.eq.f32.partialorder %v3568_v50, 8.507059e+37 }
0x24ef   :  { %v3547_v2 = vmul.f32 %v4685_v59, %v3546_v45 }
0x24f1   :  { %v3548_v55 = vadd.f32 %v4685_v59, %v3547_v2 }
0x24f2   :  { %v4687_v20 = vpop.eup %4686 }
0x24f3   :  { %v3560_v60 = vmul.f32 %v4687_v20, %v3543_v61  ;;  %v3552_v5 = vsel %vm3551_vm4, %v4685_v59, %v3548_v55  ;;  %vm3565_vm6 = vweird.f32 %v4687_v20 }
0x24f4   :  { %v3557_v8 = vsel %vm3554_vm5, %v3556_v6, %v3552_v5  ;;  %vm3566_vm8 = vmor %vm3564_vm7, %vm3565_vm6  ;;  %v3648_v5 = vld [vmem:[#allocation20 + $0x18] sm:$0xff]  ;;  %v3646_v6 = vld [vmem:[#allocation20 + $0x8] sm:$0xff] }
0x24f5   :  { %v3561_v1 = vsub.f32 1.0, %v3560_v60  ;;  %3720 = vmatpush.msra.mxu2 %v3648_v5 }
0x24f7   :  { %v3562_v14 = vmul.f32 %v4687_v20, %v3561_v1  ;;  %v3647_v1 = vld [vmem:[#allocation20 + $0x10] sm:$0xff] }
0x24f8   :  { %3721 = vmatpush.msra.mxu2 %v3647_v1 }
0x24f9   :  { %v3563_v25 = vadd.f32 %v4687_v20, %v3562_v14  ;;  %v4439_v14 = vld [vmem:[#allocation11] ss:$0 sm:$0xff] }
0x24fa   :  { %3722 = vmatpush.msra.mxu2 %v3646_v6 }
0x24fb   :  { %v3567_v18 = vsel %vm3566_vm8, %v4687_v20, %v3563_v25 }
0x24fc   :  { %v3572_v21 = vsel %vm3569_vm9, %v3571_v26, %v3567_v18 }
0x2547   :  { %v3577_v7 = vpop.permute.xlu0 %3576 }
0x2548   :  { %v3582_v11 = vmul.f32 %v3577_v7, %v3557_v8  ;;  %v3645_v7 = vld [vmem:[#allocation20] sm:$0xff]  ;;  %v3653_v8 = vld [vmem:[#allocation22 + $0x18] sm:$0xff] }
0x2549   :  { %3723 = vmatpush.msra.mxu2 %v3645_v7  ;;  %3752 = vmatpush.msra.mxu3 %v3653_v8 }
0x254a   :  { %v3584_v10 = vadd.f32 %v3582_v11, %v6735_v47  ;;  %v3652_v11 = vld [vmem:[#allocation22 + $0x10] sm:$0xff] }
0x254b   :  { %3753 = vmatpush.msra.mxu3 %v3652_v11 }
0x254c   :  { %v3586_v17 = vsel %vm829_vm2, %v3584_v10, 0.0 }
0x254d   :  { %3587 = vadd.xlane.f32.xlu0 %v3586_v17 }
0x2553   :  { %v3579_v24 = vpop.permute.xlu1 %3578 }
0x2554   :  { %v3583_v23 = vmul.f32 %v3579_v24, %v3572_v21 }
0x2556   :  { %v3585_v22 = vadd.f32 %v3583_v23, %v6740_v63  ;;  %v3643_v63 = vld [vmem:[#allocation19 + $0x18] sm:$0xff] }
0x2557   :  { %3678 = vmatpush.msrb.mxu1 %v3643_v63 }
0x2558   :  { %v3589_v42 = vsel %vm829_vm2, %v3585_v22, 0.0 }
0x2559   :  { %3590 = vadd.xlane.f32.xlu2 %v3589_v42  ;;  %3679 = vmatpush.msrb.mxu1 %v3642_v13 }
0x255b   :  { %3680 = vmatpush.msrb.mxu1 %v3641_v56 }
0x255d   :  { %3681 = vmatpush.msrb.mxu1 %v3640_v51 }
0x25c0   :  { %v3588_v47 = vpop.xlane.xlu0 %3587 }
0x25c1   :  { %v3592_v37 = vmul.f32 %v3588_v47, %v6689_v44  ;;  %v3651_v47 = vld [vmem:[#allocation22 + $0x8] sm:$0xff] }
0x25c2   :  { %3754 = vmatpush.msra.mxu3 %v3651_v47 }
0x25c3   :  { %v3594_v9 = vsub.f32 %v3584_v10, %v3592_v37  ;;  %v3650_v37 = vld [vmem:[#allocation22] sm:$0xff] }
0x25c4   :  { %3755 = vmatpush.msra.mxu3 %v3650_v37 }
0x25c5   :  { %v3596_v38 = vmul.f32 %v3594_v9, %v3594_v9 }
0x25c7   :  { %v3598_v57 = vsel %vm829_vm2, %v3596_v38, 0.0 }
0x25c8   :  { %3599 = vadd.xlane.f32.xlu1 %v3598_v57 }
0x25cc   :  { %v3591_v0 = vpop.xlane.xlu2 %3590 }
0x25cd   :  { %v3593_v36 = vmul.f32 %v3591_v0, %v6689_v44 }
0x25cf   :  { %v3595_v28 = vsub.f32 %v3585_v22, %v3593_v36 }
0x25d1   :  { %v3597_v33 = vmul.f32 %v3595_v28, %v3595_v28 }
0x25d3   :  { %v3601_v49 = vsel %vm829_vm2, %v3597_v33, 0.0 }
0x25d4   :  { %3602 = vadd.xlane.f32.xlu0 %v3601_v49 }
0x263b   :  { %v3600_v16 = vpop.xlane.xlu1 %3599 }
0x263c   :  { %v3604_v39 = vmul.f32 %v3600_v16, %v6689_v44 }
0x263e   :  { %v3606_v29 = vadd.f32 1e-05, %v3604_v39 }
0x2640   :  { %4688 = vrsqrt.f32 %v3606_v29  ;;  %vm3614_vm11 = vweird.f32 %v3606_v29 }
0x2646   :  { %v4689_v31 = vpop.eup %4688 }
0x2647   :  { %v3609_v58 = vmul.f32 %v4689_v31, %v3606_v29  ;;  %v3603_v34 = vpop.xlane.xlu0 %3602  ;;  %vm3615_vm1 = vweird.f32 %v4689_v31 }
0x2648   :  { %v3605_v27 = vmul.f32 %v3603_v34, %v6689_v44  ;;  %vm3616_vm13 = vmor %vm3614_vm11, %vm3615_vm1 }
0x2649   :  { %v3610_v30 = vmul.f32 %v4689_v31, %v3609_v58 }
0x264a   :  { %v3607_v15 = vadd.f32 1e-05, %v3605_v27 }
0x264b   :  { %v3611_v40 = vmul.f32 0.5, %v3610_v30 }
0x264c   :  { %4690 = vrsqrt.f32 %v3607_v15  ;;  %vm3624_vm15 = vweird.f32 %v3607_v15 }
0x264d   :  { %v3612_v41 = vsub.f32 1.5, %v3611_v40 }
0x264f   :  { %v3613_v32 = vmul.f32 %v4689_v31, %v3612_v41 }
0x2651   :  { %v3617_v48 = vsel %vm3616_vm13, %v4689_v31, %v3613_v32 }
0x2652   :  { %v4691_v52 = vpop.eup %4690  ;;  %v3628_v19 = vmul.f32 %v3617_v48, %v3594_v9  ;;  %v4440_v9 = vld [vmem:[#allocation13] ss:$0 sm:$0xff] }
0x2653   :  { %v3619_v53 = vmul.f32 %v4691_v52, %v3607_v15  ;;  %vm3625_vm14 = vweird.f32 %v4691_v52 }
0x2654   :  { %v3633_v59 = vmul.f32 %v4437_v43, %v3628_v19  ;;  %vm3626_vm10 = vmor %vm3624_vm15, %vm3625_vm14 }
0x2655   :  { %v3620_v61 = vmul.f32 %v4691_v52, %v3619_v53 }
0x2656   :  { %v6989_v62 = vadd.f32 %v4438_v35, %v3633_v59 }
0x2657   :  { %v3621_v45 = vmul.f32 0.5, %v3620_v61 }
0x2658   :  { %4274 = vmatmul.msk.f32.vlgmr.msrb.gmra.mxu1 %vm829_vm2, %v6989_v62 }
0x2659   :  { %v3622_v2 = vsub.f32 1.5, %v3621_v45 }
0x265b   :  { %v3623_v20 = vmul.f32 %v4691_v52, %v3622_v2 }
0x265d   :  { %v3627_v55 = vsel %vm3626_vm10, %v4691_v52, %v3623_v20 }
0x265e   :  { %v3629_v60 = vmul.f32 %v3627_v55, %v3595_v28  ;;  %v4441_v28 = vld [vmem:[#allocation14] ss:$0 sm:$0xff] }
0x2660   :  { %v3634_v3 = vmul.f32 %v4437_v43, %v3629_v60 }
0x2662   :  { %v6993_v4 = vadd.f32 %v4438_v35, %v3634_v3 }
0x2664   :  { %4275 = vmatmul.msk.f32.gmra.mxu1 %vm829_vm2, %v6993_v4 }
0x26d5   :  { %v3683_v10 = vpop.f32.mrf.mxu1 }
0x26d6   :  { %v3684_v17 = vadd.f32 %v4439_v14, %v3683_v10 }
0x26d8   :  { %v3691_v25 = vmul.f32 1.442695, %v3684_v17  ;;  %vm3689_vm3 = vcmp.gt.f32.partialorder %v3684_v17, 0.0 }
0x26da   :  { %4692 = vpow2.f32 %v3691_v25 }
0x26e0   :  { %v4693_v46 = vpop.eup %4692 }
0x26e1   :  { %v4276_v50 = vadd.f32 -1.0, %v4693_v46  ;;  %v3686_v18 = vpop.f32.mrf.mxu1 }
0x26e2   :  { %v3687_v26 = vadd.f32 %v4439_v14, %v3686_v18 }
0x26e3   :  { %v3697_v24 = vsel %vm3689_vm3, %v3684_v17, %v4276_v50 }
0x26e4   :  { %v3693_v21 = vmul.f32 1.442695, %v3687_v26  ;;  %4278 = vmatmul.msk.f32.vlgmr.msra.gmra.mxu2 %vm829_vm2, %v3697_v24  ;;  %vm3690_vm12 = vcmp.gt.f32.partialorder %v3687_v26, 0.0 }
0x26e6   :  { %4694 = vpow2.f32 %v3693_v21  ;;  %v3869_v21 = vld [vmem:[#allocation28 + $0x10] sm:$0xff] }
0x26ec   :  { %v4695_v23 = vpop.eup %4694 }
0x26ed   :  { %v4277_v22 = vadd.f32 -1.0, %v4695_v23  ;;  %v3868_v23 = vld [vmem:[#allocation28 + $0x8] sm:$0xff] }
0x26ef   :  { %v3698_v42 = vsel %vm3690_vm12, %v3687_v26, %v4277_v22  ;;  %v3867_v22 = vld [vmem:[#allocation28] sm:$0xff] }
0x26f0   :  { %4279 = vmatmul.msk.f32.gmra.mxu2 %vm829_vm2, %v3698_v42 }
0x2767   :  { %v3725_v38 = vpop.f32.mrf.mxu2 }
0x2768   :  { %v3726_v57 = vadd.f32 %v4440_v9, %v3725_v38 }
0x276a   :  { %4280 = vmatmul.msk.f32.vlgmr.msra.gmra.mxu3 %vm829_vm2, %v3726_v57 }
0x2773   :  { %v3728_v0 = vpop.f32.mrf.mxu2 }
0x2774   :  { %v3729_v36 = vadd.f32 %v4440_v9, %v3728_v0 }
0x2776   :  { %4281 = vmatmul.msk.f32.gmra.mxu3 %vm829_vm2, %v3729_v36 }
0x27ed   :  { %v3757_v33 = vpop.f32.mrf.mxu3 }
0x27ee   :  { %v3758_v49 = vadd.f32 %v4441_v28, %v3757_v33  ;;  %v4442_v33 = vld [vmem:[#allocation17] ss:$0 sm:$0xff] }
0x27f0   :  { %3803 = vrot.lane.b32.xlu2 %v3758_v49, %s5754_s20  ;;  %v4282_v56 = vmul.f32 -1.442695, %v3758_v49 }
0x27f2   :  { %4696 = vpow2.f32 %v4282_v56 }
0x27f8   :  { %v4697_v51 = vpop.eup %4696 }
0x27f9   :  { %v3760_v63 = vpop.f32.mrf.mxu3  ;;  %v3769_v16 = vadd.f32 1.0, %v4697_v51 }
0x27fa   :  { %v3761_v13 = vadd.f32 %v4441_v28, %v3760_v63 }
0x27fb   :  { %4698 = vrcp.f32 %v3769_v16  ;;  %v3782_v30 = vand.u32 2147483648, %v3769_v16  ;;  %vm3776_vm4 = vweird.f32 %v3769_v16  ;;  %v3780_v15 = vand.u32 2147483647, %v3769_v16 }
0x27fc   :  { %3805 = vrot.lane.b32.xlu1 %v3761_v13, %s5754_s20  ;;  %v4283_v34 = vmul.f32 -1.442695, %v3761_v13  ;;  %v4443_v13 = vld [vmem:[#allocation16] ss:$0 sm:$0xff] }
0x27fd   :  { %v3783_v41 = vor.u32 1.1754944e-38, %v3782_v30  ;;  %vm3781_vm6 = vcmp.eq.f32.partialorder %v3780_v15, 8.507059e+37 }
0x27fe   :  { %4700 = vpow2.f32 %v4283_v34 }
0x2801   :  { %v4699_v39 = vpop.eup %4698 }
0x2802   :  { %v3772_v29 = vmul.f32 %v4699_v39, %v3769_v16  ;;  %vm3777_vm0 = vweird.f32 %v4699_v39 }
0x2803   :  { %vm3778_vm5 = vmor %vm3776_vm4, %vm3777_vm0 }
0x2804   :  { %v3773_v31 = vsub.f32 1.0, %v3772_v29  ;;  %v4701_v48 = vpop.eup %4700 }
0x2805   :  { %v3770_v35 = vadd.f32 1.0, %v4701_v48  ;;  %v4444_v48 = vld [vmem:[#allocation23] ss:$0 sm:$0xff] }
0x2806   :  { %v3774_v58 = vmul.f32 %v4699_v39, %v3773_v31 }
0x2807   :  { %4702 = vrcp.f32 %v3770_v35  ;;  %v3797_v55 = vand.u32 2147483648, %v3770_v35  ;;  %vm3791_vm8 = vweird.f32 %v3770_v35  ;;  %v3795_v60 = vand.u32 2147483647, %v3770_v35 }
0x2808   :  { %v3775_v27 = vadd.f32 %v4699_v39, %v3774_v58 }
0x2809   :  { %v3798_v5 = vor.u32 1.1754944e-38, %v3797_v55  ;;  %vm3796_vm1 = vcmp.eq.f32.partialorder %v3795_v60, 8.507059e+37 }
0x280a   :  { %v3779_v40 = vsel %vm3778_vm5, %v4699_v39, %v3775_v27 }
0x280b   :  { %v3784_v32 = vsel %vm3781_vm6, %v3783_v41, %v3779_v40 }
0x280d   :  { %v4703_v59 = vpop.eup %4702 }
0x280e   :  { %v3787_v61 = vmul.f32 %v4703_v59, %v3770_v35  ;;  %vm3792_vm7 = vweird.f32 %v4703_v59 }
0x280f   :  { %vm3793_vm9 = vmor %vm3791_vm8, %vm3792_vm7 }
0x2810   :  { %v3788_v45 = vsub.f32 1.0, %v3787_v61 }
0x2812   :  { %v3789_v2 = vmul.f32 %v4703_v59, %v3788_v45 }
0x2814   :  { %v3790_v20 = vadd.f32 %v4703_v59, %v3789_v2 }
0x2816   :  { %v3794_v3 = vsel %vm3793_vm9, %v4703_v59, %v3790_v20 }
0x284a   :  { %v3804_v43 = vpop.permute.xlu2 %3803 }
0x284b   :  { %v3809_v52 = vmul.f32 %v3804_v43, %v3784_v32 }
0x284d   :  { %v3811_v19 = vadd.f32 %v3809_v52, %v6989_v62  ;;  %v3799_v62 = vsel %vm3796_vm1, %v3798_v5, %v3794_v3 }
0x284f   :  { %v3813_v53 = vsel %vm829_vm2, %v3811_v19, 0.0 }
0x2850   :  { %3814 = vadd.xlane.f32.xlu0 %v3813_v53 }
0x286e   :  { %v3806_v1 = vpop.permute.xlu1 %3805 }
0x286f   :  { %v3810_v6 = vmul.f32 %v3806_v1, %v3799_v62 }
0x2871   :  { %v3812_v7 = vadd.f32 %v3810_v6, %v6993_v4  ;;  %v3870_v4 = vld [vmem:[#allocation28 + $0x18] sm:$0xff] }
0x2872   :  { %3895 = vmatpush.msra.mxu0 %v3870_v4 }
0x2873   :  { %v3816_v8 = vsel %vm829_vm2, %v3812_v7, 0.0 }
0x2874   :  { %3817 = vadd.xlane.f32.xlu0 %v3816_v8  ;;  %3896 = vmatpush.msra.mxu0 %v3869_v21 }
0x2876   :  { %3897 = vmatpush.msra.mxu0 %v3868_v23 }
0x2878   :  { %3898 = vmatpush.msra.mxu0 %v3867_v22 }
0x28c3   :  { %v3815_v11 = vpop.xlane.xlu0 %3814 }
0x28c4   :  { %v3819_v14 = vmul.f32 %v3815_v11, %v6689_v44 }
0x28c6   :  { %v3821_v10 = vsub.f32 %v3811_v19, %v3819_v14 }
0x28c8   :  { %v3823_v17 = vmul.f32 %v3821_v10, %v3821_v10 }
0x28ca   :  { %v3825_v25 = vsel %vm829_vm2, %v3823_v17, 0.0 }
0x28cb   :  { %3826 = vadd.xlane.f32.xlu0 %v3825_v25 }
0x28e7   :  { %v3818_v46 = vpop.xlane.xlu0 %3817 }
0x28e8   :  { %v3820_v50 = vmul.f32 %v3818_v46, %v6689_v44 }
0x28ea   :  { %v3822_v18 = vsub.f32 %v3812_v7, %v3820_v50 }
0x28ec   :  { %v3824_v26 = vmul.f32 %v3822_v18, %v3822_v18 }
0x28ee   :  { %v3828_v24 = vsel %vm829_vm2, %v3824_v26, 0.0 }
0x28ef   :  { %3829 = vadd.xlane.f32.xlu2 %v3828_v24 }
0x293e   :  { %v3827_v42 = vpop.xlane.xlu0 %3826 }
0x293f   :  { %v3831_v47 = vmul.f32 %v3827_v42, %v6689_v44 }
0x2941   :  { %v3833_v37 = vadd.f32 1e-05, %v3831_v47 }
0x2943   :  { %4704 = vrsqrt.f32 %v3833_v37  ;;  %vm3841_vm13 = vweird.f32 %v3833_v37 }
0x2949   :  { %v4705_v9 = vpop.eup %4704 }
0x294a   :  { %v3836_v38 = vmul.f32 %v4705_v9, %v3833_v37  ;;  %vm3842_vm11 = vweird.f32 %v4705_v9 }
0x294b   :  { %vm3843_vm14 = vmor %vm3841_vm13, %vm3842_vm11 }
0x294c   :  { %v3837_v57 = vmul.f32 %v4705_v9, %v3836_v38 }
0x294e   :  { %v3838_v0 = vmul.f32 0.5, %v3837_v57 }
0x2950   :  { %v3839_v36 = vsub.f32 1.5, %v3838_v0 }
0x2952   :  { %v3840_v28 = vmul.f32 %v4705_v9, %v3839_v36 }
0x2954   :  { %v3844_v49 = vsel %vm3843_vm14, %v4705_v9, %v3840_v28 }
0x2955   :  { %v3855_v63 = vmul.f32 %v3844_v49, %v3821_v10 }
0x2957   :  { %v3860_v56 = vmul.f32 %v4442_v33, %v3855_v63 }
0x2959   :  { %v3865_v51 = vadd.f32 %v4443_v13, %v3860_v56 }
0x295b   :  { %4284 = vmatmul.msk.f32.vlgmr.msra.gmra.mxu0 %vm829_vm2, %v3865_v51 }
0x2962   :  { %v3830_v16 = vpop.xlane.xlu2 %3829 }
0x2963   :  { %v3832_v39 = vmul.f32 %v3830_v16, %v6689_v44 }
0x2965   :  { %v3834_v29 = vadd.f32 1e-05, %v3832_v39 }
0x2967   :  { %4706 = vrsqrt.f32 %v3834_v29  ;;  %vm3851_vm10 = vweird.f32 %v3834_v29 }
0x296d   :  { %v4707_v31 = vpop.eup %4706 }
0x296e   :  { %v3846_v58 = vmul.f32 %v4707_v31, %v3834_v29  ;;  %vm3852_vm15 = vweird.f32 %v4707_v31 }
0x296f   :  { %vm3853_vm3 = vmor %vm3851_vm10, %vm3852_vm15 }
0x2970   :  { %v3847_v34 = vmul.f32 %v4707_v31, %v3846_v58 }
0x2972   :  { %v3848_v27 = vmul.f32 0.5, %v3847_v34 }
0x2974   :  { %v3849_v30 = vsub.f32 1.5, %v3848_v27 }
0x2976   :  { %v3850_v15 = vmul.f32 %v4707_v31, %v3849_v30 }
0x2978   :  { %v3854_v40 = vsel %vm3853_vm3, %v4707_v31, %v3850_v15  ;;  %v4445_v15 = vld [vmem:[#allocation26] ss:$0 sm:$0xff] }
0x2979   :  { %v3856_v41 = vmul.f32 %v3854_v40, %v3822_v18 }
0x297b   :  { %v3861_v32 = vmul.f32 %v4442_v33, %v3856_v41  ;;  %v4446_v41 = vld [vmem:[#allocation25] ss:$0 sm:$0xff] }
0x297d   :  { %v3866_v43 = vadd.f32 %v4443_v13, %v3861_v32 }
0x297f   :  { %4285 = vmatmul.msk.f32.gmra.mxu0 %vm829_vm2, %v3866_v43 }
0x29d8   :  { %v3900_v52 = vpop.f32.mrf.mxu0 }
0x29d9   :  { %v3901_v19 = vadd.f32 %v4444_v48, %v3900_v52 }
0x29db   :  { %3946 = vrot.lane.b32.xlu1 %v3901_v19, %s5754_s20  ;;  %v4286_v59 = vmul.f32 -1.442695, %v3901_v19 }
0x29dd   :  { %4708 = vpow2.f32 %v4286_v59 }
0x29e3   :  { %v4709_v61 = vpop.eup %4708 }
0x29e4   :  { %v3912_v45 = vadd.f32 1.0, %v4709_v61 }
0x29e6   :  { %4710 = vrcp.f32 %v3912_v45  ;;  %v3925_v1 = vand.u32 2147483648, %v3912_v45  ;;  %vm3919_vm0 = vweird.f32 %v3912_v45  ;;  %v3923_v62 = vand.u32 2147483647, %v3912_v45 }
0x29e8   :  { %v3926_v7 = vor.u32 1.1754944e-38, %v3925_v1  ;;  %vm3924_vm5 = vcmp.eq.f32.partialorder %v3923_v62, 8.507059e+37 }
0x29ec   :  { %v4711_v2 = vpop.eup %4710 }
0x29ed   :  { %v3915_v20 = vmul.f32 %v4711_v2, %v3912_v45  ;;  %vm3920_vm12 = vweird.f32 %v4711_v2  ;;  %v4017_v45 = vld [vmem:[%s7173_s15 + $0x18] sm:$0xff] }
0x29ee   :  { %vm3921_vm4 = vmor %vm3919_vm0, %vm3920_vm12  ;;  %4068 = vmatpush.msra.mxu1 %v4017_v45 }
0x29ef   :  { %v3916_v55 = vsub.f32 1.0, %v3915_v20  ;;  %v4015_v20 = vld [vmem:[%s7173_s15 + $0x8] sm:$0xff] }
0x29f1   :  { %v3917_v60 = vmul.f32 %v4711_v2, %v3916_v55 }
0x29f3   :  { %v3918_v5 = vadd.f32 %v4711_v2, %v3917_v60 }
0x29f5   :  { %v3922_v6 = vsel %vm3921_vm4, %v4711_v2, %v3918_v5  ;;  %v4016_v2 = vld [vmem:[%s7173_s15 + $0x10] sm:$0xff] }
0x29f6   :  { %v3927_v11 = vsel %vm3924_vm5, %v3926_v7, %v3922_v6  ;;  %4069 = vmatpush.msra.mxu1 %v4016_v2 }
0x29f8   :  { %4070 = vmatpush.msra.mxu1 %v4015_v20 }
0x29fc   :  { %v3903_v35 = vpop.f32.mrf.mxu0 }
0x29fd   :  { %v3904_v53 = vadd.f32 %v4444_v48, %v3903_v35 }
0x29ff   :  { %3948 = vrot.lane.b32.xlu0 %v3904_v53, %s5754_s20  ;;  %v4287_v3 = vmul.f32 -1.442695, %v3904_v53 }
0x2a01   :  { %4712 = vpow2.f32 %v4287_v3  ;;  %v4014_v3 = vld [vmem:[%s7173_s15] sm:$0xff] }
0x2a02   :  { %4071 = vmatpush.msra.mxu1 %v4014_v3 }
0x2a07   :  { %v4713_v14 = vpop.eup %4712 }
0x2a08   :  { %v3913_v25 = vadd.f32 1.0, %v4713_v14 }
0x2a0a   :  { %4714 = vrcp.f32 %v3913_v25  ;;  %v3940_v21 = vand.u32 2147483648, %v3913_v25  ;;  %vm3934_vm7 = vweird.f32 %v3913_v25  ;;  %v3938_v23 = vand.u32 2147483647, %v3913_v25 }
0x2a0c   :  { %v3941_v42 = vor.u32 1.1754944e-38, %v3940_v21  ;;  %vm3939_vm9 = vcmp.eq.f32.partialorder %v3938_v23, 8.507059e+37 }
0x2a10   :  { %v4715_v50 = vpop.eup %4714 }
0x2a11   :  { %v3930_v18 = vmul.f32 %v4715_v50, %v3913_v25  ;;  %vm3935_vm6 = vweird.f32 %v4715_v50  ;;  %v4447_v25 = vld [vmem:[#allocation34] ss:$0 sm:$0xff] }
0x2a12   :  { %vm3936_vm8 = vmor %vm3934_vm7, %vm3935_vm6 }
0x2a13   :  { %v3931_v26 = vsub.f32 1.0, %v3930_v18 }
0x2a15   :  { %v3932_v24 = vmul.f32 %v4715_v50, %v3931_v26 }
0x2a17   :  { %v3933_v4 = vadd.f32 %v4715_v50, %v3932_v24 }
0x2a19   :  { %v3937_v22 = vsel %vm3936_vm8, %v4715_v50, %v3933_v4  ;;  %v4028_v50 = vrot.slane %v4447_v25, 2 }
0x2a4d   :  { %v3947_v8 = vpop.permute.xlu1 %3946 }
0x2a4e   :  { %v3952_v10 = vmul.f32 %v3947_v8, %v3927_v11 }
0x2a50   :  { %v3954_v17 = vadd.f32 %v3952_v10, %v6700_v54  ;;  %v3942_v54 = vsel %vm3939_vm9, %v3941_v42, %v3937_v22 }
0x2a52   :  { %v3956_v46 = vsel %vm829_vm2, %v3954_v17, 0.0 }
0x2a53   :  { %3957 = vadd.xlane.f32.xlu1 %v3956_v46  ;;  %v4027_v46 = vrot.slane %v4447_v25, 1 }
0x2a71   :  { %v3949_v47 = vpop.permute.xlu0 %3948 }
0x2a72   :  { %v3953_v37 = vmul.f32 %v3949_v47, %v3942_v54 }
0x2a74   :  { %v3955_v9 = vadd.f32 %v3953_v37, %v6705_v12 }
0x2a76   :  { %v3959_v38 = vsel %vm829_vm2, %v3955_v9, 0.0 }
0x2a77   :  { %3960 = vadd.xlane.f32.xlu0 %v3959_v38 }
0x2ac6   :  { %v3958_v57 = vpop.xlane.xlu1 %3957 }
0x2ac7   :  { %v3962_v0 = vmul.f32 %v3958_v57, %v6689_v44 }
0x2ac9   :  { %v3964_v36 = vsub.f32 %v3954_v17, %v3962_v0 }
0x2acb   :  { %v3966_v28 = vmul.f32 %v3964_v36, %v3964_v36 }
0x2acd   :  { %v3968_v33 = vsel %vm829_vm2, %v3966_v28, 0.0 }
0x2ace   :  { %3969 = vadd.xlane.f32.xlu2 %v3968_v33 }
0x2aea   :  { %v3961_v49 = vpop.xlane.xlu0 %3960 }
0x2aeb   :  { %v3963_v63 = vmul.f32 %v3961_v49, %v6689_v44 }
0x2aed   :  { %v3965_v13 = vsub.f32 %v3955_v9, %v3963_v63 }
0x2aef   :  { %v3967_v56 = vmul.f32 %v3965_v13, %v3965_v13 }
0x2af1   :  { %v3971_v51 = vsel %vm829_vm2, %v3967_v56, 0.0 }
0x2af2   :  { %3972 = vadd.xlane.f32.xlu2 %v3971_v51 }
0x2b41   :  { %v3970_v12 = vpop.xlane.xlu2 %3969 }
0x2b42   :  { %v3974_v16 = vmul.f32 %v3970_v12, %v6689_v44 }
0x2b44   :  { %v3976_v39 = vadd.f32 1e-05, %v3974_v16 }
0x2b46   :  { %4716 = vrsqrt.f32 %v3976_v39  ;;  %vm3984_vm11 = vweird.f32 %v3976_v39 }
0x2b4c   :  { %v4717_v29 = vpop.eup %4716 }
0x2b4d   :  { %v3979_v31 = vmul.f32 %v4717_v29, %v3976_v39  ;;  %vm3985_vm1 = vweird.f32 %v4717_v29 }
0x2b4e   :  { %vm3986_vm13 = vmor %vm3984_vm11, %vm3985_vm1 }
0x2b4f   :  { %v3980_v58 = vmul.f32 %v4717_v29, %v3979_v31 }
0x2b51   :  { %v3981_v34 = vmul.f32 0.5, %v3980_v58 }
0x2b53   :  { %v3982_v27 = vsub.f32 1.5, %v3981_v34 }
0x2b55   :  { %v3983_v30 = vmul.f32 %v4717_v29, %v3982_v27 }
0x2b57   :  { %v3987_v40 = vsel %vm3986_vm13, %v4717_v29, %v3983_v30 }
0x2b58   :  { %v3998_v32 = vmul.f32 %v3987_v40, %v3964_v36 }
0x2b5a   :  { %v4003_v43 = vmul.f32 %v4445_v15, %v3998_v32 }
0x2b5c   :  { %v4008_v48 = vadd.f32 %v4446_v41, %v4003_v43 }
0x2b5e   :  { %4010 = vst.msk [vmem:[#allocation5] sm:$0xff] %vm829_vm2, %v4008_v48 }
0x2b65   :  { %v4012_v52 = vld [vmem:[#allocation5 + $0x5] sm:$0x7]  ;;  %v3973_v19 = vpop.xlane.xlu2 %3972 }
0x2b66   :  { %v4023_v35 = vrot.slane %v4012_v52, 1  ;;  %v4024_v53 = vrot.slane %v4012_v52, 2  ;;  %4029 = vst [vmem:[#allocation1] ss:$9 sm:$0xff] %v4012_v52  ;;  %v3975_v59 = vmul.f32 %v3973_v19, %v6689_v44 }
0x2b68   :  { %4031 = vst [vmem:[#allocation1 + $0x1] ss:$9 sm:$0xff] %v4023_v35  ;;  %v3977_v61 = vadd.f32 1e-05, %v3975_v59 }
0x2b69   :  { %4033 = vst [vmem:[#allocation1 + $0x2] ss:$9 sm:$0xff] %v4024_v53 }
0x2b6a   :  { %4718 = vrsqrt.f32 %v3977_v61  ;;  %vm3994_vm15 = vweird.f32 %v3977_v61 }
0x2b70   :  { %v4719_v55 = vpop.eup %4718 }
0x2b71   :  { %v3989_v60 = vmul.f32 %v4719_v55, %v3977_v61  ;;  %vm3995_vm14 = vweird.f32 %v4719_v55 }
0x2b72   :  { %vm3996_vm10 = vmor %vm3994_vm15, %vm3995_vm14 }
0x2b73   :  { %v3990_v5 = vmul.f32 %v4719_v55, %v3989_v60 }
0x2b75   :  { %v3991_v1 = vmul.f32 0.5, %v3990_v5 }
0x2b77   :  { %v3992_v62 = vsub.f32 1.5, %v3991_v1 }
0x2b79   :  { %v3993_v6 = vmul.f32 %v4719_v55, %v3992_v62 }
0x2b7b   :  { %v3997_v44 = vsel %vm3996_vm10, %v4719_v55, %v3993_v6 }
0x2b7c   :  { %v3999_v7 = vmul.f32 %v3997_v44, %v3965_v13 }
0x2b7e   :  { %v4004_v8 = vmul.f32 %v4445_v15, %v3999_v7 }
0x2b80   :  { %v4009_v11 = vadd.f32 %v4446_v41, %v4004_v8 }
0x2b82   :  { %4011 = vst.msk [vmem:[#allocation5 + $0x8] sm:$0xff] %vm829_vm2, %v4009_v11 }
0x2b89   :  { %v4013_v14 = vld [vmem:[#allocation5 + $0xd] sm:$0x7] }
0x2b8a   :  { %v4025_v10 = vrot.slane %v4013_v14, 1  ;;  %v4026_v17 = vrot.slane %v4013_v14, 2  ;;  %4035 = vst [vmem:[#allocation1 + $0x3] ss:$9 sm:$0xff] %v4013_v14 }
0x2b8c   :  { %4037 = vst [vmem:[#allocation1 + $0x4] ss:$9 sm:$0xff] %v4025_v10 }
0x2b8d   :  { %4039 = vst [vmem:[#allocation1 + $0x5] ss:$9 sm:$0xff] %v4026_v17 }
0x2b94   :  { %v4040_v18 = vld [vmem:[#allocation1] sm:$0xff] }
0x2b95   :  { %4288 = vmatmul.msk.f32.vlgmr.msra.gmra.mxu1 %vm829_vm2, %v4040_v18  ;;  %4041 = vst [vmem:[#allocation1] ss:$9 sm:$0xff] %v4447_v25  ;;  %vm4094_vm2 = vcmask 51200  }
0x2b96   :  { %4043 = vst [vmem:[#allocation1 + $0x1] ss:$9 sm:$0xff] %v4027_v46 }
0x2b97   :  { %4045 = vst [vmem:[#allocation1 + $0x2] ss:$9 sm:$0xff] %v4028_v50 }
0x2b98   :  { %4047 = vst [vmem:[#allocation1 + $0x3] ss:$9 sm:$0xff] %v4447_v25 }
0x2b99   :  { %4049 = vst [vmem:[#allocation1 + $0x4] ss:$9 sm:$0xff] %v4027_v46 }
0x2b9a   :  { %4051 = vst [vmem:[#allocation1 + $0x5] ss:$9 sm:$0xff] %v4028_v50 }
0x2ba1   :  { %v4052_v26 = vld [vmem:[#allocation1] sm:$0xff] }
0x2c12   :  { %v4073_v24 = vpop.f32.mrf.mxu1 }
0x2c13   :  { %v4074_v4 = vadd.f32 %v4073_v24, %v4052_v26 }
0x2c15   :  { %v4077_v21 = vrot.slane %v4074_v4, 1  ;;  %v4078_v23 = vrot.slane %v4074_v4, 2  ;;  %4082 = vst [vmem:[#allocation1] ss:$9 sm:$0xff] %v4074_v4  ;;  %v4079_v22 = vrot.slane %v4074_v4, 3  ;;  %v4080_v42 = vrot.slane %v4074_v4, 4 }
0x2c16   :  { %v4081_v54 = vrot.slane %v4074_v4, 5 }
0x2c17   :  { %4084 = vst [vmem:[#allocation1 + $0x1] ss:$9 sm:$0xff] %v4077_v21 }
0x2c18   :  { %4086 = vst [vmem:[#allocation1 + $0x2] ss:$9 sm:$0xff] %v4078_v23 }
0x2c1f   :  { %v4087_v47 = vld [vmem:[#allocation1] sm:$0xff] }
0x2c20   :  { %4088 = vst [vmem:[#allocation1] ss:$9 sm:$0xff] %v4079_v22 }
0x2c21   :  { %4089 = vst [vmem:[#allocation1 + $0x1] ss:$9 sm:$0xff] %v4080_v42 }
0x2c22   :  { %4090 = vst [vmem:[#allocation1 + $0x2] ss:$9 sm:$0xff] %v4081_v54 }
0x2c23   :  { %4095 = vst.msk [vmem:[%s6080_s8] sm:$0x7] %vm4094_vm2, %v4087_v47 }
0x2c29   :  { %v4091_v37 = vld [vmem:[#allocation1] sm:$0xff] }
0x2c2a   :  { %4096 = vst.msk [vmem:[%s6080_s8 + $0x4] sm:$0x7] %vm4094_vm2, %v4091_v37 }
0x2c2b   :  { %4101 = vsyncpa [#allocation7], 1 }
0x2c2c   :  { %4102 = vsyncpa [#allocation9], 1 }
0x2c2d   :  { %4103 = vsyncpa [#allocation12], 1 }
0x2c2e   :  { %4104 = vsyncpa [#allocation15], 1 }
0x2c2f   :  { %4105 = vsyncpa [#allocation18], 1 }
0x2c30   :  { %4106 = vsyncpa [#allocation21], 1 }
0x2c31   :  { %4107 = vsyncpa [#allocation24], 1 }
0x2c32   :  { %4108 = vsyncpa [#allocation27], 1 }
0x2c33   :  { %4109 = vsyncpa [#allocation30], 1 }
0x2c34   :  { %4110 = vsyncpa [#allocation33], 1 }
0x2c35   :  { %4111 = vsyncpa [#allocation36], 1 }
0x2c36   :  { %4112 = vsyncpa [#allocation39], 1 }
0x2c37   :  { %4113 = vsyncpa [#allocation42], 1 }
0x2c38   :  { %4114 = vsyncpa [#allocation45], 1 }
0x2c39   :  { %4115 = vsyncpa [#allocation48], 1 }
0x2c3a   :  { %4116 = vsyncpa [#allocation51], 1 }
0x2c3b   :  { %4117 = vsyncpa [#allocation54], 1 }
0x2c3c   :  { %4118 = vsyncpa [#allocation57], 1 }
0x2c3d   :  { %4119 = vsyncpa [#allocation60], 1 }

</bundles_post_ra>
